<compile_context>
chip_gen: v6e
topology: v6e:2x2x1
jax: 0.10.0
libtpu: 0.0.40
codegen_flags: <defaults>
</compile_context>

<pallas_src>
import functools

import jax
import jax.numpy as jnp
from jax import lax
from jax.experimental import pallas as pl
from jax.experimental.pallas import tpu as pltpu

DILATIONS = (1, 2, 4, 8)
MAXPAD = max(DILATIONS)  # 8 -- pad once for all branches


def _unique_tap_offsets():
    """Unique (dy, dx) tap offsets over all branches (33 of them)."""
    offs = []
    for d in DILATIONS:
        for ky in range(3):
            for kx in range(3):
                o = ((ky - 1) * d, (kx - 1) * d)
                if o not in offs:
                    offs.append(o)
    return tuple(offs)


def _pack_params(weights, scales, shifts, offs, k_pad):
    """Fold BN scale into the conv weights and pack them, transposed, into a
    block-structured (4*width, k_pad) bf16 matrix matching the (K, M) im2col
    layout (column block t*cin:(t+1)*cin <-> tap offset offs[t])."""
    n_br, _, _, cin, width = weights.shape
    cout = n_br * width
    w_scaled = weights.astype(jnp.float32) * scales[:, None, None, None, :]
    w_t = jnp.zeros((cout, k_pad), jnp.float32)
    for b, d in enumerate(DILATIONS):
        for ky in range(3):
            for kx in range(3):
                t = offs.index(((ky - 1) * d, (kx - 1) * d))
                w_t = w_t.at[b * width:(b + 1) * width,
                             t * cin:(t + 1) * cin].set(w_scaled[b, ky, kx].T)
    shift_col = shifts.reshape(cout, 1).astype(jnp.float32)
    return w_t.astype(jnp.bfloat16), shift_col


def _jpfm_kernel(x_ref, w_ref, shift_ref, o_ref, p_ref, *,
                 offs, H, W, Wp, cin, k_total, batch_block):
    """One grid step = `batch_block` batch elements.

    x_ref    : (bb, Cin, (Hp+2)*Wp) bf16  flattened, guard-padded NCHW input
    w_ref    : (4*width, k_pad)     bf16  packed, transposed, BN-scale-folded
    shift_ref: (4*width, 1)         f32   folded BN shift
    o_ref    : (bb, 4*width, H*W)   f32   channel-major (NCHW) fused output
    p_ref    : (k_pad, bb*H*Wp)     bf16  im2col scratch (K on sublanes,
                                          pixels on lanes)
    """
    M = H * Wp
    cout = w_ref.shape[0]
    k_pad, m_tot = p_ref.shape

    # Zero the K-alignment padding rows (their weight columns are zero, but
    # uninitialized VMEM could hold NaNs).  Done every step on purpose -- see
    # header comment about per-core scratch under "parallel" sharding.
    if k_pad > k_total:  # static Python branch
        p_ref[k_total:, :] = jnp.zeros((k_pad - k_total, m_tot), jnp.bfloat16)

    # Lane-dense im2col: each tap is one contiguous lane-window of the
    # flattened guard-padded image -- Cin sublanes x M lanes, unmasked in the
    # lane dimension.
    for b in range(batch_block):
        for t, (dy, dx) in enumerate(offs):
            s = (MAXPAD + 1 + dy) * Wp + dx  # +1 row of guard band at the top
            p_ref[t * cin:(t + 1) * cin, b * M:(b + 1) * M] = x_ref[b, :, s:s + M]

    # One MXU matmul covering all 4 branches (BN scale pre-folded), f32
    # accumulation, then BN shift + ReLU on the f32 accumulator.
    y = jnp.dot(w_ref[...], p_ref[...], preferred_element_type=jnp.float32)
    y = jnp.maximum(y + shift_ref[...], 0.0)

    # Crop the Wp pad columns and store channel-major with lane-dense
    # (H*W)-wide stores.
    for b in range(batch_block):
        yb = y[:, b * M:(b + 1) * M].reshape(cout, H, Wp)[:, :, MAXPAD:MAXPAD + W]
        o_ref[b] = yb.reshape(cout, H * W).astype(o_ref.dtype)


def jpfm_forward(x_nchw, weights, scales, shifts, *, batch_block=None):
    """x_nchw: (N, Cin, H, W) f32; weights: (4, 3, 3, Cin, width) HWIO taps per
    branch; scales/shifts: (4, width) folded inference BatchNorm.
    Returns (N, 4*width, H, W) f32, matching JPFM.forward."""
    offs = _unique_tap_offsets()

    N, cin, H, W = x_nchw.shape
    width = scales.shape[1]
    cout = 4 * width
    Wp = W + 2 * MAXPAD
    M = H * Wp                                   # matmul pixels per batch elem
    k_total = len(offs) * cin
    k_pad = ((k_total + 15) // 16) * 16          # bf16 sublane-pack alignment

    if batch_block is None:
        # Merge batch elements per step to amortize per-step overhead while
        # keeping >=2 "parallel" steps for v7x's two TensorCores.
        batch_block = N // 2 if (N >= 2 and N % 2 == 0) else 1
    if N % batch_block != 0:
        batch_block = 1
    num_steps = N // batch_block

    # Pad spatially once for all dilations (plus one guard row top/bottom so
    # every tap is a single in-bounds contiguous slice after flattening), cast
    # to bf16 once, and flatten H/W.  Input stays channel-major: no transpose.
    xb = x_nchw.astype(jnp.bfloat16)
    xp = jnp.pad(xb, ((0, 0), (0, 0),
                      (MAXPAD + 1, MAXPAD + 1), (MAXPAD, MAXPAD)))
    Mg = (H + 2 * MAXPAD + 2) * Wp
    xf = xp.reshape(N, cin, Mg)

    w_packed, shift_col = _pack_params(weights, scales, shifts, offs, k_pad)

    kernel = functools.partial(_jpfm_kernel, offs=offs, H=H, W=W, Wp=Wp,
                               cin=cin, k_total=k_total,
                               batch_block=batch_block)

    # Explicit VMEM budget: double-buffered ins/outs + im2col scratch, with 2x
    # headroom, capped well under v7x's 64 MiB physical VMEM.
    vmem_need = (2 * batch_block * cin * Mg * 2            # x block (bf16)
                 + 2 * batch_block * cout * H * W * 4      # out block (f32)
                 + 2 * (cout * k_pad * 2 + cout * 4)       # weights + shift
                 + k_pad * batch_block * M * 2)            # im2col scratch
    vmem_limit = int(min(48 * 2**20, max(2 * vmem_need, 16 * 2**20)))

    out_flat = pl.pallas_call(
        kernel,
        out_shape=jax.ShapeDtypeStruct((N, cout, H * W), jnp.float32),
        grid_spec=pltpu.PrefetchScalarGridSpec(
            num_scalar_prefetch=0,
            grid=(num_steps,),
            in_specs=[
                pl.BlockSpec((batch_block, cin, Mg), lambda n: (n, 0, 0)),
                pl.BlockSpec((cout, k_pad), lambda n: (0, 0)),
                pl.BlockSpec((cout, 1), lambda n: (0, 0)),
            ],
            out_specs=pl.BlockSpec((batch_block, cout, H * W),
                                   lambda n: (n, 0, 0)),
            scratch_shapes=[pltpu.VMEM((k_pad, batch_block * M), jnp.bfloat16)],
        ),
        compiler_params=pltpu.CompilerParams(
            dimension_semantics=("parallel",),
            vmem_limit_bytes=vmem_limit),
    )(xf, w_packed, shift_col)
    # TODO(synk): for production H/W/Cin, add an H row-block grid axis with a
    # halo'd window so input block + im2col scratch + output block fit the
    # per-generation VMEM budget (64 MiB on v7x vs 128 MiB on v5e/v6e).

    # Free metadata reshape -- the kernel already emitted channel-major (NCHW).
    return out_flat.reshape(N, cout, H, W)


def jpfm_reference(x_nchw, weights, scales, shifts):
    """Pure-JAX f32 reference using lax.conv_general_dilated (NHWC / HWIO)."""
    x = jnp.transpose(x_nchw, (0, 2, 3, 1))
    outs = []
    for b, d in enumerate(DILATIONS):
        w_hwio = weights[b]  # (3, 3, Cin, width)
        y = lax.conv_general_dilated(
            x, w_hwio,
            window_strides=(1, 1),
            padding=[(d, d), (d, d)],
            rhs_dilation=(d, d),
            dimension_numbers=('NHWC', 'HWIO', 'NHWC'),
            precision=lax.Precision.HIGHEST)
        y = y * scales[b][None, None, None, :] + shifts[b][None, None, None, :]
        outs.append(jnp.maximum(y, 0.0))
    return jnp.transpose(jnp.concatenate(outs, axis=-1), (0, 3, 1, 2))


if __name__ == "__main__":
    # Small shapes consistent with the module: batch=2, in_channel=4, 16x16,
    # width=32.
    N, Cin, H, W = 2, 4, 16, 16
    width = 32

    key = jax.random.PRNGKey(0)
    kx_, kw, kg, kb, km, kv = jax.random.split(key, 6)

    x = jax.random.normal(kx_, (N, Cin, H, W), jnp.float32)

    # Conv weights: PyTorch shape (width, Cin, 3, 3) per branch; kernel uses
    # (branch, kh, kw, Cin, width) i.e. HWIO taps.
    w_torch_layout = jax.random.normal(kw, (4, width, Cin, 3, 3), jnp.float32) * 0.1
    weights = jnp.transpose(w_torch_layout, (0, 3, 4, 2, 1))  # (4, 3, 3, Cin, width)

    # Deterministic BatchNorm params (inference-mode fold).
    eps = 1e-5
    gamma = 1.0 + 0.1 * jax.random.normal(kg, (4, width), jnp.float32)
    beta = 0.1 * jax.random.normal(kb, (4, width), jnp.float32)
    running_mean = 0.1 * jax.random.normal(km, (4, width), jnp.float32)
    running_var = jnp.abs(jax.random.normal(kv, (4, width), jnp.float32)) + 0.5
    scales = gamma / jnp.sqrt(running_var + eps)
    shifts = beta - running_mean * scales

    ref = jax.block_until_ready(jpfm_reference(x, weights, scales, shifts))

    # Default path: batch_block=1, grid=(2,) "parallel" (both v7x TCs busy).
    out = jax.block_until_ready(jpfm_forward(x, weights, scales, shifts))
    assert out.shape == (N, 4 * width, H, W), out.shape
    err = float(jnp.max(jnp.abs(out - ref)))
    # bf16 MXU operands (f32 accumulation) vs. the exact f32 reference.
    assert jnp.allclose(out, ref, atol=5e-2, rtol=5e-2), err

    # Batch-merged path: both batch elements stacked along M in one grid step
    # (the v5e/v6e-oriented configuration).
    out2 = jax.block_until_ready(
        jpfm_forward(x, weights, scales, shifts, batch_block=2))
    err2 = float(jnp.max(jnp.abs(out2 - ref)))
    assert jnp.allclose(out2, ref, atol=5e-2, rtol=5e-2), err2

    print("KERNEL_OK")
</pallas_src>

<mosaic_0001>
module attributes {stable_mosaic.version = 11 : i64} {
  func.func @_jpfm_kernel(%arg0: i32, %arg1: memref<1x4x1088xbf16, #tpu.memory_space<vmem>>, %arg2: memref<128x144xbf16, #tpu.memory_space<vmem>>, %arg3: memref<128x1xf32, #tpu.memory_space<vmem>>, %arg4: memref<1x128x256xf32, #tpu.memory_space<vmem>>, %arg5: memref<144x512xbf16, #tpu.memory_space<vmem>>) attributes {dimension_semantics = [#tpu.dimension_semantics<parallel>], iteration_bounds = array<i64: 2>, scalar_prefetch = 0 : i64, scratch_operands = 1 : i64, tpu.core_type = #tpu.core_type<tc>, window_params = [{transform_indices = @transform_0, window_bounds = array<i64: 1, 4, 1088>}, {pipeline_mode = #tpu.pipeline_mode<synchronous>, transform_indices = @transform_1, window_bounds = array<i64: 128, 144>}, {pipeline_mode = #tpu.pipeline_mode<synchronous>, transform_indices = @transform_2, window_bounds = array<i64: 128, 1>}, {transform_indices = @transform_3, window_bounds = array<i64: 1, 128, 256>}]} {
    %cst = arith.constant 0.000000e+00 : bf16
    %0 = vector.broadcast %cst : bf16 to vector<12x512xbf16>
    %c132 = arith.constant 132 : index
    %c0 = arith.constant 0 : index
    %1 = vector.load %arg5[%c132, %c0] : memref<144x512xbf16, #tpu.memory_space<vmem>>, vector<12x512xbf16>
    tpu.vector_store %arg5[%c132, %c0], %0 {strides = array<i32>} : memref<144x512xbf16, #tpu.memory_space<vmem>>, vector<12x512xbf16>,
    %c0_0 = arith.constant 0 : index
    %c0_1 = arith.constant 0 : index
    %c255 = arith.constant 255 : index
    %2 = vector.load %arg1[%c0_0, %c0_1, %c255] : memref<1x4x1088xbf16, #tpu.memory_space<vmem>>, vector<1x4x512xbf16>
    %3 = vector.shape_cast %2 : vector<1x4x512xbf16> to vector<4x512xbf16>
    %c0_2 = arith.constant 0 : index
    %c0_3 = arith.constant 0 : index
    %4 = vector.load %arg5[%c0_2, %c0_3] : memref<144x512xbf16, #tpu.memory_space<vmem>>, vector<4x512xbf16>
    tpu.vector_store %arg5[%c0_2, %c0_3], %3 {strides = array<i32>} : memref<144x512xbf16, #tpu.memory_space<vmem>>, vector<4x512xbf16>,
    %c0_4 = arith.constant 0 : index
    %c0_5 = arith.constant 0 : index
    %c256 = arith.constant 256 : index
    %5 = vector.load %arg1[%c0_4, %c0_5, %c256] : memref<1x4x1088xbf16, #tpu.memory_space<vmem>>, vector<1x4x512xbf16>
    %6 = vector.shape_cast %5 : vector<1x4x512xbf16> to vector<4x512xbf16>
    %c4 = arith.constant 4 : index
    %c0_6 = arith.constant 0 : index
    %7 = vector.load %arg5[%c4, %c0_6] : memref<144x512xbf16, #tpu.memory_space<vmem>>, vector<4x512xbf16>
    tpu.vector_store %arg5[%c4, %c0_6], %6 {strides = array<i32>} : memref<144x512xbf16, #tpu.memory_space<vmem>>, vector<4x512xbf16>,
    %c0_7 = arith.constant 0 : index
    %c0_8 = arith.constant 0 : index
    %c257 = arith.constant 257 : index
    %8 = vector.load %arg1[%c0_7, %c0_8, %c257] : memref<1x4x1088xbf16, #tpu.memory_space<vmem>>, vector<1x4x512xbf16>
    %9 = vector.shape_cast %8 : vector<1x4x512xbf16> to vector<4x512xbf16>
    %c8 = arith.constant 8 : index
    %c0_9 = arith.constant 0 : index
    %10 = vector.load %arg5[%c8, %c0_9] : memref<144x512xbf16, #tpu.memory_space<vmem>>, vector<4x512xbf16>
    tpu.vector_store %arg5[%c8, %c0_9], %9 {strides = array<i32>} : memref<144x512xbf16, #tpu.memory_space<vmem>>, vector<4x512xbf16>,
    %c0_10 = arith.constant 0 : index
    %c0_11 = arith.constant 0 : index
    %c287 = arith.constant 287 : index
    %11 = vector.load %arg1[%c0_10, %c0_11, %c287] : memref<1x4x1088xbf16, #tpu.memory_space<vmem>>, vector<1x4x512xbf16>
    %12 = vector.shape_cast %11 : vector<1x4x512xbf16> to vector<4x512xbf16>
    %c12 = arith.constant 12 : index
    %c0_12 = arith.constant 0 : index
    %13 = vector.load %arg5[%c12, %c0_12] : memref<144x512xbf16, #tpu.memory_space<vmem>>, vector<4x512xbf16>
    tpu.vector_store %arg5[%c12, %c0_12], %12 {strides = array<i32>} : memref<144x512xbf16, #tpu.memory_space<vmem>>, vector<4x512xbf16>,
    %c0_13 = arith.constant 0 : index
    %c0_14 = arith.constant 0 : index
    %c288 = arith.constant 288 : index
    %14 = vector.load %arg1[%c0_13, %c0_14, %c288] : memref<1x4x1088xbf16, #tpu.memory_space<vmem>>, vector<1x4x512xbf16>
    %15 = vector.shape_cast %14 : vector<1x4x512xbf16> to vector<4x512xbf16>
    %c16 = arith.constant 16 : index
    %c0_15 = arith.constant 0 : index
    %16 = vector.load %arg5[%c16, %c0_15] : memref<144x512xbf16, #tpu.memory_space<vmem>>, vector<4x512xbf16>
    tpu.vector_store %arg5[%c16, %c0_15], %15 {strides = array<i32>} : memref<144x512xbf16, #tpu.memory_space<vmem>>, vector<4x512xbf16>,
    %c0_16 = arith.constant 0 : index
    %c0_17 = arith.constant 0 : index
    %c289 = arith.constant 289 : index
    %17 = vector.load %arg1[%c0_16, %c0_17, %c289] : memref<1x4x1088xbf16, #tpu.memory_space<vmem>>, vector<1x4x512xbf16>
    %18 = vector.shape_cast %17 : vector<1x4x512xbf16> to vector<4x512xbf16>
    %c20 = arith.constant 20 : index
    %c0_18 = arith.constant 0 : index
    %19 = vector.load %arg5[%c20, %c0_18] : memref<144x512xbf16, #tpu.memory_space<vmem>>, vector<4x512xbf16>
    tpu.vector_store %arg5[%c20, %c0_18], %18 {strides = array<i32>} : memref<144x512xbf16, #tpu.memory_space<vmem>>, vector<4x512xbf16>,
    %c0_19 = arith.constant 0 : index
    %c0_20 = arith.constant 0 : index
    %c319 = arith.constant 319 : index
    %20 = vector.load %arg1[%c0_19, %c0_20, %c319] : memref<1x4x1088xbf16, #tpu.memory_space<vmem>>, vector<1x4x512xbf16>
    %21 = vector.shape_cast %20 : vector<1x4x512xbf16> to vector<4x512xbf16>
    %c24 = arith.constant 24 : index
    %c0_21 = arith.constant 0 : index
    %22 = vector.load %arg5[%c24, %c0_21] : memref<144x512xbf16, #tpu.memory_space<vmem>>, vector<4x512xbf16>
    tpu.vector_store %arg5[%c24, %c0_21], %21 {strides = array<i32>} : memref<144x512xbf16, #tpu.memory_space<vmem>>, vector<4x512xbf16>,
    %c0_22 = arith.constant 0 : index
    %c0_23 = arith.constant 0 : index
    %c320 = arith.constant 320 : index
    %23 = vector.load %arg1[%c0_22, %c0_23, %c320] : memref<1x4x1088xbf16, #tpu.memory_space<vmem>>, vector<1x4x512xbf16>
    %24 = vector.shape_cast %23 : vector<1x4x512xbf16> to vector<4x512xbf16>
    %c28 = arith.constant 28 : index
    %c0_24 = arith.constant 0 : index
    %25 = vector.load %arg5[%c28, %c0_24] : memref<144x512xbf16, #tpu.memory_space<vmem>>, vector<4x512xbf16>
    tpu.vector_store %arg5[%c28, %c0_24], %24 {strides = array<i32>} : memref<144x512xbf16, #tpu.memory_space<vmem>>, vector<4x512xbf16>,
    %c0_25 = arith.constant 0 : index
    %c0_26 = arith.constant 0 : index
    %c321 = arith.constant 321 : index
    %26 = vector.load %arg1[%c0_25, %c0_26, %c321] : memref<1x4x1088xbf16, #tpu.memory_space<vmem>>, vector<1x4x512xbf16>
    %27 = vector.shape_cast %26 : vector<1x4x512xbf16> to vector<4x512xbf16>
    %c32 = arith.constant 32 : index
    %c0_27 = arith.constant 0 : index
    %28 = vector.load %arg5[%c32, %c0_27] : memref<144x512xbf16, #tpu.memory_space<vmem>>, vector<4x512xbf16>
    tpu.vector_store %arg5[%c32, %c0_27], %27 {strides = array<i32>} : memref<144x512xbf16, #tpu.memory_space<vmem>>, vector<4x512xbf16>,
    %c0_28 = arith.constant 0 : index
    %c0_29 = arith.constant 0 : index
    %c222 = arith.constant 222 : index
    %29 = vector.load %arg1[%c0_28, %c0_29, %c222] : memref<1x4x1088xbf16, #tpu.memory_space<vmem>>, vector<1x4x512xbf16>
    %30 = vector.shape_cast %29 : vector<1x4x512xbf16> to vector<4x512xbf16>
    %c36 = arith.constant 36 : index
    %c0_30 = arith.constant 0 : index
    %31 = vector.load %arg5[%c36, %c0_30] : memref<144x512xbf16, #tpu.memory_space<vmem>>, vector<4x512xbf16>
    tpu.vector_store %arg5[%c36, %c0_30], %30 {strides = array<i32>} : memref<144x512xbf16, #tpu.memory_space<vmem>>, vector<4x512xbf16>,
    %c0_31 = arith.constant 0 : index
    %c0_32 = arith.constant 0 : index
    %c224 = arith.constant 224 : index
    %32 = vector.load %arg1[%c0_31, %c0_32, %c224] : memref<1x4x1088xbf16, #tpu.memory_space<vmem>>, vector<1x4x512xbf16>
    %33 = vector.shape_cast %32 : vector<1x4x512xbf16> to vector<4x512xbf16>
    %c40 = arith.constant 40 : index
    %c0_33 = arith.constant 0 : index
    %34 = vector.load %arg5[%c40, %c0_33] : memref<144x512xbf16, #tpu.memory_space<vmem>>, vector<4x512xbf16>
    tpu.vector_store %arg5[%c40, %c0_33], %33 {strides = array<i32>} : memref<144x512xbf16, #tpu.memory_space<vmem>>, vector<4x512xbf16>,
    %c0_34 = arith.constant 0 : index
    %c0_35 = arith.constant 0 : index
    %c226 = arith.constant 226 : index
    %35 = vector.load %arg1[%c0_34, %c0_35, %c226] : memref<1x4x1088xbf16, #tpu.memory_space<vmem>>, vector<1x4x512xbf16>
    %36 = vector.shape_cast %35 : vector<1x4x512xbf16> to vector<4x512xbf16>
    %c44 = arith.constant 44 : index
    %c0_36 = arith.constant 0 : index
    %37 = vector.load %arg5[%c44, %c0_36] : memref<144x512xbf16, #tpu.memory_space<vmem>>, vector<4x512xbf16>
    tpu.vector_store %arg5[%c44, %c0_36], %36 {strides = array<i32>} : memref<144x512xbf16, #tpu.memory_space<vmem>>, vector<4x512xbf16>,
    %c0_37 = arith.constant 0 : index
    %c0_38 = arith.constant 0 : index
    %c286 = arith.constant 286 : index
    %38 = vector.load %arg1[%c0_37, %c0_38, %c286] : memref<1x4x1088xbf16, #tpu.memory_space<vmem>>, vector<1x4x512xbf16>
    %39 = vector.shape_cast %38 : vector<1x4x512xbf16> to vector<4x512xbf16>
    %c48 = arith.constant 48 : index
    %c0_39 = arith.constant 0 : index
    %40 = vector.load %arg5[%c48, %c0_39] : memref<144x512xbf16, #tpu.memory_space<vmem>>, vector<4x512xbf16>
    tpu.vector_store %arg5[%c48, %c0_39], %39 {strides = array<i32>} : memref<144x512xbf16, #tpu.memory_space<vmem>>, vector<4x512xbf16>,
    %c0_40 = arith.constant 0 : index
    %c0_41 = arith.constant 0 : index
    %c290 = arith.constant 290 : index
    %41 = vector.load %arg1[%c0_40, %c0_41, %c290] : memref<1x4x1088xbf16, #tpu.memory_space<vmem>>, vector<1x4x512xbf16>
    %42 = vector.shape_cast %41 : vector<1x4x512xbf16> to vector<4x512xbf16>
    %c52 = arith.constant 52 : index
    %c0_42 = arith.constant 0 : index
    %43 = vector.load %arg5[%c52, %c0_42] : memref<144x512xbf16, #tpu.memory_space<vmem>>, vector<4x512xbf16>
    tpu.vector_store %arg5[%c52, %c0_42], %42 {strides = array<i32>} : memref<144x512xbf16, #tpu.memory_space<vmem>>, vector<4x512xbf16>,
    %c0_43 = arith.constant 0 : index
    %c0_44 = arith.constant 0 : index
    %c350 = arith.constant 350 : index
    %44 = vector.load %arg1[%c0_43, %c0_44, %c350] : memref<1x4x1088xbf16, #tpu.memory_space<vmem>>, vector<1x4x512xbf16>
    %45 = vector.shape_cast %44 : vector<1x4x512xbf16> to vector<4x512xbf16>
    %c56 = arith.constant 56 : index
    %c0_45 = arith.constant 0 : index
    %46 = vector.load %arg5[%c56, %c0_45] : memref<144x512xbf16, #tpu.memory_space<vmem>>, vector<4x512xbf16>
    tpu.vector_store %arg5[%c56, %c0_45], %45 {strides = array<i32>} : memref<144x512xbf16, #tpu.memory_space<vmem>>, vector<4x512xbf16>,
    %c0_46 = arith.constant 0 : index
    %c0_47 = arith.constant 0 : index
    %c352 = arith.constant 352 : index
    %47 = vector.load %arg1[%c0_46, %c0_47, %c352] : memref<1x4x1088xbf16, #tpu.memory_space<vmem>>, vector<1x4x512xbf16>
    %48 = vector.shape_cast %47 : vector<1x4x512xbf16> to vector<4x512xbf16>
    %c60 = arith.constant 60 : index
    %c0_48 = arith.constant 0 : index
    %49 = vector.load %arg5[%c60, %c0_48] : memref<144x512xbf16, #tpu.memory_space<vmem>>, vector<4x512xbf16>
    tpu.vector_store %arg5[%c60, %c0_48], %48 {strides = array<i32>} : memref<144x512xbf16, #tpu.memory_space<vmem>>, vector<4x512xbf16>,
    %c0_49 = arith.constant 0 : index
    %c0_50 = arith.constant 0 : index
    %c354 = arith.constant 354 : index
    %50 = vector.load %arg1[%c0_49, %c0_50, %c354] : memref<1x4x1088xbf16, #tpu.memory_space<vmem>>, vector<1x4x512xbf16>
    %51 = vector.shape_cast %50 : vector<1x4x512xbf16> to vector<4x512xbf16>
    %c64 = arith.constant 64 : index
    %c0_51 = arith.constant 0 : index
    %52 = vector.load %arg5[%c64, %c0_51] : memref<144x512xbf16, #tpu.memory_space<vmem>>, vector<4x512xbf16>
    tpu.vector_store %arg5[%c64, %c0_51], %51 {strides = array<i32>} : memref<144x512xbf16, #tpu.memory_space<vmem>>, vector<4x512xbf16>,
    %c0_52 = arith.constant 0 : index
    %c0_53 = arith.constant 0 : index
    %c156 = arith.constant 156 : index
    %53 = vector.load %arg1[%c0_52, %c0_53, %c156] : memref<1x4x1088xbf16, #tpu.memory_space<vmem>>, vector<1x4x512xbf16>
    %54 = vector.shape_cast %53 : vector<1x4x512xbf16> to vector<4x512xbf16>
    %c68 = arith.constant 68 : index
    %c0_54 = arith.constant 0 : index
    %55 = vector.load %arg5[%c68, %c0_54] : memref<144x512xbf16, #tpu.memory_space<vmem>>, vector<4x512xbf16>
    tpu.vector_store %arg5[%c68, %c0_54], %54 {strides = array<i32>} : memref<144x512xbf16, #tpu.memory_space<vmem>>, vector<4x512xbf16>,
    %c0_55 = arith.constant 0 : index
    %c0_56 = arith.constant 0 : index
    %c160 = arith.constant 160 : index
    %56 = vector.load %arg1[%c0_55, %c0_56, %c160] : memref<1x4x1088xbf16, #tpu.memory_space<vmem>>, vector<1x4x512xbf16>
    %57 = vector.shape_cast %56 : vector<1x4x512xbf16> to vector<4x512xbf16>
    %c72 = arith.constant 72 : index
    %c0_57 = arith.constant 0 : index
    %58 = vector.load %arg5[%c72, %c0_57] : memref<144x512xbf16, #tpu.memory_space<vmem>>, vector<4x512xbf16>
    tpu.vector_store %arg5[%c72, %c0_57], %57 {strides = array<i32>} : memref<144x512xbf16, #tpu.memory_space<vmem>>, vector<4x512xbf16>,
    %c0_58 = arith.constant 0 : index
    %c0_59 = arith.constant 0 : index
    %c164 = arith.constant 164 : index
    %59 = vector.load %arg1[%c0_58, %c0_59, %c164] : memref<1x4x1088xbf16, #tpu.memory_space<vmem>>, vector<1x4x512xbf16>
    %60 = vector.shape_cast %59 : vector<1x4x512xbf16> to vector<4x512xbf16>
    %c76 = arith.constant 76 : index
    %c0_60 = arith.constant 0 : index
    %61 = vector.load %arg5[%c76, %c0_60] : memref<144x512xbf16, #tpu.memory_space<vmem>>, vector<4x512xbf16>
    tpu.vector_store %arg5[%c76, %c0_60], %60 {strides = array<i32>} : memref<144x512xbf16, #tpu.memory_space<vmem>>, vector<4x512xbf16>,
    %c0_61 = arith.constant 0 : index
    %c0_62 = arith.constant 0 : index
    %c284 = arith.constant 284 : index
    %62 = vector.load %arg1[%c0_61, %c0_62, %c284] : memref<1x4x1088xbf16, #tpu.memory_space<vmem>>, vector<1x4x512xbf16>
    %63 = vector.shape_cast %62 : vector<1x4x512xbf16> to vector<4x512xbf16>
    %c80 = arith.constant 80 : index
    %c0_63 = arith.constant 0 : index
    %64 = vector.load %arg5[%c80, %c0_63] : memref<144x512xbf16, #tpu.memory_space<vmem>>, vector<4x512xbf16>
    tpu.vector_store %arg5[%c80, %c0_63], %63 {strides = array<i32>} : memref<144x512xbf16, #tpu.memory_space<vmem>>, vector<4x512xbf16>,
    %c0_64 = arith.constant 0 : index
    %c0_65 = arith.constant 0 : index
    %c292 = arith.constant 292 : index
    %65 = vector.load %arg1[%c0_64, %c0_65, %c292] : memref<1x4x1088xbf16, #tpu.memory_space<vmem>>, vector<1x4x512xbf16>
    %66 = vector.shape_cast %65 : vector<1x4x512xbf16> to vector<4x512xbf16>
    %c84 = arith.constant 84 : index
    %c0_66 = arith.constant 0 : index
    %67 = vector.load %arg5[%c84, %c0_66] : memref<144x512xbf16, #tpu.memory_space<vmem>>, vector<4x512xbf16>
    tpu.vector_store %arg5[%c84, %c0_66], %66 {strides = array<i32>} : memref<144x512xbf16, #tpu.memory_space<vmem>>, vector<4x512xbf16>,
    %c0_67 = arith.constant 0 : index
    %c0_68 = arith.constant 0 : index
    %c412 = arith.constant 412 : index
    %68 = vector.load %arg1[%c0_67, %c0_68, %c412] : memref<1x4x1088xbf16, #tpu.memory_space<vmem>>, vector<1x4x512xbf16>
    %69 = vector.shape_cast %68 : vector<1x4x512xbf16> to vector<4x512xbf16>
    %c88 = arith.constant 88 : index
    %c0_69 = arith.constant 0 : index
    %70 = vector.load %arg5[%c88, %c0_69] : memref<144x512xbf16, #tpu.memory_space<vmem>>, vector<4x512xbf16>
    tpu.vector_store %arg5[%c88, %c0_69], %69 {strides = array<i32>} : memref<144x512xbf16, #tpu.memory_space<vmem>>, vector<4x512xbf16>,
    %c0_70 = arith.constant 0 : index
    %c0_71 = arith.constant 0 : index
    %c416 = arith.constant 416 : index
    %71 = vector.load %arg1[%c0_70, %c0_71, %c416] : memref<1x4x1088xbf16, #tpu.memory_space<vmem>>, vector<1x4x512xbf16>
    %72 = vector.shape_cast %71 : vector<1x4x512xbf16> to vector<4x512xbf16>
    %c92 = arith.constant 92 : index
    %c0_72 = arith.constant 0 : index
    %73 = vector.load %arg5[%c92, %c0_72] : memref<144x512xbf16, #tpu.memory_space<vmem>>, vector<4x512xbf16>
    tpu.vector_store %arg5[%c92, %c0_72], %72 {strides = array<i32>} : memref<144x512xbf16, #tpu.memory_space<vmem>>, vector<4x512xbf16>,
    %c0_73 = arith.constant 0 : index
    %c0_74 = arith.constant 0 : index
    %c420 = arith.constant 420 : index
    %74 = vector.load %arg1[%c0_73, %c0_74, %c420] : memref<1x4x1088xbf16, #tpu.memory_space<vmem>>, vector<1x4x512xbf16>
    %75 = vector.shape_cast %74 : vector<1x4x512xbf16> to vector<4x512xbf16>
    %c96 = arith.constant 96 : index
    %c0_75 = arith.constant 0 : index
    %76 = vector.load %arg5[%c96, %c0_75] : memref<144x512xbf16, #tpu.memory_space<vmem>>, vector<4x512xbf16>
    tpu.vector_store %arg5[%c96, %c0_75], %75 {strides = array<i32>} : memref<144x512xbf16, #tpu.memory_space<vmem>>, vector<4x512xbf16>,
    %c0_76 = arith.constant 0 : index
    %c0_77 = arith.constant 0 : index
    %c24_78 = arith.constant 24 : index
    %77 = vector.load %arg1[%c0_76, %c0_77, %c24_78] : memref<1x4x1088xbf16, #tpu.memory_space<vmem>>, vector<1x4x512xbf16>
    %78 = vector.shape_cast %77 : vector<1x4x512xbf16> to vector<4x512xbf16>
    %c100 = arith.constant 100 : index
    %c0_79 = arith.constant 0 : index
    %79 = vector.load %arg5[%c100, %c0_79] : memref<144x512xbf16, #tpu.memory_space<vmem>>, vector<4x512xbf16>
    tpu.vector_store %arg5[%c100, %c0_79], %78 {strides = array<i32>} : memref<144x512xbf16, #tpu.memory_space<vmem>>, vector<4x512xbf16>,
    %c0_80 = arith.constant 0 : index
    %c0_81 = arith.constant 0 : index
    %c32_82 = arith.constant 32 : index
    %80 = vector.load %arg1[%c0_80, %c0_81, %c32_82] : memref<1x4x1088xbf16, #tpu.memory_space<vmem>>, vector<1x4x512xbf16>
    %81 = vector.shape_cast %80 : vector<1x4x512xbf16> to vector<4x512xbf16>
    %c104 = arith.constant 104 : index
    %c0_83 = arith.constant 0 : index
    %82 = vector.load %arg5[%c104, %c0_83] : memref<144x512xbf16, #tpu.memory_space<vmem>>, vector<4x512xbf16>
    tpu.vector_store %arg5[%c104, %c0_83], %81 {strides = array<i32>} : memref<144x512xbf16, #tpu.memory_space<vmem>>, vector<4x512xbf16>,
    %c0_84 = arith.constant 0 : index
    %c0_85 = arith.constant 0 : index
    %c40_86 = arith.constant 40 : index
    %83 = vector.load %arg1[%c0_84, %c0_85, %c40_86] : memref<1x4x1088xbf16, #tpu.memory_space<vmem>>, vector<1x4x512xbf16>
    %84 = vector.shape_cast %83 : vector<1x4x512xbf16> to vector<4x512xbf16>
    %c108 = arith.constant 108 : index
    %c0_87 = arith.constant 0 : index
    %85 = vector.load %arg5[%c108, %c0_87] : memref<144x512xbf16, #tpu.memory_space<vmem>>, vector<4x512xbf16>
    tpu.vector_store %arg5[%c108, %c0_87], %84 {strides = array<i32>} : memref<144x512xbf16, #tpu.memory_space<vmem>>, vector<4x512xbf16>,
    %c0_88 = arith.constant 0 : index
    %c0_89 = arith.constant 0 : index
    %c280 = arith.constant 280 : index
    %86 = vector.load %arg1[%c0_88, %c0_89, %c280] : memref<1x4x1088xbf16, #tpu.memory_space<vmem>>, vector<1x4x512xbf16>
    %87 = vector.shape_cast %86 : vector<1x4x512xbf16> to vector<4x512xbf16>
    %c112 = arith.constant 112 : index
    %c0_90 = arith.constant 0 : index
    %88 = vector.load %arg5[%c112, %c0_90] : memref<144x512xbf16, #tpu.memory_space<vmem>>, vector<4x512xbf16>
    tpu.vector_store %arg5[%c112, %c0_90], %87 {strides = array<i32>} : memref<144x512xbf16, #tpu.memory_space<vmem>>, vector<4x512xbf16>,
    %c0_91 = arith.constant 0 : index
    %c0_92 = arith.constant 0 : index
    %c296 = arith.constant 296 : index
    %89 = vector.load %arg1[%c0_91, %c0_92, %c296] : memref<1x4x1088xbf16, #tpu.memory_space<vmem>>, vector<1x4x512xbf16>
    %90 = vector.shape_cast %89 : vector<1x4x512xbf16> to vector<4x512xbf16>
    %c116 = arith.constant 116 : index
    %c0_93 = arith.constant 0 : index
    %91 = vector.load %arg5[%c116, %c0_93] : memref<144x512xbf16, #tpu.memory_space<vmem>>, vector<4x512xbf16>
    tpu.vector_store %arg5[%c116, %c0_93], %90 {strides = array<i32>} : memref<144x512xbf16, #tpu.memory_space<vmem>>, vector<4x512xbf16>,
    %c0_94 = arith.constant 0 : index
    %c0_95 = arith.constant 0 : index
    %c536 = arith.constant 536 : index
    %92 = vector.load %arg1[%c0_94, %c0_95, %c536] : memref<1x4x1088xbf16, #tpu.memory_space<vmem>>, vector<1x4x512xbf16>
    %93 = vector.shape_cast %92 : vector<1x4x512xbf16> to vector<4x512xbf16>
    %c120 = arith.constant 120 : index
    %c0_96 = arith.constant 0 : index
    %94 = vector.load %arg5[%c120, %c0_96] : memref<144x512xbf16, #tpu.memory_space<vmem>>, vector<4x512xbf16>
    tpu.vector_store %arg5[%c120, %c0_96], %93 {strides = array<i32>} : memref<144x512xbf16, #tpu.memory_space<vmem>>, vector<4x512xbf16>,
    %c0_97 = arith.constant 0 : index
    %c0_98 = arith.constant 0 : index
    %c544 = arith.constant 544 : index
    %95 = vector.load %arg1[%c0_97, %c0_98, %c544] : memref<1x4x1088xbf16, #tpu.memory_space<vmem>>, vector<1x4x512xbf16>
    %96 = vector.shape_cast %95 : vector<1x4x512xbf16> to vector<4x512xbf16>
    %c124 = arith.constant 124 : index
    %c0_99 = arith.constant 0 : index
    %97 = vector.load %arg5[%c124, %c0_99] : memref<144x512xbf16, #tpu.memory_space<vmem>>, vector<4x512xbf16>
    tpu.vector_store %arg5[%c124, %c0_99], %96 {strides = array<i32>} : memref<144x512xbf16, #tpu.memory_space<vmem>>, vector<4x512xbf16>,
    %c0_100 = arith.constant 0 : index
    %c0_101 = arith.constant 0 : index
    %c552 = arith.constant 552 : index
    %98 = vector.load %arg1[%c0_100, %c0_101, %c552] : memref<1x4x1088xbf16, #tpu.memory_space<vmem>>, vector<1x4x512xbf16>
    %99 = vector.shape_cast %98 : vector<1x4x512xbf16> to vector<4x512xbf16>
    %c128 = arith.constant 128 : index
    %c0_102 = arith.constant 0 : index
    %100 = vector.load %arg5[%c128, %c0_102] : memref<144x512xbf16, #tpu.memory_space<vmem>>, vector<4x512xbf16>
    tpu.vector_store %arg5[%c128, %c0_102], %99 {strides = array<i32>} : memref<144x512xbf16, #tpu.memory_space<vmem>>, vector<4x512xbf16>,
    %c0_103 = arith.constant 0 : index
    %c0_104 = arith.constant 0 : index
    %101 = vector.load %arg2[%c0_103, %c0_104] : memref<128x144xbf16, #tpu.memory_space<vmem>>, vector<128x144xbf16>
    %c0_105 = arith.constant 0 : index
    %c0_106 = arith.constant 0 : index
    %102 = vector.load %arg5[%c0_105, %c0_106] : memref<144x512xbf16, #tpu.memory_space<vmem>>, vector<144x512xbf16>
    %cst_107 = arith.constant dense<0.000000e+00> : vector<128x512xf32>
    %103 = tpu.matmul %101, %102, %cst_107 {dimension_numbers = #tpu.dot_dimension_numbers<[1], [0], [0], [1], [0, 0, 1, 1], [], []>} : vector<128x144xbf16>, vector<144x512xbf16>, vector<128x512xf32> -> vector<128x512xf32>
    %c0_108 = arith.constant 0 : index
    %c0_109 = arith.constant 0 : index
    %104 = vector.load %arg3[%c0_108, %c0_109] : memref<128x1xf32, #tpu.memory_space<vmem>>, vector<128x1xf32>
    %105 = vector.broadcast %104 : vector<128x1xf32> to vector<128x512xf32>
    %106 = arith.addf %103, %105 : vector<128x512xf32>
    %cst_110 = arith.constant 0.000000e+00 : f32
    %107 = vector.broadcast %cst_110 : f32 to vector<128x512xf32>
    %108 = arith.maximumf %106, %107 : vector<128x512xf32>
    %109 = vector.shape_cast %108 : vector<128x512xf32> to vector<128x16x32xf32>
    %110 = vector.extract_strided_slice %109 {offsets = [0, 0, 8], sizes = [128, 16, 16], strides = [1, 1, 1]} : vector<128x16x32xf32> to vector<128x16x16xf32>
    %111 = vector.shape_cast %110 : vector<128x16x16xf32> to vector<128x256xf32>
    %c0_111 = arith.constant 0 : index
    %c0_112 = arith.constant 0 : index
    %c0_113 = arith.constant 0 : index
    %112 = vector.load %arg4[%c0_111, %c0_112, %c0_113] : memref<1x128x256xf32, #tpu.memory_space<vmem>>, vector<1x128x256xf32>
    %113 = vector.shape_cast %112 : vector<1x128x256xf32> to vector<128x256xf32>
    %114 = vector.shape_cast %111 : vector<128x256xf32> to vector<1x128x256xf32>
    tpu.vector_store %arg4[%c0_111, %c0_112, %c0_113], %114 {strides = array<i32>} : memref<1x128x256xf32, #tpu.memory_space<vmem>>, vector<1x128x256xf32>,
    return
  }
  func.func @transform_0(%arg0: i32) -> (i32, i32, i32) {
    %c0_i32 = arith.constant 0 : i32
    %c0_i32_0 = arith.constant 0 : i32
    %c0_i32_1 = arith.constant 0 : i32
    return %arg0, %c0_i32, %c0_i32_0 : i32, i32, i32
  }
  func.func @transform_1(%arg0: i32) -> (i32, i32) {
    %c0_i32 = arith.constant 0 : i32
    %c0_i32_0 = arith.constant 0 : i32
    %c0_i32_1 = arith.constant 0 : i32
    return %c0_i32, %c0_i32_0 : i32, i32
  }
  func.func @transform_2(%arg0: i32) -> (i32, i32) {
    %c0_i32 = arith.constant 0 : i32
    %c0_i32_0 = arith.constant 0 : i32
    %c0_i32_1 = arith.constant 0 : i32
    return %c0_i32, %c0_i32_0 : i32, i32
  }
  func.func @transform_3(%arg0: i32) -> (i32, i32, i32) {
    %c0_i32 = arith.constant 0 : i32
    %c0_i32_0 = arith.constant 0 : i32
    %c0_i32_1 = arith.constant 0 : i32
    return %arg0, %c0_i32, %c0_i32_0 : i32, i32, i32
  }
}

</mosaic_0001>

<bundles_post_ra>
// kernel: tpu_custom_call.1
= control target key start
LH: loop header
LB: loop body
LE: loop exit
PB: predicated region body
PF: predicated region fallthrough
CT: control target
= control target key end

     0   :  { %8 = vsyncpa [#allocation4], 0  ;;  %s22750_s0 = inlined_call_operand.vmem [shape: bf16[2,4,1088], index: 0, kind: input, shape index: {}]   ;;  %s22751_s1 = inlined_call_operand.vmem [shape: bf16[128,144], index: 1, kind: input, shape index: {}]   ;;  %s22752_s2 = inlined_call_operand.vmem [shape: f32[128,1], index: 2, kind: input, shape index: {}]   ;;  %s22753_s3 = inlined_call_operand.hbm [shape: f32[2,128,256], index: 3, kind: output, shape index: {}]  }
   0x1   :  { %10 = vsyncpa [#allocation4 + $0x1], 0  ;;  %s14294_s12 = smov 0   ;;  %s14296_s13 = smov 0  }
   0x2   :  { %s14298_s14 = smov 0   ;;  %s14300_s15 = smov 0  }
   0x3 LB: > { %s14315_s16 = sadd.s32 4294967295, %s14245_s15   ;;  %s13921_s17 = sadd.s32 4294967294, %s14245_s15   ;;  %s14245_s15 = sphi %s14300_s15, %s25027_s15   ;;  %s14241_s14 = sphi %s14298_s14, %s25026_s14   ;;  %s14237_s13 = sphi %s14296_s13, %s25025_s13   ;;  %s14233_s12 = sphi %s14294_s12, %s25024_s12  }
   0x4   : > { %s14319_s18 = sadd.s32 1, %s14245_s15   ;;  %s91_s19 = sadd.s32 1, %s14241_s14 }
   0x5   : > { %s88_s20 = ssub.s32 %s14245_s15, %s14319_s18  ;;  %p101_p0 = scmp.ne.s32.totalorder %s14241_s14, %s14237_s13 }
   0x6   : > { %p89_p1 = scmp.eq.s32.totalorder %s88_s20, 0  ;;  %p102_p2 = scmp.eq.s32.totalorder %s14315_s16, 1 }
   0x7   : > { %p107_p3 = scmp.ne.s32.totalorder %s14237_s13, %s14233_s12  ;;  %p108_p4 = scmp.eq.s32.totalorder %s13921_s17, 1 }
   0x8   : > { %s14330_s21 = scalar_select %p89_p1, %s14241_s14, %s91_s19  }
   0x9   : > { %p14332_p5 = por %p102_p2, %p101_p0  ;;  %p14336_p6 = por %p108_p4, %p107_p3 }
   0xa   : > { %p13924_p7 = scmp.ge.s32.totalorder %s14245_s15, 1  ;;  %p140_p8 = scmp.lt.s32.totalorder %s14245_s15, 3 }
   0xc   : > { %p141_p9 = pnand %p13924_p7, %p140_p8 }
   0xe   : > { %144 = sbr.rel (%p141_p9) target bundleno = 2145 (0x861), region = 32 }
  0x13   : > { %p164_p10 = scmp.lt.s32.totalorder %s14315_s16, 1  ;;  %v182_v0 = vlaneseq  ;;  %v14247_v1 = vmov 1983009808   ;;  %s14248_s29 = smov 1   ;;  %vm209_vm0 = vcmask 1043456   ;;  %vm211_vm1 = vcmask 7168  }
  0x14   : > { %v180_v2 = vunpack.c.l.s4 %v14247_v1  ;;  %s14249_s30 = smov 127   ;;  %s14250_s4 = smov 97   ;;  %vm276_vm2 = vcmask 1039360   ;;  %vm321_vm3 = vcmask 793600   ;;  %vm365_vm4 = vcmask 785408  }
  0x15   : > { %s165_s24 = scalar_select %p164_p10, %s14315_s16, 1  ;;  %v14344_v3 = vshrl.u32 %v182_v0, 7  ;;  %vm410_vm5 = vcmask 777216   ;;  %vm454_vm6 = vcmask 531456   ;;  %vm499_vm7 = vcmask 523264  }
  0x16   : > { %v181_v4 = vunpack.c.0.s8 %v180_v2  ;;  %s14251_s5 = smov 96   ;;  %s14252_s6 = smov 95   ;;  %vm543_vm8 = vcmask 515072   ;;  %vm588_vm9 = vcmask 277504   ;;  %vm632_vm10 = vcmask 261120  }
  0x17   : > { %s14020_s25 = smul.u32 18, %s165_s24  ;;  %s14253_s7 = smov 65   ;;  %vm677_vm11 = vcmask 244736   ;;  %vm721_vm12 = vcmask 801792   ;;  %vm766_vm13 = vcmask 769024   ;;  %vm941_vm14 = vcmask 818176  }
  0x18   : > { %v14347_v5 = vsub.s32 %v181_v4, %v14344_v3  ;;  %s14254_s8 = smov 64   ;;  %s14255_s9 = smov 63   ;;  %vm2004_vm15 = vcmask 130048  }
  0x19   : > { %s14352_s28 = scalar_lea.vmem %s22750_s0, %s14020_s25  ;;  %s14256_s10 = smov 34  }
  0x1a   : > { %v14355_v6 = vld.sshfl [vmem:[%s14352_s28 + $0xa] sm:$0x3 pattern:$0x76325410]  ;;  %v174_v7 = vld [vmem:[%s14352_s28 + $0x2] sm:$0xff]  ;;  %s14257_s11 = smov 32  }
  0x1b   : > { %v240_v8 = vld [vmem:[%s14352_s28 + $0x4] sm:$0xff]  ;;  %204 = vrot.lane.b32.xlu1 %v14355_v6, %s14248_s29  ;;  %v14361_v9 = vrot.slane %v174_v7, %v14347_v5  ;;  %v178_v10 = vcombine.high %v174_v7, %v174_v7  ;;  %v14364_v11 = vld.sshfl [vmem:[%s14352_s28 + $0xc] sm:$0x3 pattern:$0x76325410]  ;;  %v555_v26 = vcombine.low %v174_v7, %v174_v7  ;;  %s14258_s17 = smov 30  }
  0x1c   : > { %v244_v13 = vcombine.high %v240_v8, %v240_v8  ;;  %v14372_v14 = vrot.slane %v240_v8, %v14347_v5  ;;  %v288_v16 = vcombine.low %v240_v8, %v240_v8  ;;  %v14091_v18 = vld [vmem:[%s14352_s28 + $0xc] ss:$0 sps:$4 sm:$0x33]   ;;  %v219_v19 = vld [vmem:[%s14352_s28 + $0x4] sm:$0xff]  ;;  %s14259_s19 = smov 98   ;;  %s14260_s20 = smov 94  }
  0x1d   : > { %200 = vrot.lane.b32.xlu0 %v14361_v9, %s14248_s29  ;;  %v14368_v12 = vrot.slane %v178_v10, %v14347_v5  ;;  %v221_v20 = vcombine.low %v219_v19, %v219_v19  ;;  %13929 = vst.sshfl [vmem:[#allocation2 + $0x8] sm:$0xf0 pattern:$0x76325410] %v219_v19  ;;  %v310_v21 = vrot.slane %v14091_v18, %v14347_v5  ;;  %s14261_s24 = smov 100   ;;  %s14262_s25 = smov 92  }
  0x1e   : > { %v14376_v15 = vrot.slane %v244_v13, %v14347_v5  ;;  %v14381_v17 = vrot.slane %v288_v16, %v14347_v5  ;;  %v14092_v22 = vld [vmem:[%s14352_s28 + $0xc] ss:$0 sps:$4 sm:$0x33]   ;;  %v562_v27 = vrot.slane %v555_v26, %v14347_v5  ;;  %v14095_v28 = vld [vmem:[%s14352_s28 + $0xa] ss:$0 sps:$4 sm:$0x33]  }
  0x1f   : > { %270 = vrot.lane.b32.xlu1 %v14364_v11, %s14249_s30  ;;  %13928 = vst.sshfl [vmem:[#allocation2] sm:$0xf0 pattern:$0x76325410] %v221_v20  ;;  %v399_v23 = vrot.slane %v14092_v22, %v14347_v5  ;;  %v577_v29 = vrot.slane %v14095_v28, %v14347_v5  ;;  %v1124_v42 = vld [vmem:[%s14352_s28 + $0x6] sm:$0xff]  ;;  %s14263_s26 = smov 104  }
  0x20   : > { %v14093_v24 = vld [vmem:[%s14352_s28 + $0xc] ss:$0 sps:$4 sm:$0x33]   ;;  %v14096_v30 = vld [vmem:[%s14352_s28 + $0xa] ss:$0 sps:$4 sm:$0x33]   ;;  %v1135_v46 = vrot.slane %v1124_v42, %v14347_v5  ;;  %v1128_v52 = vcombine.high %v1124_v42, %v1124_v42  ;;  %v1171_v0 = vcombine.low %v1124_v42, %v1124_v42 }
  0x21   : > { %202 = vrot.lane.b32.xlu0 %v14368_v12, %s14248_s29  ;;  %v488_v25 = vrot.slane %v14093_v24, %v14347_v5  ;;  %v666_v31 = vrot.slane %v14096_v30, %v14347_v5  ;;  %v14097_v32 = vld [vmem:[%s14352_s28 + $0xc] ss:$0 sps:$4 sm:$0x33]   ;;  %v14099_v36 = vld [vmem:[%s14352_s28 + $0xa] ss:$0 sps:$4 sm:$0x33]  }
  0x22   : > { %v755_v33 = vrot.slane %v14097_v32, %v14347_v5  ;;  %v14098_v34 = vld [vmem:[%s14352_s28 + $0xc] ss:$0 sps:$4 sm:$0x33]   ;;  %v930_v37 = vrot.slane %v14099_v36, %v14347_v5  ;;  %v14100_v38 = vld [vmem:[%s14352_s28 + $0xa] ss:$0 sps:$4 sm:$0x33]   ;;  %v1142_v63 = vrot.slane %v1128_v52, %v14347_v5 }
  0x23   : > { %266 = vrot.lane.b32.xlu1 %v14372_v14, %s14249_s30  ;;  %v843_v35 = vrot.slane %v14098_v34, %v14347_v5  ;;  %v1018_v39 = vrot.slane %v14100_v38, %v14347_v5  ;;  %v14101_v44 = vld [vmem:[%s14352_s28 + $0xc] ss:$0 sps:$4 sm:$0x33]   ;;  %v14104_v13 = vld [vmem:[%s14352_s28 + $0xe] ss:$0 sps:$4 sm:$0x33]  }
  0x24   : > { %v1106_v51 = vrot.slane %v14101_v44, %v14347_v5  ;;  %v13940_v61 = vld.sshfl [vmem:[%s14352_s28 + $0xe] sm:$0x3 pattern:$0x76325410]  ;;  %v1193_v22 = vrot.slane %v14104_v13, %v14347_v5  ;;  %s14264_s27 = smov 88  }
  0x25   : > { %268 = vrot.lane.b32.xlu0 %v14376_v15, %s14249_s30  ;;  %v14106_v42 = vld [vmem:[%s14352_s28 + $0x8] ss:$0 sps:$4 sm:$0x33]  }
  0x27   : > { %313 = vrot.lane.b32.xlu1 %v14372_v14, %s14250_s4 }
  0x29   : > { %311 = vrot.lane.b32.xlu0 %v14381_v17, %s14250_s4 }
  0x2b   : > { %355 = vrot.lane.b32.xlu1 %v14372_v14, %s14251_s5 }
  0x2d   : > { %315 = vrot.lane.b32.xlu0 %v310_v21, %s14250_s4 }
  0x2f   : > { %359 = vrot.lane.b32.xlu1 %v14364_v11, %s14251_s5 }
  0x31   : > { %357 = vrot.lane.b32.xlu0 %v14376_v15, %s14251_s5 }
  0x33   : > { %402 = vrot.lane.b32.xlu1 %v14372_v14, %s14252_s6 }
  0x35   : > { %400 = vrot.lane.b32.xlu0 %v14381_v17, %s14252_s6 }
  0x37   : > { %444 = vrot.lane.b32.xlu1 %v14372_v14, %s14253_s7 }
  0x39   : > { %404 = vrot.lane.b32.xlu0 %v399_v23, %s14252_s6  ;;  %s14267_s6 = smov 120  }
  0x3b   : > { %448 = vrot.lane.b32.xlu1 %v14364_v11, %s14253_s7 }
  0x3d   : > { %446 = vrot.lane.b32.xlu0 %v14376_v15, %s14253_s7  ;;  %s14268_s7 = smov 16  }
  0x3f   : > { %491 = vrot.lane.b32.xlu1 %v14372_v14, %s14254_s8 }
  0x41   : > { %489 = vrot.lane.b32.xlu0 %v14381_v17, %s14254_s8 }
  0x43   : > { %533 = vrot.lane.b32.xlu1 %v14372_v14, %s14255_s9 }
  0x45   : > { %493 = vrot.lane.b32.xlu0 %v488_v25, %s14254_s8  ;;  %v1254_v25 = vld [vmem:[%s14352_s28] sm:$0xff] }
  0x46   : > { %v1272_v38 = vrot.slane %v1254_v25, %v14347_v5 }
  0x47   : > { %537 = vrot.lane.b32.xlu1 %v14364_v11, %s14255_s9 }
  0x49   : > { %535 = vrot.lane.b32.xlu0 %v14376_v15, %s14255_s9  ;;  %s14269_s9 = smov 48  }
  0x4b   : > { %580 = vrot.lane.b32.xlu1 %v14361_v9, %s14256_s10 }
  0x4d   : > { %578 = vrot.lane.b32.xlu0 %v562_v27, %s14256_s10 }
  0x4f   : > { %622 = vrot.lane.b32.xlu1 %v14361_v9, %s14257_s11 }
  0x51   : > { %582 = vrot.lane.b32.xlu0 %v577_v29, %s14256_s10 }
  0x53   : > { %626 = vrot.lane.b32.xlu1 %v14355_v6, %s14257_s11 }
  0x55   : > { %624 = vrot.lane.b32.xlu0 %v14368_v12, %s14257_s11 }
  0x57   : > { %669 = vrot.lane.b32.xlu1 %v14361_v9, %s14258_s17 }
  0x59   : > { %667 = vrot.lane.b32.xlu0 %v562_v27, %s14258_s17 }
  0x5b   : > { %711 = vrot.lane.b32.xlu1 %v14372_v14, %s14259_s19 }
  0x5d   : > { %671 = vrot.lane.b32.xlu0 %v666_v31, %s14258_s17  ;;  %v1258_v31 = vcombine.low %v1254_v25, %v1254_v25 }
  0x5f   : > { %715 = vrot.lane.b32.xlu1 %v14364_v11, %s14259_s19 }
  0x61   : > { %713 = vrot.lane.b32.xlu0 %v14376_v15, %s14259_s19  ;;  %s161_s19 = sand.u32 1, %s14237_s13  }
  0x63   : > { %758 = vrot.lane.b32.xlu1 %v14372_v14, %s14260_s20 }
  0x65   : > { %756 = vrot.lane.b32.xlu0 %v14381_v17, %s14260_s20 }
  0x67   : > { %800 = vrot.lane.b32.xlu1 %v14372_v14, %s14256_s10 }
  0x69   : > { %760 = vrot.lane.b32.xlu0 %v755_v33, %s14260_s20  ;;  %s13925_s20 = sshll.u32 %s161_s19, 8 }
  0x6b   : > { %804 = vrot.lane.b32.xlu1 %v14364_v11, %s14256_s10 }
  0x6d   : > { %802 = vrot.lane.b32.xlu0 %v14376_v15, %s14256_s10  ;;  %s14270_s10 = smov 80  }
  0x6f   : > { %846 = vrot.lane.b32.xlu1 %v14372_v14, %s14257_s11 }
  0x71   : > { %844 = vrot.lane.b32.xlu0 %v14381_v17, %s14257_s11 }
  0x73   : > { %887 = vrot.lane.b32.xlu1 %v14372_v14, %s14258_s17 }
  0x75   : > { %848 = vrot.lane.b32.xlu0 %v843_v35, %s14257_s11 }
  0x77   : > { %891 = vrot.lane.b32.xlu1 %v14364_v11, %s14258_s17 }
  0x79   : > { %889 = vrot.lane.b32.xlu0 %v14376_v15, %s14258_s17  ;;  %s14271_s17 = smov 112  }
  0x7b   : > { %933 = vrot.lane.b32.xlu1 %v14361_v9, %s14261_s24 }
  0x7d   : > { %931 = vrot.lane.b32.xlu0 %v562_v27, %s14261_s24 }
  0x7f   : > { %975 = vrot.lane.b32.xlu1 %v14361_v9, %s14251_s5 }
  0x81   : > { %935 = vrot.lane.b32.xlu0 %v930_v37, %s14261_s24 }
  0x83   : > { %979 = vrot.lane.b32.xlu1 %v14355_v6, %s14251_s5 }
  0x85   : > { %977 = vrot.lane.b32.xlu0 %v14368_v12, %s14251_s5  ;;  %v1178_v12 = vrot.slane %v1171_v0, %v14347_v5 }
  0x87   : > { %1021 = vrot.lane.b32.xlu1 %v14361_v9, %s14262_s25 }
  0x89   : > { %1019 = vrot.lane.b32.xlu0 %v562_v27, %s14262_s25 }
  0x8b   : > { %1063 = vrot.lane.b32.xlu1 %v14372_v14, %s14261_s24 }
  0x8d   : > { %1023 = vrot.lane.b32.xlu0 %v1018_v39, %s14262_s25  ;;  %v205_v40 = vpop.permute.xlu1 %204 }
  0x8e   : > { %v208_v47 = vrot.slane %v205_v40, 4 }
  0x8f   : > { %v201_v41 = vpop.permute.xlu0 %200  ;;  %1067 = vrot.lane.b32.xlu1 %v14364_v11, %s14261_s24 }
  0x90   : > { %v206_v48 = vrot.slane %v201_v41, 4 }
  0x91   : > { %1065 = vrot.lane.b32.xlu0 %v14376_v15, %s14261_s24  ;;  %v271_v43 = vpop.permute.xlu1 %270 }
  0x92   : > { %v274_v59 = vrot.slane %v271_v43, 4 }
  0x93   : > { %v203_v45 = vpop.permute.xlu0 %202  ;;  %1109 = vrot.lane.b32.xlu1 %v14372_v14, %s14262_s25 }
  0x94   : > { %v207_v49 = vrot.slane %v203_v45, 4 }
  0x95   : > { %1107 = vrot.lane.b32.xlu0 %v14381_v17, %s14262_s25  ;;  %v267_v50 = vpop.permute.xlu1 %266 }
  0x96   : > { %v210_v53 = vsel %vm209_vm0, %v206_v48, %v207_v49  ;;  %v213_v54 = vsel %vm209_vm0, %v207_v49, %v208_v47  ;;  %v272_v55 = vrot.slane %v267_v50, 4  ;;  %v1280_v48 = vrot.slane %v14106_v42, %v14347_v5 }
  0x97   : > { %v212_v56 = vsel %vm211_vm1, %v201_v41, %v210_v53  ;;  %v214_v57 = vsel %vm211_vm1, %v203_v45, %v213_v54  ;;  %v269_v58 = vpop.permute.xlu0 %268  ;;  %1150 = vrot.lane.b32.xlu1 %v1135_v46, %s14261_s24  ;;  %v1265_v41 = vrot.slane %v1258_v31, %v14347_v5  ;;  %v1303_v49 = vcombine.high %v1254_v25, %v1254_v25 }
  0x98   : > { %217 = vst [vmem:[#allocation2] sm:$0x33] %v212_v56  ;;  %218 = vst [vmem:[#allocation2 + $0x8] sm:$0x33] %v214_v57  ;;  %v273_v60 = vrot.slane %v269_v58, 4  ;;  %vm1029_vm1 = vcmask 752640  }
  0x99   : > { %1111 = vrot.lane.b32.xlu0 %v1106_v51, %s14262_s25  ;;  %v314_v62 = vpop.permute.xlu1 %313  ;;  %v13942_v56 = vld.sshfl [vmem:[%s14352_s28 + $0x8] sm:$0x3 pattern:$0x76325410] }
  0x9a   : > { %v275_v1 = vsel %vm209_vm0, %v272_v55, %v273_v60  ;;  %v278_v2 = vsel %vm209_vm0, %v273_v60, %v274_v59  ;;  %v318_v4 = vrot.slane %v314_v62, 4 }
  0x9b   : > { %v277_v6 = vsel %vm276_vm2, %v267_v50, %v275_v1  ;;  %v279_v7 = vsel %vm276_vm2, %v269_v58, %v278_v2  ;;  %v312_v8 = vpop.permute.xlu0 %311  ;;  %1154 = vrot.lane.b32.xlu1 %v13940_v61, %s14261_s24  ;;  %v1317_v58 = vrot.slane %v1303_v49, %v14347_v5  ;;  %vm1291_vm2 = vcmask 850944  }
  0x9c   : > { %282 = vst [vmem:[#allocation2 + $0x10] sm:$0x33] %v277_v6  ;;  %283 = vst [vmem:[#allocation2 + $0x18] sm:$0x33] %v279_v7  ;;  %v317_v9 = vrot.slane %v312_v8, 4 }
  0x9d   : > { %1152 = vrot.lane.b32.xlu0 %v1142_v63, %s14261_s24  ;;  %v356_v10 = vpop.permute.xlu1 %355  ;;  %s21731_s24 = scalar_lea.vmem [#allocation3], %s13925_s20 }
  0x9e   : > { %v320_v16 = vsel %vm209_vm0, %v317_v9, %v318_v4  ;;  %v361_v28 = vrot.slane %v356_v10, 4 }
  0x9f   : > { %v322_v18 = vsel %vm321_vm3, %v312_v8, %v320_v16  ;;  %v316_v19 = vpop.permute.xlu0 %315  ;;  %1196 = vrot.lane.b32.xlu1 %v1135_v46, %s14251_s5 }
  0xa0   : > { %327 = vst [vmem:[#allocation2 + $0x10] sm:$0xcc] %v322_v18  ;;  %v319_v20 = vrot.slane %v316_v19, 4 }
  0xa1   : > { %1194 = vrot.lane.b32.xlu0 %v1178_v12, %s14251_s5  ;;  %v360_v21 = vpop.permute.xlu1 %359 }
  0xa2   : > { %v323_v23 = vsel %vm209_vm0, %v318_v4, %v319_v20  ;;  %v363_v24 = vrot.slane %v360_v21, 4  ;;  %v14108_v4 = vld [vmem:[%s14352_s28 + $0x8] ss:$0 sps:$4 sm:$0x33]  }
  0xa3   : > { %v324_v26 = vsel %vm321_vm3, %v314_v62, %v323_v23  ;;  %v358_v27 = vpop.permute.xlu0 %357  ;;  %1237 = vrot.lane.b32.xlu1 %v1135_v46, %s14262_s25  ;;  %v1368_v12 = vrot.slane %v14108_v4, %v14347_v5  ;;  %vm1379_vm3 = vcmask 719872  }
  0xa4   : > { %328 = vst [vmem:[#allocation2 + $0x18] sm:$0xcc] %v324_v26  ;;  %v362_v29 = vrot.slane %v358_v27, 4 }
  0xa5   : > { %1198 = vrot.lane.b32.xlu0 %v1193_v22, %s14251_s5  ;;  %v403_v30 = vpop.permute.xlu1 %402 }
  0xa6   : > { %v364_v32 = vsel %vm209_vm0, %v361_v28, %v362_v29  ;;  %v367_v33 = vsel %vm209_vm0, %v362_v29, %v363_v24  ;;  %v407_v34 = vrot.slane %v403_v30, 4 }
  0xa7   : > { %v366_v35 = vsel %vm365_vm4, %v356_v10, %v364_v32  ;;  %v368_v36 = vsel %vm365_vm4, %v358_v27, %v367_v33  ;;  %v401_v37 = vpop.permute.xlu0 %400  ;;  %1241 = vrot.lane.b32.xlu1 %v13940_v61, %s14262_s25  ;;  %v14109_v32 = vld [vmem:[%s14352_s28 + $0xc] ss:$0 sps:$4 sm:$0x33]  }
  0xa8   : > { %371 = vst [vmem:[#allocation2 + $0x20] sm:$0x33] %v366_v35  ;;  %372 = vst [vmem:[#allocation2 + $0x28] sm:$0x33] %v368_v36  ;;  %v406_v39 = vrot.slane %v401_v37, 4 }
  0xa9   : > { %1239 = vrot.lane.b32.xlu0 %v1142_v63, %s14262_s25  ;;  %v445_v40 = vpop.permute.xlu1 %444 }
  0xaa   : > { %v409_v43 = vsel %vm209_vm0, %v406_v39, %v407_v34  ;;  %v450_v54 = vrot.slane %v445_v40, 4 }
  0xab   : > { %v411_v44 = vsel %vm410_vm5, %v401_v37, %v409_v43  ;;  %v405_v45 = vpop.permute.xlu0 %404  ;;  %1283 = vrot.lane.b32.xlu1 %v1272_v38, %s14263_s26 }
  0xac   : > { %416 = vst [vmem:[#allocation2 + $0x20] sm:$0xcc] %v411_v44  ;;  %v408_v46 = vrot.slane %v405_v45, 4 }
  0xad   : > { %1281 = vrot.lane.b32.xlu0 %v1265_v41, %s14263_s26  ;;  %v449_v47 = vpop.permute.xlu1 %448  ;;  %v13944_v44 = vld.sshfl [vmem:[%s14352_s28 + $0x10] sm:$0x3 pattern:$0x76325410] }
  0xae   : > { %v412_v50 = vsel %vm209_vm0, %v407_v34, %v408_v46  ;;  %v452_v51 = vrot.slane %v449_v47, 4 }
  0xaf   : > { %v413_v52 = vsel %vm410_vm5, %v403_v30, %v412_v50  ;;  %v447_v53 = vpop.permute.xlu0 %446  ;;  %1325 = vrot.lane.b32.xlu1 %v1272_v38, %s14251_s5  ;;  %v1474_v30 = vld [vmem:[%s14352_s28 + $0x8] sm:$0xff]  ;;  %vm13650_vm5 = vcmask 654336  }
  0xb0   : > { %417 = vst [vmem:[#allocation2 + $0x28] sm:$0xcc] %v413_v52  ;;  %v451_v55 = vrot.slane %v447_v53, 4  ;;  %v1521_v46 = vcombine.low %v1474_v30, %v1474_v30 }
  0xb1   : > { %1285 = vrot.lane.b32.xlu0 %v1280_v48, %s14263_s26  ;;  %v492_v57 = vpop.permute.xlu1 %491 }
  0xb2   : > { %v453_v59 = vsel %vm209_vm0, %v450_v54, %v451_v55  ;;  %v456_v60 = vsel %vm209_vm0, %v451_v55, %v452_v51  ;;  %v496_v61 = vrot.slane %v492_v57, 4  ;;  %v1528_v55 = vrot.slane %v1521_v46, %v14347_v5 }
  0xb3   : > { %v455_v62 = vsel %vm454_vm6, %v445_v40, %v453_v59  ;;  %v457_v63 = vsel %vm454_vm6, %v447_v53, %v456_v60  ;;  %v490_v0 = vpop.permute.xlu0 %489  ;;  %1329 = vrot.lane.b32.xlu1 %v13942_v56, %s14251_s5  ;;  %v14112_v56 = vld [vmem:[%s14352_s28 + $0x10] ss:$0 sps:$4 sm:$0x33]   ;;  %vm13684_vm6 = vcmask 916480   ;;  %s14272_s28 = smov [#allocation3]  }
  0xb4   : > { %460 = vst [vmem:[#allocation2 + $0x30] sm:$0x33] %v455_v62  ;;  %461 = vst [vmem:[#allocation2 + $0x38] sm:$0x33] %v457_v63  ;;  %v495_v1 = vrot.slane %v490_v0, 4  ;;  %v1543_v62 = vrot.slane %v14112_v56, %v14347_v5  ;;  %s14189_s29 = sshll.u32 %s14272_s28, 4  ;;  %s14190_s29 = int_to_ptr.vmem [resolvable:$false] %s14189_s29 }
  0xb5   : > { %1327 = vrot.lane.b32.xlu0 %v1317_v58, %s14251_s5  ;;  %v534_v2 = vpop.permute.xlu1 %533  ;;  %s14191_s30 = scalar_lea.vmem %s14190_s29, 8192 }
  0xb6   : > { %v498_v6 = vsel %vm209_vm0, %v495_v1, %v496_v61  ;;  %v539_v20 = vrot.slane %v534_v2, 4 }
  0xb7   : > { %v500_v7 = vsel %vm499_vm7, %v490_v0, %v498_v6  ;;  %v494_v8 = vpop.permute.xlu0 %493  ;;  %1371 = vrot.lane.b32.xlu1 %v1272_v38, %s14264_s27  ;;  %v1478_v38 = vcombine.high %v1474_v30, %v1474_v30 }
  0xb8   : > { %505 = vst [vmem:[#allocation2 + $0x30] sm:$0xcc] %v500_v7  ;;  %v497_v9 = vrot.slane %v494_v8, 4 }
  0xb9   : > { %1369 = vrot.lane.b32.xlu0 %v1265_v41, %s14264_s27  ;;  %v538_v10 = vpop.permute.xlu1 %537  ;;  %v1492_v45 = vrot.slane %v1478_v38, %v14347_v5 }
  0xba   : > { %v501_v13 = vsel %vm209_vm0, %v496_v61, %v497_v9  ;;  %v541_v16 = vrot.slane %v538_v10, 4 }
  0xbb   : > { %v502_v18 = vsel %vm499_vm7, %v492_v57, %v501_v13  ;;  %v536_v19 = vpop.permute.xlu0 %535  ;;  %1413 = vrot.lane.b32.xlu1 %v14372_v14, %s14263_s26 }
  0xbc   : > { %506 = vst [vmem:[#allocation2 + $0x38] sm:$0xcc] %v502_v18  ;;  %v540_v21 = vrot.slane %v536_v19, 4 }
  0xbd   : > { %1373 = vrot.lane.b32.xlu0 %v1368_v12, %s14264_s27  ;;  %v581_v22 = vpop.permute.xlu1 %580 }
  0xbe   : > { %v542_v23 = vsel %vm209_vm0, %v539_v20, %v540_v21  ;;  %v545_v24 = vsel %vm209_vm0, %v540_v21, %v541_v16  ;;  %v585_v25 = vrot.slane %v581_v22, 4 }
  0xbf   : > { %v544_v26 = vsel %vm543_vm8, %v534_v2, %v542_v23  ;;  %v546_v27 = vsel %vm543_vm8, %v536_v19, %v545_v24  ;;  %v579_v28 = vpop.permute.xlu0 %578  ;;  %1417 = vrot.lane.b32.xlu1 %v14364_v11, %s14263_s26  ;;  %v1485_v11 = vrot.slane %v1474_v30, %v14347_v5 }
  0xc0   : > { %549 = vst [vmem:[#allocation2 + $0x40] sm:$0x33] %v544_v26  ;;  %550 = vst [vmem:[#allocation2 + $0x48] sm:$0x33] %v546_v27  ;;  %v584_v29 = vrot.slane %v579_v28, 4 }
  0xc1   : > { %1415 = vrot.lane.b32.xlu0 %v14376_v15, %s14263_s26  ;;  %v623_v31 = vpop.permute.xlu1 %622  ;;  %v1456_v15 = vrot.slane %v14109_v32, %v14347_v5 }
  0xc2   : > { %v587_v33 = vsel %vm209_vm0, %v584_v29, %v585_v25 }
  0xc3   : > { %v589_v34 = vsel %vm588_vm9, %v579_v28, %v587_v33  ;;  %v583_v35 = vpop.permute.xlu0 %582  ;;  %1459 = vrot.lane.b32.xlu1 %v14372_v14, %s14264_s27  ;;  %v628_v14 = vrot.slane %v623_v31, 4 }
  0xc4   : > { %594 = vst [vmem:[#allocation2 + $0x40] sm:$0xcc] %v589_v34  ;;  %v586_v36 = vrot.slane %v583_v35, 4 }
  0xc5   : > { %1457 = vrot.lane.b32.xlu0 %v14381_v17, %s14264_s27  ;;  %v627_v37 = vpop.permute.xlu1 %626 }
  0xc6   : > { %v590_v39 = vsel %vm209_vm0, %v585_v25, %v586_v36  ;;  %v630_v40 = vrot.slane %v627_v37, 4 }
  0xc7   : > { %v591_v41 = vsel %vm588_vm9, %v581_v22, %v590_v39  ;;  %v625_v42 = vpop.permute.xlu0 %624  ;;  %1500 = vrot.lane.b32.xlu1 %v1485_v11, %s14263_s26 }
  0xc8   : > { %595 = vst [vmem:[#allocation2 + $0x48] sm:$0xcc] %v591_v41  ;;  %v629_v43 = vrot.slane %v625_v42, 4 }
  0xc9   : > { %1461 = vrot.lane.b32.xlu0 %v1456_v15, %s14264_s27  ;;  %v670_v17 = vpop.permute.xlu1 %669  ;;  %v14265_v15 = vmov 0  }
  0xca   : > { %v631_v47 = vsel %vm209_vm0, %v628_v14, %v629_v43  ;;  %v634_v48 = vsel %vm209_vm0, %v629_v43, %v630_v40  ;;  %v674_v49 = vrot.slane %v670_v17, 4  ;;  %170 = vst [vmem:[#allocation2 + $0x100] sm:$0xcc] %v14265_v15  ;;  %171 = vst [vmem:[#allocation2 + $0x108] sm:$0xcc] %v14265_v15  ;;  %14086 = vset.pattern.permute.xlu0 %v14265_v15  ;;  %14087 = vset.pattern.permute.xlu1 %v14265_v15 }
  0xcb   : > { %v633_v50 = vsel %vm632_vm10, %v623_v31, %v631_v47  ;;  %v635_v51 = vsel %vm632_vm10, %v625_v42, %v634_v48  ;;  %v668_v52 = vpop.permute.xlu0 %667  ;;  %1504 = vrot.lane.b32.xlu1 %v13944_v44, %s14263_s26 }
  0xcc   : > { %638 = vst [vmem:[#allocation2 + $0x50] sm:$0x33] %v633_v50  ;;  %639 = vst [vmem:[#allocation2 + $0x58] sm:$0x33] %v635_v51  ;;  %v673_v53 = vrot.slane %v668_v52, 4 }
  0xcd   : > { %1502 = vrot.lane.b32.xlu0 %v1492_v45, %s14263_s26  ;;  %v712_v54 = vpop.permute.xlu1 %711 }
  0xce   : > { %v676_v57 = vsel %vm209_vm0, %v673_v53, %v674_v49  ;;  %v717_v4 = vrot.slane %v712_v54, 4 }
  0xcf   : > { %v678_v58 = vsel %vm677_vm11, %v668_v52, %v676_v57  ;;  %v672_v59 = vpop.permute.xlu0 %671  ;;  %1546 = vrot.lane.b32.xlu1 %v1485_v11, %s14251_s5 }
  0xd0   : > { %683 = vst [vmem:[#allocation2 + $0x50] sm:$0xcc] %v678_v58  ;;  %v675_v60 = vrot.slane %v672_v59, 4  ;;  %v14163_v58 = vld [vmem:[%s22751_s1 + $0x4] ss:$8 sps:$4 sm:$0xff]  }
  0xd1   : > { %1544 = vrot.lane.b32.xlu0 %v1528_v55, %s14251_s5  ;;  %v716_v61 = vpop.permute.xlu1 %715  ;;  %13998 = vmatprep.mubr.msk.bf16.mxu0 %vm2004_vm15, %v14163_v58 }
  0xd2   : > { %v679_v63 = vsel %vm209_vm0, %v674_v49, %v675_v60  ;;  %v719_v0 = vrot.slane %v716_v61, 4  ;;  %14006 = vmatprep.mubr.msk.bf16.mxu1 %vm2004_vm15, %v14163_v58 }
  0xd3   : > { %v680_v1 = vsel %vm677_vm11, %v670_v17, %v679_v63  ;;  %v714_v2 = vpop.permute.xlu0 %713  ;;  %1587 = vrot.lane.b32.xlu1 %v1485_v11, %s14264_s27 }
  0xd4   : > { %684 = vst [vmem:[#allocation2 + $0x58] sm:$0xcc] %v680_v1  ;;  %v718_v6 = vrot.slane %v714_v2, 4 }
  0xd5   : > { %1548 = vrot.lane.b32.xlu0 %v1543_v62, %s14251_s5  ;;  %v759_v7 = vpop.permute.xlu1 %758 }
  0xd6   : > { %v720_v8 = vsel %vm209_vm0, %v717_v4, %v718_v6  ;;  %v723_v9 = vsel %vm209_vm0, %v718_v6, %v719_v0  ;;  %v763_v10 = vrot.slane %v759_v7, 4 }
  0xd7   : > { %v722_v12 = vsel %vm721_vm12, %v712_v54, %v720_v8  ;;  %v724_v13 = vsel %vm721_vm12, %v714_v2, %v723_v9  ;;  %v757_v16 = vpop.permute.xlu0 %756  ;;  %1591 = vrot.lane.b32.xlu1 %v13944_v44, %s14264_s27 }
  0xd8   : > { %727 = vst [vmem:[#allocation2 + $0x60] sm:$0x33] %v722_v12  ;;  %728 = vst [vmem:[#allocation2 + $0x68] sm:$0x33] %v724_v13  ;;  %v762_v18 = vrot.slane %v757_v16, 4 }
  0xd9   : > { %v801_v19 = vpop.permute.xlu1 %800  ;;  %1589 = vrot.lane.b32.xlu0 %v1492_v45, %s14264_s27 }
  0xda   : > { %v765_v20 = vsel %vm209_vm0, %v762_v18, %v763_v10  ;;  %v806_v29 = vrot.slane %v801_v19, 4 }
  0xdb   : > { %v767_v21 = vsel %vm766_vm13, %v757_v16, %v765_v20  ;;  %v761_v22 = vpop.permute.xlu0 %760 }
  0xdc   : > { %772 = vst [vmem:[#allocation2 + $0x60] sm:$0xcc] %v767_v21  ;;  %v764_v23 = vrot.slane %v761_v22, 4 }
  0xdd   : > { %v805_v24 = vpop.permute.xlu1 %804 }
  0xde   : > { %v768_v25 = vsel %vm209_vm0, %v763_v10, %v764_v23  ;;  %v808_v26 = vrot.slane %v805_v24, 4 }
  0xdf   : > { %v769_v27 = vsel %vm766_vm13, %v759_v7, %v768_v25  ;;  %v803_v28 = vpop.permute.xlu0 %802 }
  0xe0   : > { %773 = vst [vmem:[#allocation2 + $0x68] sm:$0xcc] %v769_v27  ;;  %v807_v30 = vrot.slane %v803_v28, 4 }
  0xe1   : > { %v847_v31 = vpop.permute.xlu1 %846 }
  0xe2   : > { %v809_v32 = vsel %vm209_vm0, %v806_v29, %v807_v30  ;;  %v811_v33 = vsel %vm209_vm0, %v807_v30, %v808_v26  ;;  %v851_v34 = vrot.slane %v847_v31, 4 }
  0xe3   : > { %v810_v35 = vsel %vm588_vm9, %v801_v19, %v809_v32  ;;  %v812_v11 = vsel %vm588_vm9, %v803_v28, %v811_v33  ;;  %v845_v36 = vpop.permute.xlu0 %844 }
  0xe4   : > { %815 = vst [vmem:[#allocation2 + $0x70] sm:$0x33] %v810_v35  ;;  %816 = vst [vmem:[#allocation2 + $0x78] sm:$0x33] %v812_v11  ;;  %v850_v37 = vrot.slane %v845_v36, 4 }
  0xe5   : > { %v888_v38 = vpop.permute.xlu1 %887 }
  0xe6   : > { %v853_v39 = vsel %vm209_vm0, %v850_v37, %v851_v34  ;;  %v893_v46 = vrot.slane %v888_v38, 4 }
  0xe7   : > { %v854_v40 = vsel %vm632_vm10, %v845_v36, %v853_v39  ;;  %v849_v41 = vpop.permute.xlu0 %848 }
  0xe8   : > { %859 = vst [vmem:[#allocation2 + $0x70] sm:$0xcc] %v854_v40  ;;  %v852_v42 = vrot.slane %v849_v41, 4 }
  0xe9   : > { %v892_v14 = vpop.permute.xlu1 %891 }
  0xea   : > { %v855_v43 = vsel %vm209_vm0, %v851_v34, %v852_v42  ;;  %v895_v44 = vrot.slane %v892_v14, 4 }
  0xeb   : > { %v856_v17 = vsel %vm632_vm10, %v847_v31, %v855_v43  ;;  %v890_v45 = vpop.permute.xlu0 %889 }
  0xec   : > { %860 = vst [vmem:[#allocation2 + $0x78] sm:$0xcc] %v856_v17  ;;  %v894_v47 = vrot.slane %v890_v45, 4 }
  0xed   : > { %v934_v48 = vpop.permute.xlu1 %933 }
  0xee   : > { %v896_v49 = vsel %vm209_vm0, %v893_v46, %v894_v47  ;;  %v898_v50 = vsel %vm209_vm0, %v894_v47, %v895_v44  ;;  %v938_v51 = vrot.slane %v934_v48, 4 }
  0xef   : > { %v897_v52 = vsel %vm677_vm11, %v888_v38, %v896_v49  ;;  %v899_v53 = vsel %vm677_vm11, %v890_v45, %v898_v50  ;;  %v932_v54 = vpop.permute.xlu0 %931 }
  0xf0   : > { %902 = vst [vmem:[#allocation2 + $0x80] sm:$0x33] %v897_v52  ;;  %903 = vst [vmem:[#allocation2 + $0x88] sm:$0x33] %v899_v53  ;;  %v937_v55 = vrot.slane %v932_v54, 4 }
  0xf1   : > { %v976_v56 = vpop.permute.xlu1 %975 }
  0xf2   : > { %v940_v57 = vsel %vm209_vm0, %v937_v55, %v938_v51  ;;  %v981_v4 = vrot.slane %v976_v56, 4 }
  0xf3   : > { %v942_v59 = vsel %vm941_vm14, %v932_v54, %v940_v57  ;;  %v936_v60 = vpop.permute.xlu0 %935 }
  0xf4   : > { %947 = vst [vmem:[#allocation2 + $0x80] sm:$0xcc] %v942_v59  ;;  %v939_v61 = vrot.slane %v936_v60, 4 }
  0xf5   : > { %v980_v62 = vpop.permute.xlu1 %979 }
  0xf6   : > { %v943_v63 = vsel %vm209_vm0, %v938_v51, %v939_v61  ;;  %v983_v0 = vrot.slane %v980_v62, 4 }
  0xf7   : > { %v944_v1 = vsel %vm941_vm14, %v934_v48, %v943_v63  ;;  %v978_v2 = vpop.permute.xlu0 %977 }
  0xf8   : > { %948 = vst [vmem:[#allocation2 + $0x88] sm:$0xcc] %v944_v1  ;;  %v982_v6 = vrot.slane %v978_v2, 4 }
  0xf9   : > { %v1022_v7 = vpop.permute.xlu1 %1021 }
  0xfa   : > { %v984_v8 = vsel %vm209_vm0, %v981_v4, %v982_v6  ;;  %v986_v9 = vsel %vm209_vm0, %v982_v6, %v983_v0  ;;  %v1026_v10 = vrot.slane %v1022_v7, 4 }
  0xfb   : > { %v985_v12 = vsel %vm365_vm4, %v976_v56, %v984_v8  ;;  %v987_v13 = vsel %vm365_vm4, %v978_v2, %v986_v9  ;;  %v1020_v16 = vpop.permute.xlu0 %1019 }
  0xfc   : > { %990 = vst [vmem:[#allocation2 + $0x90] sm:$0x33] %v985_v12  ;;  %991 = vst [vmem:[#allocation2 + $0x98] sm:$0x33] %v987_v13  ;;  %v1025_v18 = vrot.slane %v1020_v16, 4 }
  0xfd   : > { %v1064_v19 = vpop.permute.xlu1 %1063 }
  0xfe   : > { %v1028_v20 = vsel %vm209_vm0, %v1025_v18, %v1026_v10  ;;  %v1069_v29 = vrot.slane %v1064_v19, 4 }
  0xff   : > { %v1030_v21 = vsel %vm1029_vm1, %v1020_v16, %v1028_v20  ;;  %v1024_v22 = vpop.permute.xlu0 %1023  ;;  %v1659_v20 = vld [vmem:[%s22752_s2 + $0x18] sm:$0xff] }
 0x100   : > { %1035 = vst [vmem:[#allocation2 + $0x90] sm:$0xcc] %v1030_v21  ;;  %v1027_v23 = vrot.slane %v1024_v22, 4 }
 0x101   : > { %v1068_v24 = vpop.permute.xlu1 %1067 }
 0x102   : > { %v1031_v25 = vsel %vm209_vm0, %v1026_v10, %v1027_v23  ;;  %v1071_v26 = vrot.slane %v1068_v24, 4 }
 0x103   : > { %v1032_v27 = vsel %vm1029_vm1, %v1022_v7, %v1031_v25  ;;  %v1066_v28 = vpop.permute.xlu0 %1065  ;;  %v1656_v7 = vld [vmem:[%s22752_s2] sm:$0xff] }
 0x104   : > { %1036 = vst [vmem:[#allocation2 + $0x98] sm:$0xcc] %v1032_v27  ;;  %v1070_v30 = vrot.slane %v1066_v28, 4  ;;  %1674 = vperm.xlu0 %14086, %v1656_v7  }
 0x105   : > { %v1110_v31 = vpop.permute.xlu1 %1109 }
 0x106   : > { %v1072_v32 = vsel %vm209_vm0, %v1069_v29, %v1070_v30  ;;  %v1074_v33 = vsel %vm209_vm0, %v1070_v30, %v1071_v26  ;;  %v1114_v34 = vrot.slane %v1110_v31, 4  ;;  %v1661_v26 = vld [vmem:[%s22752_s2 + $0x28] sm:$0xff] }
 0x107   : > { %v1073_v35 = vsel %vm941_vm14, %v1064_v19, %v1072_v32  ;;  %v1075_v11 = vsel %vm941_vm14, %v1066_v28, %v1074_v33  ;;  %v1108_v36 = vpop.permute.xlu0 %1107 }
 0x108   : > { %1078 = vst [vmem:[#allocation2 + $0xa0] sm:$0x33] %v1073_v35  ;;  %1079 = vst [vmem:[#allocation2 + $0xa8] sm:$0x33] %v1075_v11  ;;  %v1113_v37 = vrot.slane %v1108_v36, 4  ;;  %1689 = vperm.xlu0 %14086, %v1659_v20  }
 0x109   : > { %v1151_v38 = vpop.permute.xlu1 %1150 }
 0x10a   : > { %v1116_v39 = vsel %vm209_vm0, %v1113_v37, %v1114_v34  ;;  %v1156_v46 = vrot.slane %v1151_v38, 4 }
 0x10b   : > { %v1117_v40 = vsel %vm1029_vm1, %v1108_v36, %v1116_v39  ;;  %v1112_v41 = vpop.permute.xlu0 %1111 }
 0x10c   : > { %1122 = vst [vmem:[#allocation2 + $0xa0] sm:$0xcc] %v1117_v40  ;;  %v1115_v42 = vrot.slane %v1112_v41, 4  ;;  %1699 = vperm.xlu0 %14086, %v1661_v26  }
 0x10d   : > { %v1155_v14 = vpop.permute.xlu1 %1154 }
 0x10e   : > { %v1118_v43 = vsel %vm209_vm0, %v1114_v34, %v1115_v42  ;;  %v1158_v44 = vrot.slane %v1155_v14, 4  ;;  %v1663_v34 = vld [vmem:[%s22752_s2 + $0x38] sm:$0xff]  ;;  %v1665_v42 = vld [vmem:[%s22752_s2 + $0x48] sm:$0xff] }
 0x10f   : > { %v1119_v17 = vsel %vm1029_vm1, %v1110_v31, %v1118_v43  ;;  %v1153_v45 = vpop.permute.xlu0 %1152 }
 0x110   : > { %1123 = vst [vmem:[#allocation2 + $0xa8] sm:$0xcc] %v1119_v17  ;;  %v1157_v47 = vrot.slane %v1153_v45, 4  ;;  %1709 = vperm.xlu0 %14086, %v1663_v34  }
 0x111   : > { %v1197_v48 = vpop.permute.xlu1 %1196 }
 0x112   : > { %v1159_v49 = vsel %vm209_vm0, %v1156_v46, %v1157_v47  ;;  %v1161_v50 = vsel %vm209_vm0, %v1157_v47, %v1158_v44  ;;  %v1201_v51 = vrot.slane %v1197_v48, 4  ;;  %v1667_v46 = vld [vmem:[%s22752_s2 + $0x58] sm:$0xff]  ;;  %v1657_v47 = vld [vmem:[%s22752_s2 + $0x8] sm:$0xff] }
 0x113   : > { %v1160_v52 = vsel %vm941_vm14, %v1151_v38, %v1159_v49  ;;  %v1162_v53 = vsel %vm941_vm14, %v1153_v45, %v1161_v50  ;;  %v1195_v54 = vpop.permute.xlu0 %1194  ;;  %1679 = vperm.xlu1 %14087, %v1657_v47  }
 0x114   : > { %1165 = vst [vmem:[#allocation2 + $0xb0] sm:$0x33] %v1160_v52  ;;  %1166 = vst [vmem:[#allocation2 + $0xb8] sm:$0x33] %v1162_v53  ;;  %v1200_v55 = vrot.slane %v1195_v54, 4  ;;  %1719 = vperm.xlu0 %14086, %v1665_v42   ;;  %v1669_v52 = vld [vmem:[%s22752_s2 + $0x68] sm:$0xff] }
 0x115   : > { %v1238_v56 = vpop.permute.xlu1 %1237  ;;  %v1658_v53 = vld [vmem:[%s22752_s2 + $0x10] sm:$0xff] }
 0x116   : > { %v1203_v57 = vsel %vm209_vm0, %v1200_v55, %v1201_v51  ;;  %v1243_v2 = vrot.slane %v1238_v56, 4  ;;  %v1670_v42 = vld [vmem:[%s22752_s2 + $0x70] sm:$0xff] }
 0x117   : > { %v1204_v58 = vsel %vm365_vm4, %v1195_v54, %v1203_v57  ;;  %v1199_v59 = vpop.permute.xlu0 %1198  ;;  %1684 = vperm.xlu1 %14087, %v1658_v53  }
 0x118   : > { %1209 = vst [vmem:[#allocation2 + $0xb0] sm:$0xcc] %v1204_v58  ;;  %v1202_v60 = vrot.slane %v1199_v59, 4  ;;  %1729 = vperm.xlu0 %14086, %v1667_v46  }
 0x119   : > { %v1242_v61 = vpop.permute.xlu1 %1241 }
 0x11a   : > { %v1205_v62 = vsel %vm209_vm0, %v1201_v51, %v1202_v60  ;;  %v1245_v63 = vrot.slane %v1242_v61, 4 }
 0x11b   : > { %v1206_v0 = vsel %vm365_vm4, %v1197_v48, %v1205_v62  ;;  %v1240_v1 = vpop.permute.xlu0 %1239 }
 0x11c   : > { %1210 = vst [vmem:[#allocation2 + $0xb8] sm:$0xcc] %v1206_v0  ;;  %v1244_v4 = vrot.slane %v1240_v1, 4  ;;  %1739 = vperm.xlu0 %14086, %v1669_v52   ;;  %v1660_v0 = vld [vmem:[%s22752_s2 + $0x20] sm:$0xff] }
 0x11d   : > { %v1284_v6 = vpop.permute.xlu1 %1283  ;;  %1694 = vperm.xlu1 %14087, %v1660_v0   ;;  %v14140_v0 = vld [vmem:[#allocation2 + $0x44] ss:$16 sps:$4 sm:$0xff]  }
 0x11e   : > { %v1246_v8 = vsel %vm209_vm0, %v1243_v2, %v1244_v4  ;;  %v1248_v9 = vsel %vm209_vm0, %v1244_v4, %v1245_v63  ;;  %v1288_v10 = vrot.slane %v1284_v6, 4  ;;  %v1671_v63 = vld [vmem:[%s22752_s2 + $0x78] sm:$0xff] }
 0x11f   : > { %v1247_v12 = vsel %vm1029_vm1, %v1238_v56, %v1246_v8  ;;  %v1249_v13 = vsel %vm1029_vm1, %v1240_v1, %v1248_v9  ;;  %v1282_v16 = vpop.permute.xlu0 %1281  ;;  %v1662_v8 = vld [vmem:[%s22752_s2 + $0x30] sm:$0xff] }
 0x120   : > { %1252 = vst [vmem:[#allocation2 + $0xc0] sm:$0x33] %v1247_v12  ;;  %1253 = vst [vmem:[#allocation2 + $0xc8] sm:$0x33] %v1249_v13  ;;  %v1287_v18 = vrot.slane %v1282_v16, 4  ;;  %1749 = vperm.xlu0 %14086, %v1671_v63  }
 0x121   : > { %v1326_v19 = vpop.permute.xlu1 %1325  ;;  %1704 = vperm.xlu1 %14087, %v1662_v8   ;;  %v14122_v52 = vld [vmem:[#allocation2 + $0xa4] ss:$16 sps:$4 sm:$0xff]   ;;  %v14139_v63 = vld [vmem:[#allocation2 + $0x88] ss:$16 sps:$4 sm:$0xff]   ;;  %v14150_v8 = vld [vmem:[#allocation2 + $0x20] ss:$16 sps:$4 sm:$0xff]  }
 0x122   : > { %v1290_v21 = vsel %vm209_vm0, %v1287_v18, %v1288_v10  ;;  %v1331_v31 = vrot.slane %v1326_v19, 4 }
 0x123   : > { %v1292_v22 = vsel %vm1291_vm2, %v1282_v16, %v1290_v21  ;;  %v1286_v23 = vpop.permute.xlu0 %1285 }
 0x124   : > { %1297 = vst [vmem:[#allocation2 + $0xc0] sm:$0xcc] %v1292_v22  ;;  %v1289_v24 = vrot.slane %v1286_v23, 4 }
 0x125   : > { %v1330_v25 = vpop.permute.xlu1 %1329 }
 0x126   : > { %v1293_v27 = vsel %vm209_vm0, %v1288_v10, %v1289_v24  ;;  %v1333_v28 = vrot.slane %v1330_v25, 4 }
 0x127   : > { %v1294_v29 = vsel %vm1291_vm2, %v1284_v6, %v1293_v27  ;;  %v1328_v30 = vpop.permute.xlu0 %1327 }
 0x128   : > { %1298 = vst [vmem:[#allocation2 + $0xc8] sm:$0xcc] %v1294_v29  ;;  %v1332_v32 = vrot.slane %v1328_v30, 4  ;;  %v1666_v29 = vld [vmem:[%s22752_s2 + $0x50] sm:$0xff] }
 0x129   : > { %v1372_v33 = vpop.permute.xlu1 %1371 }
 0x12a   : > { %v1334_v35 = vsel %vm209_vm0, %v1331_v31, %v1332_v32  ;;  %v1336_v11 = vsel %vm209_vm0, %v1332_v32, %v1333_v28  ;;  %v1376_v36 = vrot.slane %v1372_v33, 4 }
 0x12b   : > { %v1335_v37 = vsel %vm365_vm4, %v1326_v19, %v1334_v35  ;;  %v1337_v38 = vsel %vm365_vm4, %v1328_v30, %v1336_v11  ;;  %v1370_v39 = vpop.permute.xlu0 %1369  ;;  %v1664_v19 = vld [vmem:[%s22752_s2 + $0x40] sm:$0xff] }
 0x12c   : > { %1340 = vst [vmem:[#allocation2 + $0xd0] sm:$0x33] %v1335_v37  ;;  %1341 = vst [vmem:[#allocation2 + $0xd8] sm:$0x33] %v1337_v38  ;;  %v1375_v40 = vrot.slane %v1370_v39, 4  ;;  %1714 = vperm.xlu1 %14087, %v1664_v19   ;;  %v1668_v35 = vld [vmem:[%s22752_s2 + $0x60] sm:$0xff] }
 0x12d   : > { %v1414_v41 = vpop.permute.xlu1 %1413 }
 0x12e   : > { %v1378_v14 = vsel %vm209_vm0, %v1375_v40, %v1376_v36  ;;  %v1419_v54 = vrot.slane %v1414_v41, 4 }
 0x12f   : > { %v1380_v43 = vsel %vm1379_vm3, %v1370_v39, %v1378_v14  ;;  %v1374_v44 = vpop.permute.xlu0 %1373 }
 0x130   : > { %1385 = vst [vmem:[#allocation2 + $0xd0] sm:$0xcc] %v1380_v43  ;;  %v1377_v17 = vrot.slane %v1374_v44, 4  ;;  %1724 = vperm.xlu1 %14087, %v1666_v29  }
 0x131   : > { %v1418_v45 = vpop.permute.xlu1 %1417 }
 0x132   : > { %v1381_v48 = vsel %vm209_vm0, %v1376_v36, %v1377_v17  ;;  %v1421_v49 = vrot.slane %v1418_v45, 4 }
 0x133   : > { %v1382_v50 = vsel %vm1379_vm3, %v1372_v33, %v1381_v48  ;;  %v1416_v51 = vpop.permute.xlu0 %1415 }
 0x134   : > { %1386 = vst [vmem:[#allocation2 + $0xd8] sm:$0xcc] %v1382_v50  ;;  %v1420_v55 = vrot.slane %v1416_v51, 4  ;;  %1734 = vperm.xlu1 %14087, %v1668_v35   ;;  %v14175_v35 = vld [vmem:[%s22751_s1 + $0x40] ss:$8 sps:$4 sm:$0xff]  }
 0x135   : > { %v1460_v56 = vpop.permute.xlu1 %1459 }
 0x136   : > { %v1422_v57 = vsel %vm209_vm0, %v1419_v54, %v1420_v55  ;;  %v1424_v58 = vsel %vm209_vm0, %v1420_v55, %v1421_v49  ;;  %v1464_v59 = vrot.slane %v1460_v56, 4  ;;  %v14126_v54 = vld [vmem:[#allocation2 + $0xa0] ss:$16 sps:$4 sm:$0xff]  }
 0x137   : > { %v1423_v60 = vsel %vm1291_vm2, %v1414_v41, %v1422_v57  ;;  %v1425_v61 = vsel %vm1291_vm2, %v1416_v51, %v1424_v58  ;;  %v1458_v62 = vpop.permute.xlu0 %1457  ;;  %v14116_v48 = vld [vmem:[#allocation2 + $0xc4] ss:$16 sps:$4 sm:$0xff]   ;;  %v14120_v51 = vld [vmem:[#allocation2 + $0xc0] ss:$16 sps:$4 sm:$0xff]   ;;  %v14130_v57 = vld [vmem:[#allocation2 + $0xac] ss:$16 sps:$4 sm:$0xff]  }
 0x138   : > { %1428 = vst [vmem:[#allocation2 + $0xe0] sm:$0x33] %v1423_v60  ;;  %1429 = vst [vmem:[#allocation2 + $0xe8] sm:$0x33] %v1425_v61  ;;  %v1463_v1 = vrot.slane %v1458_v62, 4  ;;  %1744 = vperm.xlu1 %14087, %v1670_v42  }
 0x139   : > { %v1501_v2 = vpop.permute.xlu1 %1500  ;;  %v14132_v58 = vld [vmem:[#allocation2 + $0x80] ss:$16 sps:$4 sm:$0xff]   ;;  %v14134_v60 = vld [vmem:[#allocation2 + $0x64] ss:$16 sps:$4 sm:$0xff]   ;;  %v14136_v61 = vld [vmem:[#allocation2 + $0x8c] ss:$16 sps:$4 sm:$0xff]  }
 0x13a   : > { %v1466_v4 = vsel %vm209_vm0, %v1463_v1, %v1464_v59  ;;  %v1506_v20 = vrot.slane %v1501_v2, 4  ;;  %v14142_v1 = vld [vmem:[#allocation2 + $0x6c] ss:$16 sps:$4 sm:$0xff]  }
 0x13b   : > { %v1467_v6 = vsel %vm1379_vm3, %v1458_v62, %v1466_v4  ;;  %v1462_v7 = vpop.permute.xlu0 %1461  ;;  %v14124_v53 = vld [vmem:[#allocation2 + $0xcc] ss:$16 sps:$4 sm:$0xff]   ;;  %v14127_v55 = vld [vmem:[#allocation2 + $0xc8] ss:$16 sps:$4 sm:$0xff]   ;;  %v14138_v62 = vld [vmem:[#allocation2 + $0x60] ss:$16 sps:$4 sm:$0xff]  }
 0x13c   : > { %1472 = vst [vmem:[#allocation2 + $0xe0] sm:$0xcc] %v1467_v6  ;;  %v1465_v9 = vrot.slane %v1462_v7, 4  ;;  %v14145_v4 = vld [vmem:[#allocation2 + $0x68] ss:$16 sps:$4 sm:$0xff]  }
 0x13d   : > { %v1505_v10 = vpop.permute.xlu1 %1504  ;;  %v14146_v6 = vld [vmem:[#allocation2 + $0x24] ss:$16 sps:$4 sm:$0xff]   ;;  %v14148_v7 = vld [vmem:[#allocation2 + $0x4c] ss:$16 sps:$4 sm:$0xff]  }
 0x13e   : > { %v1468_v12 = vsel %vm209_vm0, %v1464_v59, %v1465_v9  ;;  %v1508_v13 = vrot.slane %v1505_v10, 4  ;;  %v14133_v59 = vld [vmem:[#allocation2 + $0xa8] ss:$16 sps:$4 sm:$0xff]  }
 0x13f   : > { %v1469_v16 = vsel %vm1379_vm3, %v1460_v56, %v1468_v12  ;;  %v1503_v18 = vpop.permute.xlu0 %1502  ;;  %v14128_v56 = vld [vmem:[#allocation2 + $0x84] ss:$16 sps:$4 sm:$0xff]   ;;  %v14151_v9 = vld [vmem:[#allocation2 + $0x48] ss:$16 sps:$4 sm:$0xff]  }
 0x140   : > { %1473 = vst [vmem:[#allocation2 + $0xe8] sm:$0xcc] %v1469_v16  ;;  %v1507_v21 = vrot.slane %v1503_v18, 4  ;;  %v1622_v12 = vld [vmem:[#allocation2 + $0x10] sm:$0xff]  ;;  %v14155_v16 = vld [vmem:[#allocation2 + $0x2c] ss:$16 sps:$4 sm:$0xff]  }
 0x141   : > { %v1547_v22 = vpop.permute.xlu1 %1546 }
 0x142   : > { %v1509_v23 = vsel %vm209_vm0, %v1506_v20, %v1507_v21  ;;  %v1511_v24 = vsel %vm209_vm0, %v1507_v21, %v1508_v13  ;;  %v1551_v25 = vrot.slane %v1547_v22, 4  ;;  %v14153_v13 = vld [vmem:[#allocation2 + $0x4] ss:$16 sps:$4 sm:$0xff]   ;;  %v14157_v21 = vld [vmem:[#allocation2 + $0x28] ss:$16 sps:$4 sm:$0xff]  }
 0x143   : > { %v1510_v26 = vsel %vm1291_vm2, %v1501_v2, %v1509_v23  ;;  %v1512_v27 = vsel %vm1291_vm2, %v1503_v18, %v1511_v24  ;;  %v1545_v28 = vpop.permute.xlu0 %1544  ;;  %v14144_v2 = vld [vmem:[#allocation2 + $0x40] ss:$16 sps:$4 sm:$0xff]  }
 0x144   : > { %1515 = vst [vmem:[#allocation2 + $0xf0] sm:$0x33] %v1510_v26  ;;  %1516 = vst [vmem:[#allocation2 + $0xf8] sm:$0x33] %v1512_v27  ;;  %v1550_v30 = vrot.slane %v1545_v28, 4  ;;  %v1620_v18 = vld [vmem:[#allocation2] sm:$0xff] }
 0x145   : > { %v1588_v31 = vpop.permute.xlu1 %1587  ;;  %v13962_v20 = vcombine.low %v1620_v18, %v1622_v12  ;;  %v14161_v27 = vld [vmem:[%s22751_s1] ss:$8 sps:$4 sm:$0xff]  }
 0x146   : > { %v1553_v32 = vsel %vm209_vm0, %v1550_v30, %v1551_v25  ;;  %v1593_v38 = vrot.slane %v1588_v31, 4  ;;  %v14166_v30 = vld [vmem:[%s22751_s1 + $0x10] ss:$8 sps:$4 sm:$0xff]  }
 0x147   : > { %v1554_v33 = vsel %vm365_vm4, %v1545_v28, %v1553_v32  ;;  %v1549_v34 = vpop.permute.xlu0 %1548  ;;  %v14164_v28 = vld [vmem:[%s22751_s1 + $0x14] ss:$8 sps:$4 sm:$0xff]  }
 0x148   : > { %1559 = vst [vmem:[#allocation2 + $0xf0] sm:$0xcc] %v1554_v33  ;;  %v1552_v11 = vrot.slane %v1549_v34, 4  ;;  %v14170_v32 = vld [vmem:[%s22751_s1 + $0x34] ss:$8 sps:$4 sm:$0xff]  }
 0x149   : > { %v1592_v36 = vpop.permute.xlu1 %1591  ;;  %v14172_v33 = vld [vmem:[%s22751_s1 + $0x30] ss:$8 sps:$4 sm:$0xff]   ;;  %v14173_v34 = vld [vmem:[%s22751_s1 + $0x44] ss:$8 sps:$4 sm:$0xff]  }
 0x14a   : > { %v1555_v37 = vsel %vm209_vm0, %v1551_v25, %v1552_v11  ;;  %v1595_v39 = vrot.slane %v1592_v36, 4  ;;  %v14160_v25 = vld [vmem:[#allocation2 + $0x8] ss:$16 sps:$4 sm:$0xff]   ;;  %v14176_v11 = vld [vmem:[%s22751_s1 + $0x54] ss:$8 sps:$4 sm:$0xff]  }
 0x14b   : > { %v1556_v40 = vsel %vm365_vm4, %v1547_v22, %v1555_v37  ;;  %v1590_v41 = vpop.permute.xlu0 %1589  ;;  %v14158_v22 = vld [vmem:[#allocation2 + $0xc] ss:$16 sps:$4 sm:$0xff]   ;;  %v14178_v36 = vld [vmem:[%s22751_s1 + $0x50] ss:$8 sps:$4 sm:$0xff]  }
 0x14c   : > { %1560 = vst [vmem:[#allocation2 + $0xf8] sm:$0xcc] %v1556_v40  ;;  %v1594_v14 = vrot.slane %v1590_v41, 4  ;;  %v14179_v37 = vld [vmem:[%s22751_s1 + $0x64] ss:$8 sps:$4 sm:$0xff]  }
 0x14d   : > { %v14184_v40 = vld [vmem:[%s22751_s1 + $0x70] ss:$8 sps:$4 sm:$0xff]  }
 0x14e   : > { %v1596_v43 = vsel %vm209_vm0, %v1593_v38, %v1594_v14  ;;  %v1598_v44 = vsel %vm209_vm0, %v1594_v14, %v1595_v39  ;;  %v14181_v38 = vld [vmem:[%s22751_s1 + $0x60] ss:$8 sps:$4 sm:$0xff]   ;;  %v14182_v39 = vld [vmem:[%s22751_s1 + $0x74] ss:$8 sps:$4 sm:$0xff]   ;;  %vm13616_vm0 = vcmask 392192  }
 0x14f   : > { %v14113_v17 = vld [vmem:[#allocation2 + $0xe4] ss:$16 sps:$4 sm:$0xff]   ;;  %v14115_v45 = vld [vmem:[#allocation2 + $0xe0] ss:$16 sps:$4 sm:$0xff]   ;;  %v1597_v46 = vsel %vm1379_vm3, %v1588_v31, %v1596_v43  ;;  %v1599_v47 = vsel %vm1379_vm3, %v1590_v41, %v1598_v44 }
 0x150   : > { %1602 = vst [vmem:[#allocation2 + $0x100] sm:$0x33] %v1597_v46  ;;  %1603 = vst [vmem:[#allocation2 + $0x108] sm:$0x33] %v1599_v47  ;;  %2029 = vmatprep.subr.bf16.mxu0 %v14113_v17  ;;  %v14167_v31 = vld [vmem:[%s22751_s1 + $0x24] ss:$8 sps:$4 sm:$0xff]  }
 0x151   : > { %2030 = vmatpush1.bf16.msra.mxu0 %v14115_v45 }
 0x152   : > { %2031 = vmatprep.subr.bf16.mxu0 %v14116_v48 }
 0x153   : > { %v14118_v49 = vld [vmem:[#allocation2 + $0xec] ss:$16 sps:$4 sm:$0xff]   ;;  %v14121_v50 = vld [vmem:[#allocation2 + $0xe8] ss:$16 sps:$4 sm:$0xff]  }
 0x154   : > { %2142 = vmatprep.subr.bf16.mxu1 %v14118_v49 }
 0x155   : > { %2032 = vmatpush1.bf16.msra.mxu0 %v14120_v51  ;;  %2143 = vmatpush1.bf16.msra.mxu1 %v14121_v50 }
 0x156   : > { %2033 = vmatprep.subr.bf16.mxu0 %v14122_v52  ;;  %2144 = vmatprep.subr.bf16.mxu1 %v14124_v53 }
 0x157   : > { %v1652_v10 = vld [vmem:[#allocation2 + $0x100] sm:$0xff]  ;;  %v1653_v23 = vld [vmem:[#allocation2 + $0x108] sm:$0xff] }
 0x158   : > { %v13995_v19 = vcombine.high %v1652_v10, %v14265_v15  ;;  %v13994_v24 = vcombine.low %v1652_v10, %v14265_v15  ;;  %v13997_v26 = vcombine.high %v1653_v23, %v14265_v15  ;;  %v13996_v29 = vcombine.low %v1653_v23, %v14265_v15  ;;  %v14169_v15 = vld [vmem:[%s22751_s1 + $0x20] ss:$8 sps:$4 sm:$0xff]  }
 0x159   : > { %2034 = vmatpush1.bf16.msra.mxu0 %v14126_v54  ;;  %2145 = vmatpush1.bf16.msra.mxu1 %v14127_v55 }
 0x15a   : > { %2035 = vmatprep.subr.bf16.mxu0 %v14128_v56  ;;  %2146 = vmatprep.subr.bf16.mxu1 %v14130_v57 }
 0x15d   : > { %2036 = vmatpush1.bf16.msra.mxu0 %v14132_v58  ;;  %2147 = vmatpush1.bf16.msra.mxu1 %v14133_v59 }
 0x15e   : > { %2037 = vmatprep.subr.bf16.mxu0 %v14134_v60  ;;  %2148 = vmatprep.subr.bf16.mxu1 %v14136_v61 }
 0x161   : > { %2038 = vmatpush1.bf16.msra.mxu0 %v14138_v62  ;;  %2149 = vmatpush1.bf16.msra.mxu1 %v14139_v63 }
 0x162   : > { %2039 = vmatprep.subr.bf16.mxu0 %v14140_v0  ;;  %2150 = vmatprep.subr.bf16.mxu1 %v14142_v1 }
 0x165   : > { %2040 = vmatpush1.bf16.msra.mxu0 %v14144_v2  ;;  %2151 = vmatpush1.bf16.msra.mxu1 %v14145_v4 }
 0x166   : > { %2041 = vmatprep.subr.bf16.mxu0 %v14146_v6  ;;  %2152 = vmatprep.subr.bf16.mxu1 %v14148_v7 }
 0x169   : > { %2042 = vmatpush1.bf16.msra.mxu0 %v14150_v8  ;;  %2153 = vmatpush1.bf16.msra.mxu1 %v14151_v9 }
 0x16a   : > { %2043 = vmatprep.subr.bf16.mxu0 %v14153_v13  ;;  %2154 = vmatprep.subr.bf16.mxu1 %v14155_v16 }
 0x16d   : > { %2044 = vmatpush1.bf16.msra.mxu0 %v13962_v20  ;;  %2155 = vmatpush1.bf16.msra.mxu1 %v14157_v21 }
 0x16e   : > { %2059 = vmatprep.subr.bf16.mxu0 %v13995_v19  ;;  %2156 = vmatprep.subr.bf16.mxu1 %v14158_v22 }
 0x171   : > { %2060 = vmatpush2.bf16.msra.mxu0 %v13994_v24  ;;  %2157 = vmatpush1.bf16.msra.mxu1 %v14160_v25 }
 0x172   : > { %2172 = vmatprep.subr.bf16.mxu1 %v13997_v26 }
 0x174   : > { %2062 = vmatmul.mubr.bf16.vlgmr.msra.gmra.mxu0 %v14161_v27 }
 0x175   : > { %2173 = vmatpush2.bf16.msra.mxu1 %v13996_v29  ;;  %13999 = vmatprep.mubr.msk.bf16.mxu0 %vm2004_vm15, %v14164_v28 }
 0x178   : > { %2175 = vmatmul.mubr.bf16.vlgmr.msra.gmra.mxu1 %v14161_v27 }
 0x179   : > { %14007 = vmatprep.mubr.msk.bf16.mxu1 %vm2004_vm15, %v14164_v28 }
 0x17c   : > { %2072 = vmatmul.mubr.bf16.gmra.mxu0 %v14166_v30 }
 0x17d   : > { %14000 = vmatprep.mubr.msk.bf16.mxu0 %vm2004_vm15, %v14167_v31 }
 0x17f   : > { %v14776_v41 = vpop.permute.xlu0 %1674 }
 0x180   : > { %2185 = vmatmul.mubr.bf16.gmra.mxu1 %v14166_v30 }
 0x181   : > { %14008 = vmatprep.mubr.msk.bf16.mxu1 %vm2004_vm15, %v14167_v31 }
 0x183   : > { %v14831_v2 = vpop.permute.xlu0 %1689 }
 0x184   : > { %2082 = vmatmul.mubr.bf16.gmra.mxu0 %v14169_v15 }
 0x185   : > { %14001 = vmatprep.mubr.msk.bf16.mxu0 %vm2004_vm15, %v14170_v32 }
 0x187   : > { %v14885_v30 = vpop.permute.xlu0 %1699 }
 0x188   : > { %2195 = vmatmul.mubr.bf16.gmra.mxu1 %v14169_v15 }
 0x189   : > { %14009 = vmatprep.mubr.msk.bf16.mxu1 %vm2004_vm15, %v14170_v32 }
 0x18c   : > { %2092 = vmatmul.mubr.bf16.gmra.mxu0 %v14172_v33 }
 0x18d   : > { %14002 = vmatprep.mubr.msk.bf16.mxu0 %vm2004_vm15, %v14173_v34 }
 0x18e   : > { %v14781_v17 = vpop.permute.xlu1 %1679 }
 0x190   : > { %2205 = vmatmul.mubr.bf16.gmra.mxu1 %v14172_v33 }
 0x191   : > { %14010 = vmatprep.mubr.msk.bf16.mxu1 %vm2004_vm15, %v14173_v34 }
 0x192   : > { %v14822_v62 = vpop.permute.xlu1 %1684 }
 0x194   : > { %2102 = vmatmul.mubr.bf16.gmra.mxu0 %v14175_v35 }
 0x195   : > { %14003 = vmatprep.mubr.msk.bf16.mxu0 %vm2004_vm15, %v14176_v11 }
 0x198   : > { %2215 = vmatmul.mubr.bf16.gmra.mxu1 %v14175_v35  ;;  %v14876_v26 = vpop.permute.xlu1 %1694 }
 0x199   : > { %14011 = vmatprep.mubr.msk.bf16.mxu1 %vm2004_vm15, %v14176_v11 }
 0x19c   : > { %2112 = vmatmul.mubr.bf16.gmra.mxu0 %v14178_v36 }
 0x19d   : > { %14004 = vmatprep.mubr.msk.bf16.mxu0 %vm2004_vm15, %v14179_v37 }
 0x1a0   : > { %2225 = vmatmul.mubr.bf16.gmra.mxu1 %v14178_v36 }
 0x1a1   : > { %14012 = vmatprep.mubr.msk.bf16.mxu1 %vm2004_vm15, %v14179_v37 }
 0x1a4   : > { %2122 = vmatmul.mubr.bf16.gmra.mxu0 %v14181_v38 }
 0x1a5   : > { %14005 = vmatprep.mubr.msk.bf16.mxu0 %vm2004_vm15, %v14182_v39 }
 0x1a8   : > { %2235 = vmatmul.mubr.bf16.gmra.mxu1 %v14181_v38 }
 0x1a9   : > { %14013 = vmatprep.mubr.msk.bf16.mxu1 %vm2004_vm15, %v14182_v39 }
 0x1ac   : > { %2132 = vmatmul.mubr.bf16.gmra.mxu0 %v14184_v40 }
 0x1b0   : > { %2245 = vmatmul.mubr.bf16.gmra.mxu1 %v14184_v40 }
 0x234   : > { %v2063_v42 = vpop.f32.mrf.mxu0 }
 0x235   : > { %v2064_v14 = vadd.f32 %v2063_v42, %v14776_v41 }
 0x236   : > { %v2065_v43 = vpop.f32.mrf.mxu0 }
 0x237   : > { %v14779_v44 = vmax.f32 %v2064_v14, 0.0  ;;  %v2066_v52 = vadd.f32 %v2065_v43, %v14776_v41 }
 0x238   : > { %v2067_v45 = vpop.f32.mrf.mxu0  ;;  %v2176_v47 = vpop.f32.mrf.mxu1 }
 0x239   : > { %v2068_v46 = vadd.f32 %v2067_v45, %v14781_v17  ;;  %2335 = vrot.lane.b32.xlu1 %v14779_v44, %s14251_s5  ;;  %v2177_v50 = vadd.f32 %v2176_v47, %v14776_v41  ;;  %v14807_v56 = vmax.f32 %v2066_v52, 0.0  ;;  %v14930_v47 = vpop.permute.xlu1 %1704 }
 0x23a   : > { %v14792_v49 = vpop.f32.mrf.mxu1  ;;  %v2069_v55 = vpop.f32.mrf.mxu0 }
 0x23b   : > { %v14786_v48 = vmax.f32 %v2068_v46, 0.0  ;;  %v14800_v53 = vmax.f32 %v2177_v50, 0.0  ;;  %v2070_v57 = vadd.f32 %v2069_v55, %v14781_v17 }
 0x23c   : > { %v2180_v51 = vpop.f32.mrf.mxu1  ;;  %v2073_v59 = vpop.f32.mrf.mxu0 }
 0x23d   : > { %23493 = vst [vmem:[#allocation6_spill] sm:$0xff] %v14786_v48  ;;  %2337 = vrot.lane.b32.xlu0 %v14786_v48, %s14251_s5  ;;  %2383 = vrot.lane.b32.xlu1 %v14779_v44, %s14254_s8  ;;  %v2181_v54 = vadd.f32 %v2180_v51, %v14781_v17  ;;  %v14816_v60 = vmax.f32 %v2070_v57, 0.0  ;;  %v2074_v63 = vadd.f32 %v2073_v59, %v14822_v62 }
 0x23e   : > { %v2075_v61 = vpop.f32.mrf.mxu0  ;;  %v14825_v0 = vpop.f32.mrf.mxu1 }
 0x23f   : > { %v14810_v58 = vmax.f32 %v2181_v54, 0.0  ;;  %23494 = vst [vmem:[#allocation7_spill] sm:$0xff] %v14816_v60  ;;  %v14833_v4 = vmax.f32 %v2074_v63, 0.0  ;;  %v2076_v13 = vadd.f32 %v2075_v61, %v14822_v62  ;;  %v14939_v54 = vpop.permute.xlu0 %1709 }
 0x240   : > { %v2077_v1 = vpop.f32.mrf.mxu0  ;;  %v2186_v7 = vpop.f32.mrf.mxu1 }
 0x241   : > { %2385 = vrot.lane.b32.xlu0 %v14786_v48, %s14254_s8  ;;  %2431 = vrot.lane.b32.xlu1 %v14779_v44, %s14257_s11  ;;  %23495 = vst [vmem:[#allocation8_spill] sm:$0xff] %v14833_v4  ;;  %v2078_v6 = vadd.f32 %v2077_v1, %v14831_v2  ;;  %v2187_v10 = vadd.f32 %v2186_v7, %v14822_v62  ;;  %v14861_v20 = vmax.f32 %v2076_v13, 0.0  ;;  %v14957_v7 = vpop.permute.xlu1 %1714 }
 0x242   : > { %v14842_v9 = vpop.f32.mrf.mxu1  ;;  %v2079_v19 = vpop.f32.mrf.mxu0 }
 0x243   : > { %v14840_v8 = vmax.f32 %v2078_v6, 0.0  ;;  %v14854_v16 = vmax.f32 %v2187_v10, 0.0  ;;  %23497 = vst [vmem:[#allocation10_spill] sm:$0xff] %v14861_v20  ;;  %v2080_v21 = vadd.f32 %v2079_v19, %v14831_v2  ;;  %v14967_v19 = vpop.permute.xlu0 %1719 }
 0x244   : > { %v2190_v12 = vpop.f32.mrf.mxu1  ;;  %v2083_v23 = vpop.f32.mrf.mxu0 }
 0x245   : > { %2433 = vrot.lane.b32.xlu0 %v14786_v48, %s14257_s11  ;;  %2655 = vrot.lane.b32.xlu1 %v14800_v53, %s14251_s5  ;;  %23496 = vst [vmem:[#allocation9_spill] sm:$0xff] %v14840_v8  ;;  %v2191_v18 = vadd.f32 %v2190_v12, %v14831_v2  ;;  %v14870_v24 = vmax.f32 %v2080_v21, 0.0  ;;  %v2084_v27 = vadd.f32 %v2083_v23, %v14876_v26  ;;  %v14973_v21 = vpop.permute.xlu1 %1724 }
 0x246   : > { %v2085_v25 = vpop.f32.mrf.mxu0  ;;  %v14879_v28 = vpop.f32.mrf.mxu1 }
 0x247   : > { %v14864_v22 = vmax.f32 %v2191_v18, 0.0  ;;  %23498 = vst [vmem:[#allocation11_spill] sm:$0xff] %v14870_v24  ;;  %v14887_v31 = vmax.f32 %v2084_v27, 0.0  ;;  %v2086_v36 = vadd.f32 %v2085_v25, %v14876_v26 }
 0x248   : > { %v2087_v29 = vpop.f32.mrf.mxu0  ;;  %v2196_v32 = vpop.f32.mrf.mxu1 }
 0x249   : > { %2657 = vrot.lane.b32.xlu0 %v14810_v58, %s14251_s5  ;;  %2495 = vrot.lane.b32.xlu1 %v14807_v56, %s14251_s5  ;;  %23499 = vst [vmem:[#allocation12_spill] sm:$0xff] %v14887_v31  ;;  %v2088_v15 = vadd.f32 %v2087_v29, %v14885_v30  ;;  %v2197_v35 = vadd.f32 %v2196_v32, %v14876_v26  ;;  %v14915_v40 = vmax.f32 %v2086_v36, 0.0 }
 0x24a   : > { %v14896_v34 = vpop.f32.mrf.mxu1  ;;  %v2089_v39 = vpop.f32.mrf.mxu0 }
 0x24b   : > { %v14894_v33 = vmax.f32 %v2088_v15, 0.0  ;;  %v14908_v37 = vmax.f32 %v2197_v35, 0.0  ;;  %23502 = vst [vmem:[#allocation15_spill] sm:$0xff] %v14915_v40  ;;  %v2090_v42 = vadd.f32 %v2089_v39, %v14885_v30  ;;  %v14984_v15 = vpop.permute.xlu0 %1729 }
 0x24c   : > { %v2200_v11 = vpop.f32.mrf.mxu1  ;;  %v2093_v43 = vpop.f32.mrf.mxu0 }
 0x24d   : > { %2497 = vrot.lane.b32.xlu0 %v14816_v60, %s14251_s5  ;;  %2543 = vrot.lane.b32.xlu1 %v14807_v56, %s14254_s8  ;;  %23500 = vst [vmem:[#allocation13_spill] sm:$0xff] %v14894_v33  ;;  %23501 = vst [vmem:[#allocation14_spill] sm:$0xff] %v14908_v37  ;;  %v2201_v38 = vadd.f32 %v2200_v11, %v14885_v30  ;;  %v14924_v45 = vmax.f32 %v2090_v42, 0.0  ;;  %v2094_v50 = vadd.f32 %v2093_v43, %v14930_v47  ;;  %v14988_v11 = vpop.permute.xlu1 %1734 }
 0x24e   : > { %v2095_v46 = vpop.f32.mrf.mxu0  ;;  %v14933_v51 = vpop.f32.mrf.mxu1 }
 0x24f   : > { %v14918_v14 = vmax.f32 %v2201_v38, 0.0  ;;  %23504 = vst [vmem:[#allocation17_spill] sm:$0xff] %v14924_v45  ;;  %v14941_v55 = vmax.f32 %v2094_v50, 0.0  ;;  %v2096_v10 = vadd.f32 %v2095_v46, %v14930_v47  ;;  %v14997_v42 = vpop.permute.xlu0 %1739 }
 0x250   : > { %v2097_v52 = vpop.f32.mrf.mxu0  ;;  %v2206_v59 = vpop.f32.mrf.mxu1 }
 0x251   : > { %2545 = vrot.lane.b32.xlu0 %v14816_v60, %s14254_s8  ;;  %2591 = vrot.lane.b32.xlu1 %v14807_v56, %s14257_s11  ;;  %23503 = vst [vmem:[#allocation16_spill] sm:$0xff] %v14918_v14  ;;  %23505 = vst [vmem:[#allocation18_spill] sm:$0xff] %v14941_v55  ;;  %v2098_v57 = vadd.f32 %v2097_v52, %v14939_v54  ;;  %v2207_v1 = vadd.f32 %v2206_v59, %v14930_v47  ;;  %v14975_v23 = vmax.f32 %v2096_v10, 0.0  ;;  %v15003_v43 = vpop.permute.xlu1 %1744 }
 0x252   : > { %v14950_v63 = vpop.f32.mrf.mxu1  ;;  %v2099_v18 = vpop.f32.mrf.mxu0 }
 0x253   : > { %v14948_v61 = vmax.f32 %v2098_v57, 0.0  ;;  %v14964_v12 = vmax.f32 %v2207_v1, 0.0  ;;  %23508 = vst [vmem:[#allocation21_spill] sm:$0xff] %v14975_v23  ;;  %v2100_v25 = vadd.f32 %v2099_v18, %v14939_v54  ;;  %v15012_v57 = vpop.permute.xlu0 %1749 }
 0x254   : > { %v2210_v6 = vpop.f32.mrf.mxu1  ;;  %v2103_v29 = vpop.f32.mrf.mxu0 }
 0x255   : > { %2593 = vrot.lane.b32.xlu0 %v14816_v60, %s14257_s11  ;;  %2339 = vrot.lane.b32.xlu1 %v14833_v4, %s14251_s5  ;;  %23506 = vst [vmem:[#allocation19_spill] sm:$0xff] %v14948_v61  ;;  %23507 = vst [vmem:[#allocation20_spill] sm:$0xff] %v14964_v12  ;;  %v2211_v13 = vadd.f32 %v2210_v6, %v14939_v54  ;;  %v14986_v32 = vmax.f32 %v2100_v25, 0.0  ;;  %v2104_v36 = vadd.f32 %v2103_v29, %v14957_v7 }
 0x256   : > { %v2105_v35 = vpop.f32.mrf.mxu0  ;;  %v14995_v38 = vpop.f32.mrf.mxu1 }
 0x257   : > { %v14978_v27 = vmax.f32 %v2211_v13, 0.0  ;;  %23510 = vst [vmem:[#allocation23_spill] sm:$0xff] %v14986_v32  ;;  %v15005_v46 = vmax.f32 %v2104_v36, 0.0  ;;  %v2106_v29 = vadd.f32 %v2105_v35, %v14957_v7 }
 0x258   : > { %v2107_v39 = vpop.f32.mrf.mxu0  ;;  %v2216_v52 = vpop.f32.mrf.mxu1 }
 0x259   : > { %2387 = vrot.lane.b32.xlu1 %v14833_v4, %s14254_s8  ;;  %2341 = vrot.lane.b32.xlu0 %v14840_v8, %s14251_s5  ;;  %23509 = vst [vmem:[#allocation22_spill] sm:$0xff] %v14978_v27  ;;  %23511 = vst [vmem:[#allocation24_spill] sm:$0xff] %v15005_v46  ;;  %v2108_v50 = vadd.f32 %v2107_v39, %v14967_v19  ;;  %v2217_v10 = vadd.f32 %v2216_v52, %v14957_v7 }
 0x25a   : > { %v15018_v6 = vpop.f32.mrf.mxu1 }
 0x25b   : > { %v15014_v59 = vmax.f32 %v2108_v50, 0.0  ;;  %v15034_v36 = vmax.f32 %v2217_v10, 0.0 }
 0x25c   : > { %v2220_v25 = vpop.f32.mrf.mxu1 }
 0x25d   : > { %2435 = vrot.lane.b32.xlu1 %v14833_v4, %s14257_s11  ;;  %2389 = vrot.lane.b32.xlu0 %v14840_v8, %s14254_s8  ;;  %23512 = vst [vmem:[#allocation25_spill] sm:$0xff] %v15014_v59  ;;  %23514 = vst [vmem:[#allocation27_spill] sm:$0xff] %v15034_v36  ;;  %v2221_v39 = vadd.f32 %v2220_v25, %v14967_v19 }
 0x261   : > { %2659 = vrot.lane.b32.xlu1 %v14854_v16, %s14251_s5  ;;  %2437 = vrot.lane.b32.xlu0 %v14840_v8, %s14257_s11 }
 0x265   : > { %2499 = vrot.lane.b32.xlu1 %v14861_v20, %s14251_s5  ;;  %2661 = vrot.lane.b32.xlu0 %v14864_v22, %s14251_s5 }
 0x269   : > { %2547 = vrot.lane.b32.xlu1 %v14861_v20, %s14254_s8  ;;  %2501 = vrot.lane.b32.xlu0 %v14870_v24, %s14251_s5 }
 0x26d   : > { %2595 = vrot.lane.b32.xlu1 %v14861_v20, %s14257_s11  ;;  %2549 = vrot.lane.b32.xlu0 %v14870_v24, %s14254_s8 }
 0x271   : > { %2343 = vrot.lane.b32.xlu1 %v14887_v31, %s14251_s5  ;;  %2597 = vrot.lane.b32.xlu0 %v14870_v24, %s14257_s11 }
 0x275   : > { %2391 = vrot.lane.b32.xlu1 %v14887_v31, %s14254_s8  ;;  %2345 = vrot.lane.b32.xlu0 %v14894_v33, %s14251_s5 }
 0x279   : > { %2439 = vrot.lane.b32.xlu1 %v14887_v31, %s14257_s11  ;;  %2393 = vrot.lane.b32.xlu0 %v14894_v33, %s14254_s8 }
 0x27d   : > { %2663 = vrot.lane.b32.xlu1 %v14908_v37, %s14251_s5  ;;  %2441 = vrot.lane.b32.xlu0 %v14894_v33, %s14257_s11 }
 0x281   : > { %2503 = vrot.lane.b32.xlu1 %v14915_v40, %s14251_s5  ;;  %2665 = vrot.lane.b32.xlu0 %v14918_v14, %s14251_s5 }
 0x285   : > { %2551 = vrot.lane.b32.xlu1 %v14915_v40, %s14254_s8  ;;  %2505 = vrot.lane.b32.xlu0 %v14924_v45, %s14251_s5 }
 0x289   : > { %2599 = vrot.lane.b32.xlu1 %v14915_v40, %s14257_s11  ;;  %2553 = vrot.lane.b32.xlu0 %v14924_v45, %s14254_s8 }
 0x28d   : > { %2347 = vrot.lane.b32.xlu1 %v14941_v55, %s14251_s5  ;;  %2601 = vrot.lane.b32.xlu0 %v14924_v45, %s14257_s11 }
 0x291   : > { %2395 = vrot.lane.b32.xlu1 %v14941_v55, %s14254_s8  ;;  %2349 = vrot.lane.b32.xlu0 %v14948_v61, %s14251_s5 }
 0x295   : > { %2443 = vrot.lane.b32.xlu1 %v14941_v55, %s14257_s11  ;;  %2397 = vrot.lane.b32.xlu0 %v14948_v61, %s14254_s8 }
 0x299   : > { %2667 = vrot.lane.b32.xlu1 %v14964_v12, %s14251_s5  ;;  %2445 = vrot.lane.b32.xlu0 %v14948_v61, %s14257_s11 }
 0x29d   : > { %2507 = vrot.lane.b32.xlu1 %v14975_v23, %s14251_s5  ;;  %2669 = vrot.lane.b32.xlu0 %v14978_v27, %s14251_s5 }
 0x2a1   : > { %2555 = vrot.lane.b32.xlu1 %v14975_v23, %s14254_s8  ;;  %2509 = vrot.lane.b32.xlu0 %v14986_v32, %s14251_s5 }
 0x2a5   : > { %2603 = vrot.lane.b32.xlu1 %v14975_v23, %s14257_s11  ;;  %2557 = vrot.lane.b32.xlu0 %v14986_v32, %s14254_s8  ;;  %v15047_v23 = vmax.f32 %v2221_v39, 0.0 }
 0x2a7   : > { %23517 = vst [vmem:[#allocation30_spill] sm:$0xff] %v15047_v23 }
 0x2a9   : > { %2351 = vrot.lane.b32.xlu1 %v15005_v46, %s14251_s5  ;;  %2605 = vrot.lane.b32.xlu0 %v14986_v32, %s14257_s11  ;;  %v2109_v32 = vpop.f32.mrf.mxu0 }
 0x2aa   : > { %v2110_v25 = vadd.f32 %v2109_v32, %v14967_v19 }
 0x2ab   : > { %v15016_v1 = vpop.permute.xlu1 %2335  ;;  %v2113_v61 = vpop.f32.mrf.mxu0 }
 0x2ac   : > { %v2114_v32 = vadd.f32 %v2113_v61, %v14973_v21 }
 0x2ad   : > { %2399 = vrot.lane.b32.xlu1 %v15005_v46, %s14254_s8  ;;  %2353 = vrot.lane.b32.xlu0 %v15014_v59, %s14251_s5  ;;  %v2115_v39 = vpop.f32.mrf.mxu0 }
 0x2af   : > { %v15025_v13 = vpop.permute.xlu1 %2383  ;;  %v15027_v18 = vpop.permute.xlu0 %2337 }
 0x2b0   : > { %23513 = vst [vmem:[#allocation26_spill] sm:$0xff] %v15027_v18  ;;  %v2117_v33 = vpop.f32.mrf.mxu0 }
 0x2b1   : > { %2447 = vrot.lane.b32.xlu1 %v15005_v46, %s14257_s11  ;;  %2401 = vrot.lane.b32.xlu0 %v15014_v59, %s14254_s8  ;;  %v15045_v46 = vmax.f32 %v2106_v29, 0.0  ;;  %v15062_v29 = vmax.f32 %v2110_v25, 0.0  ;;  %v15077_v25 = vmax.f32 %v2114_v32, 0.0  ;;  %v2118_v8 = vadd.f32 %v2117_v33, %v14984_v15 }
 0x2b2   : > { %v2116_v33 = vadd.f32 %v2115_v39, %v14973_v21  ;;  %v2119_v4 = vpop.f32.mrf.mxu0 }
 0x2b3   : > { %v15037_v50 = vpop.permute.xlu1 %2431  ;;  %v15039_v52 = vpop.permute.xlu0 %2385  ;;  %23516 = vst [vmem:[#allocation29_spill] sm:$0xff] %v15045_v46  ;;  %23521 = vst [vmem:[#allocation34_spill] sm:$0xff] %v15062_v29  ;;  %v15092_v24 = vmax.f32 %v2118_v8, 0.0 }
 0x2b4   : > { %23515 = vst [vmem:[#allocation28_spill] sm:$0xff] %v15039_v52  ;;  %23523 = vst [vmem:[#allocation36_spill] sm:$0xff] %v15077_v25  ;;  %v15107_v8 = vmax.f32 %v2116_v33, 0.0  ;;  %v2123_v39 = vpop.f32.mrf.mxu0 }
 0x2b5   : > { %2671 = vrot.lane.b32.xlu1 %v15034_v36, %s14251_s5  ;;  %2449 = vrot.lane.b32.xlu0 %v15014_v59, %s14257_s11  ;;  %23527 = vst [vmem:[#allocation40_spill] sm:$0xff] %v15092_v24 }
 0x2b6   : > { %23530 = vst [vmem:[#allocation43_spill] sm:$0xff] %v15107_v8  ;;  %v2125_v33 = vpop.f32.mrf.mxu0 }
 0x2b7   : > { %v15049_v35 = vpop.permute.xlu1 %2655  ;;  %v15051_v10 = vpop.permute.xlu0 %2433 }
 0x2b8   : > { %23518 = vst [vmem:[#allocation31_spill] sm:$0xff] %v15049_v35  ;;  %23519 = vst [vmem:[#allocation32_spill] sm:$0xff] %v15051_v10 }
 0x2b9   : > { %2511 = vrot.lane.b32.xlu1 %v15045_v46, %s14251_s5  ;;  %2673 = vrot.lane.b32.xlu0 %v15047_v23, %s14251_s5 }
 0x2bb   : > { %v15058_v55 = vpop.permute.xlu1 %2495  ;;  %v15060_v59 = vpop.permute.xlu0 %2657 }
 0x2bc   : > { %23520 = vst [vmem:[#allocation33_spill] sm:$0xff] %v15060_v59 }
 0x2bd   : > { %2559 = vrot.lane.b32.xlu1 %v15045_v46, %s14254_s8  ;;  %2513 = vrot.lane.b32.xlu0 %v15062_v29, %s14251_s5 }
 0x2bf   : > { %v15069_v45 = vpop.permute.xlu1 %2543  ;;  %v15071_v40 = vpop.permute.xlu0 %2497 }
 0x2c0   : > { %23522 = vst [vmem:[#allocation35_spill] sm:$0xff] %v15071_v40 }
 0x2c1   : > { %2607 = vrot.lane.b32.xlu1 %v15045_v46, %s14257_s11  ;;  %2561 = vrot.lane.b32.xlu0 %v15062_v29, %s14254_s8 }
 0x2c3   : > { %v15079_v59 = vpop.permute.xlu1 %2591  ;;  %v15081_v31 = vpop.permute.xlu0 %2545 }
 0x2c4   : > { %23524 = vst [vmem:[#allocation37_spill] sm:$0xff] %v15081_v31 }
 0x2c5   : > { %2355 = vrot.lane.b32.xlu1 %v15077_v25, %s14251_s5  ;;  %2609 = vrot.lane.b32.xlu0 %v15062_v29, %s14257_s11 }
 0x2c7   : > { %v15088_v61 = vpop.permute.xlu1 %2339  ;;  %v15090_v46 = vpop.permute.xlu0 %2593 }
 0x2c8   : > { %23525 = vst [vmem:[#allocation38_spill] sm:$0xff] %v15088_v61  ;;  %23526 = vst [vmem:[#allocation39_spill] sm:$0xff] %v15090_v46  ;;  %v2120_v61 = vadd.f32 %v2119_v4, %v14984_v15  ;;  %v2124_v4 = vadd.f32 %v2123_v39, %v14988_v11 }
 0x2c9   : > { %2403 = vrot.lane.b32.xlu1 %v15077_v25, %s14254_s8  ;;  %2357 = vrot.lane.b32.xlu0 %v15092_v24, %s14251_s5 }
 0x2cb   : > { %v15099_v32 = vpop.permute.xlu1 %2387  ;;  %v15101_v35 = vpop.permute.xlu0 %2341 }
 0x2cc   : > { %23528 = vst [vmem:[#allocation41_spill] sm:$0xff] %v15099_v32  ;;  %23529 = vst [vmem:[#allocation42_spill] sm:$0xff] %v15101_v35  ;;  %v15122_v32 = vmax.f32 %v2120_v61, 0.0  ;;  %v15137_v61 = vmax.f32 %v2124_v4, 0.0 }
 0x2cd   : > { %2451 = vrot.lane.b32.xlu1 %v15077_v25, %s14257_s11  ;;  %2405 = vrot.lane.b32.xlu0 %v15092_v24, %s14254_s8 }
 0x2ce   : > { %23535 = vst [vmem:[#allocation48_spill] sm:$0xff] %v15122_v32  ;;  %23538 = vst [vmem:[#allocation51_spill] sm:$0xff] %v15137_v61 }
 0x2cf   : > { %v15109_v29 = vpop.permute.xlu1 %2435  ;;  %v15111_v20 = vpop.permute.xlu0 %2389 }
 0x2d0   : > { %23531 = vst [vmem:[#allocation44_spill] sm:$0xff] %v15109_v29  ;;  %23532 = vst [vmem:[#allocation45_spill] sm:$0xff] %v15111_v20 }
 0x2d1   : > { %2515 = vrot.lane.b32.xlu1 %v15107_v8, %s14251_s5  ;;  %2453 = vrot.lane.b32.xlu0 %v15092_v24, %s14257_s11  ;;  %v2127_v24 = vpop.f32.mrf.mxu0 }
 0x2d2   : > { %v2128_v48 = vadd.f32 %v2127_v24, %v14997_v42  ;;  %v2126_v24 = vadd.f32 %v2125_v33, %v14988_v11 }
 0x2d3   : > { %v15118_v35 = vpop.permute.xlu1 %2659  ;;  %v15120_v25 = vpop.permute.xlu0 %2437 }
 0x2d4   : > { %23533 = vst [vmem:[#allocation46_spill] sm:$0xff] %v15118_v35  ;;  %23534 = vst [vmem:[#allocation47_spill] sm:$0xff] %v15120_v25 }
 0x2d5   : > { %2563 = vrot.lane.b32.xlu1 %v15107_v8, %s14254_s8  ;;  %2517 = vrot.lane.b32.xlu0 %v15122_v32, %s14251_s5 }
 0x2d7   : > { %v15129_v20 = vpop.permute.xlu1 %2499  ;;  %v15131_v29 = vpop.permute.xlu0 %2661 }
 0x2d8   : > { %23536 = vst [vmem:[#allocation49_spill] sm:$0xff] %v15129_v20  ;;  %23537 = vst [vmem:[#allocation50_spill] sm:$0xff] %v15131_v29  ;;  %v15152_v29 = vmax.f32 %v2128_v48, 0.0  ;;  %v15169_v48 = vmax.f32 %v2126_v24, 0.0 }
 0x2d9   : > { %2611 = vrot.lane.b32.xlu1 %v15107_v8, %s14257_s11  ;;  %2565 = vrot.lane.b32.xlu0 %v15122_v32, %s14254_s8 }
 0x2da   : > { %23543 = vst [vmem:[#allocation56_spill] sm:$0xff] %v15152_v29  ;;  %23546 = vst [vmem:[#allocation59_spill] sm:$0xff] %v15169_v48 }
 0x2db   : > { %v15139_v35 = vpop.permute.xlu1 %2547  ;;  %v15141_v25 = vpop.permute.xlu0 %2501 }
 0x2dc   : > { %23539 = vst [vmem:[#allocation52_spill] sm:$0xff] %v15139_v35  ;;  %23540 = vst [vmem:[#allocation53_spill] sm:$0xff] %v15141_v25  ;;  %v15163_v35 = vpop.f32.mrf.mxu1 }
 0x2dd   : > { %2359 = vrot.lane.b32.xlu1 %v15137_v61, %s14251_s5  ;;  %2613 = vrot.lane.b32.xlu0 %v15122_v32, %s14257_s11  ;;  %v2129_v32 = vpop.f32.mrf.mxu0 }
 0x2de   : > { %v2130_v33 = vadd.f32 %v2129_v32, %v14997_v42 }
 0x2df   : > { %v15148_v39 = vpop.permute.xlu1 %2595  ;;  %v15150_v8 = vpop.permute.xlu0 %2549 }
 0x2e0   : > { %23541 = vst [vmem:[#allocation54_spill] sm:$0xff] %v15148_v39  ;;  %23542 = vst [vmem:[#allocation55_spill] sm:$0xff] %v15150_v8  ;;  %v2133_v39 = vpop.f32.mrf.mxu0  ;;  %v15184_v24 = vmax.f32 %v2130_v33, 0.0 }
 0x2e1   : > { %2407 = vrot.lane.b32.xlu1 %v15137_v61, %s14254_s8  ;;  %2361 = vrot.lane.b32.xlu0 %v15152_v29, %s14251_s5  ;;  %v2134_v32 = vadd.f32 %v2133_v39, %v15003_v43 }
 0x2e2   : > { %23551 = vst [vmem:[#allocation64_spill] sm:$0xff] %v15184_v24 }
 0x2e3   : > { %v15159_v4 = vpop.permute.xlu1 %2343  ;;  %v15161_v25 = vpop.permute.xlu0 %2597  ;;  %v15201_v33 = vmax.f32 %v2134_v32, 0.0 }
 0x2e4   : > { %23544 = vst [vmem:[#allocation57_spill] sm:$0xff] %v15159_v4  ;;  %23545 = vst [vmem:[#allocation58_spill] sm:$0xff] %v15161_v25  ;;  %v2226_v4 = vpop.f32.mrf.mxu1 }
 0x2e5   : > { %2455 = vrot.lane.b32.xlu1 %v15137_v61, %s14257_s11  ;;  %2409 = vrot.lane.b32.xlu0 %v15152_v29, %s14254_s8  ;;  %23554 = vst [vmem:[#allocation67_spill] sm:$0xff] %v15201_v33 }
 0x2e6   : > { %v15186_v52 = vpop.f32.mrf.mxu1 }
 0x2e7   : > { %v15171_v8 = vpop.permute.xlu1 %2391  ;;  %v15173_v20 = vpop.permute.xlu0 %2345 }
 0x2e8   : > { %23547 = vst [vmem:[#allocation60_spill] sm:$0xff] %v15171_v8  ;;  %23548 = vst [vmem:[#allocation61_spill] sm:$0xff] %v15173_v20  ;;  %v2135_v8 = vpop.f32.mrf.mxu0 }
 0x2e9   : > { %2519 = vrot.lane.b32.xlu1 %v15169_v48, %s14251_s5  ;;  %2457 = vrot.lane.b32.xlu0 %v15152_v29, %s14257_s11 }
 0x2ea   : > { %v2137_v60 = vpop.f32.mrf.mxu0 }
 0x2eb   : > { %v15180_v61 = vpop.permute.xlu1 %2439  ;;  %v15182_v25 = vpop.permute.xlu0 %2393  ;;  %v2138_v39 = vadd.f32 %v2137_v60, %v15012_v57  ;;  %v2136_v60 = vadd.f32 %v2135_v8, %v15003_v43 }
 0x2ec   : > { %23549 = vst [vmem:[#allocation62_spill] sm:$0xff] %v15180_v61  ;;  %23550 = vst [vmem:[#allocation63_spill] sm:$0xff] %v15182_v25  ;;  %v2230_v61 = vpop.f32.mrf.mxu1 }
 0x2ed   : > { %2567 = vrot.lane.b32.xlu1 %v15169_v48, %s14254_s8  ;;  %2521 = vrot.lane.b32.xlu0 %v15184_v24, %s14251_s5  ;;  %v15218_v32 = vmax.f32 %v2138_v39, 0.0  ;;  %v15235_v39 = vmax.f32 %v2136_v60, 0.0 }
 0x2ee   : > { %v15208_v18 = vpop.f32.mrf.mxu1 }
 0x2ef   : > { %v15193_v20 = vpop.permute.xlu1 %2663  ;;  %v15195_v29 = vpop.permute.xlu0 %2441  ;;  %23559 = vst [vmem:[#allocation72_spill] sm:$0xff] %v15218_v32  ;;  %23562 = vst [vmem:[#allocation75_spill] sm:$0xff] %v15235_v39 }
 0x2f0   : > { %23552 = vst [vmem:[#allocation65_spill] sm:$0xff] %v15193_v20  ;;  %23553 = vst [vmem:[#allocation66_spill] sm:$0xff] %v15195_v29  ;;  %v2236_v29 = vpop.f32.mrf.mxu1 }
 0x2f1   : > { %2615 = vrot.lane.b32.xlu1 %v15169_v48, %s14257_s11  ;;  %2569 = vrot.lane.b32.xlu0 %v15184_v24, %s14254_s8 }
 0x2f3   : > { %v15203_v25 = vpop.permute.xlu1 %2503  ;;  %v15205_v31 = vpop.permute.xlu0 %2665 }
 0x2f4   : > { %23555 = vst [vmem:[#allocation68_spill] sm:$0xff] %v15203_v25  ;;  %23556 = vst [vmem:[#allocation69_spill] sm:$0xff] %v15205_v31 }
 0x2f5   : > { %2363 = vrot.lane.b32.xlu1 %v15201_v33, %s14251_s5  ;;  %2617 = vrot.lane.b32.xlu0 %v15184_v24, %s14257_s11  ;;  %v15229_v24 = vpop.f32.mrf.mxu1 }
 0x2f7   : > { %v15214_v48 = vpop.permute.xlu1 %2551  ;;  %v15216_v20 = vpop.permute.xlu0 %2505 }
 0x2f8   : > { %23557 = vst [vmem:[#allocation70_spill] sm:$0xff] %v15214_v48  ;;  %23558 = vst [vmem:[#allocation71_spill] sm:$0xff] %v15216_v20  ;;  %v2139_v48 = vpop.f32.mrf.mxu0 }
 0x2f9   : > { %2411 = vrot.lane.b32.xlu1 %v15201_v33, %s14254_s8  ;;  %2365 = vrot.lane.b32.xlu0 %v15218_v32, %s14251_s5  ;;  %v2140_v8 = vadd.f32 %v2139_v48, %v15012_v57  ;;  %v2227_v48 = vadd.f32 %v2226_v4, %v14973_v21  ;;  %v2231_v4 = vadd.f32 %v2230_v61, %v14984_v15 }
 0x2fb   : > { %v15225_v31 = vpop.permute.xlu1 %2599  ;;  %v15227_v25 = vpop.permute.xlu0 %2553  ;;  %v15250_v40 = vmax.f32 %v2140_v8, 0.0  ;;  %v15267_v8 = vmax.f32 %v2227_v48, 0.0 }
 0x2fc   : > { %23560 = vst [vmem:[#allocation73_spill] sm:$0xff] %v15225_v31  ;;  %23561 = vst [vmem:[#allocation74_spill] sm:$0xff] %v15227_v25  ;;  %v2240_v31 = vpop.f32.mrf.mxu1 }
 0x2fd   : > { %2459 = vrot.lane.b32.xlu1 %v15201_v33, %s14257_s11  ;;  %2413 = vrot.lane.b32.xlu0 %v15218_v32, %s14254_s8  ;;  %23567 = vst [vmem:[#allocation80_spill] sm:$0xff] %v15250_v40  ;;  %23570 = vst [vmem:[#allocation83_spill] sm:$0xff] %v15267_v8  ;;  %v2241_v61 = vadd.f32 %v2240_v31, %v14997_v42 }
 0x2fe   : > { %v15252_v60 = vpop.f32.mrf.mxu1 }
 0x2ff   : > { %v15237_v20 = vpop.permute.xlu1 %2347  ;;  %v15239_v10 = vpop.permute.xlu0 %2601 }
 0x300   : > { %23563 = vst [vmem:[#allocation76_spill] sm:$0xff] %v15237_v20  ;;  %23564 = vst [vmem:[#allocation77_spill] sm:$0xff] %v15239_v10 }
 0x301   : > { %2523 = vrot.lane.b32.xlu1 %v15235_v39, %s14251_s5  ;;  %2461 = vrot.lane.b32.xlu0 %v15218_v32, %s14257_s11  ;;  %v2246_v32 = vpop.f32.mrf.mxu1 }
 0x302   : > { %v2247_v48 = vadd.f32 %v2246_v32, %v15003_v43 }
 0x303   : > { %v15246_v25 = vpop.permute.xlu1 %2395  ;;  %v15248_v33 = vpop.permute.xlu0 %2349 }
 0x304   : > { %23565 = vst [vmem:[#allocation78_spill] sm:$0xff] %v15246_v25  ;;  %23566 = vst [vmem:[#allocation79_spill] sm:$0xff] %v15248_v33  ;;  %v2237_v33 = vadd.f32 %v2236_v29, %v14988_v11 }
 0x305   : > { %2571 = vrot.lane.b32.xlu1 %v15235_v39, %s14254_s8  ;;  %2525 = vrot.lane.b32.xlu0 %v15250_v40, %s14251_s5 }
 0x307   : > { %v15259_v20 = vpop.permute.xlu1 %2443  ;;  %v15261_v10 = vpop.permute.xlu0 %2397 }
 0x308   : > { %23568 = vst [vmem:[#allocation81_spill] sm:$0xff] %v15259_v20  ;;  %23569 = vst [vmem:[#allocation82_spill] sm:$0xff] %v15261_v10  ;;  %v15275_v20 = vpop.f32.mrf.mxu1 }
 0x309   : > { %2619 = vrot.lane.b32.xlu1 %v15235_v39, %s14257_s11  ;;  %2573 = vrot.lane.b32.xlu0 %v15250_v40, %s14254_s8  ;;  %v15281_v39 = vmax.f32 %v2237_v33, 0.0 }
 0x30b   : > { %v15270_v25 = vpop.permute.xlu1 %2667  ;;  %v15272_v46 = vpop.permute.xlu0 %2445  ;;  %23573 = vst [vmem:[#allocation86_spill] sm:$0xff] %v15281_v39 }
 0x30c   : > { %23571 = vst [vmem:[#allocation84_spill] sm:$0xff] %v15270_v25  ;;  %23572 = vst [vmem:[#allocation85_spill] sm:$0xff] %v15272_v46  ;;  %v15288_v25 = vmax.f32 %v2231_v4, 0.0  ;;  %v2250_v46 = vpop.f32.mrf.mxu1 }
 0x30d   : > { %2675 = vrot.lane.b32.xlu1 %v15267_v8, %s14251_s5  ;;  %2621 = vrot.lane.b32.xlu0 %v15250_v40, %s14257_s11  ;;  %v15295_v40 = vmax.f32 %v2247_v48, 0.0  ;;  %v2251_v4 = vadd.f32 %v2250_v46, %v15012_v57 }
 0x30e   : > { %23576 = vst [vmem:[#allocation89_spill] sm:$0xff] %v15288_v25 }
 0x30f   : > { %v15284_v10 = vpop.permute.xlu1 %2507  ;;  %v15286_v29 = vpop.permute.xlu0 %2669  ;;  %23577 = vst [vmem:[#allocation90_spill] sm:$0xff] %v15295_v40  ;;  %v15312_v48 = vmax.f32 %v2251_v4, 0.0 }
 0x310   : > { %23574 = vst [vmem:[#allocation87_spill] sm:$0xff] %v15284_v10  ;;  %23575 = vst [vmem:[#allocation88_spill] sm:$0xff] %v15286_v29  ;;  %v15301_v10 = vmax.f32 %v2241_v61, 0.0 }
 0x311   : > { %2679 = vrot.lane.b32.xlu1 %v15281_v39, %s14251_s5  ;;  %2677 = vrot.lane.b32.xlu0 %v15288_v25, %s14251_s5  ;;  %23581 = vst [vmem:[#allocation94_spill] sm:$0xff] %v15312_v48 }
 0x312   : > { %23579 = vst [vmem:[#allocation92_spill] sm:$0xff] %v15301_v10 }
 0x313   : > { %v15297_v33 = vpop.permute.xlu1 %2555  ;;  %v15299_v32 = vpop.permute.xlu0 %2509 }
 0x314   : > { %23578 = vst [vmem:[#allocation91_spill] sm:$0xff] %v15299_v32 }
 0x315   : > { %2683 = vrot.lane.b32.xlu1 %v15295_v40, %s14251_s5  ;;  %2681 = vrot.lane.b32.xlu0 %v15301_v10, %s14251_s5 }
 0x317   : > { %v15308_v31 = vpop.permute.xlu1 %2603  ;;  %v15310_v29 = vpop.permute.xlu0 %2557 }
 0x318   : > { %23580 = vst [vmem:[#allocation93_spill] sm:$0xff] %v15310_v29 }
 0x319   : > { %2703 = vrot.lane.b32.xlu1 %v14800_v53, %s14254_s8  ;;  %2685 = vrot.lane.b32.xlu0 %v15312_v48, %s14251_s5 }
 0x31b   : > { %v15318_v61 = vpop.permute.xlu1 %2351  ;;  %v15320_v46 = vpop.permute.xlu0 %2605 }
 0x31c   : > { %23582 = vst [vmem:[#allocation95_spill] sm:$0xff] %v15318_v61  ;;  %23583 = vst [vmem:[#allocation96_spill] sm:$0xff] %v15320_v46 }
 0x31d   : > { %2707 = vrot.lane.b32.xlu1 %v14854_v16, %s14254_s8  ;;  %2705 = vrot.lane.b32.xlu0 %v14810_v58, %s14254_s8 }
 0x31f   : > { %v15326_v32 = vpop.permute.xlu1 %2399  ;;  %v15328_v4 = vpop.permute.xlu0 %2353 }
 0x320   : > { %23584 = vst [vmem:[#allocation97_spill] sm:$0xff] %v15326_v32  ;;  %23585 = vst [vmem:[#allocation98_spill] sm:$0xff] %v15328_v4 }
 0x321   : > { %2711 = vrot.lane.b32.xlu1 %v14908_v37, %s14254_s8  ;;  %2709 = vrot.lane.b32.xlu0 %v14864_v22, %s14254_s8 }
 0x323   : > { %v15334_v29 = vpop.permute.xlu1 %2447  ;;  %v15336_v61 = vpop.permute.xlu0 %2401 }
 0x324   : > { %23586 = vst [vmem:[#allocation99_spill] sm:$0xff] %v15334_v29  ;;  %23587 = vst [vmem:[#allocation100_spill] sm:$0xff] %v15336_v61 }
 0x325   : > { %2715 = vrot.lane.b32.xlu1 %v14964_v12, %s14254_s8  ;;  %2713 = vrot.lane.b32.xlu0 %v14918_v14, %s14254_s8 }
 0x327   : > { %v15342_v46 = vpop.permute.xlu1 %2671  ;;  %v15344_v32 = vpop.permute.xlu0 %2449 }
 0x328   : > { %23588 = vst [vmem:[#allocation101_spill] sm:$0xff] %v15342_v46  ;;  %23589 = vst [vmem:[#allocation102_spill] sm:$0xff] %v15344_v32 }
 0x329   : > { %2719 = vrot.lane.b32.xlu1 %v15034_v36, %s14254_s8  ;;  %2717 = vrot.lane.b32.xlu0 %v14978_v27, %s14254_s8 }
 0x32b   : > { %v15350_v4 = vpop.permute.xlu1 %2511  ;;  %v15352_v29 = vpop.permute.xlu0 %2673 }
 0x32c   : > { %23590 = vst [vmem:[#allocation103_spill] sm:$0xff] %v15350_v4  ;;  %23591 = vst [vmem:[#allocation104_spill] sm:$0xff] %v15352_v29 }
 0x32d   : > { %2723 = vrot.lane.b32.xlu1 %v15267_v8, %s14254_s8  ;;  %2721 = vrot.lane.b32.xlu0 %v15047_v23, %s14254_s8 }
 0x32f   : > { %v15358_v61 = vpop.permute.xlu1 %2559  ;;  %v15360_v46 = vpop.permute.xlu0 %2513 }
 0x330   : > { %23592 = vst [vmem:[#allocation105_spill] sm:$0xff] %v15358_v61  ;;  %23593 = vst [vmem:[#allocation106_spill] sm:$0xff] %v15360_v46 }
 0x331   : > { %2727 = vrot.lane.b32.xlu1 %v15281_v39, %s14254_s8  ;;  %2725 = vrot.lane.b32.xlu0 %v15288_v25, %s14254_s8 }
 0x333   : > { %v15366_v32 = vpop.permute.xlu1 %2607  ;;  %v15368_v4 = vpop.permute.xlu0 %2561 }
 0x334   : > { %23594 = vst [vmem:[#allocation107_spill] sm:$0xff] %v15366_v32  ;;  %23595 = vst [vmem:[#allocation108_spill] sm:$0xff] %v15368_v4 }
 0x335   : > { %2731 = vrot.lane.b32.xlu1 %v15295_v40, %s14254_s8  ;;  %2729 = vrot.lane.b32.xlu0 %v15301_v10, %s14254_s8 }
 0x337   : > { %v15374_v29 = vpop.permute.xlu1 %2355  ;;  %v15376_v61 = vpop.permute.xlu0 %2609 }
 0x338   : > { %23596 = vst [vmem:[#allocation109_spill] sm:$0xff] %v15374_v29  ;;  %23597 = vst [vmem:[#allocation110_spill] sm:$0xff] %v15376_v61 }
 0x339   : > { %2751 = vrot.lane.b32.xlu1 %v14800_v53, %s14257_s11  ;;  %2733 = vrot.lane.b32.xlu0 %v15312_v48, %s14254_s8 }
 0x33b   : > { %v15382_v46 = vpop.permute.xlu1 %2403  ;;  %v15384_v32 = vpop.permute.xlu0 %2357 }
 0x33c   : > { %23598 = vst [vmem:[#allocation111_spill] sm:$0xff] %v15382_v46  ;;  %23599 = vst [vmem:[#allocation112_spill] sm:$0xff] %v15384_v32 }
 0x33d   : > { %2755 = vrot.lane.b32.xlu1 %v14854_v16, %s14257_s11  ;;  %2753 = vrot.lane.b32.xlu0 %v14810_v58, %s14257_s11 }
 0x33f   : > { %v15390_v4 = vpop.permute.xlu1 %2451  ;;  %v15392_v29 = vpop.permute.xlu0 %2405 }
 0x340   : > { %23600 = vst [vmem:[#allocation113_spill] sm:$0xff] %v15390_v4  ;;  %23601 = vst [vmem:[#allocation114_spill] sm:$0xff] %v15392_v29 }
 0x341   : > { %2759 = vrot.lane.b32.xlu1 %v14908_v37, %s14257_s11  ;;  %2757 = vrot.lane.b32.xlu0 %v14864_v22, %s14257_s11 }
 0x343   : > { %v15398_v61 = vpop.permute.xlu1 %2515  ;;  %v15400_v46 = vpop.permute.xlu0 %2453 }
 0x344   : > { %23602 = vst [vmem:[#allocation115_spill] sm:$0xff] %v15398_v61  ;;  %23603 = vst [vmem:[#allocation116_spill] sm:$0xff] %v15400_v46 }
 0x345   : > { %2763 = vrot.lane.b32.xlu1 %v14964_v12, %s14257_s11  ;;  %2761 = vrot.lane.b32.xlu0 %v14918_v14, %s14257_s11 }
 0x347   : > { %v15406_v32 = vpop.permute.xlu1 %2563  ;;  %v15408_v4 = vpop.permute.xlu0 %2517 }
 0x348   : > { %23604 = vst [vmem:[#allocation117_spill] sm:$0xff] %v15406_v32  ;;  %23605 = vst [vmem:[#allocation118_spill] sm:$0xff] %v15408_v4 }
 0x349   : > { %2767 = vrot.lane.b32.xlu1 %v15034_v36, %s14257_s11  ;;  %2765 = vrot.lane.b32.xlu0 %v14978_v27, %s14257_s11  ;;  %v2179_v36 = vadd.f32 %v14792_v49, %v14776_v41  ;;  %v2183_v41 = vadd.f32 %v14825_v0, %v14781_v17  ;;  %v2193_v17 = vadd.f32 %v14879_v28, %v14831_v2 }
 0x34a   : > { %v2203_v2 = vadd.f32 %v14933_v51, %v14885_v30  ;;  %v2213_v30 = vadd.f32 %v14995_v38, %v14939_v54  ;;  %v2223_v54 = vadd.f32 %v15163_v35, %v14967_v19  ;;  %v2233_v19 = vadd.f32 %v15208_v18, %v14984_v15 }
 0x34b   : > { %v15414_v29 = vpop.permute.xlu1 %2611  ;;  %v15416_v61 = vpop.permute.xlu0 %2565  ;;  %v2243_v15 = vadd.f32 %v15252_v60, %v14997_v42 }
 0x34c   : > { %23606 = vst [vmem:[#allocation119_spill] sm:$0xff] %v15414_v29  ;;  %23607 = vst [vmem:[#allocation120_spill] sm:$0xff] %v15416_v61 }
 0x34d   : > { %2771 = vrot.lane.b32.xlu1 %v15267_v8, %s14257_s11  ;;  %2769 = vrot.lane.b32.xlu0 %v15047_v23, %s14257_s11  ;;  %v15440_v8 = vmax.f32 %v2179_v36, 0.0  ;;  %v2199_v36 = vadd.f32 %v14896_v34, %v14876_v26  ;;  %v2209_v26 = vadd.f32 %v14950_v63, %v14930_v47  ;;  %v2219_v47 = vadd.f32 %v15018_v6, %v14957_v7 }
 0x34e   : > { %v2229_v7 = vadd.f32 %v15186_v52, %v14973_v21  ;;  %v2239_v21 = vadd.f32 %v15229_v24, %v14988_v11  ;;  %v2249_v11 = vadd.f32 %v15275_v20, %v15003_v43  ;;  %v15554_v20 = vmax.f32 %v2243_v15, 0.0 }
 0x34f   : > { %v15422_v12 = vpop.permute.xlu1 %2359  ;;  %v15424_v32 = vpop.permute.xlu0 %2613 }
 0x350   : > { %23608 = vst [vmem:[#allocation121_spill] sm:$0xff] %v15422_v12  ;;  %23609 = vst [vmem:[#allocation122_spill] sm:$0xff] %v15424_v32 }
 0x351   : > { %2775 = vrot.lane.b32.xlu1 %v15281_v39, %s14257_s11  ;;  %2773 = vrot.lane.b32.xlu0 %v15288_v25, %s14257_s11  ;;  %v2189_v39 = vadd.f32 %v14842_v9, %v14822_v62  ;;  %v15460_v62 = vmax.f32 %v2183_v41, 0.0  ;;  %v15470_v9 = vmax.f32 %v2199_v36, 0.0  ;;  %v15486_v41 = vmax.f32 %v2209_v26, 0.0  ;;  %23637 = vst [vmem:[#allocation150_spill] sm:$0xff] %v15554_v20 }
 0x352   : > { %v15492_v36 = vmax.f32 %v2203_v2, 0.0  ;;  %v15508_v26 = vmax.f32 %v2213_v30, 0.0  ;;  %v15518_v2 = vmax.f32 %v2229_v7, 0.0  ;;  %v15534_v30 = vmax.f32 %v2239_v21, 0.0 }
 0x353   : > { %v15432_v27 = vpop.permute.xlu1 %2407  ;;  %v15434_v4 = vpop.permute.xlu0 %2361  ;;  %23616 = vst [vmem:[#allocation129_spill] sm:$0xff] %v15470_v9  ;;  %23619 = vst [vmem:[#allocation132_spill] sm:$0xff] %v15486_v41  ;;  %v15540_v7 = vmax.f32 %v2233_v19, 0.0  ;;  %v15550_v21 = vmax.f32 %v2249_v11, 0.0 }
 0x354   : > { %23610 = vst [vmem:[#allocation123_spill] sm:$0xff] %v15432_v27  ;;  %23611 = vst [vmem:[#allocation124_spill] sm:$0xff] %v15434_v4 }
 0x355   : > { %2779 = vrot.lane.b32.xlu1 %v15295_v40, %s14257_s11  ;;  %2777 = vrot.lane.b32.xlu0 %v15301_v10, %s14257_s11  ;;  %v15454_v40 = vmax.f32 %v2189_v39, 0.0  ;;  %v15476_v39 = vmax.f32 %v2193_v17, 0.0  ;;  %23621 = vst [vmem:[#allocation134_spill] sm:$0xff] %v15492_v36  ;;  %v15502_v17 = vmax.f32 %v2219_v47, 0.0  ;;  %23625 = vst [vmem:[#allocation138_spill] sm:$0xff] %v15508_v26  ;;  %v15524_v47 = vmax.f32 %v2223_v54, 0.0  ;;  %v2252_v54 = vpop.f32.mrf.mxu1 }
 0x356   : > { %23627 = vst [vmem:[#allocation140_spill] sm:$0xff] %v15518_v2  ;;  %23631 = vst [vmem:[#allocation144_spill] sm:$0xff] %v15534_v30  ;;  %v2253_v43 = vadd.f32 %v2252_v54, %v15012_v57 }
 0x357   : > { %v15444_v23 = vpop.permute.xlu1 %2455  ;;  %v15448_v49 = vpop.permute.xlu0 %2409  ;;  %23623 = vst [vmem:[#allocation136_spill] sm:$0xff] %v15502_v17  ;;  %23629 = vst [vmem:[#allocation142_spill] sm:$0xff] %v15524_v47 }
 0x358   : > { %23612 = vst [vmem:[#allocation125_spill] sm:$0xff] %v15444_v23  ;;  %23613 = vst [vmem:[#allocation126_spill] sm:$0xff] %v15448_v49  ;;  %v15565_v60 = vmax.f32 %v2253_v43, 0.0 }
 0x359   : > { %2815 = vrot.lane.b32.xlu1 %v15440_v8, %s14251_s5  ;;  %2781 = vrot.lane.b32.xlu0 %v15312_v48, %s14257_s11  ;;  %23633 = vst [vmem:[#allocation146_spill] sm:$0xff] %v15540_v7  ;;  %23635 = vst [vmem:[#allocation148_spill] sm:$0xff] %v15550_v21 }
 0x35a   : > { %23640 = vst [vmem:[#allocation153_spill] sm:$0xff] %v15565_v60 }
 0x35b   : > { %v15458_v10 = vpop.permute.xlu1 %2519  ;;  %v15464_v0 = vpop.permute.xlu0 %2457 }
 0x35c   : > { %23614 = vst [vmem:[#allocation127_spill] sm:$0xff] %v15458_v10  ;;  %23615 = vst [vmem:[#allocation128_spill] sm:$0xff] %v15464_v0 }
 0x35d   : > { %2819 = vrot.lane.b32.xlu1 %v15454_v40, %s14251_s5  ;;  %2817 = vrot.lane.b32.xlu0 %v15460_v62, %s14251_s5 }
 0x35f   : > { %v15474_v34 = vpop.permute.xlu1 %2567  ;;  %v15480_v28 = vpop.permute.xlu0 %2521 }
 0x360   : > { %23617 = vst [vmem:[#allocation130_spill] sm:$0xff] %v15474_v34  ;;  %23618 = vst [vmem:[#allocation131_spill] sm:$0xff] %v15480_v28 }
 0x361   : > { %2823 = vrot.lane.b32.xlu1 %v15470_v9, %s14251_s5  ;;  %2821 = vrot.lane.b32.xlu0 %v15476_v39, %s14251_s5 }
 0x363   : > { %v15490_v63 = vpop.permute.xlu1 %2615  ;;  %v15496_v51 = vpop.permute.xlu0 %2569 }
 0x364   : > { %23620 = vst [vmem:[#allocation133_spill] sm:$0xff] %v15490_v63  ;;  %23622 = vst [vmem:[#allocation135_spill] sm:$0xff] %v15496_v51  ;;  %v2959_v51 = vcombine.low %v14779_v44, %v15025_v13 }
 0x365   : > { %2827 = vrot.lane.b32.xlu1 %v15486_v41, %s14251_s5  ;;  %2825 = vrot.lane.b32.xlu0 %v15492_v36, %s14251_s5 }
 0x366   : > { %v2967_v4 = vrot.slane %v2959_v51, %v14347_v5 }
 0x367   : > { %v15506_v6 = vpop.permute.xlu1 %2363  ;;  %v15512_v38 = vpop.permute.xlu0 %2617 }
 0x368   : > { %23624 = vst [vmem:[#allocation137_spill] sm:$0xff] %v15506_v6  ;;  %23626 = vst [vmem:[#allocation139_spill] sm:$0xff] %v15512_v38  ;;  %v2975_v38 = vcombine.low %v15016_v1, %v15037_v50 }
 0x369   : > { %2831 = vrot.lane.b32.xlu1 %v15502_v17, %s14251_s5  ;;  %2829 = vrot.lane.b32.xlu0 %v15508_v26, %s14251_s5 }
 0x36a   : > { %v2983_v63 = vrot.slane %v2975_v38, %v14347_v5 }
 0x36b   : > { %v15522_v52 = vpop.permute.xlu1 %2411  ;;  %v15528_v35 = vpop.permute.xlu0 %2365 }
 0x36c   : > { %23628 = vst [vmem:[#allocation141_spill] sm:$0xff] %v15522_v52  ;;  %23630 = vst [vmem:[#allocation143_spill] sm:$0xff] %v15528_v35 }
 0x36d   : > { %2835 = vrot.lane.b32.xlu1 %v15518_v2, %s14251_s5  ;;  %2833 = vrot.lane.b32.xlu0 %v15524_v47, %s14251_s5 }
 0x36f   : > { %v15538_v24 = vpop.permute.xlu1 %2459  ;;  %v15544_v18 = vpop.permute.xlu0 %2413 }
 0x370   : > { %23632 = vst [vmem:[#allocation145_spill] sm:$0xff] %v15538_v24  ;;  %23634 = vst [vmem:[#allocation147_spill] sm:$0xff] %v15544_v18 }
 0x371   : > { %2839 = vrot.lane.b32.xlu1 %v15534_v30, %s14251_s5  ;;  %2837 = vrot.lane.b32.xlu0 %v15540_v7, %s14251_s5 }
 0x373   : > { %v15552_v48 = vpop.permute.xlu1 %2523  ;;  %v15557_v19 = vpop.permute.xlu0 %2461 }
 0x374   : > { %23636 = vst [vmem:[#allocation149_spill] sm:$0xff] %v15552_v48  ;;  %23638 = vst [vmem:[#allocation151_spill] sm:$0xff] %v15557_v19 }
 0x375   : > { %2843 = vrot.lane.b32.xlu1 %v15550_v21, %s14251_s5  ;;  %2841 = vrot.lane.b32.xlu0 %v15554_v20, %s14251_s5 }
 0x377   : > { %v15563_v42 = vpop.permute.xlu1 %2571  ;;  %v15567_v11 = vpop.permute.xlu0 %2525 }
 0x378   : > { %23639 = vst [vmem:[#allocation152_spill] sm:$0xff] %v15563_v42  ;;  %23641 = vst [vmem:[#allocation154_spill] sm:$0xff] %v15567_v11 }
 0x379   : > { %2863 = vrot.lane.b32.xlu1 %v15440_v8, %s14254_s8  ;;  %2845 = vrot.lane.b32.xlu0 %v15565_v60, %s14251_s5 }
 0x37b   : > { %v15573_v57 = vpop.permute.xlu1 %2619  ;;  %v15575_v15 = vpop.permute.xlu0 %2573 }
 0x37c   : > { %23642 = vst [vmem:[#allocation155_spill] sm:$0xff] %v15573_v57  ;;  %23643 = vst [vmem:[#allocation156_spill] sm:$0xff] %v15575_v15 }
 0x37d   : > { %2867 = vrot.lane.b32.xlu1 %v15454_v40, %s14254_s8  ;;  %2865 = vrot.lane.b32.xlu0 %v15460_v62, %s14254_s8 }
 0x37f   : > { %v15581_v54 = vpop.permute.xlu1 %2675  ;;  %v15583_v43 = vpop.permute.xlu0 %2621 }
 0x380   : > { %23644 = vst [vmem:[#allocation157_spill] sm:$0xff] %v15581_v54  ;;  %23645 = vst [vmem:[#allocation158_spill] sm:$0xff] %v15583_v43 }
 0x381   : > { %2871 = vrot.lane.b32.xlu1 %v15470_v9, %s14254_s8  ;;  %2869 = vrot.lane.b32.xlu0 %v15476_v39, %s14254_s8 }
 0x383   : > { %v15589_v11 = vpop.permute.xlu1 %2679  ;;  %v15591_v25 = vpop.permute.xlu0 %2677 }
 0x384   : > { %23646 = vst [vmem:[#allocation159_spill] sm:$0xff] %v15589_v11  ;;  %23647 = vst [vmem:[#allocation160_spill] sm:$0xff] %v15591_v25 }
 0x385   : > { %2875 = vrot.lane.b32.xlu1 %v15486_v41, %s14254_s8  ;;  %2873 = vrot.lane.b32.xlu0 %v15492_v36, %s14254_s8 }
 0x387   : > { %v15597_v15 = vpop.permute.xlu1 %2683  ;;  %v15599_v35 = vpop.permute.xlu0 %2681 }
 0x388   : > { %23648 = vst [vmem:[#allocation161_spill] sm:$0xff] %v15597_v15  ;;  %23649 = vst [vmem:[#allocation162_spill] sm:$0xff] %v15599_v35 }
 0x389   : > { %2879 = vrot.lane.b32.xlu1 %v15502_v17, %s14254_s8  ;;  %2877 = vrot.lane.b32.xlu0 %v15508_v26, %s14254_s8 }
 0x38b   : > { %v15605_v43 = vpop.permute.xlu1 %2703  ;;  %v15607_v11 = vpop.permute.xlu0 %2685 }
 0x38c   : > { %23650 = vst [vmem:[#allocation163_spill] sm:$0xff] %v15607_v11 }
 0x38d   : > { %2883 = vrot.lane.b32.xlu1 %v15518_v2, %s14254_s8  ;;  %2881 = vrot.lane.b32.xlu0 %v15524_v47, %s14254_s8 }
 0x38f   : > { %v15613_v25 = vpop.permute.xlu1 %2707  ;;  %v15615_v15 = vpop.permute.xlu0 %2705 }
 0x391   : > { %2887 = vrot.lane.b32.xlu1 %v15534_v30, %s14254_s8  ;;  %2885 = vrot.lane.b32.xlu0 %v15540_v7, %s14254_s8 }
 0x393   : > { %v15621_v35 = vpop.permute.xlu1 %2711  ;;  %v15623_v19 = vpop.permute.xlu0 %2709 }
 0x394   : > { %23651 = vst [vmem:[#allocation164_spill] sm:$0xff] %v15621_v35 }
 0x395   : > { %2891 = vrot.lane.b32.xlu1 %v15550_v21, %s14254_s8  ;;  %2889 = vrot.lane.b32.xlu0 %v15554_v20, %s14254_s8 }
 0x397   : > { %v15629_v11 = vpop.permute.xlu1 %2715  ;;  %v15631_v48 = vpop.permute.xlu0 %2713 }
 0x398   : > { %23652 = vst [vmem:[#allocation165_spill] sm:$0xff] %v15629_v11  ;;  %23653 = vst [vmem:[#allocation166_spill] sm:$0xff] %v15631_v48 }
 0x399   : > { %2911 = vrot.lane.b32.xlu1 %v15440_v8, %s14257_s11  ;;  %2893 = vrot.lane.b32.xlu0 %v15565_v60, %s14254_s8 }
 0x39b   : > { %v15637_v57 = vpop.permute.xlu1 %2719  ;;  %v15639_v42 = vpop.permute.xlu0 %2717 }
 0x39c   : > { %23654 = vst [vmem:[#allocation167_spill] sm:$0xff] %v15637_v57  ;;  %23655 = vst [vmem:[#allocation168_spill] sm:$0xff] %v15639_v42  ;;  %v3023_v57 = vcombine.low %v2967_v4, %v2983_v63 }
 0x39d   : > { %2915 = vrot.lane.b32.xlu1 %v15454_v40, %s14257_s11  ;;  %2913 = vrot.lane.b32.xlu0 %v15460_v62, %s14257_s11 }
 0x39f   : > { %v15645_v18 = vpop.permute.xlu1 %2723  ;;  %v15647_v6 = vpop.permute.xlu0 %2721 }
 0x3a0   : > { %23656 = vst [vmem:[#allocation169_spill] sm:$0xff] %v15645_v18  ;;  %23657 = vst [vmem:[#allocation170_spill] sm:$0xff] %v15647_v6  ;;  %v3007_v18 = vcombine.low %v15058_v55, %v15079_v59 }
 0x3a1   : > { %2919 = vrot.lane.b32.xlu1 %v15470_v9, %s14257_s11  ;;  %2917 = vrot.lane.b32.xlu0 %v15476_v39, %s14257_s11 }
 0x3a3   : > { %v15653_v24 = vpop.permute.xlu1 %2727  ;;  %v15655_v54 = vpop.permute.xlu0 %2725 }
 0x3a4   : > { %23658 = vst [vmem:[#allocation171_spill] sm:$0xff] %v15653_v24  ;;  %23659 = vst [vmem:[#allocation172_spill] sm:$0xff] %v15655_v54  ;;  %v2991_v24 = vcombine.low %v14807_v56, %v15069_v45  ;;  %v14266_v54 = vmov 1934713408  }
 0x3a5   : > { %2923 = vrot.lane.b32.xlu1 %v15486_v41, %s14257_s11  ;;  %2921 = vrot.lane.b32.xlu0 %v15492_v36, %s14257_s11  ;;  %v3026_v6 = vunpack.c.l.s4 %v14266_v54 }
 0x3a6   : > { %v2999_v34 = vrot.slane %v2991_v24, %v14347_v5 }
 0x3a7   : > { %v15663_v52 = vpop.permute.xlu1 %2731  ;;  %v15665_v28 = vpop.permute.xlu0 %2729  ;;  %v3027_v54 = vunpack.c.0.s8 %v3026_v6 }
 0x3a8   : > { %23660 = vst [vmem:[#allocation173_spill] sm:$0xff] %v15663_v52  ;;  %23661 = vst [vmem:[#allocation174_spill] sm:$0xff] %v15665_v28  ;;  %v3015_v52 = vrot.slane %v3007_v18, %v14347_v5 }
 0x3a9   : > { %2927 = vrot.lane.b32.xlu1 %v15502_v17, %s14257_s11  ;;  %2925 = vrot.lane.b32.xlu0 %v15508_v26, %s14257_s11  ;;  %v15696_v38 = vsub.s32 %v3027_v54, %v14344_v3  ;;  %v3008_v3 = vcombine.high %v15058_v55, %v15079_v59  ;;  %v2960_v55 = vcombine.high %v14779_v44, %v15025_v13 }
 0x3aa   : > { %v3055_v0 = vcombine.low %v2999_v34, %v3015_v52  ;;  %v3056_v54 = vcombine.high %v2999_v34, %v3015_v52 }
 0x3ab   : > { %v15678_v28 = vpop.permute.xlu1 %2751  ;;  %v15680_v10 = vpop.permute.xlu0 %2733  ;;  %v3022_v59 = vrot.slane %v3008_v3, %v14347_v5 }
 0x3ac   : > { %23662 = vst [vmem:[#allocation175_spill] sm:$0xff] %v15680_v10  ;;  %v3063_v24 = vrot.slane %v3055_v0, %v15696_v38  ;;  %v3031_v10 = vrot.slane %v3023_v57, %v15696_v38  ;;  %v2976_v0 = vcombine.high %v15016_v1, %v15037_v50  ;;  %v3070_v1 = vrot.slane %v3056_v54, %v15696_v38 }
 0x3ad   : > { %2931 = vrot.lane.b32.xlu1 %v15518_v2, %s14257_s11  ;;  %2929 = vrot.lane.b32.xlu0 %v15524_v47, %s14257_s11  ;;  %v3024_v47 = vcombine.high %v2967_v4, %v2983_v63  ;;  %v2974_v63 = vrot.slane %v2960_v55, %v14347_v5  ;;  %v23672_v55 = vld [vmem:[#allocation39_spill] sm:$0xff] }
 0x3ae   : > { %v3088_v52 = vcombine.high %v3031_v10, %v3063_v24 }
 0x3af   : > { %v15689_v17 = vpop.permute.xlu1 %2755  ;;  %v15691_v18 = vpop.permute.xlu0 %2753  ;;  %v3038_v4 = vrot.slane %v3024_v47, %v15696_v38 }
 0x3b1   : > { %2935 = vrot.lane.b32.xlu1 %v15534_v30, %s14257_s11  ;;  %2933 = vrot.lane.b32.xlu0 %v15540_v7, %s14257_s11  ;;  %v3087_v7 = vcombine.low %v3031_v10, %v3063_v24  ;;  %v3090_v3 = vcombine.high %v3038_v4, %v3070_v1 }
 0x3b3   : > { %v15700_v6 = vpop.permute.xlu1 %2759  ;;  %v15703_v51 = vpop.permute.xlu0 %2757 }
 0x3b4   : > { %23663 = vst [vmem:[#allocation176_spill] sm:$0xff] %v15700_v6 }
 0x3b5   : > { %2939 = vrot.lane.b32.xlu1 %v15550_v21, %s14257_s11  ;;  %2937 = vrot.lane.b32.xlu0 %v15554_v20, %s14257_s11  ;;  %v2992_v21 = vcombine.high %v14807_v56, %v15069_v45  ;;  %v2990_v56 = vrot.slane %v2976_v0, %v14347_v5 }
 0x3b7   : > { %v15712_v30 = vpop.permute.xlu1 %2763  ;;  %v15714_v2 = vpop.permute.xlu0 %2761  ;;  %v3006_v45 = vrot.slane %v2992_v21, %v14347_v5  ;;  %v3039_v10 = vcombine.low %v2974_v63, %v2990_v56 }
 0x3b8   : > { %23664 = vst [vmem:[#allocation177_spill] sm:$0xff] %v15712_v30  ;;  %23665 = vst [vmem:[#allocation178_spill] sm:$0xff] %v15714_v2 }
 0x3b9   : > { %7567 = vrot.lane.b32.xlu1 %v3087_v7, %s14267_s6  ;;  %2941 = vrot.lane.b32.xlu0 %v15565_v60, %s14257_s11  ;;  %v3071_v44 = vcombine.low %v3006_v45, %v3022_v59  ;;  %v3089_v7 = vcombine.low %v3038_v4, %v3070_v1  ;;  %v3047_v47 = vrot.slane %v3039_v10, %v15696_v38  ;;  %v23677_v1 = vld [vmem:[#allocation26_spill] sm:$0xff] }
 0x3ba   : > { %v3072_v0 = vcombine.high %v3006_v45, %v3022_v59  ;;  %v23681_v10 = vld [vmem:[#allocation6_spill] sm:$0xff] }
 0x3bb   : > { %v15726_v34 = vpop.permute.xlu1 %2767  ;;  %v15729_v50 = vpop.permute.xlu0 %2765  ;;  %v3079_v21 = vrot.slane %v3071_v44, %v15696_v38  ;;  %v23678_v44 = vld [vmem:[#allocation37_spill] sm:$0xff] }
 0x3bc   : > { %23666 = vst [vmem:[#allocation179_spill] sm:$0xff] %v15726_v34  ;;  %23667 = vst [vmem:[#allocation180_spill] sm:$0xff] %v15729_v50  ;;  %v23679_v34 = vld [vmem:[#allocation7_spill] sm:$0xff]  ;;  %v3086_v12 = vrot.slane %v3072_v0, %v15696_v38 }
 0x3bd   : > { %7571 = vrot.lane.b32.xlu1 %v3088_v52, %s14267_s6  ;;  %v23673_v52 = vld [vmem:[#allocation35_spill] sm:$0xff] }
 0x3be   : > { %v3279_v60 = vcombine.low %v23673_v52, %v23672_v55 }
 0x3bf   : > { %v15736_v13 = vpop.permute.xlu1 %2771  ;;  %v15738_v57 = vpop.permute.xlu0 %2769 }
 0x3c0   : > { %23668 = vst [vmem:[#allocation181_spill] sm:$0xff] %v15736_v13  ;;  %23669 = vst [vmem:[#allocation182_spill] sm:$0xff] %v15738_v57  ;;  %v3091_v13 = vcombine.low %v3047_v47, %v3079_v21  ;;  %v3287_v45 = vrot.slane %v3279_v60, %v14347_v5 }
 0x3c1   : > { %7575 = vrot.lane.b32.xlu1 %v3089_v7, %s14267_s6  ;;  %v3040_v7 = vcombine.high %v2974_v63, %v2990_v56 }
 0x3c3   : > { %v15741_v24 = vpop.permute.xlu1 %2775  ;;  %v15744_v54 = vpop.permute.xlu0 %2773 }
 0x3c4   : > { %23670 = vst [vmem:[#allocation183_spill] sm:$0xff] %v15741_v24  ;;  %23671 = vst [vmem:[#allocation184_spill] sm:$0xff] %v15744_v54  ;;  %v23676_v24 = vld [vmem:[#allocation32_spill] sm:$0xff]  ;;  %v3263_v54 = vcombine.low %v23679_v34, %v23678_v44 }
 0x3c5   : > { %7579 = vrot.lane.b32.xlu1 %v3090_v3, %s14267_s6  ;;  %v3247_v4 = vcombine.low %v23677_v1, %v23676_v24  ;;  %v23680_v3 = vld [vmem:[#allocation28_spill] sm:$0xff] }
 0x3c6   : > { %v3231_v59 = vcombine.low %v23681_v10, %v23680_v3  ;;  %v3271_v63 = vrot.slane %v3263_v54, %v14347_v5 }
 0x3c7   : > { %v15750_v20 = vpop.permute.xlu1 %2779  ;;  %v15752_v57 = vpop.permute.xlu0 %2777  ;;  %v3255_v56 = vrot.slane %v3247_v4, %v14347_v5 }
 0x3c8   : > { %23674 = vst [vmem:[#allocation39_spill] sm:$0xff] %v15750_v20  ;;  %23675 = vst [vmem:[#allocation35_spill] sm:$0xff] %v15752_v57  ;;  %v3092_v20 = vcombine.high %v3047_v47, %v3079_v21  ;;  %v3239_v23 = vrot.slane %v3231_v59, %v14347_v5  ;;  %v3327_v42 = vcombine.low %v3271_v63, %v3287_v45 }
 0x3c9   : > { %7583 = vrot.lane.b32.xlu1 %v3091_v13, %s14267_s6  ;;  %v3054_v13 = vrot.slane %v3040_v7, %v15696_v38  ;;  %v3280_v7 = vcombine.high %v23673_v52, %v23672_v55  ;;  %v3328_v59 = vcombine.high %v3271_v63, %v3287_v45 }
 0x3ca   : > { %v3295_v21 = vcombine.low %v3239_v23, %v3255_v56  ;;  %v3335_v54 = vrot.slane %v3327_v42, %v15696_v38  ;;  %v3264_v42 = vcombine.high %v23679_v34, %v23678_v44 }
 0x3cb   : > { %v15762_v49 = vpop.permute.xlu1 %2815  ;;  %v15765_v57 = vpop.permute.xlu0 %2781  ;;  %v3093_v60 = vcombine.low %v3054_v13, %v3086_v12  ;;  %v3094_v0 = vcombine.high %v3054_v13, %v3086_v12  ;;  %v3248_v12 = vcombine.high %v23677_v1, %v23676_v24  ;;  %v3296_v13 = vcombine.high %v3239_v23, %v3255_v56 }
 0x3cc   : > { %23682 = vst [vmem:[#allocation32_spill] sm:$0xff] %v15765_v57  ;;  %v3294_v55 = vrot.slane %v3280_v7, %v14347_v5  ;;  %v3342_v63 = vrot.slane %v3328_v59, %v15696_v38  ;;  %v3278_v23 = vrot.slane %v3264_v42, %v14347_v5  ;;  %v23693_v42 = vld [vmem:[#allocation49_spill] sm:$0xff] }
 0x3cd   : > { %7587 = vrot.lane.b32.xlu1 %v3092_v20, %s14267_s6  ;;  %v3303_v20 = vrot.slane %v3295_v21, %v15696_v38  ;;  %v3262_v24 = vrot.slane %v3248_v12, %v14347_v5  ;;  %v3310_v34 = vrot.slane %v3296_v13, %v15696_v38  ;;  %v23692_v13 = vld [vmem:[#allocation54_spill] sm:$0xff] }
 0x3ce   : > { %v3343_v1 = vcombine.low %v3278_v23, %v3294_v55  ;;  %v3344_v12 = vcombine.high %v3278_v23, %v3294_v55 }
 0x3cf   : > { %v15772_v27 = vpop.permute.xlu1 %2819  ;;  %v15774_v26 = vpop.permute.xlu0 %2817  ;;  %v3359_v50 = vcombine.low %v3303_v20, %v3335_v54  ;;  %v3360_v45 = vcombine.high %v3303_v20, %v3335_v54  ;;  %v3362_v54 = vcombine.high %v3310_v34, %v3342_v63 }
 0x3d0   : > { %v3351_v20 = vrot.slane %v3343_v1, %v15696_v38  ;;  %v23698_v1 = vld [vmem:[#allocation52_spill] sm:$0xff]  ;;  %v3358_v61 = vrot.slane %v3344_v12, %v15696_v38 }
 0x3d1   : > { %7591 = vrot.lane.b32.xlu1 %v3093_v60, %s14267_s6  ;;  %v3232_v60 = vcombine.high %v23681_v10, %v23680_v3  ;;  %v3361_v3 = vcombine.low %v3310_v34, %v3342_v63  ;;  %v23697_v63 = vld [vmem:[#allocation38_spill] sm:$0xff] }
 0x3d3   : > { %v15777_v47 = vpop.permute.xlu1 %2823  ;;  %v15780_v4 = vpop.permute.xlu0 %2821 }
 0x3d4   : > { %23683 = vst [vmem:[#allocation26_spill] sm:$0xff] %v15777_v47 }
 0x3d5   : > { %7595 = vrot.lane.b32.xlu1 %v3094_v0, %s14267_s6 }
 0x3d7   : > { %v15786_v57 = vpop.permute.xlu1 %2827  ;;  %v15788_v32 = vpop.permute.xlu0 %2825 }
 0x3d8   : > { %23684 = vst [vmem:[#allocation37_spill] sm:$0xff] %v15786_v57  ;;  %23685 = vst [vmem:[#allocation7_spill] sm:$0xff] %v15788_v32 }
 0x3d9   : > { %7599 = vrot.lane.b32.xlu1 %v3359_v50, %s14267_s6  ;;  %v3246_v50 = vrot.slane %v3232_v60, %v14347_v5  ;;  %v3551_v60 = vcombine.low %v23693_v42, %v23692_v13 }
 0x3db   : > { %v15798_v52 = vpop.permute.xlu1 %2831  ;;  %v15801_v21 = vpop.permute.xlu0 %2829  ;;  %v3311_v56 = vcombine.low %v3246_v50, %v3262_v24  ;;  %v3559_v23 = vrot.slane %v3551_v60, %v14347_v5 }
 0x3dc   : > { %23686 = vst [vmem:[#allocation28_spill] sm:$0xff] %v15798_v52  ;;  %23687 = vst [vmem:[#allocation6_spill] sm:$0xff] %v15801_v21  ;;  %v23699_v52 = vld [vmem:[#allocation10_spill] sm:$0xff] }
 0x3dd   : > { %7603 = vrot.lane.b32.xlu1 %v3360_v45, %s14267_s6  ;;  %v3319_v59 = vrot.slane %v3311_v56, %v15696_v38  ;;  %v23701_v56 = vld [vmem:[#allocation8_spill] sm:$0xff] }
 0x3df   : > { %v15808_v44 = vpop.permute.xlu1 %2835  ;;  %v15810_v10 = vpop.permute.xlu0 %2833 }
 0x3e0   : > { %23688 = vst [vmem:[#allocation185_spill] sm:$0xff] %v15808_v44  ;;  %23689 = vst [vmem:[#allocation186_spill] sm:$0xff] %v15810_v10  ;;  %v3363_v44 = vcombine.low %v3319_v59, %v3351_v20 }
 0x3e1   : > { %7607 = vrot.lane.b32.xlu1 %v3361_v3, %s14267_s6  ;;  %v3312_v3 = vcombine.high %v3246_v50, %v3262_v24 }
 0x3e3   : > { %v15813_v0 = vpop.permute.xlu1 %2839  ;;  %v15816_v7 = vpop.permute.xlu0 %2837 }
 0x3e4   : > { %23690 = vst [vmem:[#allocation187_spill] sm:$0xff] %v15813_v0  ;;  %23691 = vst [vmem:[#allocation188_spill] sm:$0xff] %v15816_v7  ;;  %v23696_v0 = vld [vmem:[#allocation44_spill] sm:$0xff]  ;;  %v3535_v7 = vcombine.low %v23699_v52, %v23698_v1 }
 0x3e5   : > { %7611 = vrot.lane.b32.xlu1 %v3362_v54, %s14267_s6  ;;  %v3519_v34 = vcombine.low %v23697_v63, %v23696_v0  ;;  %v23700_v54 = vld [vmem:[#allocation41_spill] sm:$0xff] }
 0x3e6   : > { %v3503_v55 = vcombine.low %v23701_v56, %v23700_v54  ;;  %v3543_v50 = vrot.slane %v3535_v7, %v14347_v5 }
 0x3e7   : > { %v15822_v45 = vpop.permute.xlu1 %2843  ;;  %v15824_v10 = vpop.permute.xlu0 %2841  ;;  %v3527_v24 = vrot.slane %v3519_v34, %v14347_v5 }
 0x3e8   : > { %23694 = vst [vmem:[#allocation54_spill] sm:$0xff] %v15822_v45  ;;  %23695 = vst [vmem:[#allocation49_spill] sm:$0xff] %v15824_v10  ;;  %v3364_v45 = vcombine.high %v3319_v59, %v3351_v20  ;;  %v3511_v29 = vrot.slane %v3503_v55, %v14347_v5  ;;  %v3599_v57 = vcombine.low %v3543_v50, %v3559_v23 }
 0x3e9   : > { %7615 = vrot.lane.b32.xlu1 %v3363_v44, %s14267_s6  ;;  %v3326_v44 = vrot.slane %v3312_v3, %v15696_v38  ;;  %v3552_v3 = vcombine.high %v23693_v42, %v23692_v13  ;;  %v3600_v34 = vcombine.high %v3543_v50, %v3559_v23 }
 0x3ea   : > { %v3567_v30 = vcombine.low %v3511_v29, %v3527_v24  ;;  %v3607_v7 = vrot.slane %v3599_v57, %v15696_v38  ;;  %v3568_v46 = vcombine.high %v3511_v29, %v3527_v24 }
 0x3eb   : > { %v15834_v21 = vpop.permute.xlu1 %2863  ;;  %v15837_v10 = vpop.permute.xlu0 %2845  ;;  %v3365_v60 = vcombine.low %v3326_v44, %v3358_v61  ;;  %v3366_v12 = vcombine.high %v3326_v44, %v3358_v61  ;;  %v3536_v61 = vcombine.high %v23699_v52, %v23698_v1  ;;  %v3566_v57 = vrot.slane %v3552_v3, %v14347_v5 }
 0x3ec   : > { %23702 = vst [vmem:[#allocation44_spill] sm:$0xff] %v15837_v10  ;;  %v3614_v23 = vrot.slane %v3600_v34, %v15696_v38 }
 0x3ed   : > { %7619 = vrot.lane.b32.xlu1 %v3364_v45, %s14267_s6  ;;  %v3575_v45 = vrot.slane %v3567_v30, %v15696_v38  ;;  %v3504_v30 = vcombine.high %v23701_v56, %v23700_v54 }
 0x3ef   : > { %v15844_v41 = vpop.permute.xlu1 %2867  ;;  %v15846_v20 = vpop.permute.xlu0 %2865  ;;  %v3631_v11 = vcombine.low %v3575_v45, %v3607_v7  ;;  %v3632_v42 = vcombine.high %v3575_v45, %v3607_v7  ;;  %v3518_v52 = vrot.slane %v3504_v30, %v14347_v5  ;;  %v23710_v45 = vld [vmem:[#allocation31_spill] sm:$0xff] }
 0x3f0   : > { %v3111_v3 = vcombine.low %v23710_v45, %v15678_v28 }
 0x3f1   : > { %7623 = vrot.lane.b32.xlu1 %v3365_v60, %s14267_s6  ;;  %v3520_v60 = vcombine.high %v23697_v63, %v23696_v0  ;;  %v3550_v0 = vrot.slane %v3536_v61, %v14347_v5  ;;  %v23712_v61 = vld [vmem:[#allocation53_spill] sm:$0xff] }
 0x3f3   : > { %v15849_v59 = vpop.permute.xlu1 %2871  ;;  %v15856_v55 = vpop.permute.xlu0 %2869  ;;  %v3534_v50 = vrot.slane %v3520_v60, %v14347_v5  ;;  %v3615_v63 = vcombine.low %v3550_v0, %v3566_v57  ;;  %v3616_v34 = vcombine.high %v3550_v0, %v3566_v57  ;;  %v23711_v60 = vld [vmem:[#allocation58_spill] sm:$0xff]  ;;  %v3119_v57 = vrot.slane %v3111_v3, %v14347_v5 }
 0x3f4   : > { %23703 = vst [vmem:[#allocation38_spill] sm:$0xff] %v15849_v59  ;;  %v3823_v30 = vcombine.low %v23712_v61, %v23711_v60  ;;  %v3127_v0 = vcombine.low %v15440_v8, %v15834_v21 }
 0x3f5   : > { %7627 = vrot.lane.b32.xlu1 %v3366_v12, %s14267_s6  ;;  %v3583_v56 = vcombine.low %v3518_v52, %v3534_v50  ;;  %v3623_v7 = vrot.slane %v3615_v63, %v15696_v38  ;;  %v23715_v63 = vld [vmem:[#allocation42_spill] sm:$0xff]  ;;  %v3630_v32 = vrot.slane %v3616_v34, %v15696_v38 }
 0x3f6   : > { %v3135_v37 = vrot.slane %v3127_v0, %v14347_v5 }
 0x3f7   : > { %v15858_v10 = vpop.permute.xlu1 %2875  ;;  %v15873_v29 = vpop.permute.xlu0 %2873 }
 0x3f8   : > { %23704 = vst [vmem:[#allocation52_spill] sm:$0xff] %v15858_v10  ;;  %23706 = vst [vmem:[#allocation41_spill] sm:$0xff] %v15873_v29  ;;  %v23720_v10 = vld [vmem:[#allocation9_spill] sm:$0xff] }
 0x3f9   : > { %7631 = vrot.lane.b32.xlu1 %v3631_v11, %s14267_s6  ;;  %v3582_v11 = vrot.slane %v3568_v46, %v15696_v38  ;;  %v3591_v46 = vrot.slane %v3583_v56, %v15696_v38 }
 0x3fb   : > { %v15868_v13 = vpop.permute.xlu1 %2879  ;;  %v3633_v54 = vcombine.low %v3582_v11, %v3614_v23  ;;  %v15881_v24 = vpop.permute.xlu0 %2877  ;;  %v3634_v12 = vcombine.high %v3582_v11, %v3614_v23  ;;  %v3584_v23 = vcombine.high %v3518_v52, %v3534_v50  ;;  %v23714_v11 = vld [vmem:[#allocation47_spill] sm:$0xff]  ;;  %v3831_v50 = vrot.slane %v3823_v30, %v14347_v5 }
 0x3fc   : > { %23705 = vst [vmem:[#allocation10_spill] sm:$0xff] %v15868_v13  ;;  %23708 = vst [vmem:[#allocation189_spill] sm:$0xff] %v15881_v24  ;;  %v23717_v13 = vld [vmem:[#allocation11_spill] sm:$0xff]  ;;  %v3636_v48 = vcombine.high %v3591_v46, %v3623_v7 }
 0x3fd   : > { %7635 = vrot.lane.b32.xlu1 %v3632_v42, %s14267_s6  ;;  %v3598_v29 = vrot.slane %v3584_v23, %v15696_v38 }
 0x3ff   : > { %v15878_v1 = vpop.permute.xlu1 %2883  ;;  %v15900_v24 = vpop.permute.xlu0 %2881  ;;  %v3637_v35 = vcombine.low %v3598_v29, %v3630_v32  ;;  %v3638_v0 = vcombine.high %v3598_v29, %v3630_v32  ;;  %v3128_v32 = vcombine.high %v15440_v8, %v15834_v21 }
 0x400   : > { %23707 = vst [vmem:[#allocation8_spill] sm:$0xff] %v15878_v1  ;;  %v3791_v1 = vcombine.low %v23715_v63, %v23714_v11  ;;  %23718 = vst [vmem:[#allocation58_spill] sm:$0xff] %v15900_v24 }
 0x401   : > { %7639 = vrot.lane.b32.xlu1 %v3633_v54, %s14267_s6  ;;  %v3635_v54 = vcombine.low %v3591_v46, %v3623_v7 }
 0x403   : > { %v15883_v44 = vpop.permute.xlu1 %2887  ;;  %v15919_v34 = vpop.permute.xlu0 %2885 }
 0x404   : > { %23709 = vst [vmem:[#allocation190_spill] sm:$0xff] %v15883_v44  ;;  %v3095_v44 = vcombine.low %v14800_v53, %v15605_v43  ;;  %23721 = vst [vmem:[#allocation53_spill] sm:$0xff] %v15919_v34 }
 0x405   : > { %7643 = vrot.lane.b32.xlu1 %v3634_v12, %s14267_s6  ;;  %v23716_v12 = vld [vmem:[#allocation55_spill] sm:$0xff] }
 0x406   : > { %v3807_v56 = vcombine.low %v23717_v13, %v23716_v12  ;;  %v3103_v36 = vrot.slane %v3095_v44, %v14347_v5 }
 0x407   : > { %v15892_v42 = vpop.permute.xlu1 %2891  ;;  %v15930_v6 = vpop.permute.xlu0 %2889 }
 0x408   : > { %23713 = vst [vmem:[#allocation31_spill] sm:$0xff] %v15892_v42  ;;  %v23719_v42 = vld [vmem:[#allocation45_spill] sm:$0xff]  ;;  %v3815_v3 = vrot.slane %v3807_v56, %v14347_v5  ;;  %v3159_v2 = vcombine.low %v3103_v36, %v3119_v57  ;;  %23723 = vst [vmem:[#allocation42_spill] sm:$0xff] %v15930_v6 }
 0x409   : > { %7647 = vrot.lane.b32.xlu1 %v3635_v54, %s14267_s6  ;;  %v3775_v14 = vcombine.low %v23720_v10, %v23719_v42  ;;  %v3799_v54 = vrot.slane %v3791_v1, %v14347_v5 }
 0x40a   : > { %v3871_v46 = vcombine.low %v3815_v3, %v3831_v50  ;;  %v3872_v29 = vcombine.high %v3815_v3, %v3831_v50 }
 0x40b   : > { %v2912_v52 = vpop.permute.xlu1 %2911  ;;  %v3783_v7 = vrot.slane %v3775_v14, %v14347_v5 }
 0x40c   : > { %v3143_v24 = vcombine.low %v15762_v49, %v2912_v52  ;;  %v3144_v14 = vcombine.high %v15762_v49, %v2912_v52  ;;  %v3824_v49 = vcombine.high %v23712_v61, %v23711_v60  ;;  %v3142_v61 = vrot.slane %v3128_v32, %v14347_v5 }
 0x40d   : > { %7651 = vrot.lane.b32.xlu1 %v3636_v48, %s14267_s6  ;;  %v3839_v9 = vcombine.low %v3783_v7, %v3799_v54  ;;  %v3167_v48 = vrot.slane %v3159_v2, %v15696_v38  ;;  %v3792_v2 = vcombine.high %v23715_v63, %v23714_v11  ;;  %v3096_v11 = vcombine.high %v14800_v53, %v15605_v43 }
 0x40e   : > { %v3151_v30 = vrot.slane %v3143_v24, %v14347_v5  ;;  %v3879_v24 = vrot.slane %v3871_v46, %v15696_v38  ;;  %v3840_v21 = vcombine.high %v3783_v7, %v3799_v54  ;;  %v3838_v43 = vrot.slane %v3824_v49, %v14347_v5 }
 0x40f   : > { %v15921_v44 = vpop.permute.xlu1 %2915  ;;  %v3847_v47 = vrot.slane %v3839_v9, %v15696_v38  ;;  %v3886_v63 = vrot.slane %v3872_v29, %v15696_v38 }
 0x410   : > { %v3191_v1 = vcombine.low %v3135_v37, %v3151_v30  ;;  %v3192_v59 = vcombine.high %v3135_v37, %v3151_v30  ;;  %v3776_v37 = vcombine.high %v23720_v10, %v23719_v42  ;;  %v3808_v10 = vcombine.high %v23717_v13, %v23716_v12 }
 0x411   : > { %7655 = vrot.lane.b32.xlu1 %v3637_v35, %s14267_s6  ;;  %v3112_v35 = vcombine.high %v23710_v45, %v15678_v28  ;;  %v3903_v52 = vcombine.low %v3847_v47, %v3879_v24  ;;  %v15950_v28 = vrot.slane %v3144_v14, %v14347_v5  ;;  %v3806_v45 = vrot.slane %v3792_v2, %v14347_v5  ;;  %v23728_v14 = vld [vmem:[#allocation60_spill] sm:$0xff] }
 0x412   : > { %v3199_v23 = vrot.slane %v3191_v1, %v15696_v38  ;;  %v3160_v1 = vcombine.high %v3103_v36, %v3119_v57  ;;  %v3206_v8 = vrot.slane %v3192_v59, %v15696_v38  ;;  %v15964_v59 = vpop.permute.xlu0 %2893  ;;  %v3904_v13 = vcombine.high %v3847_v47, %v3879_v24  ;;  %v23729_v2 = vld [vmem:[#allocation12_spill] sm:$0xff] }
 0x413   : > { %v15926_v56 = vpop.permute.xlu1 %2919  ;;  %v15958_v60 = vrot.slane %v3112_v35, %v14347_v5  ;;  %23725 = vst [vmem:[#allocation11_spill] sm:$0xff] %v15964_v59  ;;  %v3790_v12 = vrot.slane %v3776_v37, %v14347_v5  ;;  %v3110_v57 = vrot.slane %v3096_v11, %v14347_v5  ;;  %v3207_v50 = vcombine.low %v3142_v61, %v15950_v28  ;;  %v23731_v11 = vld [vmem:[#allocation57_spill] sm:$0xff]  ;;  %v23742_v59 = vld [vmem:[#allocation15_spill] sm:$0xff] }
 0x414   : > { %23722 = vst [vmem:[#allocation47_spill] sm:$0xff] %v15926_v56  ;;  %v3223_v34 = vcombine.low %v3167_v48, %v3199_v23  ;;  %v3224_v36 = vcombine.high %v3167_v48, %v3199_v23  ;;  %v3174_v53 = vrot.slane %v3160_v1, %v15696_v38  ;;  %v3822_v3 = vrot.slane %v3808_v10, %v14347_v5 }
 0x415   : > { %7659 = vrot.lane.b32.xlu1 %v3638_v0, %s14267_s6  ;;  %v3854_v30 = vrot.slane %v3840_v21, %v15696_v38  ;;  %v3855_v7 = vcombine.low %v3790_v12, %v3806_v45  ;;  %v3856_v46 = vcombine.high %v3790_v12, %v3806_v45  ;;  %v3215_v24 = vrot.slane %v3207_v50, %v15696_v38 }
 0x416   : > { %7569 = vrot.lane.b32.xlu0 %v3223_v34, %s14267_s6  ;;  %v3225_v54 = vcombine.low %v3174_v53, %v3206_v8  ;;  %v3175_v34 = vcombine.low %v3110_v57, %v15958_v60  ;;  %v3887_v47 = vcombine.low %v3822_v3, %v3838_v43  ;;  %v3226_v0 = vcombine.high %v3174_v53, %v3206_v8  ;;  %v15984_v32 = vpop.permute.xlu0 %2913 }
 0x417   : > { %v15945_v9 = vpop.permute.xlu1 %2923  ;;  %v3905_v23 = vcombine.low %v3854_v30, %v3886_v63  ;;  %v4047_v35 = vcombine.low %v23729_v2, %v23728_v14  ;;  %v4048_v1 = vcombine.high %v23729_v2, %v23728_v14  ;;  %v3863_v49 = vrot.slane %v3855_v7, %v15696_v38 }
 0x418   : > { %23724 = vst [vmem:[#allocation55_spill] sm:$0xff] %v15945_v9  ;;  %v3183_v37 = vrot.slane %v3175_v34, %v15696_v38  ;;  %v15991_v29 = vrot.slane %v3856_v46, %v15696_v38  ;;  %v3906_v10 = vcombine.high %v3854_v30, %v3886_v63  ;;  %v3895_v45 = vrot.slane %v3887_v47, %v15696_v38  ;;  %v23733_v46 = vld [vmem:[#allocation63_spill] sm:$0xff]  ;;  %v23734_v34 = vld [vmem:[#allocation13_spill] sm:$0xff]  ;;  %v23735_v63 = vld [vmem:[#allocation66_spill] sm:$0xff] }
 0x419   : > { %7663 = vrot.lane.b32.xlu1 %v3903_v52, %s14267_s6  ;;  %v23730_v52 = vld [vmem:[#allocation62_spill] sm:$0xff]  ;;  %v3888_v53 = vcombine.high %v3822_v3, %v3838_v43  ;;  %v3415_v12 = vcombine.low %v15774_v26, %v15984_v32  ;;  %v4062_v7 = vrot.slane %v4048_v1, %v14347_v5  ;;  %v23736_v43 = vld [vmem:[#allocation61_spill] sm:$0xff]  ;;  %v3399_v47 = vcombine.low %v15460_v62, %v15846_v20  ;;  %v23739_v1 = vld [vmem:[#allocation68_spill] sm:$0xff] }
 0x41a   : > { %7573 = vrot.lane.b32.xlu0 %v3224_v36, %s14267_s6  ;;  %v4063_v36 = vcombine.low %v23731_v11, %v23730_v52  ;;  %v4064_v8 = vcombine.high %v23731_v11, %v23730_v52  ;;  %v3227_v50 = vcombine.low %v3183_v37, %v3215_v24  ;;  %v4335_v3 = vcombine.low %v23736_v43, %v23735_v63 }
 0x41b   : > { %v15966_v42 = vpop.permute.xlu1 %2927 }
 0x41c   : > { %23726 = vst [vmem:[#allocation45_spill] sm:$0xff] %v15966_v42  ;;  %v4071_v14 = vrot.slane %v4063_v36, %v14347_v5  ;;  %v4078_v2 = vrot.slane %v4064_v8, %v14347_v5  ;;  %v4336_v36 = vcombine.high %v23736_v43, %v23735_v63  ;;  %v23741_v8 = vld [vmem:[#allocation70_spill] sm:$0xff]  ;;  %v23758_v42 = vld [vmem:[#allocation79_spill] sm:$0xff] }
 0x41d   : > { %7667 = vrot.lane.b32.xlu1 %v3904_v13, %s14267_s6  ;;  %v3208_v13 = vcombine.high %v3142_v61, %v15950_v28  ;;  %v3176_v28 = vcombine.high %v3110_v57, %v15958_v60  ;;  %v23737_v61 = vld [vmem:[#allocation33_spill] sm:$0xff]  ;;  %v3367_v60 = vcombine.low %v14810_v58, %v15615_v15  ;;  %v16027_v57 = vrot.slane %v3415_v12, %v14347_v5 }
 0x41e   : > { %7577 = vrot.lane.b32.xlu0 %v3225_v54, %s14267_s6  ;;  %v4055_v54 = vrot.slane %v4047_v35, %v14347_v5  ;;  %v3383_v30 = vcombine.low %v23737_v61, %v15691_v18  ;;  %v23738_v35 = vld [vmem:[#allocation73_spill] sm:$0xff]  ;;  %v4079_v6 = vcombine.low %v23742_v59, %v23741_v8 }
 0x41f   : > { %v15977_v48 = vpop.permute.xlu1 %2931  ;;  %v4095_v52 = vcombine.low %v23739_v1, %v23738_v35 }
 0x420   : > { %23727 = vst [vmem:[#allocation9_spill] sm:$0xff] %v15977_v48  ;;  %v16039_v12 = vrot.slane %v3383_v30, %v14347_v5  ;;  %v4128_v48 = vcombine.high %v4062_v7, %v4078_v2 }
 0x421   : > { %7671 = vrot.lane.b32.xlu1 %v3905_v23, %s14267_s6  ;;  %v4319_v23 = vcombine.low %v23734_v34, %v23733_v46  ;;  %v16047_v63 = vrot.slane %v4095_v52, %v14347_v5 }
 0x422   : > { %7581 = vrot.lane.b32.xlu0 %v3226_v0, %s14267_s6  ;;  %v4320_v0 = vcombine.high %v23734_v34, %v23733_v46  ;;  %v3228_v46 = vcombine.high %v3183_v37, %v3215_v24  ;;  %v3222_v34 = vrot.slane %v3208_v13, %v15696_v38  ;;  %v16042_v24 = vrot.slane %v3399_v47, %v14347_v5 }
 0x423   : > { %v15997_v21 = vpop.permute.xlu1 %2935  ;;  %v3190_v37 = vrot.slane %v3176_v28, %v15696_v38  ;;  %v4111_v13 = vcombine.low %v4055_v54, %v4071_v14  ;;  %v4096_v28 = vcombine.high %v23739_v1, %v23738_v35 }
 0x424   : > { %23732 = vst [vmem:[#allocation60_spill] sm:$0xff] %v15997_v21  ;;  %v4343_v21 = vrot.slane %v4335_v3, %v14347_v5  ;;  %v16052_v3 = vrot.slane %v3367_v60, %v14347_v5  ;;  %v3463_v30 = vcombine.low %v16042_v24, %v16027_v57 }
 0x425   : > { %7675 = vrot.lane.b32.xlu1 %v3906_v10, %s14267_s6  ;;  %v3907_v10 = vcombine.low %v3863_v49, %v3895_v45  ;;  %v3229_v47 = vcombine.low %v3190_v37, %v3222_v34  ;;  %v3230_v60 = vcombine.high %v3190_v37, %v3222_v34 }
 0x426   : > { %7585 = vrot.lane.b32.xlu0 %v3227_v50, %s14267_s6  ;;  %v4327_v50 = vrot.slane %v4319_v23, %v14347_v5  ;;  %v4112_v23 = vcombine.high %v4055_v54, %v4071_v14  ;;  %v4087_v54 = vrot.slane %v4079_v6, %v14347_v5  ;;  %v3431_v52 = vcombine.low %v16052_v3, %v16039_v12 }
 0x427   : > { %v16022_v11 = vpop.permute.xlu1 %2939 }
 0x428   : > { %23740 = vst [vmem:[#allocation12_spill] sm:$0xff] %v16022_v11  ;;  %v3902_v11 = vrot.slane %v3888_v53, %v15696_v38  ;;  %v3908_v53 = vcombine.high %v3863_v49, %v3895_v45  ;;  %v16064_v49 = vrot.slane %v4320_v0, %v14347_v5  ;;  %v4383_v45 = vcombine.low %v4327_v50, %v4343_v21 }
 0x429   : > { %7679 = vrot.lane.b32.xlu1 %v3907_v10, %s14267_s6  ;;  %v4127_v10 = vcombine.low %v4062_v7, %v4078_v2  ;;  %v4384_v14 = vcombine.high %v4327_v50, %v4343_v21  ;;  %v4080_v7 = vcombine.high %v23742_v59, %v23741_v8  ;;  %v4143_v6 = vcombine.low %v4087_v54, %v16047_v63 }
 0x42a   : > { %7589 = vrot.lane.b32.xlu0 %v3228_v46, %s14267_s6  ;;  %v16057_v46 = vrot.slane %v4336_v36, %v14347_v5  ;;  %v3909_v35 = vcombine.low %v15991_v29, %v3902_v11  ;;  %v3910_v1 = vcombine.high %v15991_v29, %v3902_v11  ;;  %v3471_v0 = vrot.slane %v3463_v30, %v15696_v38 }
 0x42b   : > { %v16049_v43 = vpop.permute.xlu1 %7567  ;;  %v4119_v21 = vrot.slane %v4111_v13, %v15696_v38  ;;  %v16077_v50 = vrot.slane %v4112_v23, %v15696_v38  ;;  %v16082_v59 = vrot.slane %v4096_v28, %v14347_v5  ;;  %v16086_v8 = vrot.slane %v4127_v10, %v15696_v38  ;;  %v23744_v10 = vld [vmem:[#allocation17_spill] sm:$0xff] }
 0x42c   : > { %v4399_v36 = vcombine.low %v16064_v49, %v16057_v46  ;;  %v16089_v29 = vrot.slane %v4128_v48, %v15696_v38  ;;  %v4400_v11 = vcombine.high %v16064_v49, %v16057_v46  ;;  %v3439_v34 = vrot.slane %v3431_v52, %v15696_v38 }
 0x42d   : > { %7683 = vrot.lane.b32.xlu1 %v3908_v53, %s14267_s6  ;;  %v16096_v37 = vrot.slane %v4383_v45, %v15696_v38  ;;  %v16099_v13 = vrot.slane %v4384_v14, %v15696_v38  ;;  %v4094_v23 = vrot.slane %v4080_v7, %v14347_v5  ;;  %v23743_v53 = vld [vmem:[#allocation74_spill] sm:$0xff]  ;;  %v3416_v48 = vcombine.high %v15774_v26, %v15984_v32 }
 0x42e   : > { %7593 = vrot.lane.b32.xlu0 %v3229_v47, %s14267_s6  ;;  %v4351_v30 = vcombine.low %v23744_v10, %v23743_v53  ;;  %v4151_v28 = vrot.slane %v4143_v6, %v15696_v38  ;;  %v4352_v45 = vcombine.high %v23744_v10, %v23743_v53  ;;  %v3464_v14 = vcombine.high %v16042_v24, %v16027_v57  ;;  %v23746_v6 = vld [vmem:[#allocation71_spill] sm:$0xff] }
 0x42f   : > { %v7572_v2 = vpop.permute.xlu1 %7571  ;;  %v3495_v52 = vcombine.low %v3439_v34, %v3471_v0  ;;  %v4159_v7 = vcombine.low %v4094_v23, %v16082_v59  ;;  %v3432_v26 = vcombine.high %v16052_v3, %v16039_v12  ;;  %v3400_v32 = vcombine.high %v15460_v62, %v15846_v20 }
 0x430   : > { %v16131_v62 = vrot.slane %v3416_v48, %v14347_v5  ;;  %v4175_v12 = vcombine.low %v4119_v21, %v4151_v28 }
 0x431   : > { %7687 = vrot.lane.b32.xlu1 %v3909_v35, %s14267_s6  ;;  %v4144_v35 = vcombine.high %v4087_v54, %v16047_v63  ;;  %v4160_v63 = vcombine.high %v4094_v23, %v16082_v59  ;;  %v23745_v54 = vld [vmem:[#allocation77_spill] sm:$0xff]  ;;  %v3496_v59 = vcombine.high %v3439_v34, %v3471_v0  ;;  %v3478_v23 = vrot.slane %v3464_v14, %v15696_v38 }
 0x432   : > { %7597 = vrot.lane.b32.xlu0 %v3230_v60, %s14267_s6  ;;  %v3384_v60 = vcombine.high %v23737_v61, %v15691_v18  ;;  %v4367_v53 = vcombine.low %v23746_v6, %v23745_v54  ;;  %v4368_v18 = vcombine.high %v23746_v6, %v23745_v54  ;;  %v3368_v61 = vcombine.high %v14810_v58, %v15615_v15  ;;  %v23755_v54 = vld [vmem:[#allocation46_spill] sm:$0xff] }
 0x433   : > { %v7576_v47 = vpop.permute.xlu1 %7575  ;;  %v16138_v10 = vrot.slane %v3400_v32, %v14347_v5  ;;  %v3446_v58 = vrot.slane %v3432_v26, %v15696_v38  ;;  %v4158_v15 = vrot.slane %v4144_v35, %v15696_v38  ;;  %v3671_v32 = vcombine.low %v15454_v40, %v15844_v41 }
 0x434   : > { %v8335_v57 = vcombine.low %v16049_v43, %v7576_v47  ;;  %v8336_v24 = vcombine.high %v16049_v43, %v7576_v47  ;;  %v16135_v43 = vrot.slane %v3384_v60, %v14347_v5  ;;  %v4375_v47 = vrot.slane %v4367_v53, %v14347_v5 }
 0x435   : > { %7691 = vrot.lane.b32.xlu1 %v3910_v1, %s14267_s6  ;;  %v4382_v14 = vrot.slane %v4368_v18, %v14347_v5  ;;  %v16159_v35 = vrot.slane %v3368_v61, %v14347_v5  ;;  %v4176_v60 = vcombine.high %v4119_v21, %v4151_v28  ;;  %v3479_v26 = vcombine.low %v16138_v10, %v16131_v62 }
 0x436   : > { %7601 = vrot.lane.b32.xlu0 %v3495_v52, %s14267_s6  ;;  %v16144_v48 = vrot.slane %v8335_v57, %v14347_v5  ;;  %v3497_v6 = vcombine.low %v3446_v58, %v3478_v23  ;;  %v4359_v53 = vrot.slane %v4351_v30, %v14347_v5  ;;  %v23749_v57 = vld [vmem:[#allocation78_spill] sm:$0xff]  ;;  %v16176_v21 = vrot.slane %v4159_v7, %v15696_v38 }
 0x437   : > { %v7580_v20 = vpop.permute.xlu1 %7579  ;;  %v4366_v28 = vrot.slane %v4352_v45, %v14347_v5  ;;  %v16183_v30 = vrot.slane %v4160_v63, %v15696_v38  ;;  %v16196_v45 = vrot.slane %v4400_v11, %v15696_v38 }
 0x438   : > { %v8351_v3 = vcombine.low %v7572_v2, %v7580_v20  ;;  %v8352_v1 = vcombine.high %v7572_v2, %v7580_v20  ;;  %v16147_v2 = vrot.slane %v8336_v24, %v14347_v5  ;;  %v23750_v24 = vld [vmem:[#allocation18_spill] sm:$0xff]  ;;  %v3447_v20 = vcombine.low %v16159_v35, %v16135_v43 }
 0x439   : > { %7695 = vrot.lane.b32.xlu1 %v4175_v12, %s14267_s6  ;;  %v4591_v18 = vcombine.low %v23750_v24, %v23749_v57  ;;  %v4592_v61 = vcombine.high %v23750_v24, %v23749_v57  ;;  %v16189_v12 = vrot.slane %v4399_v36, %v15696_v38  ;;  %v4432_v63 = vcombine.high %v4366_v28, %v4382_v14 }
 0x43a   : > { %23747 = vst [vmem:[#allocation62_spill] sm:$0xff] %v16147_v2  ;;  %v16150_v0 = vrot.slane %v8351_v3, %v14347_v5  ;;  %v16153_v34 = vrot.slane %v8352_v1, %v14347_v5  ;;  %7605 = vrot.lane.b32.xlu0 %v3496_v59, %s14267_s6  ;;  %v4415_v3 = vcombine.low %v4359_v53, %v4375_v47 }
 0x43b   : > { %v16161_v52 = vpop.permute.xlu1 %7583  ;;  %v4416_v1 = vcombine.high %v4359_v53, %v4375_v47  ;;  %v4177_v59 = vcombine.low %v16077_v50, %v4158_v15  ;;  %v3487_v57 = vrot.slane %v3479_v26, %v15696_v38  ;;  %v16200_v24 = vrot.slane %v4591_v18, %v14347_v5  ;;  %v23752_v26 = vld [vmem:[#allocation76_spill] sm:$0xff]  ;;  %v23754_v18 = vld [vmem:[#allocation19_spill] sm:$0xff] }
 0x43c   : > { %23748 = vst [vmem:[#allocation57_spill] sm:$0xff] %v16153_v34  ;;  %v16203_v36 = vrot.slane %v4592_v61, %v14347_v5  ;;  %v4178_v47 = vcombine.high %v16077_v50, %v4158_v15  ;;  %v4179_v46 = vcombine.low %v16086_v8, %v16176_v21  ;;  %v3455_v49 = vrot.slane %v3447_v20, %v15696_v38  ;;  %v23753_v15 = vld [vmem:[#allocation82_spill] sm:$0xff] }
 0x43d   : > { %7699 = vrot.lane.b32.xlu1 %v4176_v60, %s14267_s6  ;;  %v4431_v60 = vcombine.low %v4366_v28, %v4382_v14  ;;  %v4180_v11 = vcombine.high %v16086_v8, %v16176_v21  ;;  %v23751_v14 = vld [vmem:[#allocation81_spill] sm:$0xff]  ;;  %v4863_v61 = vcombine.low %v23754_v18, %v23753_v15  ;;  %v3687_v28 = vcombine.low %v15772_v27, %v15921_v44 }
 0x43e   : > { %7609 = vrot.lane.b32.xlu0 %v3497_v6, %s14267_s6  ;;  %v3498_v6 = vcombine.high %v3446_v58, %v3478_v23  ;;  %v4607_v53 = vcombine.low %v23752_v26, %v23751_v14  ;;  %v4608_v50 = vcombine.high %v23752_v26, %v23751_v14  ;;  %v4864_v8 = vcombine.high %v23754_v18, %v23753_v15  ;;  %v23757_v23 = vld [vmem:[#allocation85_spill] sm:$0xff] }
 0x43f   : > { %v7588_v7 = vpop.permute.xlu1 %7587  ;;  %v3480_v21 = vcombine.high %v16138_v10, %v16131_v62  ;;  %v3655_v14 = vcombine.low %v23755_v54, %v15689_v17  ;;  %v3448_v26 = vcombine.high %v16159_v35, %v16135_v43  ;;  %v16240_v15 = vrot.slane %v4416_v1, %v15696_v38 }
 0x440   : > { %v16249_v18 = vrot.slane %v4432_v63, %v15696_v38  ;;  %v4615_v43 = vrot.slane %v4607_v53, %v14347_v5  ;;  %v4622_v35 = vrot.slane %v4608_v50, %v14347_v5  ;;  %v3639_v1 = vcombine.low %v14854_v16, %v15613_v25 }
 0x441   : > { %7703 = vrot.lane.b32.xlu1 %v4177_v59, %s14267_s6  ;;  %v3499_v59 = vcombine.low %v3455_v49, %v3487_v57  ;;  %v4879_v63 = vcombine.low %v23758_v42, %v23757_v23  ;;  %v16262_v9 = vrot.slane %v3655_v14, %v14347_v5  ;;  %v16265_v53 = vrot.slane %v3671_v32, %v14347_v5 }
 0x442   : > { %7613 = vrot.lane.b32.xlu0 %v3498_v6, %s14267_s6  ;;  %v16230_v6 = vrot.slane %v4415_v3, %v15696_v38  ;;  %v16246_v3 = vrot.slane %v4431_v60, %v15696_v38  ;;  %23756 = vst [vmem:[#allocation63_spill] sm:$0xff] %v16249_v18  ;;  %v3494_v60 = vrot.slane %v3480_v21, %v15696_v38 }
 0x443   : > { %v7592_v20 = vpop.permute.xlu1 %7591  ;;  %v3462_v50 = vrot.slane %v3448_v26, %v15696_v38  ;;  %v16283_v32 = vrot.slane %v4863_v61, %v14347_v5  ;;  %v16291_v21 = vrot.slane %v3639_v1, %v14347_v5  ;;  %v4656_v1 = vcombine.high %v16200_v24, %v4615_v43 }
 0x444   : > { %v8367_v62 = vcombine.low %v16161_v52, %v7592_v20  ;;  %v8368_v10 = vcombine.high %v16161_v52, %v7592_v20 }
 0x445   : > { %7707 = vrot.lane.b32.xlu1 %v4178_v47, %s14267_s6  ;;  %v16256_v47 = vrot.slane %v3687_v28, %v14347_v5 }
 0x446   : > { %7617 = vrot.lane.b32.xlu0 %v3499_v59, %s14267_s6  ;;  %v3500_v59 = vcombine.high %v3455_v49, %v3487_v57  ;;  %v16270_v28 = vrot.slane %v8367_v62, %v14347_v5  ;;  %v23761_v62 = vld [vmem:[#allocation87_spill] sm:$0xff] }
 0x447   : > { %v7596_v58 = vpop.permute.xlu1 %7595  ;;  %v3735_v26 = vcombine.low %v16265_v53, %v16256_v47 }
 0x448   : > { %v8383_v52 = vcombine.low %v7588_v7, %v7596_v58  ;;  %v8384_v20 = vcombine.high %v7588_v7, %v7596_v58  ;;  %v16273_v7 = vrot.slane %v8368_v10, %v14347_v5  ;;  %v4880_v58 = vcombine.high %v23758_v42, %v23757_v23 }
 0x449   : > { %7711 = vrot.lane.b32.xlu1 %v4179_v46, %s14267_s6  ;;  %v16286_v46 = vrot.slane %v4864_v8, %v14347_v5  ;;  %v3501_v10 = vcombine.low %v3462_v50, %v3494_v60  ;;  %v4655_v8 = vcombine.low %v16200_v24, %v4615_v43  ;;  %v4447_v42 = vcombine.low %v16096_v37, %v16230_v6 }
 0x44a   : > { %23759 = vst [vmem:[#allocation13_spill] sm:$0xff] %v16273_v7  ;;  %v16276_v57 = vrot.slane %v8383_v52, %v14347_v5  ;;  %v16279_v49 = vrot.slane %v8384_v20, %v14347_v5  ;;  %7621 = vrot.lane.b32.xlu0 %v3500_v59, %s14267_s6  ;;  %v16303_v52 = vrot.slane %v4879_v63, %v14347_v5 }
 0x44b   : > { %v16293_v14 = vpop.permute.xlu1 %7599  ;;  %v4671_v20 = vcombine.low %v16203_v36, %v4622_v35  ;;  %v3703_v59 = vcombine.low %v16291_v21, %v16262_v9  ;;  %v16327_v23 = vrot.slane %v4880_v58, %v14347_v5  ;;  %v3743_v56 = vrot.slane %v3735_v26, %v15696_v38 }
 0x44c   : > { %23760 = vst [vmem:[#allocation66_spill] sm:$0xff] %v16279_v49  ;;  %v4639_v63 = vcombine.low %v23761_v62, %v15308_v31  ;;  %v23762_v24 = vcombine.low %v16089_v29, %v16183_v30  ;;  %v16350_v43 = vrot.slane %v4656_v1, %v15696_v38  ;;  %v4640_v58 = vcombine.high %v23761_v62, %v15308_v31 }
 0x44d   : > { %7715 = vrot.lane.b32.xlu1 %v4180_v11, %s14267_s6  ;;  %v4672_v11 = vcombine.high %v16203_v36, %v4622_v35  ;;  %v4927_v35 = vcombine.low %v16283_v32, %v16303_v52  ;;  %v3711_v36 = vrot.slane %v3703_v59, %v15696_v38  ;;  %v16353_v49 = vrot.slane %v4671_v20, %v15696_v38 }
 0x44e   : > { %7625 = vrot.lane.b32.xlu0 %v3501_v10, %s14267_s6  ;;  %v3502_v10 = vcombine.high %v3462_v50, %v3494_v60  ;;  %v16343_v60 = vrot.slane %v4655_v8, %v15696_v38  ;;  %v23763_v50 = vld [vmem:[#allocation21_spill] sm:$0xff]  ;;  %v4943_v1 = vcombine.low %v16286_v46, %v16327_v23  ;;  %v3688_v20 = vcombine.high %v15772_v27, %v15921_v44 }
 0x44f   : > { %v16318_v61 = vpop.permute.xlu1 %7603  ;;  %v4623_v26 = vcombine.low %v23763_v50, %v15297_v33  ;;  %v4624_v8 = vcombine.high %v23763_v50, %v15297_v33  ;;  %v4944_v33 = vcombine.high %v16286_v46, %v16327_v23  ;;  %v4647_v31 = vrot.slane %v4639_v63, %v14347_v5  ;;  %v23767_v50 = vld [vmem:[#allocation96_spill] sm:$0xff] }
 0x450   : > { %v3656_v62 = vcombine.high %v23755_v54, %v15689_v17  ;;  %v23764_v59 = vcombine.high %v16089_v29, %v16183_v30  ;;  %v3704_v44 = vcombine.high %v16291_v21, %v16262_v9  ;;  %v4654_v29 = vrot.slane %v4640_v58, %v14347_v5  ;;  %v23765_v54 = vld [vmem:[#allocation93_spill] sm:$0xff]  ;;  %v23766_v30 = vld [vmem:[#allocation23_spill] sm:$0xff] }
 0x451   : > { %7719 = vrot.lane.b32.xlu1 %v23762_v24, %s14267_s6  ;;  %v4928_v24 = vcombine.high %v16283_v32, %v16303_v52  ;;  %v3736_v32 = vcombine.high %v16265_v53, %v16256_v47  ;;  %v3767_v52 = vcombine.low %v3711_v36, %v3743_v56  ;;  %v4631_v27 = vrot.slane %v4623_v26, %v14347_v5  ;;  %v23768_v58 = vld [vmem:[#allocation91_spill] sm:$0xff] }
 0x452   : > { %7629 = vrot.lane.b32.xlu0 %v3502_v10, %s14267_s6  ;;  %v16364_v10 = vrot.slane %v4672_v11, %v15696_v38  ;;  %v16382_v11 = vrot.slane %v4927_v35, %v15696_v38  ;;  %v3672_v47 = vcombine.high %v15454_v40, %v15844_v41  ;;  %v4638_v17 = vrot.slane %v4624_v8, %v14347_v5 }
 0x453   : > { %v16361_v18 = vpop.permute.xlu1 %7607  ;;  %v4895_v46 = vcombine.low %v23766_v30, %v23765_v54  ;;  %v3640_v23 = vcombine.high %v14854_v16, %v15613_v25  ;;  %v16401_v9 = vrot.slane %v3688_v20, %v14347_v5  ;;  %v3768_v41 = vcombine.high %v3711_v36, %v3743_v56 }
 0x454   : > { %v8472_v53 = vcombine.high %v16293_v14, %v16361_v18  ;;  %v3750_v21 = vrot.slane %v3736_v32, %v15696_v38  ;;  %v4687_v35 = vcombine.low %v4631_v27, %v4647_v31  ;;  %v4911_v26 = vcombine.low %v23768_v58, %v23767_v50 }
 0x455   : > { %7723 = vrot.lane.b32.xlu1 %v23764_v59, %s14267_s6  ;;  %v4912_v8 = vcombine.high %v23768_v58, %v23767_v50  ;;  %v16411_v16 = vrot.slane %v3656_v62, %v14347_v5  ;;  %v16415_v25 = vrot.slane %v3672_v47, %v14347_v5  ;;  %v3718_v36 = vrot.slane %v3704_v44, %v15696_v38  ;;  %v23774_v50 = vld [vmem:[#allocation97_spill] sm:$0xff]  ;;  %v23775_v58 = vld [vmem:[#allocation24_spill] sm:$0xff] }
 0x456   : > { %7633 = vrot.lane.b32.xlu0 %v3767_v52, %s14267_s6  ;;  %v16418_v20 = vrot.slane %v8472_v53, %v14347_v5  ;;  %v4688_v32 = vcombine.high %v4631_v27, %v4647_v31  ;;  %v4703_v52 = vcombine.low %v4638_v17, %v4654_v29  ;;  %v4704_v59 = vcombine.high %v4638_v17, %v4654_v29 }
 0x457   : > { %v16398_v63 = vpop.permute.xlu1 %7611  ;;  %v4896_v62 = vcombine.high %v23766_v30, %v23765_v54  ;;  %v16430_v47 = vrot.slane %v3640_v23, %v14347_v5  ;;  %v3751_v53 = vcombine.low %v16415_v25, %v16401_v9  ;;  %v16437_v44 = vrot.slane %v4911_v26, %v14347_v5 }
 0x458   : > { %v8488_v40 = vcombine.high %v16318_v61, %v16398_v63  ;;  %23769 = vst [vmem:[#allocation61_spill] sm:$0xff] %v16418_v20  ;;  %v23771_v31 = vcombine.high %v16096_v37, %v16230_v6  ;;  %v16444_v27 = vrot.slane %v4687_v35, %v15696_v38  ;;  %v16447_v17 = vrot.slane %v4928_v24, %v15696_v38 }
 0x459   : > { %7727 = vrot.lane.b32.xlu1 %v4447_v42, %s14267_s6  ;;  %v16450_v29 = vrot.slane %v4943_v1, %v15696_v38  ;;  %v16453_v54 = vrot.slane %v4895_v46, %v14347_v5  ;;  %v16456_v30 = vrot.slane %v4912_v8, %v14347_v5  ;;  %v3719_v23 = vcombine.low %v16430_v47, %v16411_v16  ;;  %v16480_v8 = vpop.permute.xlu0 %2917 }
 0x45a   : > { %v16421_v56 = vrot.slane %v8488_v40, %v14347_v5  ;;  %7637 = vrot.lane.b32.xlu0 %v3768_v41, %s14267_s6  ;;  %v3769_v41 = vcombine.low %v3718_v36, %v3750_v21  ;;  %v16462_v37 = vrot.slane %v4944_v33, %v15696_v38  ;;  %v16465_v6 = vrot.slane %v4896_v62, %v14347_v5 }
 0x45b   : > { %v16427_v42 = vpop.permute.xlu1 %7615  ;;  %23772 = vst [vmem:[#allocation73_spill] sm:$0xff] %v16450_v29  ;;  %v16468_v1 = vrot.slane %v4688_v32, %v15696_v38  ;;  %v16471_v46 = vrot.slane %v4703_v52, %v15696_v38  ;;  %v16474_v35 = vrot.slane %v4704_v59, %v15696_v38  ;;  %v5135_v26 = vcombine.low %v23775_v58, %v23774_v50 }
 0x45c   : > { %23770 = vst [vmem:[#allocation33_spill] sm:$0xff] %v16421_v56  ;;  %23773 = vst [vmem:[#allocation68_spill] sm:$0xff] %v16462_v37  ;;  %v5136_v33 = vcombine.high %v23775_v58, %v23774_v50  ;;  %v3770_v62 = vcombine.high %v3718_v36, %v3750_v21  ;;  %v23776_v59 = vcombine.low %v16099_v13, %v16240_v15 }
 0x45d   : > { %7731 = vrot.lane.b32.xlu1 %v23771_v31, %s14267_s6  ;;  %v3727_v58 = vrot.slane %v3719_v23, %v15696_v38  ;;  %v3959_v31 = vcombine.low %v15780_v4, %v16480_v8  ;;  %v8431_v50 = vcombine.low %v16270_v28, %v16276_v57  ;;  %v8487_v21 = vcombine.low %v16318_v61, %v16398_v63 }
 0x45e   : > { %7641 = vrot.lane.b32.xlu0 %v3769_v41, %s14267_s6  ;;  %v3759_v41 = vrot.slane %v3751_v53, %v15696_v38  ;;  %v3911_v53 = vcombine.low %v14864_v22, %v15623_v19  ;;  %v16512_v32 = vrot.slane %v5135_v26, %v14347_v5  ;;  %v3752_v23 = vcombine.high %v16415_v25, %v16401_v9  ;;  %v16534_v25 = vpop.permute.xlu0 %2921 }
 0x45f   : > { %v7620_v24 = vpop.permute.xlu1 %7619  ;;  %v3720_v37 = vcombine.high %v16430_v47, %v16411_v16  ;;  %v3943_v29 = vcombine.low %v15476_v39, %v15856_v55  ;;  %v8399_v61 = vcombine.low %v16144_v48, %v16150_v0  ;;  %v8471_v63 = vcombine.low %v16293_v14, %v16361_v18 }
 0x460   : > { %v3771_v40 = vcombine.low %v3727_v58, %v3759_v41  ;;  %v23778_v26 = vcombine.high %v16099_v13, %v16240_v15  ;;  %v16532_v9 = vrot.slane %v3911_v53, %v14347_v5  ;;  %v16545_v13 = vrot.slane %v3959_v31, %v14347_v5 }
 0x461   : > { %7735 = vrot.lane.b32.xlu1 %v23776_v59, %s14267_s6  ;;  %v23777_v59 = vld [vmem:[#allocation50_spill] sm:$0xff]  ;;  %v16548_v15 = vrot.slane %v8487_v21, %v14347_v5  ;;  %v16551_v53 = vrot.slane %v8431_v50, %v15696_v38  ;;  %v23782_v31 = vcombine.low %v16189_v12, %v16246_v3  ;;  %v3734_v21 = vrot.slane %v3720_v37, %v15696_v38 }
 0x462   : > { %7645 = vrot.lane.b32.xlu0 %v3770_v62, %s14267_s6  ;;  %v3927_v52 = vcombine.low %v23777_v59, %v15703_v51  ;;  %v16515_v62 = vrot.slane %v5136_v33, %v14347_v5  ;;  %v16555_v33 = vrot.slane %v3943_v29, %v14347_v5  ;;  %v16566_v50 = vrot.slane %v8399_v61, %v15696_v38 }
 0x463   : > { %v7624_v36 = vpop.permute.xlu1 %7623  ;;  %23779 = vst [vmem:[#allocation70_spill] sm:$0xff] %v16548_v15  ;;  %23780 = vst [vmem:[#allocation15_spill] sm:$0xff] %v16551_v53  ;;  %v23788_v61 = vcombine.high %v16144_v48, %v16150_v0 }
 0x464   : > { %v8503_v16 = vcombine.low %v16427_v42, %v7624_v36  ;;  %v8504_v47 = vcombine.high %v16427_v42, %v7624_v36  ;;  %v16542_v18 = vrot.slane %v3927_v52, %v14347_v5  ;;  %v3772_v36 = vcombine.high %v3727_v58, %v3759_v41  ;;  %23783 = vst [vmem:[#allocation17_spill] sm:$0xff] %v16566_v50 }
 0x465   : > { %7739 = vrot.lane.b32.xlu1 %v23778_v26, %s14267_s6  ;;  %v16558_v52 = vrot.slane %v8471_v63, %v14347_v5  ;;  %v16589_v63 = vrot.slane %v23788_v61, %v15696_v38 }
 0x466   : > { %7649 = vrot.lane.b32.xlu0 %v3771_v40, %s14267_s6  ;;  %v3766_v40 = vrot.slane %v3752_v23, %v15696_v38  ;;  %v16572_v41 = vrot.slane %v8504_v47, %v14347_v5 }
 0x467   : > { %v7628_v14 = vpop.permute.xlu1 %7627  ;;  %23781 = vst [vmem:[#allocation74_spill] sm:$0xff] %v16558_v52  ;;  %v8535_v37 = vcombine.low %v16558_v52, %v16548_v15  ;;  %23789 = vst [vmem:[#allocation81_spill] sm:$0xff] %v16589_v63 }
 0x468   : > { %v8519_v26 = vcombine.low %v7620_v24, %v7628_v14  ;;  %v8520_v42 = vcombine.high %v7620_v24, %v7628_v14  ;;  %v16569_v24 = vrot.slane %v8503_v16, %v14347_v5  ;;  %23785 = vst [vmem:[#allocation71_spill] sm:$0xff] %v16572_v41  ;;  %v23790_v16 = vcombine.high %v16270_v28, %v16276_v57 }
 0x469   : > { %7743 = vrot.lane.b32.xlu1 %v23782_v31, %s14267_s6  ;;  %v3773_v0 = vcombine.low %v3734_v21, %v3766_v40  ;;  %v23793_v28 = vcombine.high %v16189_v12, %v16246_v3  ;;  %v3975_v14 = vcombine.low %v16532_v9, %v16542_v18  ;;  %v23798_v12 = vld [vmem:[#allocation66_spill] sm:$0xff] }
 0x46a   : > { %23784 = vst [vmem:[#allocation77_spill] sm:$0xff] %v16569_v24  ;;  %v16575_v29 = vrot.slane %v8519_v26, %v14347_v5  ;;  %v16578_v58 = vrot.slane %v8520_v42, %v14347_v5  ;;  %7653 = vrot.lane.b32.xlu0 %v3772_v36, %s14267_s6  ;;  %v16595_v47 = vrot.slane %v23790_v16, %v15696_v38  ;;  %v16601_v42 = vpop.permute.xlu0 %2925 }
 0x46b   : > { %v16583_v23 = vpop.permute.xlu1 %7631  ;;  %v4007_v26 = vcombine.low %v16555_v33, %v16545_v13  ;;  %23792 = vst [vmem:[#allocation82_spill] sm:$0xff] %v16601_v42  ;;  %v16632_v16 = vrot.slane %v8535_v37, %v15696_v38  ;;  %v23799_v3 = vcombine.high %v16273_v7, %v23798_v12  ;;  %v3774_v37 = vcombine.high %v3734_v21, %v3766_v40 }
 0x46c   : > { %23786 = vst [vmem:[#allocation78_spill] sm:$0xff] %v16575_v29  ;;  %23787 = vst [vmem:[#allocation18_spill] sm:$0xff] %v16578_v58  ;;  %v8567_v36 = vcombine.low %v16569_v24, %v16575_v29  ;;  %v8584_v48 = vcombine.high %v16572_v41, %v16578_v58  ;;  %v23802_v58 = vld [vmem:[#allocation95_spill] sm:$0xff]  ;;  %v23803_v24 = vld [vmem:[#allocation100_spill] sm:$0xff] }
 0x46d   : > { %23791 = vst [vmem:[#allocation76_spill] sm:$0xff] %v16595_v47  ;;  %7747 = vrot.lane.b32.xlu1 %v23793_v28, %s14267_s6  ;;  %23795 = vst [vmem:[#allocation46_spill] sm:$0xff] %v16632_v16  ;;  %v16644_v41 = vrot.slane %v23799_v3, %v15696_v38  ;;  %v4015_v15 = vrot.slane %v4007_v26, %v15696_v38  ;;  %v23804_v29 = vld [vmem:[#allocation25_spill] sm:$0xff]  ;;  %v3983_v26 = vrot.slane %v3975_v14, %v15696_v38 }
 0x46e   : > { %7657 = vrot.lane.b32.xlu0 %v3773_v0, %s14267_s6  ;;  %v16627_v28 = vrot.slane %v8567_v36, %v15696_v38  ;;  %v23796_v0 = vcombine.high %v16147_v2, %v16153_v34  ;;  %v23801_v36 = vld [vmem:[#allocation99_spill] sm:$0xff]  ;;  %v5407_v2 = vcombine.low %v23804_v29, %v23803_v24  ;;  %v5408_v40 = vcombine.high %v23804_v29, %v23803_v24  ;;  %v16665_v21 = vpop.permute.xlu0 %2929  ;;  %v23838_v47 = vld [vmem:[#allocation65_spill] sm:$0xff] }
 0x46f   : > { %v7636_v31 = vpop.permute.xlu1 %7635  ;;  %23800 = vst [vmem:[#allocation79_spill] sm:$0xff] %v16644_v41  ;;  %v5151_v52 = vcombine.low %v23802_v58, %v23801_v36  ;;  %v5152_v61 = vcombine.high %v23802_v58, %v23801_v36  ;;  %23807 = vst [vmem:[#allocation87_spill] sm:$0xff] %v16665_v21  ;;  %v16676_v3 = vrot.slane %v8584_v48, %v15696_v38 }
 0x470   : > { %23794 = vst [vmem:[#allocation19_spill] sm:$0xff] %v16627_v28  ;;  %v16638_v57 = vrot.slane %v23796_v0, %v15696_v38  ;;  %v23805_v0 = vld [vmem:[#allocation63_spill] sm:$0xff]  ;;  %v3960_v58 = vcombine.high %v15780_v4, %v16480_v8  ;;  %v23811_v24 = vcombine.low %v16453_v54, %v16437_v44  ;;  %v23812_v14 = vcombine.high %v16453_v54, %v16437_v44  ;;  %v23840_v28 = vld [vmem:[#allocation129_spill] sm:$0xff] }
 0x471   : > { %v23806_v34 = vcombine.low %v16196_v45, %v23805_v0  ;;  %23810 = vst [vmem:[#allocation93_spill] sm:$0xff] %v16676_v3  ;;  %v23813_v48 = vcombine.low %v16465_v6, %v16456_v30  ;;  %v4008_v4 = vcombine.high %v16555_v33, %v16545_v13  ;;  %v4039_v8 = vcombine.low %v3983_v26, %v4015_v15  ;;  %v23831_v3 = vld [vmem:[#allocation103_spill] sm:$0xff] }
 0x472   : > { %23797 = vst [vmem:[#allocation85_spill] sm:$0xff] %v16638_v57  ;;  %7661 = vrot.lane.b32.xlu0 %v3774_v37, %s14267_s6  ;;  %v16684_v29 = vrot.slane %v23811_v24, %v15696_v38  ;;  %v16690_v37 = vrot.slane %v23812_v14, %v15696_v38  ;;  %v3928_v44 = vcombine.high %v23777_v59, %v15703_v51  ;;  %v23833_v57 = vld [vmem:[#allocation26_spill] sm:$0xff] }
 0x473   : > { %7751 = vrot.lane.b32.xlu1 %v23806_v34, %s14267_s6  ;;  %v23808_v34 = vcombine.high %v16418_v20, %v16421_v56  ;;  %v7640_v7 = vpop.permute.xlu1 %7639  ;;  %v3976_v54 = vcombine.high %v16532_v9, %v16542_v18  ;;  %v3944_v14 = vcombine.high %v15476_v39, %v15856_v55  ;;  %v23814_v33 = vcombine.high %v16196_v45, %v23805_v0  ;;  %v23816_v45 = vld [vmem:[#allocation102_spill] sm:$0xff] }
 0x474   : > { %v23815_v13 = vcombine.high %v16465_v6, %v16456_v30  ;;  %v5159_v41 = vrot.slane %v5151_v52, %v14347_v5  ;;  %v16722_v51 = vrot.slane %v5152_v61, %v14347_v5  ;;  %v8607_v59 = vcombine.low %v16583_v23, %v7640_v7  ;;  %v23817_v9 = vld [vmem:[#allocation98_spill] sm:$0xff]  ;;  %v16737_v61 = vpop.permute.xlu0 %2933 }
 0x475   : > { %v16673_v36 = vrot.slane %v23808_v34, %v15696_v38  ;;  %v16696_v34 = vrot.slane %v23813_v48, %v15696_v38  ;;  %v8608_v39 = vcombine.high %v16583_v23, %v7640_v7  ;;  %v16728_v55 = vrot.slane %v5407_v2, %v14347_v5  ;;  %23818 = vst [vmem:[#allocation23_spill] sm:$0xff] %v16737_v61 }
 0x476   : > { %v16718_v48 = vrot.slane %v23815_v13, %v15696_v38  ;;  %7665 = vrot.lane.b32.xlu0 %v4039_v8, %s14267_s6  ;;  %v5423_v18 = vcombine.low %v23817_v9, %v23816_v45  ;;  %v3912_v30 = vcombine.high %v14864_v22, %v15623_v19  ;;  %v16735_v6 = vrot.slane %v3960_v58, %v14347_v5 }
 0x477   : > { %23809 = vst [vmem:[#allocation21_spill] sm:$0xff] %v16673_v36  ;;  %7755 = vrot.lane.b32.xlu1 %v23814_v33, %s14267_s6  ;;  %v7644_v52 = vpop.permute.xlu1 %7643  ;;  %v4040_v7 = vcombine.high %v3983_v26, %v4015_v15  ;;  %v4022_v23 = vrot.slane %v4008_v4, %v15696_v38  ;;  %v5424_v2 = vcombine.high %v23817_v9, %v23816_v45  ;;  %v23832_v36 = vld [vmem:[#allocation47_spill] sm:$0xff] }
 0x478   : > { %v8623_v0 = vcombine.low %v7636_v31, %v7644_v52  ;;  %v8624_v33 = vcombine.high %v7636_v31, %v7644_v52  ;;  %v16743_v8 = vrot.slane %v3928_v44, %v14347_v5  ;;  %v16746_v13 = vrot.slane %v3944_v14, %v14347_v5  ;;  %v16798_v24 = vpop.permute.xlu0 %2937 }
 0x479   : > { %v23819_v22 = vcombine.low %v16343_v60, %v16444_v27  ;;  %v3990_v19 = vrot.slane %v3976_v54, %v15696_v38  ;;  %v16754_v15 = vrot.slane %v8607_v59, %v14347_v5  ;;  %v16757_v31 = vrot.slane %v8608_v39, %v14347_v5  ;;  %23823 = vst [vmem:[#allocation97_spill] sm:$0xff] %v16798_v24  ;;  %v23825_v59 = vld [vmem:[#allocation68_spill] sm:$0xff] }
 0x47a   : > { %v16760_v58 = vrot.slane %v8623_v0, %v14347_v5  ;;  %v16763_v26 = vrot.slane %v8624_v33, %v14347_v5  ;;  %7669 = vrot.lane.b32.xlu0 %v4040_v7, %s14267_s6  ;;  %v16767_v4 = vrot.slane %v5408_v40, %v14347_v5  ;;  %v5431_v44 = vrot.slane %v5423_v18, %v14347_v5  ;;  %v23830_v33 = vld [vmem:[#allocation107_spill] sm:$0xff] }
 0x47b   : > { %7759 = vrot.lane.b32.xlu1 %v23819_v22, %s14267_s6  ;;  %23820 = vst [vmem:[#allocation96_spill] sm:$0xff] %v16757_v31  ;;  %v16771_v54 = vrot.slane %v3912_v30, %v14347_v5  ;;  %v16773_v14 = vpop.permute.xlu1 %7647  ;;  %v4023_v39 = vcombine.low %v16746_v13, %v16735_v6  ;;  %v4041_v9 = vcombine.low %v3990_v19, %v4022_v23 }
 0x47c   : > { %23821 = vst [vmem:[#allocation91_spill] sm:$0xff] %v16763_v26  ;;  %v5199_v18 = vcombine.low %v16512_v32, %v5159_v41  ;;  %v5200_v30 = vcombine.high %v16512_v32, %v5159_v41  ;;  %v16786_v52 = vrot.slane %v5424_v2, %v14347_v5  ;;  %v23822_v0 = vcombine.high %v16343_v60, %v16444_v27  ;;  %v23824_v2 = vld [vmem:[#allocation73_spill] sm:$0xff] }
 0x47d   : > { %v5215_v7 = vcombine.low %v16515_v62, %v16722_v51  ;;  %v3991_v22 = vcombine.low %v16771_v54, %v16743_v8  ;;  %v5216_v27 = vcombine.high %v16515_v62, %v16722_v51  ;;  %v5472_v32 = vcombine.high %v16728_v55, %v5431_v44 }
 0x47e   : > { %7673 = vrot.lane.b32.xlu0 %v4041_v9, %s14267_s6  ;;  %v5471_v9 = vcombine.low %v16728_v55, %v5431_v44  ;;  %v4042_v45 = vcombine.high %v3990_v19, %v4022_v23  ;;  %v4031_v60 = vrot.slane %v4023_v39, %v15696_v38  ;;  %v5487_v62 = vcombine.low %v16767_v4, %v16786_v52  ;;  %v23827_v55 = vld [vmem:[#allocation105_spill] sm:$0xff] }
 0x47f   : > { %7763 = vrot.lane.b32.xlu1 %v23822_v0, %s14267_s6  ;;  %v7652_v41 = vpop.permute.xlu1 %7651  ;;  %v23826_v51 = vcombine.low %v16350_v43, %v16468_v1  ;;  %v16825_v40 = vrot.slane %v5199_v18, %v15696_v38  ;;  %v16828_v0 = vrot.slane %v5200_v30, %v15696_v38  ;;  %v23828_v23 = vld [vmem:[#allocation29_spill] sm:$0xff]  ;;  %v3999_v39 = vrot.slane %v3991_v22, %v15696_v38  ;;  %v16850_v22 = vpop.permute.xlu0 %2941  ;;  %v23837_v18 = vld [vmem:[#allocation176_spill] sm:$0xff] }
 0x480   : > { %v5167_v19 = vcombine.low %v23828_v23, %v23827_v55  ;;  %v5168_v44 = vcombine.high %v23828_v23, %v23827_v55  ;;  %v5183_v30 = vcombine.low %v23831_v3, %v23830_v33  ;;  %v4231_v20 = vcombine.low %v23833_v57, %v23832_v36  ;;  %23835 = vst [vmem:[#allocation99_spill] sm:$0xff] %v16850_v22 }
 0x481   : > { %v16846_v12 = vrot.slane %v5216_v27, %v15696_v38  ;;  %v16853_v55 = vrot.slane %v5471_v9, %v15696_v38  ;;  %v16856_v23 = vrot.slane %v5472_v32, %v15696_v38  ;;  %v4199_v63 = vcombine.low %v23838_v47, %v23837_v18  ;;  %v23839_v27 = vld [vmem:[#allocation38_spill] sm:$0xff] }
 0x482   : > { %7677 = vrot.lane.b32.xlu0 %v4042_v45, %s14267_s6  ;;  %v4024_v45 = vcombine.high %v16746_v13, %v16735_v6  ;;  %v3992_v16 = vcombine.high %v16771_v54, %v16743_v8  ;;  %v4215_v50 = vcombine.low %v23840_v28, %v23839_v27  ;;  %v23841_v6 = vcombine.high %v16350_v43, %v16468_v1  ;;  %v23843_v1 = vld [vmem:[#allocation164_spill] sm:$0xff] }
 0x483   : > { %7767 = vrot.lane.b32.xlu1 %v23826_v51, %s14267_s6  ;;  %v16837_v51 = vrot.slane %v5215_v7, %v15696_v38  ;;  %v7656_v56 = vpop.permute.xlu1 %7655  ;;  %23834 = vst [vmem:[#allocation50_spill] sm:$0xff] %v16846_v12  ;;  %v4043_v7 = vcombine.low %v3999_v39, %v4031_v60  ;;  %23836 = vst [vmem:[#allocation95_spill] sm:$0xff] %v16856_v23  ;;  %v16869_v13 = vrot.slane %v5487_v62, %v15696_v38  ;;  %v23844_v62 = vld [vmem:[#allocation14_spill] sm:$0xff] }
 0x484   : > { %v16872_v32 = vrot.slane %v5167_v19, %v14347_v5  ;;  %v16875_v9 = vrot.slane %v5168_v44, %v14347_v5  ;;  %v8639_v22 = vcombine.low %v16773_v14, %v7656_v56  ;;  %v8640_v8 = vcombine.high %v16773_v14, %v7656_v56 }
 0x485   : > { %23829 = vst [vmem:[#allocation24_spill] sm:$0xff] %v16837_v51  ;;  %23842 = vst [vmem:[#allocation100_spill] sm:$0xff] %v16869_v13  ;;  %v5184_v54 = vcombine.high %v23831_v3, %v23830_v33  ;;  %v16883_v43 = vrot.slane %v5183_v30, %v14347_v5  ;;  %v16888_v19 = vrot.slane %v4231_v20, %v14347_v5 }
 0x486   : > { %7681 = vrot.lane.b32.xlu0 %v4043_v7, %s14267_s6  ;;  %v4044_v56 = vcombine.high %v3999_v39, %v4031_v60  ;;  %v4038_v14 = vrot.slane %v4024_v45, %v15696_v38  ;;  %v16894_v7 = vrot.slane %v4199_v63, %v14347_v5  ;;  %v16897_v3 = vrot.slane %v4215_v50, %v14347_v5  ;;  %v23848_v45 = vld [vmem:[#allocation108_spill] sm:$0xff] }
 0x487   : > { %7771 = vrot.lane.b32.xlu1 %v23841_v6, %s14267_s6  ;;  %v4183_v6 = vcombine.low %v23844_v62, %v23843_v1  ;;  %v7660_v44 = vpop.permute.xlu1 %7659  ;;  %v8671_v33 = vcombine.low %v16754_v15, %v16760_v58  ;;  %v23845_v20 = vcombine.low %v16353_v49, %v16471_v46  ;;  %v8647_v60 = vrot.slane %v8639_v22, %v14347_v5 }
 0x488   : > { %v8655_v53 = vcombine.low %v7652_v41, %v7660_v44  ;;  %v8656_v24 = vcombine.high %v7652_v41, %v7660_v44  ;;  %v16890_v61 = vpop.permute.xlu0 %7569  ;;  %v4006_v41 = vrot.slane %v3992_v16, %v15696_v38  ;;  %v16908_v39 = vrot.slane %v8640_v8, %v14347_v5  ;;  %v23849_v44 = vld [vmem:[#allocation34_spill] sm:$0xff] }
 0x489   : > { %v5198_v30 = vrot.slane %v5184_v54, %v14347_v5  ;;  %v5439_v21 = vcombine.low %v23849_v44, %v23848_v45  ;;  %v4279_v16 = vcombine.low %v16897_v3, %v16888_v19  ;;  %v5231_v54 = vcombine.low %v16872_v32, %v16883_v43 }
 0x48a   : > { %23846 = vst [vmem:[#allocation25_spill] sm:$0xff] %v16908_v39  ;;  %v8663_v63 = vrot.slane %v8655_v53, %v14347_v5  ;;  %v16912_v50 = vrot.slane %v8656_v24, %v14347_v5  ;;  %7685 = vrot.lane.b32.xlu0 %v4044_v56, %s14267_s6  ;;  %v4045_v56 = vcombine.low %v4006_v41, %v4038_v14 }
 0x48b   : > { %7775 = vrot.lane.b32.xlu1 %v23845_v20, %s14267_s6  ;;  %v16919_v20 = vrot.slane %v4183_v6, %v14347_v5  ;;  %v16923_v22 = vpop.permute.xlu1 %7663  ;;  %v5440_v6 = vcombine.high %v23849_v44, %v23848_v45  ;;  %v23850_v23 = vcombine.high %v16353_v49, %v16471_v46  ;;  %v23853_v45 = vcombine.high %v16754_v15, %v16760_v58 }
 0x48c   : > { %23847 = vst [vmem:[#allocation63_spill] sm:$0xff] %v16912_v50  ;;  %v8703_v8 = vcombine.low %v8647_v60, %v8663_v63  ;;  %v8704_v53 = vcombine.high %v8647_v60, %v8663_v63  ;;  %v8720_v24 = vcombine.high %v16908_v39, %v16912_v50  ;;  %v16927_v42 = vpop.permute.xlu0 %7573  ;;  %v16940_v60 = vrot.slane %v8671_v33, %v15696_v38 }
 0x48d   : > { %v4247_v13 = vcombine.low %v16919_v20, %v16894_v7  ;;  %v16950_v44 = vrot.slane %v23853_v45, %v15696_v38  ;;  %v5232_v46 = vcombine.high %v16872_v32, %v16883_v43  ;;  %v23857_v32 = vcombine.high %v16757_v31, %v16763_v26  ;;  %v23875_v31 = vld [vmem:[#allocation178_spill] sm:$0xff]  ;;  %v23876_v26 = vld [vmem:[#allocation69_spill] sm:$0xff] }
 0x48e   : > { %23851 = vst [vmem:[#allocation102_spill] sm:$0xff] %v16940_v60  ;;  %7689 = vrot.lane.b32.xlu0 %v4045_v56, %s14267_s6  ;;  %v16944_v63 = vrot.slane %v8703_v8, %v15696_v38  ;;  %v16953_v39 = vrot.slane %v8704_v53, %v15696_v38  ;;  %v16956_v49 = vrot.slane %v8720_v24, %v15696_v38  ;;  %v23860_v24 = vld [vmem:[#allocation106_spill] sm:$0xff] }
 0x48f   : > { %7779 = vrot.lane.b32.xlu1 %v23850_v23, %s14267_s6  ;;  %23854 = vst [vmem:[#allocation73_spill] sm:$0xff] %v16950_v44  ;;  %v5247_v23 = vcombine.low %v16875_v9, %v5198_v30  ;;  %v16961_v33 = vpop.permute.xlu1 %7667  ;;  %v4046_v8 = vcombine.high %v4006_v41, %v4038_v14  ;;  %v4287_v56 = vrot.slane %v4279_v16, %v15696_v38  ;;  %v23859_v16 = vld [vmem:[#allocation110_spill] sm:$0xff]  ;;  %v23879_v44 = vld [vmem:[#allocation7_spill] sm:$0xff] }
 0x490   : > { %23852 = vst [vmem:[#allocation98_spill] sm:$0xff] %v16944_v63  ;;  %23855 = vst [vmem:[#allocation68_spill] sm:$0xff] %v16953_v39  ;;  %v16964_v50 = vpop.permute.xlu0 %7577  ;;  %v16976_v43 = vrot.slane %v23857_v32, %v15696_v38  ;;  %v5248_v14 = vcombine.high %v16875_v9, %v5198_v30  ;;  %v16980_v41 = vrot.slane %v5439_v21, %v14347_v5  ;;  %v23878_v39 = vld [vmem:[#allocation134_spill] sm:$0xff] }
 0x491   : > { %23856 = vst [vmem:[#allocation105_spill] sm:$0xff] %v16956_v49  ;;  %v5455_v45 = vcombine.low %v23860_v24, %v23859_v16  ;;  %v23861_v58 = vcombine.low %v16364_v10, %v16474_v35  ;;  %v23862_v53 = vcombine.high %v16767_v4, %v16786_v52  ;;  %v5456_v9 = vcombine.high %v23860_v24, %v23859_v16 }
 0x492   : > { %23858 = vst [vmem:[#allocation29_spill] sm:$0xff] %v16976_v43  ;;  %7693 = vrot.lane.b32.xlu0 %v4046_v8, %s14267_s6  ;;  %v4255_v21 = vrot.slane %v4247_v13, %v15696_v38  ;;  %v10512_v4 = vcombine.high %v16890_v61, %v16964_v50  ;;  %v17013_v8 = vrot.slane %v5232_v46, %v15696_v38 }
 0x493   : > { %7783 = vrot.lane.b32.xlu1 %v23861_v58, %s14267_s6  ;;  %v16992_v15 = vrot.slane %v23862_v53, %v15696_v38  ;;  %v17003_v58 = vrot.slane %v5440_v6, %v14347_v5  ;;  %v17007_v52 = vpop.permute.xlu1 %7671  ;;  %v17010_v53 = vrot.slane %v5231_v54, %v15696_v38  ;;  %v4232_v13 = vcombine.high %v23833_v57, %v23832_v36 }
 0x494   : > { %23863 = vst [vmem:[#allocation107_spill] sm:$0xff] %v17013_v8  ;;  %v4280_v16 = vcombine.high %v16897_v3, %v16888_v19  ;;  %v17019_v24 = vpop.permute.xlu0 %7581  ;;  %v4311_v6 = vcombine.low %v4255_v21, %v4287_v56  ;;  %v17022_v32 = vrot.slane %v5247_v23, %v15696_v38  ;;  %v17025_v30 = vrot.slane %v5455_v45, %v14347_v5  ;;  %v23867_v23 = vld [vmem:[#allocation111_spill] sm:$0xff] }
 0x495   : > { %v4200_v54 = vcombine.high %v23838_v47, %v23837_v18  ;;  %v10528_v46 = vcombine.high %v16927_v42, %v17019_v24  ;;  %v23865_v57 = vcombine.high %v16364_v10, %v16474_v35  ;;  %v17036_v36 = vrot.slane %v5248_v14, %v15696_v38  ;;  %v23868_v10 = vld [vmem:[#allocation36_spill] sm:$0xff] }
 0x496   : > { %23864 = vst [vmem:[#allocation103_spill] sm:$0xff] %v17022_v32  ;;  %v17039_v19 = vrot.slane %v5456_v9, %v14347_v5  ;;  %v4248_v3 = vcombine.high %v16919_v20, %v16894_v7  ;;  %v4216_v47 = vcombine.high %v23840_v28, %v23839_v27  ;;  %v8744_v18 = vcombine.high %v16923_v22, %v17007_v52 }
 0x497   : > { %7787 = vrot.lane.b32.xlu1 %v23865_v57, %s14267_s6  ;;  %23866 = vst [vmem:[#allocation47_spill] sm:$0xff] %v17036_v36  ;;  %7697 = vrot.lane.b32.xlu0 %v4311_v6, %s14267_s6  ;;  %v5679_v35 = vcombine.low %v23868_v10, %v23867_v23  ;;  %v4184_v14 = vcombine.high %v23844_v62, %v23843_v1  ;;  %v17058_v7 = vpop.permute.xlu1 %7675 }
 0x498   : > { %v17053_v45 = vrot.slane %v10512_v4, %v14347_v5  ;;  %v17056_v9 = vrot.slane %v10528_v46, %v14347_v5  ;;  %v17061_v28 = vrot.slane %v4232_v13, %v14347_v5  ;;  %v8760_v27 = vcombine.high %v16961_v33, %v17058_v7  ;;  %v17065_v20 = vpop.permute.xlu0 %7585 }
 0x499   : > { %v4312_v6 = vcombine.high %v4255_v21, %v4287_v56  ;;  %v4294_v57 = vrot.slane %v4280_v16, %v15696_v38  ;;  %v5680_v1 = vcombine.high %v23868_v10, %v23867_v23  ;;  %v4214_v62 = vrot.slane %v4200_v54, %v14347_v5 }
 0x49a   : > { %23869 = vst [vmem:[#allocation26_spill] sm:$0xff] %v17053_v45  ;;  %23870 = vst [vmem:[#allocation176_spill] sm:$0xff] %v17056_v9  ;;  %v23871_v13 = vcombine.low %v16382_v11, %v16684_v29  ;;  %v17080_v56 = vrot.slane %v4216_v47, %v14347_v5  ;;  %v17083_v21 = vrot.slane %v8744_v18, %v14347_v5  ;;  %v23877_v18 = vld [vmem:[#allocation41_spill] sm:$0xff] }
 0x49b   : > { %v17086_v16 = vrot.slane %v8760_v27, %v14347_v5  ;;  %7701 = vrot.lane.b32.xlu0 %v4312_v6, %s14267_s6  ;;  %v4262_v54 = vrot.slane %v4248_v3, %v15696_v38  ;;  %v5503_v23 = vcombine.low %v16980_v41, %v17025_v30  ;;  %v4198_v27 = vrot.slane %v4184_v14, %v14347_v5 }
 0x49c   : > { %7791 = vrot.lane.b32.xlu1 %v23871_v13, %s14267_s6  ;;  %23872 = vst [vmem:[#allocation65_spill] sm:$0xff] %v17083_v21  ;;  %v17096_v13 = vpop.permute.xlu1 %7679  ;;  %v4295_v6 = vcombine.low %v17080_v56, %v17061_v28  ;;  %v7590_v46 = vpop.permute.xlu0 %7589  ;;  %v17108_v47 = vrot.slane %v5679_v35, %v14347_v5  ;;  %v17111_v49 = vrot.slane %v5680_v1, %v14347_v5  ;;  %v23881_v1 = vld [vmem:[#allocation109_spill] sm:$0xff] }
 0x49d   : > { %23873 = vst [vmem:[#allocation38_spill] sm:$0xff] %v17086_v16  ;;  %v4313_v4 = vcombine.low %v4262_v54, %v4294_v57  ;;  %v23874_v14 = vcombine.high %v16382_v11, %v16684_v29  ;;  %v4263_v3 = vcombine.low %v4198_v27, %v4214_v62  ;;  %v4264_v43 = vcombine.high %v4198_v27, %v4214_v62  ;;  %v23880_v27 = vld [vmem:[#allocation113_spill] sm:$0xff] }
 0x49e   : > { %v4471_v11 = vcombine.low %v23876_v26, %v23875_v31  ;;  %v4487_v10 = vcombine.low %v23878_v39, %v23877_v18  ;;  %v4503_v35 = vcombine.low %v23879_v44, %v16534_v25  ;;  %v4314_v63 = vcombine.high %v4262_v54, %v4294_v57  ;;  %v23883_v57 = vld [vmem:[#allocation166_spill] sm:$0xff]  ;;  %v23884_v54 = vld [vmem:[#allocation16_spill] sm:$0xff] }
 0x49f   : > { %7705 = vrot.lane.b32.xlu0 %v4313_v4, %s14267_s6  ;;  %v4303_v62 = vrot.slane %v4295_v6, %v15696_v38  ;;  %v23882_v4 = vcombine.low %v16447_v17, %v16690_v37  ;;  %v17148_v36 = vrot.slane %v5503_v23, %v15696_v38  ;;  %v4455_v6 = vcombine.low %v23884_v54, %v23883_v57 }
 0x4a0   : > { %7795 = vrot.lane.b32.xlu1 %v23874_v14, %s14267_s6  ;;  %v7684_v29 = vpop.permute.xlu1 %7683  ;;  %v7594_v60 = vpop.permute.xlu0 %7593  ;;  %v10527_v14 = vcombine.low %v16927_v42, %v17019_v24  ;;  %v10511_v32 = vcombine.low %v16890_v61, %v16964_v50  ;;  %v8759_v51 = vcombine.low %v16961_v33, %v17058_v7  ;;  %v4271_v42 = vrot.slane %v4263_v3, %v15696_v38 }
 0x4a1   : > { %v17159_v24 = vrot.slane %v4471_v11, %v14347_v5  ;;  %v10544_v23 = vcombine.high %v17065_v20, %v7594_v60  ;;  %v17164_v8 = vrot.slane %v4264_v43, %v15696_v38  ;;  %v17167_v61 = vrot.slane %v4487_v10, %v14347_v5 }
 0x4a2   : > { %v4296_v50 = vcombine.high %v17080_v56, %v17061_v28  ;;  %v4315_v7 = vcombine.low %v4271_v42, %v4303_v62  ;;  %v8743_v3 = vcombine.low %v16923_v22, %v17007_v52  ;;  %v23886_v10 = vcombine.high %v16447_v17, %v16690_v37 }
 0x4a3   : > { %7709 = vrot.lane.b32.xlu0 %v4314_v63, %s14267_s6  ;;  %v17172_v63 = vrot.slane %v4503_v35, %v14347_v5  ;;  %v17184_v28 = vrot.slane %v10511_v32, %v14347_v5  ;;  %v17187_v56 = vrot.slane %v8759_v51, %v14347_v5 }
 0x4a4   : > { %7799 = vrot.lane.b32.xlu1 %v23882_v4, %s14267_s6  ;;  %v10543_v4 = vcombine.low %v17065_v20, %v7594_v60  ;;  %v7688_v12 = vpop.permute.xlu1 %7687  ;;  %v7598_v33 = vpop.permute.xlu0 %7597  ;;  %v17177_v60 = vrot.slane %v10527_v14, %v14347_v5 }
 0x4a5   : > { %v10559_v20 = vcombine.low %v7590_v46, %v7598_v33  ;;  %v10560_v43 = vcombine.high %v7590_v46, %v7598_v33  ;;  %23887 = vst [vmem:[#allocation164_spill] sm:$0xff] %v17184_v28  ;;  %23888 = vst [vmem:[#allocation14_spill] sm:$0xff] %v17187_v56  ;;  %v8775_v35 = vcombine.low %v17096_v13, %v7688_v12 }
 0x4a6   : > { %23885 = vst [vmem:[#allocation129_spill] sm:$0xff] %v17177_v60  ;;  %v8776_v22 = vcombine.high %v17096_v13, %v7688_v12  ;;  %v17193_v52 = vrot.slane %v10543_v4, %v14347_v5  ;;  %v17196_v46 = vrot.slane %v10544_v23, %v14347_v5  ;;  %v4316_v12 = vcombine.high %v4271_v42, %v4303_v62 }
 0x4a7   : > { %7713 = vrot.lane.b32.xlu0 %v4315_v7, %s14267_s6  ;;  %v17199_v17 = vrot.slane %v10559_v20, %v14347_v5  ;;  %v17202_v37 = vrot.slane %v10560_v43, %v14347_v5  ;;  %v4310_v13 = vrot.slane %v4296_v50, %v15696_v38  ;;  %v17208_v4 = vrot.slane %v8743_v3, %v14347_v5 }
 0x4a8   : > { %7803 = vrot.lane.b32.xlu1 %v23886_v10, %s14267_s6  ;;  %23889 = vst [vmem:[#allocation108_spill] sm:$0xff] %v17193_v52  ;;  %23890 = vst [vmem:[#allocation34_spill] sm:$0xff] %v17196_v46  ;;  %v7692_v51 = vpop.permute.xlu1 %7691  ;;  %v17204_v14 = vpop.permute.xlu0 %7601  ;;  %v10575_v23 = vcombine.low %v17184_v28, %v17177_v60  ;;  %v17221_v62 = vrot.slane %v8775_v35, %v14347_v5  ;;  %v17224_v42 = vrot.slane %v8776_v22, %v14347_v5 }
 0x4a9   : > { %23891 = vst [vmem:[#allocation110_spill] sm:$0xff] %v17199_v17  ;;  %23892 = vst [vmem:[#allocation106_spill] sm:$0xff] %v17202_v37  ;;  %v8791_v32 = vcombine.low %v7684_v29, %v7692_v51  ;;  %v8792_v11 = vcombine.high %v7684_v29, %v7692_v51  ;;  %v10607_v33 = vcombine.low %v17193_v52, %v17199_v17 }
 0x4aa   : > { %23893 = vst [vmem:[#allocation111_spill] sm:$0xff] %v17208_v4  ;;  %v10624_v7 = vcombine.high %v17196_v46, %v17202_v37  ;;  %v23894_v29 = vcombine.low %v23824_v2, %v16696_v34  ;;  %23895 = vst [vmem:[#allocation36_spill] sm:$0xff] %v17221_v62  ;;  %v17234_v20 = vrot.slane %v4455_v6, %v14347_v5  ;;  %v23902_v46 = vld [vmem:[#allocation40_spill] sm:$0xff] }
 0x4ab   : > { %23896 = vst [vmem:[#allocation178_spill] sm:$0xff] %v17224_v42  ;;  %v17227_v50 = vrot.slane %v8791_v32, %v14347_v5  ;;  %v17230_v3 = vrot.slane %v8792_v11, %v14347_v5  ;;  %7717 = vrot.lane.b32.xlu0 %v4316_v12, %s14267_s6  ;;  %v8807_v43 = vcombine.low %v17208_v4, %v17187_v56 }
 0x4ac   : > { %7807 = vrot.lane.b32.xlu1 %v23894_v29, %s14267_s6  ;;  %v17238_v10 = vpop.permute.xlu1 %7695  ;;  %v17241_v35 = vrot.slane %v10607_v33, %v15696_v38  ;;  %v17244_v22 = vrot.slane %v10624_v7, %v15696_v38  ;;  %v4551_v51 = vcombine.low %v17167_v61, %v17172_v63  ;;  %v17252_v11 = vpop.permute.xlu0 %7605  ;;  %v4317_v12 = vcombine.low %v17164_v8, %v4310_v13  ;;  %v23901_v29 = vld [vmem:[#allocation114_spill] sm:$0xff] }
 0x4ad   : > { %23897 = vst [vmem:[#allocation69_spill] sm:$0xff] %v17227_v50  ;;  %23898 = vst [vmem:[#allocation41_spill] sm:$0xff] %v17230_v3  ;;  %v8839_v32 = vcombine.low %v17221_v62, %v17227_v50  ;;  %v8856_v6 = vcombine.high %v17224_v42, %v17230_v3  ;;  %v5951_v33 = vcombine.low %v23902_v46, %v23901_v29  ;;  %v23936_v3 = vld [vmem:[#allocation132_spill] sm:$0xff] }
 0x4ae   : > { %23899 = vst [vmem:[#allocation134_spill] sm:$0xff] %v17241_v35  ;;  %23900 = vst [vmem:[#allocation7_spill] sm:$0xff] %v17244_v22  ;;  %v23903_v7 = vcombine.high %v23824_v2, %v16696_v34  ;;  %v23904_v37 = vcombine.high %v16980_v41, %v17025_v30  ;;  %v17268_v60 = vrot.slane %v10575_v23, %v15696_v38 }
 0x4af   : > { %v23906_v52 = vcombine.high %v17053_v45, %v17056_v9  ;;  %v5952_v42 = vcombine.high %v23902_v46, %v23901_v29  ;;  %v4519_v34 = vcombine.low %v17234_v20, %v17159_v24  ;;  %7721 = vrot.lane.b32.xlu0 %v4317_v12, %s14267_s6  ;;  %v17282_v2 = vrot.slane %v8839_v32, %v15696_v38 }
 0x4b0   : > { %7811 = vrot.lane.b32.xlu1 %v23903_v7, %s14267_s6  ;;  %v17265_v28 = vrot.slane %v23904_v37, %v15696_v38  ;;  %23905 = vst [vmem:[#allocation113_spill] sm:$0xff] %v17268_v60  ;;  %v17285_v41 = vrot.slane %v8856_v6, %v15696_v38  ;;  %v7700_v30 = vpop.permute.xlu1 %7699  ;;  %v17288_v37 = vrot.slane %v8807_v43, %v15696_v38  ;;  %v17296_v12 = vpop.permute.xlu0 %7609  ;;  %v23932_v60 = vld [vmem:[#allocation84_spill] sm:$0xff] }
 0x4b1   : > { %v17274_v17 = vrot.slane %v23906_v52, %v15696_v38  ;;  %23908 = vst [vmem:[#allocation166_spill] sm:$0xff] %v17282_v2  ;;  %v4318_v32 = vcombine.high %v17164_v8, %v4310_v13  ;;  %v4559_v6 = vrot.slane %v4551_v51, %v15696_v38  ;;  %v23911_v43 = vcombine.low %v17003_v58, %v17039_v19 }
 0x4b2   : > { %23909 = vst [vmem:[#allocation16_spill] sm:$0xff] %v17285_v41  ;;  %23910 = vst [vmem:[#allocation114_spill] sm:$0xff] %v17288_v37  ;;  %v23912_v7 = vcombine.high %v17083_v21, %v17086_v16  ;;  %v23914_v23 = vcombine.low %v23881_v1, %v23880_v27  ;;  %v23915_v8 = vcombine.high %v23881_v1, %v23880_v27  ;;  %v23918_v27 = vld [vmem:[#allocation95_spill] sm:$0xff] }
 0x4b3   : > { %23907 = vst [vmem:[#allocation109_spill] sm:$0xff] %v17274_v17  ;;  %v17304_v29 = vrot.slane %v23911_v43, %v15696_v38  ;;  %v23916_v51 = vcombine.low %v23825_v59, %v16718_v48  ;;  %v23917_v43 = vcombine.high %v17003_v58, %v17039_v19  ;;  %7725 = vrot.lane.b32.xlu0 %v4318_v32, %s14267_s6  ;;  %v23931_v17 = vld [vmem:[#allocation177_spill] sm:$0xff]  ;;  %v23934_v21 = vld [vmem:[#allocation43_spill] sm:$0xff] }
 0x4b4   : > { %v17310_v46 = vrot.slane %v23912_v7, %v15696_v38  ;;  %v17316_v52 = vrot.slane %v23914_v23, %v14347_v5  ;;  %v17322_v13 = vrot.slane %v23915_v8, %v14347_v5  ;;  %v4527_v1 = vrot.slane %v4519_v34, %v15696_v38 }
 0x4b5   : > { %7815 = vrot.lane.b32.xlu1 %v23916_v51, %s14267_s6  ;;  %v17332_v7 = vrot.slane %v23917_v43, %v15696_v38  ;;  %v17345_v58 = vrot.slane %v5951_v33, %v14347_v5  ;;  %v4504_v19 = vcombine.high %v23879_v44, %v16534_v25  ;;  %v10648_v32 = vcombine.high %v17204_v14, %v17296_v12  ;;  %v7704_v43 = vpop.permute.xlu1 %7703  ;;  %v17358_v51 = vpop.permute.xlu0 %7613 }
 0x4b6   : > { %23913 = vst [vmem:[#allocation40_spill] sm:$0xff] %v17310_v46  ;;  %v17354_v23 = vrot.slane %v5952_v42, %v14347_v5  ;;  %v4552_v8 = vcombine.high %v17167_v61, %v17172_v63  ;;  %v4583_v33 = vcombine.low %v4527_v1, %v4559_v6  ;;  %v4472_v25 = vcombine.high %v23876_v26, %v23875_v31 }
 0x4b7   : > { %v4520_v44 = vcombine.high %v17234_v20, %v17159_v24  ;;  %v4488_v34 = vcombine.high %v23878_v39, %v23877_v18  ;;  %v10664_v42 = vcombine.high %v17252_v11, %v17358_v51  ;;  %v23919_v61 = vcombine.high %v23825_v59, %v16718_v48 }
 0x4b8   : > { %v5743_v63 = vcombine.low %v17108_v47, %v17316_v52  ;;  %v8879_v22 = vcombine.low %v17238_v10, %v7704_v43  ;;  %v8880_v31 = vcombine.high %v17238_v10, %v7704_v43  ;;  %7729 = vrot.lane.b32.xlu0 %v4583_v33, %s14267_s6  ;;  %v4456_v39 = vcombine.high %v23884_v54, %v23883_v57 }
 0x4b9   : > { %7819 = vrot.lane.b32.xlu1 %v23919_v61, %s14267_s6  ;;  %v17384_v18 = vrot.slane %v4504_v19, %v14347_v5  ;;  %v17387_v48 = vrot.slane %v10648_v32, %v14347_v5  ;;  %v17390_v59 = vrot.slane %v10664_v42, %v14347_v5  ;;  %v7708_v24 = vpop.permute.xlu1 %7707  ;;  %v17392_v43 = vpop.permute.xlu0 %7617  ;;  %v4584_v33 = vcombine.high %v4527_v1, %v4559_v6  ;;  %v23926_v42 = vld [vmem:[#allocation112_spill] sm:$0xff] }
 0x4ba   : > { %v8895_v20 = vcombine.low %v7700_v30, %v7708_v24  ;;  %v8896_v10 = vcombine.high %v7700_v30, %v7708_v24  ;;  %v4566_v61 = vrot.slane %v4552_v8, %v15696_v38  ;;  %v4486_v26 = vrot.slane %v4472_v25, %v14347_v5  ;;  %v23925_v25 = vld [vmem:[#allocation116_spill] sm:$0xff] }
 0x4bb   : > { %23920 = vst [vmem:[#allocation95_spill] sm:$0xff] %v17387_v48  ;;  %23921 = vst [vmem:[#allocation191_spill] sm:$0xff] %v17390_v59  ;;  %v17397_v57 = vrot.slane %v4488_v34, %v14347_v5  ;;  %v23922_v19 = vcombine.low %v16825_v40, %v17010_v53  ;;  %v4534_v30 = vrot.slane %v4520_v44, %v15696_v38 }
 0x4bc   : > { %v17407_v32 = vrot.slane %v8879_v22, %v14347_v5  ;;  %v17410_v6 = vrot.slane %v8880_v31, %v14347_v5  ;;  %v17413_v1 = vrot.slane %v8895_v20, %v14347_v5  ;;  %v17416_v8 = vrot.slane %v8896_v10, %v14347_v5  ;;  %7733 = vrot.lane.b32.xlu0 %v4584_v33, %s14267_s6  ;;  %v23930_v10 = vld [vmem:[#allocation20_spill] sm:$0xff] }
 0x4bd   : > { %7823 = vrot.lane.b32.xlu1 %v23922_v19, %s14267_s6  ;;  %v5744_v34 = vcombine.high %v17108_v47, %v17316_v52  ;;  %v5967_v44 = vcombine.low %v23926_v42, %v23925_v25  ;;  %v5968_v22 = vcombine.high %v23926_v42, %v23925_v25  ;;  %v4470_v31 = vrot.slane %v4456_v39, %v14347_v5  ;;  %v17426_v24 = vpop.permute.xlu1 %7711  ;;  %v7622_v47 = vpop.permute.xlu0 %7621  ;;  %v23928_v42 = vld [vmem:[#allocation100_spill] sm:$0xff] }
 0x4be   : > { %23923 = vst [vmem:[#allocation192_spill] sm:$0xff] %v17410_v6  ;;  %23924 = vst [vmem:[#allocation193_spill] sm:$0xff] %v17416_v8  ;;  %v4567_v20 = vcombine.low %v17397_v57, %v17384_v18  ;;  %v4585_v52 = vcombine.low %v4534_v30, %v4566_v61  ;;  %v5759_v19 = vcombine.low %v17111_v49, %v17322_v13 }
 0x4bf   : > { %v23927_v39 = vcombine.high %v16825_v40, %v17010_v53  ;;  %v4535_v33 = vcombine.low %v4470_v31, %v4486_v26  ;;  %v17452_v45 = vrot.slane %v5743_v63, %v15696_v38  ;;  %v17455_v40 = vrot.slane %v5967_v44, %v14347_v5  ;;  %v23933_v44 = vld [vmem:[#allocation117_spill] sm:$0xff] }
 0x4c0   : > { %7737 = vrot.lane.b32.xlu0 %v4585_v52, %s14267_s6  ;;  %v17458_v53 = vrot.slane %v5968_v22, %v14347_v5  ;;  %v17463_v52 = vrot.slane %v5744_v34, %v15696_v38  ;;  %v4743_v35 = vcombine.low %v23932_v60, %v23931_v17  ;;  %v4536_v25 = vcombine.high %v4470_v31, %v4486_v26  ;;  %v23935_v22 = vld [vmem:[#allocation52_spill] sm:$0xff]  ;;  %v23937_v34 = vld [vmem:[#allocation107_spill] sm:$0xff]  ;;  %v23940_v31 = vld [vmem:[#allocation37_spill] sm:$0xff] }
 0x4c1   : > { %7827 = vrot.lane.b32.xlu1 %v23927_v39, %s14267_s6  ;;  %v23929_v39 = vld [vmem:[#allocation165_spill] sm:$0xff]  ;;  %v7716_v9 = vpop.permute.xlu1 %7715  ;;  %v7626_v41 = vpop.permute.xlu0 %7625  ;;  %v4586_v63 = vcombine.high %v4534_v30, %v4566_v61  ;;  %v4575_v46 = vrot.slane %v4567_v20, %v15696_v38  ;;  %v4759_v4 = vcombine.low %v23936_v3, %v23935_v22  ;;  %v10663_v56 = vcombine.low %v17252_v11, %v17358_v51  ;;  %v23939_v30 = vld [vmem:[#allocation55_spill] sm:$0xff] }
 0x4c2   : > { %v4727_v54 = vcombine.low %v23930_v10, %v23929_v39  ;;  %v23938_v62 = vcombine.low %v16828_v0, %v23937_v34  ;;  %v17479_v26 = vrot.slane %v5759_v19, %v15696_v38  ;;  %v4775_v20 = vcombine.low %v23940_v31, %v23939_v30 }
 0x4c3   : > { %v10647_v16 = vcombine.low %v17204_v14, %v17296_v12  ;;  %v4543_v11 = vrot.slane %v4535_v33, %v15696_v38  ;;  %v10679_v19 = vcombine.low %v17392_v43, %v7626_v41  ;;  %v10680_v61 = vcombine.high %v17392_v43, %v7626_v41 }
 0x4c4   : > { %7741 = vrot.lane.b32.xlu0 %v4586_v63, %s14267_s6  ;;  %v17497_v37 = vrot.slane %v4743_v35, %v14347_v5  ;;  %v4568_v14 = vcombine.high %v17397_v57, %v17384_v18  ;;  %v17502_v33 = vrot.slane %v4536_v25, %v15696_v38  ;;  %v17505_v51 = vrot.slane %v4759_v4, %v14347_v5 }
 0x4c5   : > { %7831 = vrot.lane.b32.xlu1 %v23938_v62, %s14267_s6  ;;  %v17492_v62 = vrot.slane %v4727_v54, %v14347_v5  ;;  %v7720_v50 = vpop.permute.xlu1 %7719  ;;  %v7630_v12 = vpop.permute.xlu0 %7629  ;;  %v4587_v63 = vcombine.low %v4543_v11, %v4575_v46  ;;  %v17508_v54 = vrot.slane %v10663_v56, %v14347_v5  ;;  %v23942_v35 = vcombine.high %v16828_v0, %v23937_v34 }
 0x4c6   : > { %v10695_v2 = vcombine.low %v7622_v47, %v7630_v12  ;;  %v10696_v41 = vcombine.high %v7622_v47, %v7630_v12  ;;  %v17515_v18 = vrot.slane %v4775_v20, %v14347_v5  ;;  %v17518_v43 = vrot.slane %v10647_v16, %v14347_v5 }
 0x4c7   : > { %23941 = vst [vmem:[#allocation116_spill] sm:$0xff] %v17508_v54  ;;  %v8911_v57 = vcombine.low %v17426_v24, %v7720_v50  ;;  %v8912_v4 = vcombine.high %v17426_v24, %v7720_v50  ;;  %v17524_v56 = vrot.slane %v10679_v19, %v14347_v5  ;;  %v17527_v47 = vrot.slane %v10680_v61, %v14347_v5 }
 0x4c8   : > { %23943 = vst [vmem:[#allocation112_spill] sm:$0xff] %v17518_v43  ;;  %7745 = vrot.lane.b32.xlu0 %v4587_v63, %s14267_s6  ;;  %v17530_v0 = vrot.slane %v10695_v2, %v14347_v5  ;;  %v17533_v25 = vrot.slane %v10696_v41, %v14347_v5  ;;  %v4588_v50 = vcombine.high %v4543_v11, %v4575_v46  ;;  %v23948_v41 = vld [vmem:[#allocation24_spill] sm:$0xff] }
 0x4c9   : > { %7835 = vrot.lane.b32.xlu1 %v23942_v35, %s14267_s6  ;;  %23944 = vst [vmem:[#allocation100_spill] sm:$0xff] %v17524_v56  ;;  %23945 = vst [vmem:[#allocation165_spill] sm:$0xff] %v17527_v47  ;;  %v7724_v16 = vpop.permute.xlu1 %7723  ;;  %v17535_v12 = vpop.permute.xlu0 %7633  ;;  %v4582_v24 = vrot.slane %v4568_v14, %v15696_v38  ;;  %v10711_v19 = vcombine.low %v17518_v43, %v17508_v54  ;;  %v8943_v61 = vcombine.low %v17407_v32, %v17413_v1 }
 0x4ca   : > { %23946 = vst [vmem:[#allocation20_spill] sm:$0xff] %v17530_v0  ;;  %23947 = vst [vmem:[#allocation177_spill] sm:$0xff] %v17533_v25  ;;  %v8927_v34 = vcombine.low %v7716_v9, %v7724_v16  ;;  %v8928_v20 = vcombine.high %v7716_v9, %v7724_v16  ;;  %v10743_v2 = vcombine.low %v17524_v56, %v17530_v0  ;;  %v23949_v9 = vld [vmem:[#allocation103_spill] sm:$0xff] }
 0x4cb   : > { %v10760_v63 = vcombine.high %v17527_v47, %v17533_v25  ;;  %v23950_v35 = vcombine.low %v23948_v41, %v23949_v9  ;;  %v8919_v46 = vrot.slane %v8911_v57, %v14347_v5  ;;  %v17552_v11 = vrot.slane %v8912_v4, %v14347_v5 }
 0x4cc   : > { %v8935_v14 = vrot.slane %v8927_v34, %v14347_v5  ;;  %v17556_v16 = vrot.slane %v8928_v20, %v14347_v5  ;;  %7749 = vrot.lane.b32.xlu0 %v4588_v50, %s14267_s6  ;;  %v4791_v47 = vcombine.low %v17492_v62, %v17497_v37  ;;  %v4823_v25 = vcombine.low %v17505_v51, %v17515_v18 }
 0x4cd   : > { %7839 = vrot.lane.b32.xlu1 %v23950_v35, %s14267_s6  ;;  %23951 = vst [vmem:[#allocation84_spill] sm:$0xff] %v17552_v11  ;;  %v17563_v43 = vpop.permute.xlu1 %7727  ;;  %v17566_v57 = vrot.slane %v10743_v2, %v15696_v38  ;;  %v17569_v4 = vrot.slane %v10760_v63, %v15696_v38  ;;  %v17573_v50 = vpop.permute.xlu0 %7637  ;;  %v4589_v54 = vcombine.low %v17502_v33, %v4582_v24 }
 0x4ce   : > { %23952 = vst [vmem:[#allocation117_spill] sm:$0xff] %v17556_v16  ;;  %v8975_v34 = vcombine.low %v8919_v46, %v8935_v14  ;;  %v8976_v35 = vcombine.high %v8919_v46, %v8935_v14  ;;  %v8992_v20 = vcombine.high %v17552_v11, %v17556_v16  ;;  %v23955_v56 = vcombine.high %v23948_v41, %v23949_v9  ;;  %v23967_v9 = vld [vmem:[#allocation119_spill] sm:$0xff]  ;;  %v23995_v16 = vld [vmem:[#allocation82_spill] sm:$0xff] }
 0x4cf   : > { %23953 = vst [vmem:[#allocation43_spill] sm:$0xff] %v17566_v57  ;;  %23954 = vst [vmem:[#allocation52_spill] sm:$0xff] %v17569_v4  ;;  %v4590_v2 = vcombine.high %v17502_v33, %v4582_v24  ;;  %v17582_v0 = vrot.slane %v8943_v61, %v15696_v38  ;;  %v17585_v63 = vrot.slane %v10711_v19, %v15696_v38  ;;  %v23970_v4 = vld [vmem:[#allocation47_spill] sm:$0xff] }
 0x4d0   : > { %v23958_v46 = vcombine.high %v17387_v48, %v17390_v59  ;;  %7753 = vrot.lane.b32.xlu0 %v4589_v54, %s14267_s6  ;;  %v17595_v11 = vrot.slane %v8975_v34, %v15696_v38  ;;  %v23961_v33 = vcombine.high %v17407_v32, %v17413_v1  ;;  %v17604_v24 = vrot.slane %v8976_v35, %v15696_v38  ;;  %v23968_v54 = vld [vmem:[#allocation115_spill] sm:$0xff]  ;;  %v23969_v35 = vld [vmem:[#allocation50_spill] sm:$0xff] }
 0x4d1   : > { %7843 = vrot.lane.b32.xlu1 %v23955_v56, %s14267_s6  ;;  %23956 = vst [vmem:[#allocation132_spill] sm:$0xff] %v17582_v0  ;;  %23957 = vst [vmem:[#allocation107_spill] sm:$0xff] %v17585_v63  ;;  %v17607_v19 = vrot.slane %v8992_v20, %v15696_v38  ;;  %v17609_v61 = vpop.permute.xlu1 %7731  ;;  %v4831_v41 = vrot.slane %v4823_v25, %v15696_v38  ;;  %v17618_v1 = vpop.permute.xlu0 %7641  ;;  %v23965_v20 = vcombine.high %v17410_v6, %v17416_v8  ;;  %v23992_v6 = vld [vmem:[#allocation88_spill] sm:$0xff]  ;;  %v23994_v8 = vld [vmem:[#allocation138_spill] sm:$0xff] }
 0x4d2   : > { %v17591_v14 = vrot.slane %v23958_v46, %v15696_v38  ;;  %23960 = vst [vmem:[#allocation37_spill] sm:$0xff] %v17595_v11  ;;  %v17601_v56 = vrot.slane %v23961_v33, %v15696_v38  ;;  %23963 = vst [vmem:[#allocation103_spill] sm:$0xff] %v17604_v24  ;;  %v6016_v33 = vcombine.high %v17345_v58, %v17455_v40  ;;  %v23998_v11 = vld [vmem:[#allocation51_spill] sm:$0xff] }
 0x4d3   : > { %23964 = vst [vmem:[#allocation194_spill] sm:$0xff] %v17607_v19  ;;  %v17630_v46 = vrot.slane %v23965_v20, %v15696_v38  ;;  %v6031_v32 = vcombine.low %v17354_v23, %v17458_v53  ;;  %v5727_v34 = vcombine.low %v23968_v54, %v23967_v9  ;;  %v23972_v25 = vcombine.high %v17111_v49, %v17322_v13 }
 0x4d4   : > { %23959 = vst [vmem:[#allocation55_spill] sm:$0xff] %v17591_v14  ;;  %23962 = vst [vmem:[#allocation24_spill] sm:$0xff] %v17601_v56  ;;  %v23971_v14 = vcombine.low %v23969_v35, %v23970_v4  ;;  %v6032_v48 = vcombine.high %v17354_v23, %v17458_v53  ;;  %7757 = vrot.lane.b32.xlu0 %v4590_v2, %s14267_s6  ;;  %v4799_v59 = vrot.slane %v4791_v47, %v15696_v38 }
 0x4d5   : > { %23966 = vst [vmem:[#allocation195_spill] sm:$0xff] %v17630_v46  ;;  %v17646_v20 = vrot.slane %v23972_v25, %v15696_v38  ;;  %v23974_v13 = vcombine.high %v23934_v21, %v23933_v44  ;;  %v5728_v53 = vcombine.high %v23968_v54, %v23967_v9  ;;  %v10784_v47 = vcombine.high %v17535_v12, %v17618_v1  ;;  %v17670_v2 = vpop.permute.xlu1 %7735  ;;  %v17676_v57 = vpop.permute.xlu0 %7645  ;;  %v23977_v9 = vld [vmem:[#allocation120_spill] sm:$0xff] }
 0x4d6   : > { %7847 = vrot.lane.b32.xlu1 %v23971_v14, %s14267_s6  ;;  %v23973_v14 = vcombine.low %v23934_v21, %v23933_v44  ;;  %v4776_v25 = vcombine.high %v23940_v31, %v23939_v30  ;;  %v4855_v63 = vcombine.low %v4799_v59, %v4831_v41  ;;  %v23975_v21 = vcombine.low %v17345_v58, %v17455_v40 }
 0x4d7   : > { %v17664_v23 = vrot.slane %v23974_v13, %v14347_v5  ;;  %v5735_v54 = vrot.slane %v5727_v34, %v14347_v5  ;;  %v23978_v13 = vld [vmem:[#allocation48_spill] sm:$0xff]  ;;  %v4744_v30 = vcombine.high %v23932_v60, %v23931_v17  ;;  %v10800_v31 = vcombine.high %v17573_v50, %v17676_v57 }
 0x4d8   : > { %v5719_v49 = vrot.slane %v23973_v14, %v14347_v5  ;;  %v4824_v14 = vcombine.high %v17505_v51, %v17515_v18  ;;  %v17682_v44 = vrot.slane %v23975_v21, %v15696_v38  ;;  %v5983_v19 = vcombine.low %v23978_v13, %v23977_v9  ;;  %7761 = vrot.lane.b32.xlu0 %v4855_v63, %s14267_s6 }
 0x4d9   : > { %v23979_v51 = vcombine.high %v23969_v35, %v23970_v4  ;;  %v5984_v58 = vcombine.high %v23978_v13, %v23977_v9  ;;  %v4792_v40 = vcombine.high %v17492_v62, %v17497_v37  ;;  %v4760_v18 = vcombine.high %v23936_v3, %v23935_v22  ;;  %v17713_v37 = vpop.permute.xlu1 %7739  ;;  %v17720_v62 = vpop.permute.xlu0 %7649 }
 0x4da   : > { %23976 = vst [vmem:[#allocation119_spill] sm:$0xff] %v17682_v44  ;;  %v9016_v60 = vcombine.high %v17563_v43, %v17670_v2  ;;  %v5742_v17 = vrot.slane %v5728_v53, %v14347_v5  ;;  %v4728_v4 = vcombine.high %v23930_v10, %v23929_v39  ;;  %v17708_v34 = vrot.slane %v10784_v47, %v14347_v5 }
 0x4db   : > { %7851 = vrot.lane.b32.xlu1 %v23979_v51, %s14267_s6  ;;  %v17711_v35 = vrot.slane %v10800_v31, %v14347_v5  ;;  %v17716_v3 = vrot.slane %v4776_v25, %v14347_v5  ;;  %v9032_v22 = vcombine.high %v17609_v61, %v17713_v37  ;;  %v4856_v63 = vcombine.high %v4799_v59, %v4831_v41 }
 0x4dc   : > { %23980 = vst [vmem:[#allocation115_spill] sm:$0xff] %v17708_v34  ;;  %v4838_v53 = vrot.slane %v4824_v14, %v15696_v38  ;;  %v5775_v10 = vcombine.low %v5719_v49, %v5735_v54  ;;  %v5776_v39 = vcombine.high %v5719_v49, %v5735_v54  ;;  %v4758_v47 = vrot.slane %v4744_v30, %v14347_v5 }
 0x4dd   : > { %23981 = vst [vmem:[#allocation50_spill] sm:$0xff] %v17711_v35  ;;  %v23982_v25 = vcombine.low %v16853_v55, %v17148_v36  ;;  %v17731_v9 = vrot.slane %v4760_v18, %v14347_v5  ;;  %v17734_v13 = vrot.slane %v9016_v60, %v14347_v5  ;;  %v17737_v59 = vrot.slane %v9032_v22, %v14347_v5  ;;  %v17743_v54 = vpop.permute.xlu1 %7743  ;;  %v7654_v60 = vpop.permute.xlu0 %7653 }
 0x4de   : > { %7765 = vrot.lane.b32.xlu0 %v4856_v63, %s14267_s6  ;;  %v4806_v41 = vrot.slane %v4792_v40, %v15696_v38  ;;  %v5791_v49 = vcombine.low %v17664_v23, %v5742_v17  ;;  %v5792_v14 = vcombine.high %v17664_v23, %v5742_v17  ;;  %v17746_v30 = vrot.slane %v6016_v33, %v15696_v38  ;;  %v23987_v17 = vld [vmem:[#allocation122_spill] sm:$0xff] }
 0x4df   : > { %7855 = vrot.lane.b32.xlu1 %v23982_v25, %s14267_s6  ;;  %23983 = vst [vmem:[#allocation47_spill] sm:$0xff] %v17734_v13  ;;  %23984 = vst [vmem:[#allocation120_spill] sm:$0xff] %v17737_v59  ;;  %v17749_v31 = vrot.slane %v6031_v32, %v15696_v38  ;;  %v4742_v51 = vrot.slane %v4728_v4, %v14347_v5  ;;  %v4839_v18 = vcombine.low %v17731_v9, %v17716_v3  ;;  %v23988_v63 = vld [vmem:[#allocation118_spill] sm:$0xff] }
 0x4e0   : > { %23985 = vst [vmem:[#allocation48_spill] sm:$0xff] %v17746_v30  ;;  %v4857_v22 = vcombine.low %v4806_v41, %v4838_v53  ;;  %v17757_v23 = vrot.slane %v5983_v19, %v14347_v5  ;;  %v5999_v33 = vcombine.low %v23988_v63, %v23987_v17  ;;  %v6000_v32 = vcombine.high %v23988_v63, %v23987_v17  ;;  %v23991_v63 = vld [vmem:[#allocation180_spill] sm:$0xff] }
 0x4e1   : > { %23986 = vst [vmem:[#allocation196_spill] sm:$0xff] %v17749_v31  ;;  %v23989_v4 = vcombine.high %v16853_v55, %v17148_v36  ;;  %v17768_v25 = vrot.slane %v6032_v48, %v15696_v38  ;;  %v17771_v40 = vrot.slane %v5984_v58, %v14347_v5  ;;  %v4807_v21 = vcombine.low %v4742_v51, %v4758_v47  ;;  %v7748_v36 = vpop.permute.xlu1 %7747  ;;  %v7658_v56 = vpop.permute.xlu0 %7657 }
 0x4e2   : > { %7769 = vrot.lane.b32.xlu0 %v4857_v22, %s14267_s6  ;;  %v17775_v19 = vrot.slane %v5775_v10, %v15696_v38  ;;  %v17778_v46 = vrot.slane %v5776_v39, %v15696_v38  ;;  %v4808_v17 = vcombine.high %v4742_v51, %v4758_v47  ;;  %v5015_v55 = vcombine.low %v23992_v6, %v23991_v63  ;;  %v23996_v10 = vld [vmem:[#allocation6_spill] sm:$0xff] }
 0x4e3   : > { %7859 = vrot.lane.b32.xlu1 %v23989_v4, %s14267_s6  ;;  %23990 = vst [vmem:[#allocation122_spill] sm:$0xff] %v17768_v25  ;;  %v17783_v48 = vrot.slane %v5791_v49, %v15696_v38  ;;  %v17786_v58 = vrot.slane %v5792_v14, %v15696_v38  ;;  %v23993_v4 = vld [vmem:[#allocation189_spill] sm:$0xff]  ;;  %v5047_v24 = vcombine.low %v23996_v10, %v23995_v16  ;;  %v23997_v49 = vld [vmem:[#allocation123_spill] sm:$0xff] }
 0x4e4   : > { %v5031_v22 = vcombine.low %v23994_v8, %v23993_v4  ;;  %v4858_v39 = vcombine.high %v4806_v41, %v4838_v53  ;;  %v4847_v47 = vrot.slane %v4839_v18, %v15696_v38  ;;  %v17794_v51 = vrot.slane %v5999_v33, %v14347_v5  ;;  %v24000_v53 = vld [vmem:[#allocation168_spill] sm:$0xff]  ;;  %v24001_v41 = vld [vmem:[#allocation22_spill] sm:$0xff] }
 0x4e5   : > { %v17797_v0 = vrot.slane %v6000_v32, %v14347_v5  ;;  %v10799_v25 = vcombine.low %v17573_v50, %v17676_v57  ;;  %v23999_v31 = vcombine.low %v23918_v27, %v17265_v28  ;;  %v4999_v18 = vcombine.low %v24001_v41, %v24000_v53  ;;  %v7752_v30 = vpop.permute.xlu1 %7751 }
 0x4e6   : > { %v10783_v33 = vcombine.low %v17535_v12, %v17618_v1  ;;  %v9031_v32 = vcombine.low %v17609_v61, %v17713_v37  ;;  %7773 = vrot.lane.b32.xlu0 %v4858_v39, %s14267_s6  ;;  %v4815_v14 = vrot.slane %v4807_v21, %v15696_v38  ;;  %v17816_v57 = vrot.slane %v5015_v55, %v14347_v5  ;;  %v7662_v37 = vpop.permute.xlu0 %7661 }
 0x4e7   : > { %7863 = vrot.lane.b32.xlu1 %v23999_v31, %s14267_s6  ;;  %v10815_v50 = vcombine.low %v17720_v62, %v7658_v56  ;;  %v10816_v31 = vcombine.high %v17720_v62, %v7658_v56  ;;  %v17821_v44 = vrot.slane %v4808_v17, %v15696_v38  ;;  %v17824_v12 = vrot.slane %v5031_v22, %v14347_v5 }
 0x4e8   : > { %v4840_v61 = vcombine.high %v17731_v9, %v17716_v3  ;;  %v17829_v1 = vrot.slane %v5047_v24, %v14347_v5  ;;  %v4859_v21 = vcombine.low %v4815_v14, %v4847_v47  ;;  %v9015_v55 = vcombine.low %v17563_v43, %v17670_v2 }
 0x4e9   : > { %v17834_v56 = vrot.slane %v10799_v25, %v14347_v5  ;;  %v10831_v62 = vcombine.low %v7654_v60, %v7662_v37  ;;  %v10832_v17 = vcombine.high %v7654_v60, %v7662_v37  ;;  %v24003_v22 = vcombine.high %v23918_v27, %v17265_v28  ;;  %v7756_v25 = vpop.permute.xlu1 %7755 }
 0x4ea   : > { %v17841_v3 = vrot.slane %v10783_v33, %v14347_v5  ;;  %v17844_v24 = vrot.slane %v9031_v32, %v14347_v5  ;;  %v9047_v9 = vcombine.low %v17743_v54, %v7752_v30  ;;  %v9048_v43 = vcombine.high %v17743_v54, %v7752_v30  ;;  %7777 = vrot.lane.b32.xlu0 %v4859_v21, %s14267_s6  ;;  %v17861_v32 = vpop.permute.xlu0 %7665 }
 0x4eb   : > { %24002 = vst [vmem:[#allocation118_spill] sm:$0xff] %v17834_v56  ;;  %7867 = vrot.lane.b32.xlu1 %v24003_v22, %s14267_s6  ;;  %v17850_v2 = vrot.slane %v10815_v50, %v14347_v5  ;;  %v17853_v60 = vrot.slane %v10816_v31, %v14347_v5  ;;  %v17856_v28 = vrot.slane %v10831_v62, %v14347_v5 }
 0x4ec   : > { %24004 = vst [vmem:[#allocation180_spill] sm:$0xff] %v17841_v3  ;;  %24005 = vst [vmem:[#allocation88_spill] sm:$0xff] %v17844_v24  ;;  %v17859_v27 = vrot.slane %v10832_v17, %v14347_v5  ;;  %v9063_v39 = vcombine.low %v7748_v36, %v7756_v25  ;;  %v9064_v33 = vcombine.high %v7748_v36, %v7756_v25 }
 0x4ed   : > { %24006 = vst [vmem:[#allocation189_spill] sm:$0xff] %v17850_v2  ;;  %24007 = vst [vmem:[#allocation138_spill] sm:$0xff] %v17853_v60  ;;  %v4860_v54 = vcombine.high %v4815_v14, %v4847_v47  ;;  %v4854_v30 = vrot.slane %v4840_v61, %v15696_v38  ;;  %v17865_v50 = vrot.slane %v9015_v55, %v14347_v5  ;;  %v17895_v22 = vpop.permute.xlu1 %7759 }
 0x4ee   : > { %24008 = vst [vmem:[#allocation82_spill] sm:$0xff] %v17856_v28  ;;  %24009 = vst [vmem:[#allocation6_spill] sm:$0xff] %v17859_v27  ;;  %v10847_v31 = vcombine.low %v17841_v3, %v17834_v56  ;;  %v10879_v37 = vcombine.low %v17850_v2, %v17856_v28  ;;  %v10896_v21 = vcombine.high %v17853_v60, %v17859_v27  ;;  %v24040_v28 = vld [vmem:[#allocation45_spill] sm:$0xff] }
 0x4ef   : > { %24010 = vst [vmem:[#allocation123_spill] sm:$0xff] %v17865_v50  ;;  %v24011_v36 = vcombine.low %v23928_v42, %v17304_v29  ;;  %v17878_v47 = vrot.slane %v9047_v9, %v14347_v5  ;;  %v17881_v14 = vrot.slane %v9048_v43, %v14347_v5  ;;  %v17884_v61 = vrot.slane %v9063_v39, %v14347_v5 }
 0x4f0   : > { %v17887_v55 = vrot.slane %v9064_v33, %v14347_v5  ;;  %7781 = vrot.lane.b32.xlu0 %v4860_v54, %s14267_s6  ;;  %v17891_v62 = vrot.slane %v4999_v18, %v14347_v5  ;;  %v9079_v17 = vcombine.low %v17865_v50, %v17844_v24  ;;  %v17898_v9 = vrot.slane %v10879_v37, %v15696_v38  ;;  %v17909_v33 = vpop.permute.xlu0 %7669 }
 0x4f1   : > { %7871 = vrot.lane.b32.xlu1 %v24011_v36, %s14267_s6  ;;  %24012 = vst [vmem:[#allocation51_spill] sm:$0xff] %v17878_v47  ;;  %24013 = vst [vmem:[#allocation168_spill] sm:$0xff] %v17881_v14  ;;  %v17901_v43 = vrot.slane %v10896_v21, %v15696_v38  ;;  %v5095_v25 = vcombine.low %v17824_v12, %v17829_v1  ;;  %v9111_v39 = vcombine.low %v17878_v47, %v17884_v61 }
 0x4f2   : > { %24014 = vst [vmem:[#allocation22_spill] sm:$0xff] %v17884_v61  ;;  %24015 = vst [vmem:[#allocation197_spill] sm:$0xff] %v17887_v55  ;;  %v9128_v18 = vcombine.high %v17881_v14, %v17887_v55  ;;  %v4861_v54 = vcombine.low %v17821_v44, %v4854_v30  ;;  %v6224_v37 = vcombine.high %v23998_v11, %v23997_v49  ;;  %v24049_v14 = vld [vmem:[#allocation10_spill] sm:$0xff]  ;;  %v24098_v61 = vld [vmem:[#allocation87_spill] sm:$0xff] }
 0x4f3   : > { %24016 = vst [vmem:[#allocation198_spill] sm:$0xff] %v17898_v9  ;;  %24017 = vst [vmem:[#allocation199_spill] sm:$0xff] %v17901_v43  ;;  %v24018_v21 = vcombine.high %v23928_v42, %v17304_v29  ;;  %v5807_v36 = vcombine.low %v17452_v45, %v17775_v19  ;;  %v17921_v60 = vrot.slane %v10847_v31, %v15696_v38 }
 0x4f4   : > { %v24020_v27 = vcombine.high %v17708_v34, %v17711_v35  ;;  %v5063_v56 = vcombine.low %v17891_v62, %v17816_v57  ;;  %7785 = vrot.lane.b32.xlu0 %v4861_v54, %s14267_s6  ;;  %v17935_v42 = vrot.slane %v9111_v39, %v15696_v38  ;;  %v17938_v31 = vrot.slane %v9128_v18, %v15696_v38  ;;  %v17951_v29 = vpop.permute.xlu0 %7673 }
 0x4f5   : > { %7875 = vrot.lane.b32.xlu1 %v24018_v21, %s14267_s6  ;;  %24019 = vst [vmem:[#allocation200_spill] sm:$0xff] %v17921_v60  ;;  %v7764_v21 = vpop.permute.xlu1 %7763  ;;  %v17941_v2 = vrot.slane %v9079_v17, %v15696_v38  ;;  %v6047_v39 = vcombine.low %v17757_v23, %v17794_v51  ;;  %v4862_v18 = vcombine.high %v17821_v44, %v4854_v30  ;;  %v24041_v60 = vld [vmem:[#allocation28_spill] sm:$0xff] }
 0x4f6   : > { %v17927_v3 = vrot.slane %v24020_v27, %v15696_v38  ;;  %24022 = vst [vmem:[#allocation202_spill] sm:$0xff] %v17935_v42  ;;  %24023 = vst [vmem:[#allocation203_spill] sm:$0xff] %v17938_v31  ;;  %v5103_v35 = vrot.slane %v5095_v25, %v15696_v38  ;;  %v24025_v17 = vcombine.high %v17734_v13, %v17737_v59  ;;  %v24046_v31 = vld [vmem:[#allocation119_spill] sm:$0xff]  ;;  %v24048_v13 = vld [vmem:[#allocation101_spill] sm:$0xff] }
 0x4f7   : > { %24024 = vst [vmem:[#allocation204_spill] sm:$0xff] %v17941_v2  ;;  %v24027_v44 = vcombine.low %v16992_v15, %v17332_v7  ;;  %v24028_v25 = vcombine.low %v23998_v11, %v23997_v49  ;;  %v5071_v54 = vrot.slane %v5063_v56, %v15696_v38  ;;  %v5048_v30 = vcombine.high %v23996_v10, %v23995_v16  ;;  %v24101_v42 = vld [vmem:[#allocation64_spill] sm:$0xff] }
 0x4f8   : > { %24021 = vst [vmem:[#allocation201_spill] sm:$0xff] %v17927_v3  ;;  %v17959_v27 = vrot.slane %v24025_v17, %v15696_v38  ;;  %7789 = vrot.lane.b32.xlu0 %v4862_v18, %s14267_s6  ;;  %v10920_v11 = vcombine.high %v17861_v32, %v17951_v29  ;;  %v5096_v56 = vcombine.high %v17824_v12, %v17829_v1 }
 0x4f9   : > { %7879 = vrot.lane.b32.xlu1 %v24027_v44, %s14267_s6  ;;  %v17977_v17 = vrot.slane %v24028_v25, %v14347_v5  ;;  %v17986_v44 = vrot.slane %v6224_v37, %v14347_v5  ;;  %v7768_v49 = vpop.permute.xlu1 %7767  ;;  %v17996_v25 = vpop.permute.xlu0 %7677  ;;  %v5127_v43 = vcombine.low %v5071_v54, %v5103_v35  ;;  %v5016_v16 = vcombine.high %v23992_v6, %v23991_v63 }
 0x4fa   : > { %24026 = vst [vmem:[#allocation205_spill] sm:$0xff] %v17959_v27  ;;  %v5064_v10 = vcombine.high %v17891_v62, %v17816_v57  ;;  %v5032_v18 = vcombine.high %v23994_v8, %v23993_v4  ;;  %v10936_v12 = vcombine.high %v17909_v33, %v17996_v25  ;;  %v24029_v1 = vcombine.high %v16992_v15, %v17332_v7  ;;  %v24047_v27 = vld [vmem:[#allocation179_spill] sm:$0xff] }
 0x4fb   : > { %v9151_v37 = vcombine.low %v17895_v22, %v7768_v49  ;;  %v9152_v34 = vcombine.high %v17895_v22, %v7768_v49  ;;  %v5000_v63 = vcombine.high %v24001_v41, %v24000_v53  ;;  %v18024_v4 = vrot.slane %v5048_v30, %v14347_v5  ;;  %v24036_v41 = vld [vmem:[#allocation126_spill] sm:$0xff] }
 0x4fc   : > { %7793 = vrot.lane.b32.xlu0 %v5127_v43, %s14267_s6  ;;  %v18027_v15 = vrot.slane %v10920_v11, %v14347_v5  ;;  %v18030_v7 = vrot.slane %v10936_v12, %v14347_v5  ;;  %v5128_v49 = vcombine.high %v5071_v54, %v5103_v35  ;;  %v18036_v8 = vrot.slane %v5016_v16, %v14347_v5 }
 0x4fd   : > { %7883 = vrot.lane.b32.xlu1 %v24029_v1, %s14267_s6  ;;  %v7772_v57 = vpop.permute.xlu1 %7771  ;;  %v18032_v43 = vpop.permute.xlu0 %7681  ;;  %v5110_v1 = vrot.slane %v5096_v56, %v15696_v38  ;;  %v18039_v53 = vrot.slane %v5032_v18, %v14347_v5  ;;  %v5078_v30 = vrot.slane %v5064_v10, %v15696_v38  ;;  %v18049_v35 = vrot.slane %v9152_v34, %v14347_v5  ;;  %v24034_v18 = vld [vmem:[#allocation125_spill] sm:$0xff] }
 0x4fe   : > { %24030 = vst [vmem:[#allocation206_spill] sm:$0xff] %v18027_v15  ;;  %24031 = vst [vmem:[#allocation207_spill] sm:$0xff] %v18030_v7  ;;  %v9167_v62 = vcombine.low %v7764_v21, %v7772_v57  ;;  %v9168_v22 = vcombine.high %v7764_v21, %v7772_v57  ;;  %v18046_v21 = vrot.slane %v9151_v37, %v14347_v5  ;;  %v24035_v56 = vld [vmem:[#allocation121_spill] sm:$0xff] }
 0x4ff   : > { %24032 = vst [vmem:[#allocation208_spill] sm:$0xff] %v18049_v35  ;;  %v6239_v16 = vcombine.low %v24035_v56, %v24034_v18  ;;  %v5014_v37 = vrot.slane %v5000_v63, %v14347_v5  ;;  %v18066_v34 = vrot.slane %v6047_v39, %v15696_v38  ;;  %v5111_v12 = vcombine.low %v18039_v53, %v18024_v4 }
 0x500   : > { %v18052_v54 = vrot.slane %v9167_v62, %v14347_v5  ;;  %v18055_v11 = vrot.slane %v9168_v22, %v14347_v5  ;;  %7797 = vrot.lane.b32.xlu0 %v5128_v49, %s14267_s6  ;;  %v5129_v49 = vcombine.low %v5078_v30, %v5110_v1  ;;  %v24038_v39 = vcombine.high %v17452_v45, %v17775_v19 }
 0x501   : > { %7887 = vrot.lane.b32.xlu1 %v5807_v36, %s14267_s6  ;;  %v6240_v36 = vcombine.high %v24035_v56, %v24034_v18  ;;  %v18063_v10 = vpop.permute.xlu1 %7775  ;;  %v7686_v22 = vpop.permute.xlu0 %7685  ;;  %v24037_v18 = vld [vmem:[#allocation56_spill] sm:$0xff]  ;;  %v24039_v62 = vcombine.high %v17757_v23, %v17794_v51  ;;  %v5079_v3 = vcombine.low %v5014_v37, %v18036_v8  ;;  %v5319_v9 = vcombine.low %v24041_v60, %v24040_v28 }
 0x502   : > { %24033 = vst [vmem:[#allocation209_spill] sm:$0xff] %v18055_v11  ;;  %v6495_v56 = vcombine.low %v24037_v18, %v24036_v41  ;;  %v6496_v63 = vcombine.high %v24037_v18, %v24036_v41  ;;  %v24042_v45 = vcombine.low %v17771_v40, %v17797_v0  ;;  %v24043_v41 = vcombine.high %v17771_v40, %v17797_v0  ;;  %v24044_v18 = vld [vmem:[#allocation167_spill] sm:$0xff]  ;;  %v24050_v0 = vld [vmem:[#allocation136_spill] sm:$0xff] }
 0x503   : > { %v18088_v57 = vrot.slane %v24039_v62, %v15696_v38  ;;  %v18107_v51 = vrot.slane %v6239_v16, %v14347_v5  ;;  %v18110_v62 = vrot.slane %v6240_v36, %v14347_v5  ;;  %v5287_v59 = vcombine.low %v24048_v13, %v24047_v27 }
 0x504   : > { %7801 = vrot.lane.b32.xlu0 %v5129_v49, %s14267_s6  ;;  %v18098_v19 = vrot.slane %v24042_v45, %v15696_v38  ;;  %v18104_v23 = vrot.slane %v24043_v41, %v15696_v38  ;;  %v24045_v49 = vld [vmem:[#allocation27_spill] sm:$0xff]  ;;  %v5303_v40 = vcombine.low %v24050_v0, %v24049_v14  ;;  %v5130_v55 = vcombine.high %v5078_v30, %v5110_v1 }
 0x505   : > { %7891 = vrot.lane.b32.xlu1 %v24038_v39, %s14267_s6  ;;  %v5271_v39 = vcombine.low %v24045_v49, %v24044_v18  ;;  %v7780_v6 = vpop.permute.xlu1 %7779  ;;  %v7690_v41 = vpop.permute.xlu0 %7689  ;;  %v5119_v16 = vrot.slane %v5111_v12, %v15696_v38  ;;  %v18122_v36 = vrot.slane %v6495_v56, %v14347_v5  ;;  %v5080_v50 = vcombine.high %v5014_v37, %v18036_v8 }
 0x506   : > { %v10935_v24 = vcombine.low %v17909_v33, %v17996_v25  ;;  %v24051_v45 = vcombine.low %v17463_v52, %v17778_v46  ;;  %v18134_v1 = vrot.slane %v6496_v63, %v14347_v5  ;;  %v18137_v30 = vrot.slane %v5319_v9, %v14347_v5  ;;  %v24052_v63 = vld [vmem:[#allocation48_spill] sm:$0xff] }
 0x507   : > { %v10919_v8 = vcombine.low %v17861_v32, %v17951_v29  ;;  %v5087_v33 = vrot.slane %v5079_v3, %v15696_v38  ;;  %v18144_v25 = vrot.slane %v5271_v39, %v14347_v5  ;;  %v10951_v37 = vcombine.low %v18032_v43, %v7690_v41 }
 0x508   : > { %7805 = vrot.lane.b32.xlu0 %v5130_v55, %s14267_s6  ;;  %v10952_v12 = vcombine.high %v18032_v43, %v7690_v41  ;;  %v18151_v9 = vrot.slane %v5287_v59, %v14347_v5  ;;  %v18154_v32 = vrot.slane %v5303_v40, %v14347_v5  ;;  %v5112_v3 = vcombine.high %v18039_v53, %v18024_v4 }
 0x509   : > { %7895 = vrot.lane.b32.xlu1 %v24051_v45, %s14267_s6  ;;  %v7784_v56 = vpop.permute.xlu1 %7783  ;;  %v7694_v55 = vpop.permute.xlu0 %7693  ;;  %v5131_v29 = vcombine.low %v5087_v33, %v5119_v16  ;;  %v18159_v39 = vrot.slane %v10935_v24, %v14347_v5  ;;  %v24054_v41 = vcombine.high %v17463_v52, %v17778_v46  ;;  %v5094_v59 = vrot.slane %v5080_v50, %v15696_v38 }
 0x50a   : > { %v10967_v47 = vcombine.low %v7686_v22, %v7694_v55  ;;  %v10968_v43 = vcombine.high %v7686_v22, %v7694_v55  ;;  %v5367_v40 = vcombine.low %v18154_v32, %v18137_v30  ;;  %v18169_v45 = vrot.slane %v10919_v8, %v14347_v5 }
 0x50b   : > { %24053 = vst [vmem:[#allocation125_spill] sm:$0xff] %v18159_v39  ;;  %v9183_v4 = vcombine.low %v18063_v10, %v7784_v56  ;;  %v9184_v24 = vcombine.high %v18063_v10, %v7784_v56  ;;  %v18175_v53 = vrot.slane %v10951_v37, %v14347_v5  ;;  %v18178_v52 = vrot.slane %v10952_v12, %v14347_v5 }
 0x50c   : > { %24055 = vst [vmem:[#allocation121_spill] sm:$0xff] %v18169_v45  ;;  %7809 = vrot.lane.b32.xlu0 %v5131_v29, %s14267_s6  ;;  %v18181_v46 = vrot.slane %v10967_v47, %v14347_v5  ;;  %v18184_v50 = vrot.slane %v10968_v43, %v14347_v5  ;;  %v5132_v10 = vcombine.high %v5087_v33, %v5119_v16 }
 0x50d   : > { %7899 = vrot.lane.b32.xlu1 %v24054_v41, %s14267_s6  ;;  %24056 = vst [vmem:[#allocation126_spill] sm:$0xff] %v18175_v53  ;;  %24057 = vst [vmem:[#allocation56_spill] sm:$0xff] %v18178_v52  ;;  %v7788_v22 = vpop.permute.xlu1 %7787  ;;  %v18186_v41 = vpop.permute.xlu0 %7697  ;;  %v5126_v56 = vrot.slane %v5112_v3, %v15696_v38  ;;  %v10983_v37 = vcombine.low %v18169_v45, %v18159_v39  ;;  %v9215_v12 = vcombine.low %v18046_v21, %v18052_v54 }
 0x50e   : > { %24058 = vst [vmem:[#allocation45_spill] sm:$0xff] %v18181_v46  ;;  %24059 = vst [vmem:[#allocation28_spill] sm:$0xff] %v18184_v50  ;;  %v9199_v8 = vcombine.low %v7780_v6, %v7788_v22  ;;  %v9200_v55 = vcombine.high %v7780_v6, %v7788_v22  ;;  %v11015_v47 = vcombine.low %v18175_v53, %v18181_v46 }
 0x50f   : > { %v11032_v29 = vcombine.high %v18178_v52, %v18184_v50  ;;  %v24060_v6 = vcombine.low %v17479_v26, %v17783_v48  ;;  %v9191_v16 = vrot.slane %v9183_v4, %v14347_v5  ;;  %v18203_v33 = vrot.slane %v9184_v24, %v14347_v5 }
 0x510   : > { %v9207_v3 = vrot.slane %v9199_v8, %v14347_v5  ;;  %v18207_v43 = vrot.slane %v9200_v55, %v14347_v5  ;;  %7813 = vrot.lane.b32.xlu0 %v5132_v10, %s14267_s6  ;;  %v5335_v22 = vcombine.low %v18144_v25, %v18151_v9  ;;  %v18217_v4 = vrot.slane %v11015_v47, %v15696_v38 }
 0x511   : > { %7903 = vrot.lane.b32.xlu1 %v24060_v6, %s14267_s6  ;;  %24061 = vst [vmem:[#allocation167_spill] sm:$0xff] %v18203_v33  ;;  %v18212_v52 = vpop.permute.xlu1 %7791  ;;  %v18220_v24 = vrot.slane %v11032_v29, %v15696_v38  ;;  %v18224_v10 = vpop.permute.xlu0 %7701  ;;  %v5133_v45 = vcombine.low %v5094_v59, %v5126_v56  ;;  %v24065_v39 = vcombine.high %v17479_v26, %v17783_v48 }
 0x512   : > { %24062 = vst [vmem:[#allocation27_spill] sm:$0xff] %v18207_v43  ;;  %24063 = vst [vmem:[#allocation119_spill] sm:$0xff] %v18217_v4  ;;  %v9247_v8 = vcombine.low %v9191_v16, %v9207_v3  ;;  %v9248_v50 = vcombine.high %v9191_v16, %v9207_v3  ;;  %v9264_v55 = vcombine.high %v18203_v33, %v18207_v43  ;;  %v24091_v4 = vld [vmem:[#allocation127_spill] sm:$0xff]  ;;  %v24096_v33 = vld [vmem:[#allocation58_spill] sm:$0xff] }
 0x513   : > { %24064 = vst [vmem:[#allocation179_spill] sm:$0xff] %v18220_v24  ;;  %v18231_v6 = vrot.slane %v5367_v40, %v15696_v38  ;;  %v18234_v47 = vrot.slane %v9215_v12, %v15696_v38  ;;  %v18237_v29 = vrot.slane %v10983_v37, %v15696_v38  ;;  %v24068_v16 = vcombine.high %v18027_v15, %v18030_v7 }
 0x514   : > { %7817 = vrot.lane.b32.xlu0 %v5133_v45, %s14267_s6  ;;  %v18247_v26 = vrot.slane %v9247_v8, %v15696_v38  ;;  %v24071_v48 = vcombine.high %v18046_v21, %v18052_v54  ;;  %v18256_v40 = vrot.slane %v9248_v50, %v15696_v38  ;;  %v18259_v37 = vrot.slane %v9264_v55, %v15696_v38  ;;  %v24077_v50 = vld [vmem:[#allocation128_spill] sm:$0xff] }
 0x515   : > { %7907 = vrot.lane.b32.xlu1 %v24065_v39, %s14267_s6  ;;  %24066 = vst [vmem:[#allocation101_spill] sm:$0xff] %v18234_v47  ;;  %24067 = vst [vmem:[#allocation10_spill] sm:$0xff] %v18237_v29  ;;  %v18243_v3 = vrot.slane %v24068_v16, %v15696_v38  ;;  %v18261_v12 = vpop.permute.xlu1 %7795  ;;  %v5134_v16 = vcombine.high %v5094_v59, %v5126_v56  ;;  %v18269_v54 = vpop.permute.xlu0 %7705  ;;  %v24075_v56 = vcombine.high %v18049_v35, %v18055_v11  ;;  %v24078_v55 = vld [vmem:[#allocation124_spill] sm:$0xff] }
 0x516   : > { %24070 = vst [vmem:[#allocation48_spill] sm:$0xff] %v18247_v26  ;;  %v18253_v39 = vrot.slane %v24071_v48, %v15696_v38  ;;  %24073 = vst [vmem:[#allocation211_spill] sm:$0xff] %v18256_v40  ;;  %v6287_v21 = vcombine.low %v17977_v17, %v18107_v51  ;;  %v6288_v8 = vcombine.high %v17977_v17, %v18107_v51  ;;  %v24099_v40 = vld [vmem:[#allocation186_spill] sm:$0xff] }
 0x517   : > { %24069 = vst [vmem:[#allocation136_spill] sm:$0xff] %v18243_v3  ;;  %24074 = vst [vmem:[#allocation212_spill] sm:$0xff] %v18259_v37  ;;  %v18281_v48 = vrot.slane %v24075_v56, %v15696_v38  ;;  %v6303_v45 = vcombine.low %v17986_v44, %v18110_v62  ;;  %v6511_v24 = vcombine.low %v24078_v55, %v24077_v50 }
 0x518   : > { %24072 = vst [vmem:[#allocation210_spill] sm:$0xff] %v18253_v39  ;;  %v24079_v59 = vcombine.low %v17646_v20, %v17786_v58  ;;  %v6512_v56 = vcombine.high %v24078_v55, %v24077_v50  ;;  %7821 = vrot.lane.b32.xlu0 %v5134_v16, %s14267_s6  ;;  %v5343_v3 = vrot.slane %v5335_v22, %v15696_v38  ;;  %v24080_v50 = vld [vmem:[#allocation196_spill] sm:$0xff] }
 0x519   : > { %24076 = vst [vmem:[#allocation213_spill] sm:$0xff] %v18281_v48  ;;  %v6304_v15 = vcombine.high %v17986_v44, %v18110_v62  ;;  %v11056_v7 = vcombine.high %v18186_v41, %v18269_v54  ;;  %v5320_v16 = vcombine.high %v24041_v60, %v24040_v28  ;;  %v5368_v51 = vcombine.high %v18154_v32, %v18137_v30  ;;  %v18317_v17 = vpop.permute.xlu0 %7709  ;;  %v24081_v62 = vld [vmem:[#allocation122_spill] sm:$0xff] }
 0x51a   : > { %7911 = vrot.lane.b32.xlu1 %v24079_v59, %s14267_s6  ;;  %v18307_v59 = vpop.permute.xlu1 %7799  ;;  %v5399_v44 = vcombine.low %v5343_v3, %v18231_v6  ;;  %v6519_v46 = vrot.slane %v6511_v24, %v14347_v5  ;;  %v5288_v55 = vcombine.high %v24048_v13, %v24047_v27  ;;  %v11072_v22 = vcombine.high %v18224_v10, %v18317_v17  ;;  %v24083_v24 = vld [vmem:[#allocation130_spill] sm:$0xff] }
 0x51b   : > { %v24082_v60 = vcombine.high %v17646_v20, %v17786_v58  ;;  %v18334_v30 = vrot.slane %v6512_v56, %v14347_v5  ;;  %v5336_v32 = vcombine.high %v18144_v25, %v18151_v9  ;;  %v5304_v13 = vcombine.high %v24050_v0, %v24049_v14  ;;  %v24084_v20 = vld [vmem:[#allocation59_spill] sm:$0xff] }
 0x51c   : > { %v9288_v27 = vcombine.high %v18212_v52, %v18307_v59  ;;  %7825 = vrot.lane.b32.xlu0 %v5399_v44, %s14267_s6  ;;  %v6255_v58 = vcombine.low %v24084_v20, %v24083_v24  ;;  %v18348_v56 = vrot.slane %v11056_v7, %v14347_v5  ;;  %v18351_v28 = vrot.slane %v11072_v22, %v14347_v5 }
 0x51d   : > { %v18356_v14 = vrot.slane %v5320_v16, %v14347_v5  ;;  %v18360_v9 = vpop.permute.xlu0 %7713  ;;  %v5400_v44 = vcombine.high %v5343_v3, %v18231_v6  ;;  %v6559_v7 = vcombine.low %v18122_v36, %v6519_v46  ;;  %v5302_v22 = vrot.slane %v5288_v55, %v14347_v5  ;;  %v24090_v16 = vld [vmem:[#allocation133_spill] sm:$0xff] }
 0x51e   : > { %7915 = vrot.lane.b32.xlu1 %v24082_v60, %s14267_s6  ;;  %v5272_v60 = vcombine.high %v24045_v49, %v24044_v18  ;;  %24085 = vst [vmem:[#allocation128_spill] sm:$0xff] %v18348_v56  ;;  %24086 = vst [vmem:[#allocation124_spill] sm:$0xff] %v18351_v28  ;;  %v18353_v25 = vpop.permute.xlu1 %7803  ;;  %v5382_v18 = vrot.slane %v5368_v51, %v15696_v38  ;;  %v6256_v49 = vcombine.high %v24084_v20, %v24083_v24 }
 0x51f   : > { %v9304_v0 = vcombine.high %v18261_v12, %v18353_v25  ;;  %v24087_v53 = vcombine.low %v24046_v31, %v18066_v34  ;;  %v18375_v29 = vrot.slane %v5304_v13, %v14347_v5  ;;  %v18378_v6 = vrot.slane %v9288_v27, %v14347_v5 }
 0x520   : > { %7829 = vrot.lane.b32.xlu0 %v5400_v44, %s14267_s6  ;;  %v5350_v51 = vrot.slane %v5336_v32, %v15696_v38  ;;  %v6560_v55 = vcombine.high %v18122_v36, %v6519_v46  ;;  %v6575_v24 = vcombine.low %v18134_v1, %v18334_v30  ;;  %v18394_v13 = vrot.slane %v6288_v8, %v15696_v38 }
 0x521   : > { %24088 = vst [vmem:[#allocation196_spill] sm:$0xff] %v18378_v6  ;;  %v18381_v3 = vrot.slane %v9304_v0, %v14347_v5  ;;  %v5286_v27 = vrot.slane %v5272_v60, %v14347_v5  ;;  %v5383_v0 = vcombine.low %v18375_v29, %v18356_v14  ;;  %v7718_v36 = vpop.permute.xlu0 %7717  ;;  %v24092_v8 = vcombine.high %v24046_v31, %v18066_v34  ;;  %v24093_v34 = vld [vmem:[#allocation182_spill] sm:$0xff] }
 0x522   : > { %7919 = vrot.lane.b32.xlu1 %v24087_v53, %s14267_s6  ;;  %v18388_v20 = vpop.permute.xlu1 %7807  ;;  %v18391_v53 = vrot.slane %v6287_v21, %v15696_v38  ;;  %v5401_v46 = vcombine.low %v5350_v51, %v5382_v18  ;;  %v6271_v21 = vcombine.low %v24091_v4, %v24090_v16  ;;  %v18410_v60 = vrot.slane %v6303_v45, %v15696_v38 }
 0x523   : > { %24089 = vst [vmem:[#allocation122_spill] sm:$0xff] %v18381_v3  ;;  %v18413_v37 = vrot.slane %v6304_v15, %v15696_v38  ;;  %v18416_v32 = vrot.slane %v6255_v58, %v14347_v5  ;;  %v18419_v48 = vrot.slane %v6256_v49, %v14347_v5  ;;  %v5351_v44 = vcombine.low %v5286_v27, %v5302_v22  ;;  %v24097_v49 = vld [vmem:[#allocation142_spill] sm:$0xff] }
 0x524   : > { %7833 = vrot.lane.b32.xlu0 %v5401_v46, %s14267_s6  ;;  %v18423_v35 = vrot.slane %v6559_v7, %v15696_v38  ;;  %v5352_v31 = vcombine.high %v5286_v27, %v5302_v22  ;;  %v18428_v15 = vrot.slane %v6560_v55, %v15696_v38  ;;  %v18431_v58 = vrot.slane %v6575_v24, %v15696_v38  ;;  %v24100_v55 = vld [vmem:[#allocation135_spill] sm:$0xff] }
 0x525   : > { %v5575_v43 = vcombine.low %v24097_v49, %v24096_v33  ;;  %v5591_v46 = vcombine.low %v24099_v40, %v24098_v61  ;;  %v7722_v39 = vpop.permute.xlu0 %7721  ;;  %v5402_v7 = vcombine.high %v5350_v51, %v5382_v18  ;;  %v5391_v22 = vrot.slane %v5383_v0, %v15696_v38  ;;  %v24103_v18 = vld [vmem:[#allocation170_spill] sm:$0xff] }
 0x526   : > { %7923 = vrot.lane.b32.xlu1 %v24092_v8, %s14267_s6  ;;  %v24094_v8 = vld [vmem:[#allocation104_spill] sm:$0xff]  ;;  %v7812_v11 = vpop.permute.xlu1 %7811  ;;  %24095 = vst [vmem:[#allocation130_spill] sm:$0xff] %v18431_v58  ;;  %v6272_v27 = vcombine.high %v24091_v4, %v24090_v16  ;;  %v18441_v2 = vrot.slane %v6271_v21, %v14347_v5  ;;  %v11071_v47 = vcombine.low %v18224_v10, %v18317_v17  ;;  %v24104_v51 = vld [vmem:[#allocation30_spill] sm:$0xff] }
 0x527   : > { %v5559_v45 = vcombine.low %v24094_v8, %v24093_v34  ;;  %v24102_v26 = vcombine.low %v24052_v63, %v18088_v57  ;;  %v5543_v0 = vcombine.low %v24104_v51, %v24103_v18  ;;  %v11055_v4 = vcombine.low %v18186_v41, %v18269_v54 }
 0x528   : > { %v9303_v16 = vcombine.low %v18261_v12, %v18353_v25  ;;  %7837 = vrot.lane.b32.xlu0 %v5402_v7, %s14267_s6  ;;  %v5359_v21 = vrot.slane %v5351_v44, %v15696_v38  ;;  %v11087_v17 = vcombine.low %v18360_v9, %v7722_v39  ;;  %v18465_v58 = vrot.slane %v5352_v31, %v15696_v38 }
 0x529   : > { %v18460_v10 = vrot.slane %v5559_v45, %v14347_v5  ;;  %v18468_v41 = vrot.slane %v5575_v43, %v14347_v5  ;;  %v5384_v12 = vcombine.high %v18375_v29, %v18356_v14  ;;  %v18473_v54 = vrot.slane %v5591_v46, %v14347_v5  ;;  %v7726_v25 = vpop.permute.xlu0 %7725 }
 0x52a   : > { %7927 = vrot.lane.b32.xlu1 %v24102_v26, %s14267_s6  ;;  %v11088_v26 = vcombine.high %v18360_v9, %v7722_v39  ;;  %v7816_v24 = vpop.permute.xlu1 %7815  ;;  %v5403_v44 = vcombine.low %v5359_v21, %v5391_v22  ;;  %v9287_v45 = vcombine.low %v18212_v52, %v18307_v59  ;;  %v18478_v39 = vrot.slane %v11071_v47, %v14347_v5 }
 0x52b   : > { %v11103_v9 = vcombine.low %v7718_v36, %v7726_v25  ;;  %v11104_v31 = vcombine.high %v7718_v36, %v7726_v25  ;;  %v24106_v43 = vcombine.high %v24052_v63, %v18088_v57  ;;  %v18485_v29 = vrot.slane %v11055_v4, %v14347_v5 }
 0x52c   : > { %24105 = vst [vmem:[#allocation59_spill] sm:$0xff] %v18478_v39  ;;  %v18488_v14 = vrot.slane %v9303_v16, %v14347_v5  ;;  %v9319_v46 = vcombine.low %v18388_v20, %v7816_v24  ;;  %v9320_v52 = vcombine.high %v18388_v20, %v7816_v24  ;;  %7841 = vrot.lane.b32.xlu0 %v5403_v44, %s14267_s6 }
 0x52d   : > { %24107 = vst [vmem:[#allocation133_spill] sm:$0xff] %v18485_v29  ;;  %v18494_v47 = vrot.slane %v11087_v17, %v14347_v5  ;;  %v18497_v59 = vrot.slane %v11088_v26, %v14347_v5  ;;  %v18500_v57 = vrot.slane %v11103_v9, %v14347_v5  ;;  %v18503_v63 = vrot.slane %v11104_v31, %v14347_v5  ;;  %v18505_v16 = vpop.permute.xlu0 %7729 }
 0x52e   : > { %7931 = vrot.lane.b32.xlu1 %v24106_v43, %s14267_s6  ;;  %24108 = vst [vmem:[#allocation127_spill] sm:$0xff] %v18488_v14  ;;  %v7820_v36 = vpop.permute.xlu1 %7819  ;;  %v5404_v20 = vcombine.high %v5359_v21, %v5391_v22  ;;  %v5398_v24 = vrot.slane %v5384_v12, %v15696_v38  ;;  %v18509_v17 = vrot.slane %v9287_v45, %v14347_v5 }
 0x52f   : > { %24109 = vst [vmem:[#allocation182_spill] sm:$0xff] %v18494_v47  ;;  %24110 = vst [vmem:[#allocation104_spill] sm:$0xff] %v18497_v59  ;;  %v9335_v7 = vcombine.low %v7812_v11, %v7820_v36  ;;  %v9336_v4 = vcombine.high %v7812_v11, %v7820_v36  ;;  %v11119_v26 = vcombine.low %v18485_v29, %v18478_v39 }
 0x530   : > { %24111 = vst [vmem:[#allocation58_spill] sm:$0xff] %v18500_v57  ;;  %24112 = vst [vmem:[#allocation142_spill] sm:$0xff] %v18503_v63  ;;  %v11151_v25 = vcombine.low %v18494_v47, %v18500_v57  ;;  %v11168_v44 = vcombine.high %v18497_v59, %v18503_v63  ;;  %v24114_v11 = vcombine.low %v24080_v50, %v18098_v19  ;;  %7845 = vrot.lane.b32.xlu0 %v5404_v20, %s14267_s6 }
 0x531   : > { %24113 = vst [vmem:[#allocation87_spill] sm:$0xff] %v18509_v17  ;;  %v18522_v22 = vrot.slane %v9319_v46, %v14347_v5  ;;  %v18525_v21 = vrot.slane %v9320_v52, %v14347_v5  ;;  %v18528_v12 = vrot.slane %v9335_v7, %v14347_v5  ;;  %v18531_v45 = vrot.slane %v9336_v4, %v14347_v5  ;;  %v18553_v4 = vpop.permute.xlu0 %7733 }
 0x532   : > { %7935 = vrot.lane.b32.xlu1 %v24114_v11, %s14267_s6  ;;  %v18535_v9 = vrot.slane %v5543_v0, %v14347_v5  ;;  %v9351_v31 = vcombine.low %v18509_v17, %v18488_v14  ;;  %v18539_v43 = vpop.permute.xlu1 %7823  ;;  %v18542_v46 = vrot.slane %v11151_v25, %v15696_v38  ;;  %v18545_v52 = vrot.slane %v11168_v44, %v15696_v38 }
 0x533   : > { %24115 = vst [vmem:[#allocation186_spill] sm:$0xff] %v18522_v22  ;;  %24116 = vst [vmem:[#allocation135_spill] sm:$0xff] %v18525_v21  ;;  %v5639_v36 = vcombine.low %v18468_v41, %v18473_v54  ;;  %v9383_v7 = vcombine.low %v18522_v22, %v18528_v12  ;;  %v9400_v0 = vcombine.high %v18525_v21, %v18531_v45 }
 0x534   : > { %24117 = vst [vmem:[#allocation64_spill] sm:$0xff] %v18528_v12  ;;  %24118 = vst [vmem:[#allocation170_spill] sm:$0xff] %v18531_v45  ;;  %v5405_v20 = vcombine.low %v18465_v58, %v5398_v24  ;;  %v18557_v11 = vrot.slane %v6272_v27, %v14347_v5  ;;  %v6528_v25 = vcombine.high %v24101_v42, %v24100_v55  ;;  %v24194_v12 = vld [vmem:[#allocation146_spill] sm:$0xff] }
 0x535   : > { %24119 = vst [vmem:[#allocation30_spill] sm:$0xff] %v18542_v46  ;;  %24120 = vst [vmem:[#allocation214_spill] sm:$0xff] %v18545_v52  ;;  %v24121_v44 = vcombine.high %v24080_v50, %v18098_v19  ;;  %v18566_v59 = vrot.slane %v11119_v26, %v15696_v38  ;;  %v24123_v63 = vcombine.high %v18348_v56, %v18351_v28  ;;  %v24147_v46 = vld [vmem:[#allocation157_spill] sm:$0xff] }
 0x536   : > { %v6319_v27 = vcombine.low %v18416_v32, %v18441_v2  ;;  %v5607_v39 = vcombine.low %v18535_v9, %v18460_v10  ;;  %7849 = vrot.lane.b32.xlu0 %v5405_v20, %s14267_s6  ;;  %v18580_v19 = vrot.slane %v9383_v7, %v15696_v38  ;;  %v18583_v50 = vrot.slane %v9400_v0, %v15696_v38  ;;  %v7828_v26 = vpop.permute.xlu1 %7827  ;;  %v18594_v20 = vpop.permute.xlu0 %7737 }
 0x537   : > { %7939 = vrot.lane.b32.xlu1 %v24121_v44, %s14267_s6  ;;  %24122 = vst [vmem:[#allocation215_spill] sm:$0xff] %v18566_v59  ;;  %v18572_v29 = vrot.slane %v24123_v63, %v15696_v38  ;;  %v18586_v44 = vrot.slane %v9351_v31, %v15696_v38  ;;  %v5406_v7 = vcombine.high %v18465_v58, %v5398_v24  ;;  %v24132_v24 = vld [vmem:[#allocation139_spill] sm:$0xff] }
 0x538   : > { %24125 = vst [vmem:[#allocation217_spill] sm:$0xff] %v18580_v19  ;;  %24126 = vst [vmem:[#allocation218_spill] sm:$0xff] %v18583_v50  ;;  %v5647_v0 = vrot.slane %v5639_v36, %v15696_v38  ;;  %v24128_v31 = vcombine.high %v18134_v1, %v18334_v30  ;;  %v24129_v63 = vcombine.high %v18378_v6, %v18381_v3  ;;  %v24133_v36 = vld [vmem:[#allocation131_spill] sm:$0xff]  ;;  %v24149_v6 = vld [vmem:[#allocation140_spill] sm:$0xff] }
 0x539   : > { %24124 = vst [vmem:[#allocation216_spill] sm:$0xff] %v18572_v29  ;;  %24127 = vst [vmem:[#allocation219_spill] sm:$0xff] %v18586_v44  ;;  %v24131_v28 = vcombine.low %v24101_v42, %v24100_v55  ;;  %v18617_v58 = vrot.slane %v6528_v25, %v14347_v5  ;;  %v6543_v1 = vcombine.low %v24133_v36, %v24132_v24 }
 0x53a   : > { %v18602_v47 = vrot.slane %v24128_v31, %v15696_v38  ;;  %v18608_v56 = vrot.slane %v24129_v63, %v15696_v38  ;;  %v24134_v30 = vcombine.low %v24081_v62, %v18104_v23  ;;  %7853 = vrot.lane.b32.xlu0 %v5406_v7, %s14267_s6  ;;  %v5615_v42 = vrot.slane %v5607_v39, %v15696_v38  ;;  %v7832_v7 = vpop.permute.xlu1 %7831 }
 0x53b   : > { %v18614_v52 = vrot.slane %v24131_v28, %v14347_v5  ;;  %v6327_v28 = vrot.slane %v6319_v27, %v15696_v38  ;;  %v6320_v31 = vcombine.high %v18416_v32, %v18441_v2  ;;  %v5592_v63 = vcombine.high %v24099_v40, %v24098_v61  ;;  %v18648_v2 = vpop.permute.xlu0 %7741 }
 0x53c   : > { %24130 = vst [vmem:[#allocation220_spill] sm:$0xff] %v18608_v56  ;;  %7943 = vrot.lane.b32.xlu1 %v24134_v30, %s14267_s6  ;;  %v6335_v30 = vcombine.low %v18419_v48, %v18557_v11  ;;  %v11192_v39 = vcombine.high %v18505_v16, %v18594_v20  ;;  %v6336_v27 = vcombine.high %v18419_v48, %v18557_v11  ;;  %v24148_v56 = vld [vmem:[#allocation8_spill] sm:$0xff] }
 0x53d   : > { %v6544_v55 = vcombine.high %v24133_v36, %v24132_v24  ;;  %v5640_v25 = vcombine.high %v18468_v41, %v18473_v54  ;;  %v5671_v32 = vcombine.low %v5615_v42, %v5647_v0  ;;  %v5560_v29 = vcombine.high %v24094_v8, %v24093_v34 }
 0x53e   : > { %v5608_v61 = vcombine.high %v18535_v9, %v18460_v10  ;;  %v5576_v40 = vcombine.high %v24097_v49, %v24096_v33  ;;  %v11208_v48 = vcombine.high %v18553_v4, %v18648_v2  ;;  %v24135_v11 = vcombine.high %v24081_v62, %v18104_v23  ;;  %v7836_v10 = vpop.permute.xlu1 %7835 }
 0x53f   : > { %v18663_v41 = vrot.slane %v6543_v1, %v14347_v5  ;;  %v9423_v54 = vcombine.low %v18539_v43, %v7832_v7  ;;  %v9424_v34 = vcombine.high %v18539_v43, %v7832_v7  ;;  %7857 = vrot.lane.b32.xlu0 %v5671_v32, %s14267_s6  ;;  %v6351_v8 = vcombine.low %v18391_v53, %v6327_v28  ;;  %v18680_v43 = vpop.permute.xlu0 %7745 }
 0x540   : > { %7947 = vrot.lane.b32.xlu1 %v24135_v11, %s14267_s6  ;;  %v5544_v33 = vcombine.high %v24104_v51, %v24103_v18  ;;  %v18672_v49 = vrot.slane %v5592_v63, %v14347_v5  ;;  %v18675_v23 = vrot.slane %v11192_v39, %v14347_v5  ;;  %v18678_v62 = vrot.slane %v11208_v48, %v14347_v5  ;;  %v24143_v11 = vld [vmem:[#allocation185_spill] sm:$0xff] }
 0x541   : > { %v9439_v9 = vcombine.low %v7828_v26, %v7836_v10  ;;  %v9440_v24 = vcombine.high %v7828_v26, %v7836_v10  ;;  %v5672_v36 = vcombine.high %v5615_v42, %v5647_v0  ;;  %v5654_v1 = vrot.slane %v5640_v25, %v15696_v38  ;;  %v24141_v10 = vld [vmem:[#allocation67_spill] sm:$0xff] }
 0x542   : > { %24136 = vst [vmem:[#allocation139_spill] sm:$0xff] %v18675_v23  ;;  %24137 = vst [vmem:[#allocation131_spill] sm:$0xff] %v18678_v62  ;;  %v18684_v7 = vrot.slane %v5560_v29, %v14347_v5  ;;  %v18687_v18 = vrot.slane %v5576_v40, %v14347_v5  ;;  %v5622_v63 = vrot.slane %v5608_v61, %v15696_v38  ;;  %v18710_v32 = vpop.permute.xlu1 %7839 }
 0x543   : > { %v18694_v26 = vrot.slane %v9423_v54, %v14347_v5  ;;  %v18697_v0 = vrot.slane %v9424_v34, %v14347_v5  ;;  %v18700_v42 = vrot.slane %v9439_v9, %v14347_v5  ;;  %v18703_v29 = vrot.slane %v9440_v24, %v14347_v5  ;;  %7861 = vrot.lane.b32.xlu0 %v5672_v36, %s14267_s6  ;;  %v7750_v34 = vpop.permute.xlu0 %7749  ;;  %v24142_v54 = vld [vmem:[#allocation9_spill] sm:$0xff]  ;;  %v24145_v9 = vld [vmem:[#allocation83_spill] sm:$0xff] }
 0x544   : > { %7951 = vrot.lane.b32.xlu1 %v6351_v8, %s14267_s6  ;;  %v18707_v25 = vrot.slane %v6544_v55, %v14347_v5  ;;  %v5558_v39 = vrot.slane %v5544_v33, %v14347_v5  ;;  %v6352_v61 = vcombine.high %v18391_v53, %v6327_v28  ;;  %v6334_v40 = vrot.slane %v6320_v31, %v15696_v38  ;;  %v24140_v8 = vld [vmem:[#allocation141_spill] sm:$0xff] }
 0x545   : > { %24138 = vst [vmem:[#allocation221_spill] sm:$0xff] %v18697_v0  ;;  %24139 = vst [vmem:[#allocation222_spill] sm:$0xff] %v18703_v29  ;;  %v5655_v48 = vcombine.low %v18687_v18, %v18672_v49  ;;  %v5673_v55 = vcombine.low %v5622_v63, %v5654_v1  ;;  %v6767_v33 = vcombine.low %v24141_v10, %v24140_v8  ;;  %v24146_v24 = vld [vmem:[#allocation181_spill] sm:$0xff] }
 0x546   : > { %v18726_v53 = vrot.slane %v6335_v30, %v15696_v38  ;;  %v18729_v28 = vrot.slane %v6336_v27, %v15696_v38  ;;  %v5623_v36 = vcombine.low %v5558_v39, %v18684_v7  ;;  %v5863_v51 = vcombine.low %v24143_v11, %v24142_v54  ;;  %v7844_v31 = vpop.permute.xlu1 %7843 }
 0x547   : > { %7865 = vrot.lane.b32.xlu0 %v5673_v55, %s14267_s6  ;;  %v6353_v59 = vcombine.low %v18394_v13, %v6334_v40  ;;  %v5831_v50 = vcombine.low %v24147_v46, %v24146_v24  ;;  %v5847_v3 = vcombine.low %v24149_v6, %v24148_v56  ;;  %v7754_v21 = vpop.permute.xlu0 %7753  ;;  %v5674_v55 = vcombine.high %v5622_v63, %v5654_v1 }
 0x548   : > { %7955 = vrot.lane.b32.xlu1 %v6352_v61, %s14267_s6  ;;  %v24144_v61 = vld [vmem:[#allocation169_spill] sm:$0xff]  ;;  %v5663_v45 = vrot.slane %v5655_v48, %v15696_v38  ;;  %v18752_v30 = vrot.slane %v6767_v33, %v14347_v5  ;;  %v5624_v27 = vcombine.high %v5558_v39, %v18684_v7  ;;  %v11207_v17 = vcombine.low %v18553_v4, %v18648_v2 }
 0x549   : > { %v5815_v57 = vcombine.low %v24145_v9, %v24144_v61  ;;  %v6354_v14 = vcombine.high %v18394_v13, %v6334_v40  ;;  %v18760_v22 = vrot.slane %v5863_v51, %v14347_v5  ;;  %v11191_v1 = vcombine.low %v18505_v16, %v18594_v20 }
 0x54a   : > { %v5631_v63 = vrot.slane %v5623_v36, %v15696_v38  ;;  %v6355_v7 = vcombine.low %v18410_v60, %v18726_v53  ;;  %v11224_v13 = vcombine.high %v18680_v43, %v7754_v21  ;;  %v7848_v4 = vpop.permute.xlu1 %7847  ;;  %v6356_v2 = vcombine.high %v18410_v60, %v18726_v53 }
 0x54b   : > { %7869 = vrot.lane.b32.xlu0 %v5674_v55, %s14267_s6  ;;  %v18769_v39 = vrot.slane %v5815_v57, %v14347_v5  ;;  %v18776_v16 = vrot.slane %v5831_v50, %v14347_v5  ;;  %v18779_v20 = vrot.slane %v5847_v3, %v14347_v5  ;;  %v5656_v51 = vcombine.high %v18687_v18, %v18672_v49  ;;  %v7758_v40 = vpop.permute.xlu0 %7757 }
 0x54c   : > { %7959 = vrot.lane.b32.xlu1 %v6353_v59, %s14267_s6  ;;  %v11223_v59 = vcombine.low %v18680_v43, %v7754_v21  ;;  %v5675_v57 = vcombine.low %v5631_v63, %v5663_v45  ;;  %v18784_v48 = vrot.slane %v11207_v17, %v14347_v5  ;;  %v11239_v33 = vcombine.low %v7750_v34, %v7758_v40 }
 0x54d   : > { %v11240_v21 = vcombine.high %v7750_v34, %v7758_v40  ;;  %v5638_v60 = vrot.slane %v5624_v27, %v15696_v38  ;;  %v5911_v50 = vcombine.low %v18779_v20, %v18760_v22  ;;  %v18791_v3 = vrot.slane %v11191_v1, %v14347_v5 }
 0x54e   : > { %24150 = vst [vmem:[#allocation141_spill] sm:$0xff] %v18784_v48  ;;  %v9455_v43 = vcombine.low %v18710_v32, %v7848_v4  ;;  %v9456_v49 = vcombine.high %v18710_v32, %v7848_v4  ;;  %v18797_v17 = vrot.slane %v11223_v59, %v14347_v5  ;;  %v18800_v18 = vrot.slane %v11224_v13, %v14347_v5  ;;  %v7852_v53 = vpop.permute.xlu1 %7851 }
 0x54f   : > { %24151 = vst [vmem:[#allocation67_spill] sm:$0xff] %v18791_v3  ;;  %7873 = vrot.lane.b32.xlu0 %v5675_v57, %s14267_s6  ;;  %v18806_v34 = vrot.slane %v11240_v21, %v14347_v5  ;;  %v9471_v36 = vcombine.low %v7844_v31, %v7852_v53  ;;  %v9472_v27 = vcombine.high %v7844_v31, %v7852_v53  ;;  %v18808_v55 = vpop.permute.xlu0 %7761 }
 0x550   : > { %7963 = vrot.lane.b32.xlu1 %v6354_v14, %s14267_s6  ;;  %24152 = vst [vmem:[#allocation9_spill] sm:$0xff] %v18797_v17  ;;  %24153 = vst [vmem:[#allocation185_spill] sm:$0xff] %v18800_v18  ;;  %v18803_v14 = vrot.slane %v11239_v33, %v14347_v5  ;;  %v5676_v32 = vcombine.high %v5631_v63, %v5663_v45  ;;  %v5670_v1 = vrot.slane %v5656_v51, %v15696_v38 }
 0x551   : > { %24155 = vst [vmem:[#allocation83_spill] sm:$0xff] %v18806_v34  ;;  %v11255_v59 = vcombine.low %v18791_v3, %v18784_v48  ;;  %v9487_v13 = vcombine.low %v18694_v26, %v18700_v42  ;;  %v11304_v40 = vcombine.high %v18800_v18, %v18806_v34  ;;  %v9463_v31 = vrot.slane %v9455_v43, %v14347_v5 }
 0x552   : > { %24154 = vst [vmem:[#allocation169_spill] sm:$0xff] %v18803_v14  ;;  %v11287_v4 = vcombine.low %v18797_v17, %v18803_v14  ;;  %v18822_v45 = vrot.slane %v9456_v49, %v14347_v5  ;;  %v9479_v63 = vrot.slane %v9471_v36, %v14347_v5  ;;  %v18826_v51 = vrot.slane %v9472_v27, %v14347_v5  ;;  %v18831_v33 = vpop.permute.xlu1 %7855  ;;  %v24188_v17 = vld [vmem:[#allocation151_spill] sm:$0xff] }
 0x553   : > { %7877 = vrot.lane.b32.xlu0 %v5676_v32, %s14267_s6  ;;  %v5879_v57 = vcombine.low %v18769_v39, %v18776_v16  ;;  %v18839_v43 = vrot.slane %v11304_v40, %v15696_v38  ;;  %v18843_v27 = vpop.permute.xlu0 %7765  ;;  %v5677_v32 = vcombine.low %v5638_v60, %v5670_v1  ;;  %v18847_v18 = vrot.slane %v5911_v50, %v15696_v38  ;;  %v24189_v14 = vld [vmem:[#allocation143_spill] sm:$0xff] }
 0x554   : > { %7967 = vrot.lane.b32.xlu1 %v6355_v7, %s14267_s6  ;;  %24156 = vst [vmem:[#allocation181_spill] sm:$0xff] %v18822_v45  ;;  %24157 = vst [vmem:[#allocation157_spill] sm:$0xff] %v18826_v51  ;;  %v6357_v7 = vcombine.low %v18413_v37, %v18729_v28  ;;  %v18836_v21 = vrot.slane %v11287_v4, %v15696_v38  ;;  %v9519_v49 = vcombine.low %v9463_v31, %v9479_v63 }
 0x555   : > { %24159 = vst [vmem:[#allocation140_spill] sm:$0xff] %v18839_v43  ;;  %v9520_v53 = vcombine.high %v9463_v31, %v9479_v63  ;;  %v9536_v36 = vcombine.high %v18822_v45, %v18826_v51  ;;  %v18850_v34 = vrot.slane %v9487_v13, %v15696_v38  ;;  %v18853_v4 = vrot.slane %v11255_v59, %v15696_v38  ;;  %v24193_v51 = vld [vmem:[#allocation53_spill] sm:$0xff] }
 0x556   : > { %24158 = vst [vmem:[#allocation8_spill] sm:$0xff] %v18836_v21  ;;  %v24162_v40 = vcombine.high %v18675_v23, %v18678_v62  ;;  %v18863_v63 = vrot.slane %v9519_v49, %v15696_v38  ;;  %v18877_v23 = vpop.permute.xlu1 %7859  ;;  %v24178_v3 = vcombine.low %v18617_v58, %v18707_v25 }
 0x557   : > { %24160 = vst [vmem:[#allocation223_spill] sm:$0xff] %v18850_v34  ;;  %24161 = vst [vmem:[#allocation224_spill] sm:$0xff] %v18853_v4  ;;  %7881 = vrot.lane.b32.xlu0 %v5677_v32, %s14267_s6  ;;  %v18872_v59 = vrot.slane %v9520_v53, %v15696_v38  ;;  %v18875_v13 = vrot.slane %v9536_v36, %v15696_v38  ;;  %v24172_v32 = vld [vmem:[#allocation145_spill] sm:$0xff] }
 0x558   : > { %7971 = vrot.lane.b32.xlu1 %v6356_v2, %s14267_s6  ;;  %v18859_v31 = vrot.slane %v24162_v40, %v15696_v38  ;;  %24164 = vst [vmem:[#allocation226_spill] sm:$0xff] %v18863_v63  ;;  %v24165_v2 = vcombine.high %v18694_v26, %v18700_v42  ;;  %v5678_v40 = vcombine.high %v5638_v60, %v5670_v1  ;;  %v18885_v42 = vpop.permute.xlu0 %7769  ;;  %v24173_v53 = vld [vmem:[#allocation137_spill] sm:$0xff]  ;;  %v24197_v63 = vld [vmem:[#allocation172_spill] sm:$0xff] }
 0x559   : > { %24167 = vst [vmem:[#allocation228_spill] sm:$0xff] %v18872_v59  ;;  %24168 = vst [vmem:[#allocation229_spill] sm:$0xff] %v18875_v13  ;;  %v24169_v1 = vcombine.high %v18697_v0, %v18703_v29  ;;  %v24171_v26 = vcombine.high %v24141_v10, %v24140_v8  ;;  %v6783_v43 = vcombine.low %v24173_v53, %v24172_v32  ;;  %v24192_v0 = vld [vmem:[#allocation160_spill] sm:$0xff]  ;;  %v24195_v59 = vld [vmem:[#allocation23_spill] sm:$0xff] }
 0x55a   : > { %24163 = vst [vmem:[#allocation225_spill] sm:$0xff] %v18859_v31  ;;  %v18869_v50 = vrot.slane %v24165_v2, %v15696_v38  ;;  %v6784_v36 = vcombine.high %v24173_v53, %v24172_v32  ;;  %v6358_v60 = vcombine.high %v18413_v37, %v18729_v28  ;;  %v24174_v8 = vcombine.low %v18614_v52, %v18663_v41  ;;  %v24175_v53 = vld [vmem:[#allocation147_spill] sm:$0xff] }
 0x55b   : > { %v18897_v2 = vrot.slane %v24169_v1, %v15696_v38  ;;  %v18903_v49 = vrot.slane %v24171_v26, %v14347_v5  ;;  %7885 = vrot.lane.b32.xlu0 %v5678_v40, %s14267_s6  ;;  %v5887_v1 = vrot.slane %v5879_v57, %v15696_v38  ;;  %v11328_v28 = vcombine.high %v18808_v55, %v18885_v42  ;;  %v18928_v57 = vpop.permute.xlu1 %7863 }
 0x55c   : > { %24166 = vst [vmem:[#allocation227_spill] sm:$0xff] %v18869_v50  ;;  %7975 = vrot.lane.b32.xlu1 %v6357_v7, %s14267_s6  ;;  %v6599_v10 = vrot.slane %v24174_v8, %v15696_v38  ;;  %v24176_v7 = vld [vmem:[#allocation72_spill] sm:$0xff]  ;;  %v24177_v40 = vcombine.high %v18614_v52, %v18663_v41  ;;  %v5864_v32 = vcombine.high %v24143_v11, %v24142_v54  ;;  %v18940_v62 = vpop.permute.xlu0 %7773 }
 0x55d   : > { %24170 = vst [vmem:[#allocation230_spill] sm:$0xff] %v18897_v2  ;;  %v7039_v31 = vcombine.low %v24176_v7, %v24175_v53  ;;  %v5912_v26 = vcombine.high %v18779_v20, %v18760_v22  ;;  %v5943_v37 = vcombine.low %v5887_v1, %v18847_v18  ;;  %v18947_v48 = vrot.slane %v24178_v3, %v15696_v38  ;;  %v24191_v2 = vld [vmem:[#allocation184_spill] sm:$0xff]  ;;  %v24198_v53 = vld [vmem:[#allocation89_spill] sm:$0xff] }
 0x55e   : > { %v18934_v8 = vrot.slane %v24177_v40, %v15696_v38  ;;  %v18950_v52 = vrot.slane %v6783_v43, %v14347_v5  ;;  %v5832_v41 = vcombine.high %v24147_v46, %v24146_v24  ;;  %v11344_v11 = vcombine.high %v18843_v27, %v18940_v62  ;;  %v24196_v50 = vld [vmem:[#allocation188_spill] sm:$0xff] }
 0x55f   : > { %v24179_v22 = vcombine.high %v18617_v58, %v18707_v25  ;;  %v18964_v20 = vrot.slane %v6784_v36, %v14347_v5  ;;  %v5880_v3 = vcombine.high %v18769_v39, %v18776_v16  ;;  %v5848_v46 = vcombine.high %v24149_v6, %v24148_v56  ;;  %7889 = vrot.lane.b32.xlu0 %v5943_v37, %s14267_s6  ;;  %v18981_v36 = vpop.permute.xlu1 %7867 }
 0x560   : > { %7979 = vrot.lane.b32.xlu1 %v6358_v60, %s14267_s6  ;;  %v9560_v24 = vcombine.high %v18831_v33, %v18928_v57  ;;  %v5816_v43 = vcombine.high %v24145_v9, %v24144_v61  ;;  %v18976_v58 = vrot.slane %v11328_v28, %v14347_v5  ;;  %v18979_v25 = vrot.slane %v11344_v11, %v14347_v5  ;;  %v18989_v16 = vpop.permute.xlu0 %7777 }
 0x561   : > { %v18961_v54 = vrot.slane %v24179_v22, %v15696_v38  ;;  %v6623_v39 = vcombine.low %v18423_v35, %v6599_v10  ;;  %v18985_v56 = vrot.slane %v5864_v32, %v14347_v5  ;;  %v9576_v6 = vcombine.high %v18877_v23, %v18981_v36 }
 0x562   : > { %24180 = vst [vmem:[#allocation145_spill] sm:$0xff] %v18976_v58  ;;  %24181 = vst [vmem:[#allocation137_spill] sm:$0xff] %v18979_v25  ;;  %v5944_v9 = vcombine.high %v5887_v1, %v18847_v18  ;;  %v5926_v61 = vrot.slane %v5912_v26, %v15696_v38  ;;  %v18994_v60 = vrot.slane %v7039_v31, %v14347_v5  ;;  %v24184_v26 = vld [vmem:[#allocation152_spill] sm:$0xff]  ;;  %v24185_v1 = vld [vmem:[#allocation75_spill] sm:$0xff] }
 0x563   : > { %v5846_v37 = vrot.slane %v5832_v41, %v14347_v5  ;;  %v6624_v32 = vcombine.high %v18423_v35, %v6599_v10  ;;  %v19002_v40 = vrot.slane %v5848_v46, %v14347_v5  ;;  %v19005_v11 = vrot.slane %v9560_v24, %v14347_v5  ;;  %v19016_v35 = vpop.permute.xlu1 %7871 }
 0x564   : > { %7983 = vrot.lane.b32.xlu1 %v6623_v39, %s14267_s6  ;;  %v19008_v18 = vrot.slane %v9576_v6, %v14347_v5  ;;  %7893 = vrot.lane.b32.xlu0 %v5944_v9, %s14267_s6  ;;  %v5894_v31 = vrot.slane %v5880_v3, %v15696_v38  ;;  %v6625_v10 = vcombine.low %v18428_v15, %v18934_v8  ;;  %v7782_v24 = vpop.permute.xlu0 %7781  ;;  %v24190_v6 = vld [vmem:[#allocation130_spill] sm:$0xff] }
 0x565   : > { %24182 = vst [vmem:[#allocation231_spill] sm:$0xff] %v19005_v11  ;;  %v6626_v41 = vcombine.high %v18428_v15, %v18934_v8  ;;  %v5830_v22 = vrot.slane %v5816_v43, %v14347_v5  ;;  %v5927_v46 = vcombine.low %v19002_v40, %v18985_v56  ;;  %v6799_v28 = vcombine.low %v24185_v1, %v24184_v26  ;;  %v24186_v15 = vld [vmem:[#allocation155_spill] sm:$0xff]  ;;  %v24187_v8 = vld [vmem:[#allocation149_spill] sm:$0xff] }
 0x566   : > { %24183 = vst [vmem:[#allocation232_spill] sm:$0xff] %v19008_v18  ;;  %v5945_v39 = vcombine.low %v5894_v31, %v5926_v61  ;;  %v6815_v43 = vcombine.low %v24187_v8, %v24186_v15  ;;  %v6627_v9 = vcombine.low %v24190_v6, %v18947_v48  ;;  %v6103_v29 = vcombine.low %v24192_v0, %v24191_v2 }
 0x567   : > { %v5895_v21 = vcombine.low %v5830_v22, %v5846_v37  ;;  %v5896_v13 = vcombine.high %v5830_v22, %v5846_v37  ;;  %v7876_v45 = vpop.permute.xlu1 %7875  ;;  %v6119_v3 = vcombine.low %v24194_v12, %v24193_v51  ;;  %v5946_v19 = vcombine.high %v5894_v31, %v5926_v61 }
 0x568   : > { %7987 = vrot.lane.b32.xlu1 %v6624_v32, %s14267_s6  ;;  %7897 = vrot.lane.b32.xlu0 %v5945_v39, %s14267_s6  ;;  %v6135_v39 = vcombine.low %v24196_v50, %v24195_v59  ;;  %v7786_v44 = vpop.permute.xlu0 %7785  ;;  %v5935_v37 = vrot.slane %v5927_v46, %v15696_v38  ;;  %v19055_v22 = vrot.slane %v6799_v28, %v14347_v5 }
 0x569   : > { %v19060_v32 = vrot.slane %v6815_v43, %v14347_v5  ;;  %v11343_v4 = vcombine.low %v18843_v27, %v18940_v62  ;;  %v6087_v7 = vcombine.low %v24198_v53, %v24197_v63  ;;  %v11327_v61 = vcombine.low %v18808_v55, %v18885_v42 }
 0x56a   : > { %v9575_v28 = vcombine.low %v18877_v23, %v18981_v36  ;;  %v5903_v31 = vrot.slane %v5895_v21, %v15696_v38  ;;  %v19074_v46 = vrot.slane %v6103_v29, %v14347_v5  ;;  %v11359_v62 = vcombine.low %v18989_v16, %v7786_v44 }
 0x56b   : > { %v11360_v27 = vcombine.high %v18989_v16, %v7786_v44  ;;  %v19079_v43 = vrot.slane %v5896_v13, %v15696_v38  ;;  %v19082_v55 = vrot.slane %v6119_v3, %v14347_v5  ;;  %v5928_v23 = vcombine.high %v19002_v40, %v18985_v56 }
 0x56c   : > { %7991 = vrot.lane.b32.xlu1 %v6625_v10, %s14267_s6  ;;  %7901 = vrot.lane.b32.xlu0 %v5946_v19, %s14267_s6  ;;  %v7880_v10 = vpop.permute.xlu1 %7879  ;;  %v19087_v19 = vrot.slane %v6135_v39, %v14347_v5  ;;  %v7790_v21 = vpop.permute.xlu0 %7789  ;;  %v5947_v29 = vcombine.low %v5903_v31, %v5935_v37  ;;  %v9559_v42 = vcombine.low %v18831_v33, %v18928_v57 }
 0x56d   : > { %v19092_v44 = vrot.slane %v11343_v4, %v14347_v5  ;;  %v11375_v36 = vcombine.low %v7782_v24, %v7790_v21  ;;  %v11376_v13 = vcombine.high %v7782_v24, %v7790_v21  ;;  %v19096_v16 = vrot.slane %v11327_v61, %v14347_v5 }
 0x56e   : > { %v19099_v56 = vrot.slane %v9575_v28, %v14347_v5  ;;  %v9591_v40 = vcombine.low %v19016_v35, %v7880_v10  ;;  %v9592_v3 = vcombine.high %v19016_v35, %v7880_v10  ;;  %v19105_v33 = vrot.slane %v11359_v62, %v14347_v5 }
 0x56f   : > { %24199 = vst [vmem:[#allocation152_spill] sm:$0xff] %v19092_v44  ;;  %24200 = vst [vmem:[#allocation75_spill] sm:$0xff] %v19096_v16  ;;  %v19108_v4 = vrot.slane %v11360_v27, %v14347_v5  ;;  %v19111_v57 = vrot.slane %v11375_v36, %v14347_v5  ;;  %v5948_v35 = vcombine.high %v5903_v31, %v5935_v37 }
 0x570   : > { %7995 = vrot.lane.b32.xlu1 %v6626_v41, %s14267_s6  ;;  %24201 = vst [vmem:[#allocation155_spill] sm:$0xff] %v19099_v56  ;;  %7905 = vrot.lane.b32.xlu0 %v5947_v29, %s14267_s6  ;;  %24202 = vst [vmem:[#allocation149_spill] sm:$0xff] %v19105_v33  ;;  %v19114_v41 = vrot.slane %v11376_v13, %v14347_v5  ;;  %v7884_v24 = vpop.permute.xlu1 %7883  ;;  %v19116_v28 = vpop.permute.xlu0 %7793  ;;  %v5942_v10 = vrot.slane %v5928_v23, %v15696_v38 }
 0x571   : > { %24203 = vst [vmem:[#allocation151_spill] sm:$0xff] %v19108_v4  ;;  %24204 = vst [vmem:[#allocation143_spill] sm:$0xff] %v19111_v57  ;;  %v9607_v39 = vcombine.low %v7876_v45, %v7884_v24  ;;  %v9608_v61 = vcombine.high %v7876_v45, %v7884_v24  ;;  %v19120_v62 = vrot.slane %v9559_v42, %v14347_v5 }
 0x572   : > { %24205 = vst [vmem:[#allocation130_spill] sm:$0xff] %v19114_v41  ;;  %v11391_v27 = vcombine.low %v19096_v16, %v19092_v44  ;;  %v11423_v21 = vcombine.low %v19105_v33, %v19111_v57  ;;  %v11440_v29 = vcombine.high %v19108_v4, %v19114_v41  ;;  %v19130_v45 = vrot.slane %v9591_v40, %v14347_v5  ;;  %v24228_v44 = vld [vmem:[#allocation154_spill] sm:$0xff] }
 0x573   : > { %24206 = vst [vmem:[#allocation184_spill] sm:$0xff] %v19120_v62  ;;  %v19133_v37 = vrot.slane %v9592_v3, %v14347_v5  ;;  %v19136_v31 = vrot.slane %v9607_v39, %v14347_v5  ;;  %v19139_v23 = vrot.slane %v9608_v61, %v14347_v5  ;;  %v19143_v42 = vrot.slane %v6087_v7, %v14347_v5 }
 0x574   : > { %7999 = vrot.lane.b32.xlu1 %v6627_v9, %s14267_s6  ;;  %7909 = vrot.lane.b32.xlu0 %v5948_v35, %s14267_s6  ;;  %v9623_v9 = vcombine.low %v19120_v62, %v19099_v56  ;;  %v19147_v36 = vpop.permute.xlu1 %7887  ;;  %v19150_v13 = vrot.slane %v11423_v21, %v15696_v38  ;;  %v19153_v40 = vrot.slane %v11440_v29, %v15696_v38  ;;  %v19161_v39 = vpop.permute.xlu0 %7797 }
 0x575   : > { %24207 = vst [vmem:[#allocation160_spill] sm:$0xff] %v19133_v37  ;;  %24208 = vst [vmem:[#allocation53_spill] sm:$0xff] %v19139_v23  ;;  %v6183_v3 = vcombine.low %v19082_v55, %v19087_v19  ;;  %v9655_v24 = vcombine.low %v19130_v45, %v19136_v31  ;;  %v9672_v7 = vcombine.high %v19133_v37, %v19139_v23 }
 0x576   : > { %24209 = vst [vmem:[#allocation146_spill] sm:$0xff] %v19150_v13  ;;  %24210 = vst [vmem:[#allocation23_spill] sm:$0xff] %v19153_v40  ;;  %v5949_v61 = vcombine.low %v19079_v43, %v5942_v10  ;;  %v6800_v35 = vcombine.high %v24185_v1, %v24184_v26  ;;  %v24211_v21 = vcombine.high %v24190_v6, %v18947_v48  ;;  %v24241_v13 = vld [vmem:[#allocation159_spill] sm:$0xff] }
 0x577   : > { %v6630_v29 = vcombine.high %v18602_v47, %v18961_v54  ;;  %v19173_v34 = vrot.slane %v11391_v27, %v15696_v38  ;;  %v24213_v4 = vcombine.high %v18976_v58, %v18979_v25  ;;  %v6863_v1 = vcombine.low %v19055_v22, %v19060_v32 }
 0x578   : > { %8003 = vrot.lane.b32.xlu1 %v24211_v21, %s14267_s6  ;;  %v6151_v26 = vcombine.low %v19143_v42, %v19074_v46  ;;  %7913 = vrot.lane.b32.xlu0 %v5949_v61, %s14267_s6  ;;  %v19187_v48 = vrot.slane %v9655_v24, %v15696_v38  ;;  %v19190_v6 = vrot.slane %v9672_v7, %v15696_v38  ;;  %v7892_v27 = vpop.permute.xlu1 %7891  ;;  %v19207_v7 = vpop.permute.xlu0 %7801 }
 0x579   : > { %24212 = vst [vmem:[#allocation188_spill] sm:$0xff] %v19173_v34  ;;  %v19179_v41 = vrot.slane %v24213_v4, %v15696_v38  ;;  %v19193_v21 = vrot.slane %v9623_v9, %v15696_v38  ;;  %v24218_v24 = vcombine.high %v24187_v8, %v24186_v15  ;;  %v5950_v9 = vcombine.high %v19079_v43, %v5942_v10 }
 0x57a   : > { %24215 = vst [vmem:[#allocation89_spill] sm:$0xff] %v19187_v48  ;;  %24216 = vst [vmem:[#allocation233_spill] sm:$0xff] %v19190_v6  ;;  %v6191_v16 = vrot.slane %v6183_v3, %v15696_v38  ;;  %v24219_v4 = vcombine.high %v19005_v11, %v19008_v18  ;;  %v19218_v25 = vrot.slane %v6800_v35, %v14347_v5 }
 0x57b   : > { %24214 = vst [vmem:[#allocation172_spill] sm:$0xff] %v19179_v41  ;;  %24217 = vst [vmem:[#allocation234_spill] sm:$0xff] %v19193_v21  ;;  %v19205_v61 = vrot.slane %v24218_v24, %v14347_v5  ;;  %v24221_v15 = vcombine.low %v18602_v47, %v18961_v54  ;;  %v24222_v8 = vcombine.low %v18752_v30, %v18950_v52 }
 0x57c   : > { %v19215_v58 = vrot.slane %v24219_v4, %v15696_v38  ;;  %v24223_v10 = vcombine.high %v18752_v30, %v18950_v52  ;;  %7917 = vrot.lane.b32.xlu0 %v5950_v9, %s14267_s6  ;;  %v6159_v4 = vrot.slane %v6151_v26, %v15696_v38  ;;  %v6871_v47 = vrot.slane %v6863_v1, %v15696_v38  ;;  %v7896_v9 = vpop.permute.xlu1 %7895  ;;  %v19261_v54 = vpop.permute.xlu0 %7805 }
 0x57d   : > { %8007 = vrot.lane.b32.xlu1 %v24221_v15, %s14267_s6  ;;  %v6839_v43 = vrot.slane %v24222_v8, %v15696_v38  ;;  %v24224_v30 = vcombine.low %v24189_v14, %v24188_v17  ;;  %v24225_v15 = vld [vmem:[#allocation156_spill] sm:$0xff]  ;;  %v6136_v26 = vcombine.high %v24196_v50, %v24195_v59  ;;  %v11464_v1 = vcombine.high %v19116_v28, %v19207_v7 }
 0x57e   : > { %24220 = vst [vmem:[#allocation235_spill] sm:$0xff] %v19215_v58  ;;  %v19232_v3 = vrot.slane %v24223_v10, %v15696_v38  ;;  %v24226_v8 = vld [vmem:[#allocation80_spill] sm:$0xff]  ;;  %v6864_v35 = vcombine.high %v19055_v22, %v19060_v32  ;;  %v6879_v24 = vcombine.low %v19218_v25, %v19205_v61  ;;  %v6215_v40 = vcombine.low %v6159_v4, %v6191_v16  ;;  %v24227_v22 = vld [vmem:[#allocation158_spill] sm:$0xff] }
 0x57f   : > { %v19247_v52 = vrot.slane %v24224_v30, %v14347_v5  ;;  %v7071_v10 = vcombine.low %v24226_v8, %v24225_v15  ;;  %v6184_v30 = vcombine.high %v19082_v55, %v19087_v19  ;;  %v6104_v41 = vcombine.high %v24192_v0, %v24191_v2  ;;  %v24242_v58 = vld [vmem:[#allocation190_spill] sm:$0xff] }
 0x580   : > { %v6152_v50 = vcombine.high %v19143_v42, %v19074_v46  ;;  %v6120_v59 = vcombine.high %v24194_v12, %v24193_v51  ;;  %v11480_v32 = vcombine.high %v19161_v39, %v19261_v54  ;;  %v7087_v55 = vcombine.low %v24228_v44, %v24227_v22  ;;  %7921 = vrot.lane.b32.xlu0 %v6215_v40, %s14267_s6  ;;  %v7900_v42 = vpop.permute.xlu1 %7899  ;;  %v19288_v34 = vpop.permute.xlu0 %7809 }
 0x581   : > { %8011 = vrot.lane.b32.xlu1 %v6630_v29, %s14267_s6  ;;  %v9695_v19 = vcombine.low %v19147_v36, %v7896_v9  ;;  %v9696_v33 = vcombine.high %v19147_v36, %v7896_v9  ;;  %v6895_v0 = vcombine.low %v6839_v43, %v6871_v47  ;;  %v6088_v2 = vcombine.high %v24198_v53, %v24197_v63  ;;  %v24240_v53 = vld [vmem:[#allocation183_spill] sm:$0xff] }
 0x582   : > { %v19280_v12 = vrot.slane %v6136_v26, %v14347_v5  ;;  %v19283_v51 = vrot.slane %v11464_v1, %v14347_v5  ;;  %v19286_v46 = vrot.slane %v11480_v32, %v14347_v5  ;;  %v9711_v29 = vcombine.low %v7892_v27, %v7900_v42 }
 0x583   : > { %v9712_v57 = vcombine.high %v7892_v27, %v7900_v42  ;;  %v6216_v36 = vcombine.high %v6159_v4, %v6191_v16  ;;  %v6198_v40 = vrot.slane %v6184_v30, %v15696_v38  ;;  %v19292_v9 = vrot.slane %v6104_v41, %v14347_v5 }
 0x584   : > { %24229 = vst [vmem:[#allocation156_spill] sm:$0xff] %v19283_v51  ;;  %24230 = vst [vmem:[#allocation80_spill] sm:$0xff] %v19286_v46  ;;  %v19295_v63 = vrot.slane %v6120_v59, %v14347_v5  ;;  %v6166_v26 = vrot.slane %v6152_v50, %v15696_v38  ;;  %v19302_v27 = vrot.slane %v9695_v19, %v14347_v5  ;;  %v19317_v50 = vpop.permute.xlu1 %7903 }
 0x585   : > { %8015 = vrot.lane.b32.xlu1 %v6895_v0, %s14267_s6  ;;  %v19305_v16 = vrot.slane %v9696_v33, %v14347_v5  ;;  %v19308_v4 = vrot.slane %v9711_v29, %v14347_v5  ;;  %v19311_v41 = vrot.slane %v9712_v57, %v14347_v5  ;;  %7925 = vrot.lane.b32.xlu0 %v6216_v36, %s14267_s6  ;;  %v7814_v0 = vpop.permute.xlu0 %7813  ;;  %v24237_v36 = vld [vmem:[#allocation187_spill] sm:$0xff] }
 0x586   : > { %v6880_v1 = vcombine.high %v19218_v25, %v19205_v61  ;;  %v6102_v30 = vrot.slane %v6088_v2, %v14347_v5  ;;  %v6896_v59 = vcombine.high %v6839_v43, %v6871_v47  ;;  %v6878_v32 = vrot.slane %v6864_v35, %v15696_v38  ;;  %v24238_v57 = vld [vmem:[#allocation171_spill] sm:$0xff] }
 0x587   : > { %24231 = vst [vmem:[#allocation158_spill] sm:$0xff] %v19305_v16  ;;  %24232 = vst [vmem:[#allocation154_spill] sm:$0xff] %v19311_v41  ;;  %v6199_v33 = vcombine.low %v19295_v63, %v19280_v12  ;;  %v6217_v42 = vcombine.low %v6166_v26, %v6198_v40  ;;  %v24233_v25 = vcombine.high %v24189_v14, %v24188_v17 }
 0x588   : > { %v19333_v43 = vrot.slane %v7087_v55, %v14347_v5  ;;  %v24234_v35 = vcombine.low %v18903_v49, %v18964_v20  ;;  %v24235_v2 = vcombine.high %v18903_v49, %v18964_v20  ;;  %v6167_v14 = vcombine.low %v6102_v30, %v19292_v9  ;;  %v24236_v55 = vld [vmem:[#allocation60_spill] sm:$0xff]  ;;  %v24239_v49 = vld [vmem:[#allocation86_spill] sm:$0xff] }
 0x589   : > { %v19330_v61 = vrot.slane %v24233_v25, %v14347_v5  ;;  %8019 = vrot.lane.b32.xlu1 %v6896_v59, %s14267_s6  ;;  %v6407_v59 = vcombine.low %v24237_v36, %v24236_v55  ;;  %7929 = vrot.lane.b32.xlu0 %v6217_v42, %s14267_s6  ;;  %v19355_v25 = vrot.slane %v6879_v24, %v15696_v38  ;;  %v24243_v42 = vld [vmem:[#allocation144_spill] sm:$0xff]  ;;  %v7818_v24 = vpop.permute.xlu0 %7817 }
 0x58a   : > { %v19340_v47 = vrot.slane %v24234_v35, %v15696_v38  ;;  %v19346_v29 = vrot.slane %v24235_v2, %v15696_v38  ;;  %v19358_v35 = vrot.slane %v7071_v10, %v14347_v5  ;;  %v6359_v20 = vcombine.low %v24239_v49, %v24238_v57  ;;  %v7908_v2 = vpop.permute.xlu1 %7907 }
 0x58b   : > { %v6897_v19 = vcombine.low %v19232_v3, %v6878_v32  ;;  %v19364_v17 = vrot.slane %v6880_v1, %v15696_v38  ;;  %v6375_v6 = vcombine.low %v24241_v13, %v24240_v53  ;;  %v6391_v11 = vcombine.low %v24243_v42, %v24242_v58 }
 0x58c   : > { %v6218_v18 = vcombine.high %v6166_v26, %v6198_v40  ;;  %v6207_v10 = vrot.slane %v6199_v33, %v15696_v38  ;;  %v6168_v23 = vcombine.high %v6102_v30, %v19292_v9  ;;  %v11479_v62 = vcombine.low %v19161_v39, %v19261_v54 }
 0x58d   : > { %8023 = vrot.lane.b32.xlu1 %v6897_v19, %s14267_s6  ;;  %v6898_v1 = vcombine.high %v19232_v3, %v6878_v32  ;;  %v19379_v56 = vrot.slane %v6407_v59, %v14347_v5  ;;  %v11463_v40 = vcombine.low %v19116_v28, %v19207_v7  ;;  %v6175_v26 = vrot.slane %v6167_v14, %v15696_v38  ;;  %v7822_v33 = vpop.permute.xlu0 %7821 }
 0x58e   : > { %7933 = vrot.lane.b32.xlu0 %v6218_v18, %s14267_s6  ;;  %v6899_v9 = vcombine.low %v19340_v47, %v19355_v25  ;;  %v19388_v30 = vrot.slane %v6359_v20, %v14347_v5  ;;  %v11495_v39 = vcombine.low %v19288_v34, %v7818_v24  ;;  %v11496_v3 = vcombine.high %v19288_v34, %v7818_v24  ;;  %v7912_v54 = vpop.permute.xlu1 %7911 }
 0x58f   : > { %v6900_v32 = vcombine.high %v19340_v47, %v19355_v25  ;;  %v19395_v28 = vrot.slane %v6375_v6, %v14347_v5  ;;  %v19398_v18 = vrot.slane %v6391_v11, %v14347_v5  ;;  %v6200_v7 = vcombine.high %v19295_v63, %v19280_v12 }
 0x590   : > { %v6219_v19 = vcombine.low %v6175_v26, %v6207_v10  ;;  %v19403_v14 = vrot.slane %v11479_v62, %v14347_v5  ;;  %v11511_v59 = vcombine.low %v7814_v0, %v7822_v33  ;;  %v11512_v34 = vcombine.high %v7814_v0, %v7822_v33 }
 0x591   : > { %8027 = vrot.lane.b32.xlu1 %v6898_v1, %s14267_s6  ;;  %v6182_v47 = vrot.slane %v6168_v23, %v15696_v38  ;;  %v6455_v6 = vcombine.low %v19398_v18, %v19379_v56  ;;  %v19410_v11 = vrot.slane %v11463_v40, %v14347_v5  ;;  %v9727_v25 = vcombine.low %v19317_v50, %v7912_v54  ;;  %v19427_v40 = vpop.permute.xlu0 %7825 }
 0x592   : > { %24244 = vst [vmem:[#allocation60_spill] sm:$0xff] %v19403_v14  ;;  %v9728_v12 = vcombine.high %v19317_v50, %v7912_v54  ;;  %7937 = vrot.lane.b32.xlu0 %v6219_v19, %s14267_s6  ;;  %v19416_v62 = vrot.slane %v11495_v39, %v14347_v5  ;;  %v19419_v63 = vrot.slane %v11496_v3, %v14347_v5  ;;  %v7916_v20 = vpop.permute.xlu1 %7915 }
 0x593   : > { %24245 = vst [vmem:[#allocation187_spill] sm:$0xff] %v19410_v11  ;;  %v19422_v23 = vrot.slane %v11511_v59, %v14347_v5  ;;  %v19425_v0 = vrot.slane %v11512_v34, %v14347_v5  ;;  %v9743_v24 = vcombine.low %v7908_v2, %v7916_v20  ;;  %v9744_v1 = vcombine.high %v7908_v2, %v7916_v20 }
 0x594   : > { %24246 = vst [vmem:[#allocation171_spill] sm:$0xff] %v19416_v62  ;;  %24247 = vst [vmem:[#allocation86_spill] sm:$0xff] %v19419_v63  ;;  %v6220_v50 = vcombine.high %v6175_v26, %v6207_v10  ;;  %v6214_v54 = vrot.slane %v6200_v7, %v15696_v38  ;;  %v11527_v39 = vcombine.low %v19410_v11, %v19403_v14  ;;  %v24274_v11 = vld [vmem:[#allocation97_spill] sm:$0xff] }
 0x595   : > { %24248 = vst [vmem:[#allocation183_spill] sm:$0xff] %v19422_v23  ;;  %24249 = vst [vmem:[#allocation159_spill] sm:$0xff] %v19425_v0  ;;  %v9759_v3 = vcombine.low %v19302_v27, %v19308_v4  ;;  %v11559_v33 = vcombine.low %v19416_v62, %v19422_v23  ;;  %v11576_v19 = vcombine.high %v19419_v63, %v19425_v0  ;;  %8031 = vrot.lane.b32.xlu1 %v6899_v9, %s14267_s6 }
 0x596   : > { %v9735_v2 = vrot.slane %v9727_v25, %v14347_v5  ;;  %v19441_v10 = vrot.slane %v9728_v12, %v14347_v5  ;;  %v9751_v26 = vrot.slane %v9743_v24, %v14347_v5  ;;  %v19445_v7 = vrot.slane %v9744_v1, %v14347_v5  ;;  %7941 = vrot.lane.b32.xlu0 %v6220_v50, %s14267_s6  ;;  %v19450_v34 = vpop.permute.xlu1 %7919  ;;  %v19462_v50 = vpop.permute.xlu0 %7829 }
 0x597   : > { %v6423_v59 = vcombine.low %v19388_v30, %v19395_v28  ;;  %v6901_v9 = vcombine.low %v19346_v29, %v19364_v17  ;;  %v19455_v25 = vrot.slane %v11559_v33, %v15696_v38  ;;  %v19458_v12 = vrot.slane %v11576_v19, %v15696_v38 }
 0x598   : > { %v9791_v20 = vcombine.low %v9735_v2, %v9751_v26  ;;  %v9792_v24 = vcombine.high %v9735_v2, %v9751_v26  ;;  %v9808_v1 = vcombine.high %v19441_v10, %v19445_v7  ;;  %v6221_v37 = vcombine.low %v6182_v47, %v6214_v54 }
 0x599   : > { %24250 = vst [vmem:[#allocation190_spill] sm:$0xff] %v19455_v25  ;;  %24251 = vst [vmem:[#allocation144_spill] sm:$0xff] %v19458_v12  ;;  %8035 = vrot.lane.b32.xlu1 %v6900_v32, %s14267_s6  ;;  %v19466_v63 = vrot.slane %v6455_v6, %v15696_v38  ;;  %v19469_v0 = vrot.slane %v9759_v3, %v15696_v38  ;;  %v19472_v33 = vrot.slane %v11527_v39, %v15696_v38  ;;  %v24277_v25 = vld [vmem:[#allocation92_spill] sm:$0xff] }
 0x59a   : > { %v24254_v19 = vcombine.high %v19283_v51, %v19286_v46  ;;  %7945 = vrot.lane.b32.xlu0 %v6221_v37, %s14267_s6  ;;  %v19482_v26 = vrot.slane %v9791_v20, %v15696_v38  ;;  %v24257_v32 = vcombine.high %v19302_v27, %v19308_v4  ;;  %v19491_v39 = vrot.slane %v9792_v24, %v15696_v38  ;;  %v19496_v51 = vpop.permute.xlu1 %7923  ;;  %v19504_v4 = vpop.permute.xlu0 %7833  ;;  %v24261_v20 = vld [vmem:[#allocation72_spill] sm:$0xff]  ;;  %v24262_v27 = vld [vmem:[#allocation147_spill] sm:$0xff] }
 0x59b   : > { %24252 = vst [vmem:[#allocation236_spill] sm:$0xff] %v19469_v0  ;;  %24253 = vst [vmem:[#allocation237_spill] sm:$0xff] %v19472_v33  ;;  %v19494_v3 = vrot.slane %v9808_v1, %v15696_v38  ;;  %v24263_v37 = vcombine.high %v24261_v20, %v24262_v27  ;;  %v7072_v24 = vcombine.high %v24226_v8, %v24225_v15  ;;  %v24276_v33 = vld [vmem:[#allocation174_spill] sm:$0xff] }
 0x59c   : > { %v19478_v2 = vrot.slane %v24254_v19, %v15696_v38  ;;  %24256 = vst [vmem:[#allocation239_spill] sm:$0xff] %v19482_v26  ;;  %v19488_v6 = vrot.slane %v24257_v32, %v15696_v38  ;;  %v6222_v19 = vcombine.high %v6182_v47, %v6214_v54  ;;  %v24259_v54 = vcombine.high %v19305_v16, %v19311_v41 }
 0x59d   : > { %24258 = vst [vmem:[#allocation240_spill] sm:$0xff] %v19494_v3  ;;  %v19522_v12 = vrot.slane %v24263_v37, %v14347_v5  ;;  %v7088_v1 = vcombine.high %v24228_v44, %v24227_v22  ;;  %8039 = vrot.lane.b32.xlu1 %v6901_v9, %s14267_s6  ;;  %v7104_v47 = vcombine.high %v18994_v60, %v19247_v52 }
 0x59e   : > { %24255 = vst [vmem:[#allocation238_spill] sm:$0xff] %v19478_v2  ;;  %v19516_v32 = vrot.slane %v24259_v54, %v15696_v38  ;;  %7949 = vrot.lane.b32.xlu0 %v6222_v19, %s14267_s6  ;;  %v6431_v54 = vrot.slane %v6423_v59, %v15696_v38  ;;  %v11600_v44 = vcombine.high %v19427_v40, %v19504_v4  ;;  %v19541_v8 = vpop.permute.xlu1 %7927  ;;  %v19553_v37 = vpop.permute.xlu0 %7837 }
 0x59f   : > { %v7119_v15 = vcombine.low %v19522_v12, %v19330_v61  ;;  %v6902_v22 = vcombine.high %v19346_v29, %v19364_v17  ;;  %v24264_v59 = vcombine.low %v19358_v35, %v19333_v43  ;;  %v6408_v19 = vcombine.high %v24237_v36, %v24236_v55 }
 0x5a0   : > { %24260 = vst [vmem:[#allocation241_spill] sm:$0xff] %v19516_v32  ;;  %v6456_v27 = vcombine.high %v19398_v18, %v19379_v56  ;;  %v6487_v20 = vcombine.low %v6431_v54, %v19466_v63  ;;  %v24265_v2 = vcombine.low %v18994_v60, %v19247_v52  ;;  %v7086_v17 = vrot.slane %v7072_v24, %v14347_v5 }
 0x5a1   : > { %v7143_v9 = vrot.slane %v24264_v59, %v15696_v38  ;;  %v7102_v46 = vrot.slane %v7088_v1, %v14347_v5  ;;  %v6376_v59 = vcombine.high %v24241_v13, %v24240_v53  ;;  %v11616_v55 = vcombine.high %v19462_v50, %v19553_v37  ;;  %8043 = vrot.lane.b32.xlu1 %v6902_v22, %s14267_s6 }
 0x5a2   : > { %v7111_v29 = vrot.slane %v24265_v2, %v15696_v38  ;;  %v7136_v56 = vcombine.high %v19358_v35, %v19333_v43  ;;  %v6424_v36 = vcombine.high %v19388_v30, %v19395_v28  ;;  %v6392_v60 = vcombine.high %v24243_v42, %v24242_v58  ;;  %7953 = vrot.lane.b32.xlu0 %v6487_v20, %s14267_s6  ;;  %v19584_v43 = vpop.permute.xlu1 %7931  ;;  %v19591_v42 = vpop.permute.xlu0 %7841 }
 0x5a3   : > { %v9832_v52 = vcombine.high %v19450_v34, %v19541_v8  ;;  %v6360_v13 = vcombine.high %v24239_v49, %v24238_v57  ;;  %v19579_v53 = vrot.slane %v11600_v44, %v14347_v5  ;;  %v19582_v18 = vrot.slane %v11616_v55, %v14347_v5  ;;  %v24273_v55 = vld [vmem:[#allocation150_spill] sm:$0xff] }
 0x5a4   : > { %v7167_v35 = vcombine.low %v7111_v29, %v7143_v9  ;;  %v19587_v30 = vrot.slane %v6408_v19, %v14347_v5  ;;  %v9848_v58 = vcombine.high %v19496_v51, %v19584_v43  ;;  %v6488_v28 = vcombine.high %v6431_v54, %v19466_v63 }
 0x5a5   : > { %24266 = vst [vmem:[#allocation72_spill] sm:$0xff] %v19579_v53  ;;  %24267 = vst [vmem:[#allocation147_spill] sm:$0xff] %v19582_v18  ;;  %v6470_v57 = vrot.slane %v6456_v27, %v15696_v38  ;;  %v7120_v49 = vcombine.high %v19522_v12, %v19330_v61  ;;  %v7151_v2 = vcombine.low %v7086_v17, %v7102_v46 }
 0x5a6   : > { %v6390_v24 = vrot.slane %v6376_v59, %v14347_v5  ;;  %8047 = vrot.lane.b32.xlu1 %v7167_v35, %s14267_s6  ;;  %v19602_v20 = vrot.slane %v6392_v60, %v14347_v5  ;;  %v19605_v44 = vrot.slane %v9832_v52, %v14347_v5  ;;  %v19608_v63 = vrot.slane %v9848_v58, %v14347_v5  ;;  %v19612_v54 = vpop.permute.xlu1 %7935  ;;  %v7846_v60 = vpop.permute.xlu0 %7845  ;;  %v24271_v35 = vld [vmem:[#allocation162_spill] sm:$0xff] }
 0x5a7   : > { %7957 = vrot.lane.b32.xlu0 %v6488_v28, %s14267_s6  ;;  %v6438_v61 = vrot.slane %v6424_v36, %v15696_v38  ;;  %v7152_v12 = vcombine.high %v7086_v17, %v7102_v46  ;;  %v7168_v22 = vcombine.high %v7111_v29, %v7143_v9  ;;  %v7150_v19 = vrot.slane %v7136_v56, %v15696_v38 }
 0x5a8   : > { %24268 = vst [vmem:[#allocation242_spill] sm:$0xff] %v19605_v44  ;;  %24269 = vst [vmem:[#allocation243_spill] sm:$0xff] %v19608_v63  ;;  %v6374_v27 = vrot.slane %v6360_v13, %v14347_v5  ;;  %v6471_v59 = vcombine.low %v19602_v20, %v19587_v30  ;;  %v7118_v36 = vrot.slane %v7104_v47, %v15696_v38  ;;  %v24270_v13 = vld [vmem:[#allocation35_spill] sm:$0xff] }
 0x5a9   : > { %v6489_v52 = vcombine.low %v6438_v61, %v6470_v57  ;;  %v19623_v46 = vrot.slane %v7151_v2, %v15696_v38  ;;  %v19627_v29 = vrot.slane %v7119_v15, %v15696_v38  ;;  %v19630_v17 = vrot.slane %v7120_v49, %v15696_v38  ;;  %v24272_v2 = vld [vmem:[#allocation42_spill] sm:$0xff] }
 0x5aa   : > { %8051 = vrot.lane.b32.xlu1 %v7168_v22, %s14267_s6  ;;  %v6439_v9 = vcombine.low %v6374_v27, %v6390_v24  ;;  %v6440_v56 = vcombine.high %v6374_v27, %v6390_v24  ;;  %v6647_v58 = vcombine.low %v24271_v35, %v24270_v13  ;;  %v7940_v28 = vpop.permute.xlu1 %7939  ;;  %v7169_v22 = vcombine.low %v7118_v36, %v7150_v19  ;;  %v7850_v15 = vpop.permute.xlu0 %7849 }
 0x5ab   : > { %7961 = vrot.lane.b32.xlu0 %v6489_v52, %s14267_s6  ;;  %v19635_v47 = vrot.slane %v7152_v12, %v15696_v38  ;;  %v6663_v1 = vcombine.low %v24273_v55, %v24272_v2  ;;  %v24275_v52 = vld [vmem:[#allocation49_spill] sm:$0xff]  ;;  %v6490_v62 = vcombine.high %v6438_v61, %v6470_v57  ;;  %v6479_v49 = vrot.slane %v6471_v59, %v15696_v38 }
 0x5ac   : > { %v6679_v14 = vcombine.low %v24275_v52, %v24274_v11  ;;  %v11615_v24 = vcombine.low %v19462_v50, %v19553_v37  ;;  %v7170_v27 = vcombine.high %v7118_v36, %v7150_v19  ;;  %v7171_v12 = vcombine.low %v19627_v29, %v19623_v46 }
 0x5ad   : > { %v7172_v23 = vcombine.high %v19627_v29, %v19623_v46  ;;  %v6631_v3 = vcombine.low %v24277_v25, %v24276_v33  ;;  %v11599_v57 = vcombine.low %v19427_v40, %v19504_v4  ;;  %v9847_v61 = vcombine.low %v19496_v51, %v19584_v43 }
 0x5ae   : > { %8055 = vrot.lane.b32.xlu1 %v7169_v22, %s14267_s6  ;;  %v6447_v50 = vrot.slane %v6439_v9, %v15696_v38  ;;  %v19658_v37 = vrot.slane %v6647_v58, %v14347_v5  ;;  %v11631_v19 = vcombine.low %v19591_v42, %v7850_v15  ;;  %v11632_v59 = vcombine.high %v19591_v42, %v7850_v15  ;;  %v7944_v36 = vpop.permute.xlu1 %7943  ;;  %v7854_v4 = vpop.permute.xlu0 %7853 }
 0x5af   : > { %7965 = vrot.lane.b32.xlu0 %v6490_v62, %s14267_s6  ;;  %v19663_v46 = vrot.slane %v6440_v56, %v15696_v38  ;;  %v19666_v40 = vrot.slane %v6663_v1, %v14347_v5  ;;  %v6472_v51 = vcombine.high %v19602_v20, %v19587_v30  ;;  %v19671_v62 = vrot.slane %v6679_v14, %v14347_v5 }
 0x5b0   : > { %v6491_v43 = vcombine.low %v6447_v50, %v6479_v49  ;;  %v9831_v9 = vcombine.low %v19450_v34, %v19541_v8  ;;  %v19676_v42 = vrot.slane %v11615_v24, %v14347_v5  ;;  %v11647_v29 = vcombine.low %v7846_v60, %v7854_v4 }
 0x5b1   : > { %v11648_v56 = vcombine.high %v7846_v60, %v7854_v4  ;;  %v19680_v1 = vrot.slane %v11599_v57, %v14347_v5  ;;  %v19683_v30 = vrot.slane %v9847_v61, %v14347_v5  ;;  %v9863_v14 = vcombine.low %v19612_v54, %v7944_v36 }
 0x5b2   : > { %24278 = vst [vmem:[#allocation35_spill] sm:$0xff] %v19676_v42  ;;  %8059 = vrot.lane.b32.xlu1 %v7170_v27, %s14267_s6  ;;  %v9864_v20 = vcombine.high %v19612_v54, %v7944_v36  ;;  %v19689_v34 = vrot.slane %v11631_v19, %v14347_v5  ;;  %v19692_v8 = vrot.slane %v11632_v59, %v14347_v5  ;;  %v7948_v22 = vpop.permute.xlu1 %7947  ;;  %v19700_v27 = vpop.permute.xlu0 %7857 }
 0x5b3   : > { %24279 = vst [vmem:[#allocation162_spill] sm:$0xff] %v19680_v1  ;;  %7969 = vrot.lane.b32.xlu0 %v6491_v43, %s14267_s6  ;;  %v19695_v60 = vrot.slane %v11647_v29, %v14347_v5  ;;  %v19698_v58 = vrot.slane %v11648_v56, %v14347_v5  ;;  %v9879_v15 = vcombine.low %v7940_v28, %v7948_v22 }
 0x5b4   : > { %24280 = vst [vmem:[#allocation42_spill] sm:$0xff] %v19689_v34  ;;  %24281 = vst [vmem:[#allocation150_spill] sm:$0xff] %v19692_v8  ;;  %v9880_v24 = vcombine.high %v7940_v28, %v7948_v22  ;;  %v6492_v54 = vcombine.high %v6447_v50, %v6479_v49  ;;  %v6486_v57 = vrot.slane %v6472_v51, %v15696_v38 }
 0x5b5   : > { %24282 = vst [vmem:[#allocation97_spill] sm:$0xff] %v19695_v60  ;;  %24283 = vst [vmem:[#allocation49_spill] sm:$0xff] %v19698_v58  ;;  %v19704_v61 = vrot.slane %v9831_v9, %v14347_v5  ;;  %v11663_v19 = vcombine.low %v19680_v1, %v19676_v42  ;;  %v11695_v59 = vcombine.low %v19689_v34, %v19695_v60  ;;  %v24308_v42 = vld [vmem:[#allocation173_spill] sm:$0xff]  ;;  %v24309_v34 = vld [vmem:[#allocation90_spill] sm:$0xff] }
 0x5b6   : > { %v11712_v36 = vcombine.high %v19692_v8, %v19698_v58  ;;  %8063 = vrot.lane.b32.xlu1 %v7171_v12, %s14267_s6  ;;  %v19714_v28 = vrot.slane %v9863_v14, %v14347_v5  ;;  %v19717_v49 = vrot.slane %v9864_v20, %v14347_v5  ;;  %v19720_v50 = vrot.slane %v9879_v15, %v14347_v5  ;;  %v19731_v43 = vpop.permute.xlu1 %7951  ;;  %v19745_v20 = vpop.permute.xlu0 %7861 }
 0x5b7   : > { %v19723_v51 = vrot.slane %v9880_v24, %v14347_v5  ;;  %7973 = vrot.lane.b32.xlu0 %v6492_v54, %s14267_s6  ;;  %v19727_v4 = vrot.slane %v6631_v3, %v14347_v5  ;;  %v9895_v12 = vcombine.low %v19704_v61, %v19683_v30  ;;  %v19734_v9 = vrot.slane %v11695_v59, %v15696_v38 }
 0x5b8   : > { %24284 = vst [vmem:[#allocation174_spill] sm:$0xff] %v19717_v49  ;;  %v19737_v29 = vrot.slane %v11712_v36, %v15696_v38  ;;  %v6727_v56 = vcombine.low %v19666_v40, %v19671_v62  ;;  %v9927_v14 = vcombine.low %v19714_v28, %v19720_v50  ;;  %v6493_v22 = vcombine.low %v19663_v46, %v6486_v57 }
 0x5b9   : > { %24285 = vst [vmem:[#allocation92_spill] sm:$0xff] %v19723_v51  ;;  %24286 = vst [vmem:[#allocation244_spill] sm:$0xff] %v19734_v9  ;;  %v9944_v3 = vcombine.high %v19717_v49, %v19723_v51  ;;  %v19750_v15 = vrot.slane %v11663_v19, %v15696_v38  ;;  %v24289_v24 = vcombine.high %v19579_v53, %v19582_v18 }
 0x5ba   : > { %24287 = vst [vmem:[#allocation245_spill] sm:$0xff] %v19737_v29  ;;  %8067 = vrot.lane.b32.xlu1 %v7172_v23, %s14267_s6  ;;  %v6695_v59 = vcombine.low %v19727_v4, %v19658_v37  ;;  %v7173_v36 = vcombine.low %v19630_v17, %v19635_v47  ;;  %v19764_v8 = vrot.slane %v9927_v14, %v15696_v38  ;;  %v7956_v19 = vpop.permute.xlu1 %7955  ;;  %v19778_v18 = vpop.permute.xlu0 %7865 }
 0x5bb   : > { %24288 = vst [vmem:[#allocation246_spill] sm:$0xff] %v19750_v15  ;;  %v19756_v54 = vrot.slane %v24289_v24, %v15696_v38  ;;  %7977 = vrot.lane.b32.xlu0 %v6493_v22, %s14267_s6  ;;  %v19767_v23 = vrot.slane %v9944_v3, %v15696_v38  ;;  %v19770_v58 = vrot.slane %v9895_v12, %v15696_v38  ;;  %v24311_v15 = vld [vmem:[#allocation148_spill] sm:$0xff] }
 0x5bc   : > { %24291 = vst [vmem:[#allocation248_spill] sm:$0xff] %v19764_v8  ;;  %v6494_v14 = vcombine.high %v19663_v46, %v6486_v57  ;;  %v6735_v3 = vrot.slane %v6727_v56, %v15696_v38  ;;  %v24294_v12 = vcombine.high %v19605_v44, %v19608_v63  ;;  %v6703_v22 = vrot.slane %v6695_v59, %v15696_v38 }
 0x5bd   : > { %24290 = vst [vmem:[#allocation247_spill] sm:$0xff] %v19756_v54  ;;  %24292 = vst [vmem:[#allocation249_spill] sm:$0xff] %v19767_v23  ;;  %v6680_v56 = vcombine.high %v24275_v52, %v24274_v11  ;;  %v7174_v24 = vcombine.high %v19630_v17, %v19635_v47  ;;  %v6648_v46 = vcombine.high %v24271_v35, %v24270_v13  ;;  %v24312_v23 = vld [vmem:[#allocation37_spill] sm:$0xff] }
 0x5be   : > { %24293 = vst [vmem:[#allocation250_spill] sm:$0xff] %v19770_v58  ;;  %v19786_v1 = vrot.slane %v24294_v12, %v15696_v38  ;;  %8071 = vrot.lane.b32.xlu1 %v7173_v36, %s14267_s6  ;;  %v11736_v12 = vcombine.high %v19700_v27, %v19778_v18  ;;  %v7960_v36 = vpop.permute.xlu1 %7959  ;;  %v19805_v59 = vpop.permute.xlu0 %7869  ;;  %v6759_v53 = vcombine.low %v6703_v22, %v6735_v3 }
 0x5bf   : > { %7981 = vrot.lane.b32.xlu0 %v6494_v14, %s14267_s6  ;;  %v6728_v14 = vcombine.high %v19666_v40, %v19671_v62  ;;  %v6696_v57 = vcombine.high %v19727_v4, %v19658_v37  ;;  %v6664_v11 = vcombine.high %v24273_v55, %v24272_v2  ;;  %v11752_v52 = vcombine.high %v19745_v20, %v19805_v59  ;;  %v24298_v37 = vld [vmem:[#allocation15_spill] sm:$0xff]  ;;  %v24299_v62 = vld [vmem:[#allocation17_spill] sm:$0xff] }
 0x5c0   : > { %24295 = vst [vmem:[#allocation251_spill] sm:$0xff] %v19786_v1  ;;  %v6632_v17 = vcombine.high %v24277_v25, %v24276_v33  ;;  %v9967_v47 = vcombine.low %v19731_v43, %v7960_v36  ;;  %v9968_v40 = vcombine.high %v19731_v43, %v7960_v36  ;;  %v19822_v13 = vrot.slane %v6680_v56, %v14347_v5  ;;  %v24313_v1 = vld [vmem:[#allocation132_spill] sm:$0xff] }
 0x5c1   : > { %v19825_v35 = vrot.slane %v11736_v12, %v14347_v5  ;;  %v19828_v55 = vrot.slane %v11752_v52, %v14347_v5  ;;  %v8464_v4 = vcombine.high %v24299_v62, %v24298_v37  ;;  %v6760_v43 = vcombine.high %v6703_v22, %v6735_v3  ;;  %v24305_v12 = vld [vmem:[#allocation102_spill] sm:$0xff] }
 0x5c2   : > { %8075 = vrot.lane.b32.xlu1 %v7174_v24, %s14267_s6  ;;  %v7964_v2 = vpop.permute.xlu1 %7963  ;;  %v19832_v24 = vpop.permute.xlu0 %7873  ;;  %v6662_v56 = vrot.slane %v6648_v46, %v14347_v5  ;;  %v19837_v36 = vrot.slane %v6664_v11, %v14347_v5  ;;  %v6710_v52 = vrot.slane %v6696_v57, %v15696_v38  ;;  %v19847_v22 = vrot.slane %v9968_v40, %v14347_v5  ;;  %v24302_v11 = vld [vmem:[#allocation39_spill] sm:$0xff]  ;;  %v24307_v37 = vld [vmem:[#allocation54_spill] sm:$0xff] }
 0x5c3   : > { %7985 = vrot.lane.b32.xlu0 %v6759_v53, %s14267_s6  ;;  %24296 = vst [vmem:[#allocation252_spill] sm:$0xff] %v19825_v35  ;;  %24297 = vst [vmem:[#allocation253_spill] sm:$0xff] %v19828_v55  ;;  %v9983_v25 = vcombine.low %v7956_v19, %v7964_v2  ;;  %v9984_v33 = vcombine.high %v7956_v19, %v7964_v2  ;;  %v6742_v53 = vrot.slane %v6728_v14, %v15696_v38  ;;  %v24303_v2 = vld [vmem:[#allocation161_spill] sm:$0xff] }
 0x5c4   : > { %v19844_v19 = vrot.slane %v9967_v47, %v14347_v5  ;;  %24300 = vst [vmem:[#allocation254_spill] sm:$0xff] %v19847_v22  ;;  %v6646_v14 = vrot.slane %v6632_v17, %v14347_v5  ;;  %v24304_v47 = vld [vmem:[#allocation98_spill] sm:$0xff]  ;;  %v6743_v40 = vcombine.low %v19837_v36, %v19822_v13  ;;  %v24306_v17 = vld [vmem:[#allocation12_spill] sm:$0xff]  ;;  %v6903_v60 = vcombine.low %v24309_v34, %v24308_v42 }
 0x5c5   : > { %v19850_v3 = vrot.slane %v9983_v25, %v14347_v5  ;;  %v19853_v46 = vrot.slane %v9984_v33, %v14347_v5  ;;  %v8736_v29 = vcombine.high %v24305_v12, %v24304_v47  ;;  %v6761_v54 = vcombine.low %v6710_v52, %v6742_v53  ;;  %v24310_v12 = vld [vmem:[#allocation31_spill] sm:$0xff] }
 0x5c6   : > { %12703 = vrot.lane.b32.xlu1 %v8464_v4, %s14268_s7  ;;  %v6919_v4 = vcombine.low %v24303_v2, %v24302_v11  ;;  %v19859_v57 = vpop.permute.xlu1 %7967  ;;  %v6951_v62 = vcombine.low %v24307_v37, %v24306_v17  ;;  %v6711_v47 = vcombine.low %v6646_v14, %v6662_v56  ;;  %v6935_v9 = vcombine.low %v24311_v15, %v24310_v12 }
 0x5c7   : > { %24301 = vst [vmem:[#allocation255_spill] sm:$0xff] %v19853_v46  ;;  %7989 = vrot.lane.b32.xlu0 %v6760_v43, %s14267_s6  ;;  %v7878_v43 = vpop.permute.xlu0 %7877  ;;  %v9008_v33 = vcombine.high %v24313_v1, %v24312_v23  ;;  %v6712_v44 = vcombine.high %v6646_v14, %v6662_v56  ;;  %v6762_v49 = vcombine.high %v6710_v52, %v6742_v53  ;;  %v24315_v14 = vld [vmem:[#allocation101_spill] sm:$0xff]  ;;  %v24344_v1 = vld [vmem:[#allocation11_spill] sm:$0xff] }
 0x5c8   : > { %v19880_v32 = vrot.slane %v6919_v4, %v14347_v5  ;;  %v19884_v51 = vrot.slane %v6951_v62, %v14347_v5  ;;  %v19890_v16 = vrot.slane %v6903_v60, %v14347_v5  ;;  %v11735_v4 = vcombine.low %v19700_v27, %v19778_v18 }
 0x5c9   : > { %v6719_v53 = vrot.slane %v6711_v47, %v15696_v38  ;;  %v19897_v56 = vrot.slane %v6935_v9, %v14347_v5  ;;  %v6744_v18 = vcombine.high %v19837_v36, %v19822_v13  ;;  %v6726_v47 = vrot.slane %v6712_v44, %v15696_v38  ;;  %v24318_v44 = vld [vmem:[#allocation226_spill] sm:$0xff]  ;;  %v24319_v36 = vld [vmem:[#allocation223_spill] sm:$0xff] }
 0x5ca   : > { %12707 = vrot.lane.b32.xlu1 %v8736_v29, %s14268_s7  ;;  %v7972_v25 = vpop.permute.xlu1 %7971  ;;  %v6751_v29 = vrot.slane %v6743_v40, %v15696_v38 }
 0x5cb   : > { %7993 = vrot.lane.b32.xlu0 %v6761_v54, %s14267_s6  ;;  %v7882_v63 = vpop.permute.xlu0 %7881  ;;  %v11751_v54 = vcombine.low %v19745_v20, %v19805_v59  ;;  %v24314_v59 = vld [vmem:[#allocation48_spill] sm:$0xff]  ;;  %v6999_v9 = vcombine.low %v19897_v56, %v19884_v51 }
 0x5cc   : > { %v11767_v62 = vcombine.low %v19832_v24, %v7882_v63  ;;  %v11768_v52 = vcombine.high %v19832_v24, %v7882_v63  ;;  %v9280_v40 = vcombine.high %v24315_v14, %v24314_v59  ;;  %v19915_v59 = vrot.slane %v11735_v4, %v14347_v5 }
 0x5cd   : > { %v9552_v14 = vcombine.high %v24319_v36, %v24318_v44  ;;  %v6758_v44 = vrot.slane %v6744_v18, %v15696_v38  ;;  %v9824_v36 = vcombine.high %v19469_v0, %v19482_v26 }
 0x5ce   : > { %12711 = vrot.lane.b32.xlu1 %v9008_v33, %s14268_s7  ;;  %v7976_v20 = vpop.permute.xlu1 %7975  ;;  %v19911_v33 = vrot.slane %v11751_v54, %v14347_v5  ;;  %24317 = vst [vmem:[#allocation161_spill] sm:$0xff] %v19915_v59  ;;  %v19923_v23 = vrot.slane %v11767_v62, %v14347_v5  ;;  %v19926_v54 = vrot.slane %v11768_v52, %v14347_v5 }
 0x5cf   : > { %7997 = vrot.lane.b32.xlu0 %v6762_v49, %s14267_s6  ;;  %v7886_v27 = vpop.permute.xlu0 %7885  ;;  %v6763_v49 = vcombine.low %v6719_v53, %v6751_v29  ;;  %v9999_v60 = vcombine.low %v19859_v57, %v7976_v20  ;;  %v10000_v13 = vcombine.high %v19859_v57, %v7976_v20  ;;  %v10031_v52 = vcombine.low %v19844_v19, %v19850_v3 }
 0x5d0   : > { %24316 = vst [vmem:[#allocation39_spill] sm:$0xff] %v19911_v33  ;;  %v11783_v63 = vcombine.low %v7878_v43, %v7886_v27  ;;  %v11784_v24 = vcombine.high %v7878_v43, %v7886_v27  ;;  %24320 = vst [vmem:[#allocation12_spill] sm:$0xff] %v19923_v23  ;;  %v11799_v62 = vcombine.low %v19915_v59, %v19911_v33  ;;  %v24346_v33 = vld [vmem:[#allocation99_spill] sm:$0xff] }
 0x5d1   : > { %24321 = vst [vmem:[#allocation54_spill] sm:$0xff] %v19926_v54  ;;  %v19972_v26 = vrot.slane %v10031_v52, %v15696_v38 }
 0x5d2   : > { %12715 = vrot.lane.b32.xlu1 %v9280_v40, %s14268_s7  ;;  %v19929_v43 = vrot.slane %v11783_v63, %v14347_v5  ;;  %v19932_v4 = vrot.slane %v11784_v24, %v14347_v5  ;;  %v7980_v40 = vpop.permute.xlu1 %7979 }
 0x5d3   : > { %8001 = vrot.lane.b32.xlu0 %v6763_v49, %s14267_s6  ;;  %v10015_v27 = vcombine.low %v7972_v25, %v7980_v40  ;;  %v10016_v57 = vcombine.high %v7972_v25, %v7980_v40  ;;  %v19934_v20 = vpop.permute.xlu0 %7889  ;;  %v6764_v49 = vcombine.high %v6719_v53, %v6751_v29  ;;  %v10007_v25 = vrot.slane %v9999_v60, %v14347_v5 }
 0x5d4   : > { %24322 = vst [vmem:[#allocation173_spill] sm:$0xff] %v19929_v43  ;;  %24323 = vst [vmem:[#allocation90_spill] sm:$0xff] %v19932_v4  ;;  %v11831_v63 = vcombine.low %v19923_v23, %v19929_v43  ;;  %v11848_v24 = vcombine.high %v19926_v54, %v19932_v4  ;;  %v19948_v29 = vrot.slane %v10000_v13, %v14347_v5 }
 0x5d5   : > { %v10023_v53 = vrot.slane %v10015_v27, %v14347_v5  ;;  %v19952_v18 = vrot.slane %v10016_v57, %v14347_v5  ;;  %v7007_v54 = vrot.slane %v6999_v9, %v15696_v38  ;;  %24328 = vst [vmem:[#allocation258_spill] sm:$0xff] %v19972_v26  ;;  %v6766_v9 = vcombine.high %v6726_v47, %v6758_v44 }
 0x5d6   : > { %12719 = vrot.lane.b32.xlu1 %v9552_v14, %s14268_s7  ;;  %24324 = vst [vmem:[#allocation31_spill] sm:$0xff] %v19948_v29  ;;  %v19955_v40 = vpop.permute.xlu1 %7983  ;;  %v19961_v14 = vrot.slane %v11831_v63, %v15696_v38  ;;  %v19964_v60 = vrot.slane %v11848_v24, %v15696_v38  ;;  %v19975_v63 = vrot.slane %v11799_v62, %v15696_v38 }
 0x5d7   : > { %24325 = vst [vmem:[#allocation148_spill] sm:$0xff] %v19952_v18  ;;  %8005 = vrot.lane.b32.xlu0 %v6764_v49, %s14267_s6  ;;  %v10063_v13 = vcombine.low %v10007_v25, %v10023_v53  ;;  %v10064_v27 = vcombine.high %v10007_v25, %v10023_v53  ;;  %v10080_v57 = vcombine.high %v19948_v29, %v19952_v18  ;;  %v19968_v4 = vpop.permute.xlu0 %7893 }
 0x5d8   : > { %24326 = vst [vmem:[#allocation256_spill] sm:$0xff] %v19961_v14  ;;  %24327 = vst [vmem:[#allocation257_spill] sm:$0xff] %v19964_v60  ;;  %v6765_v49 = vcombine.low %v6726_v47, %v6758_v44  ;;  %v24330_v24 = vcombine.high %v19825_v35, %v19828_v55  ;;  %v6936_v55 = vcombine.high %v24311_v15, %v24310_v12 }
 0x5d9   : > { %24329 = vst [vmem:[#allocation259_spill] sm:$0xff] %v19975_v63  ;;  %v19985_v53 = vrot.slane %v10063_v13, %v15696_v38  ;;  %v19994_v47 = vrot.slane %v10064_v27, %v15696_v38  ;;  %v19997_v44 = vrot.slane %v10080_v57, %v15696_v38 }
 0x5da   : > { %12723 = vrot.lane.b32.xlu1 %v9824_v36, %s14268_s7  ;;  %v19981_v25 = vrot.slane %v24330_v24, %v15696_v38  ;;  %v24333_v36 = vcombine.high %v19844_v19, %v19850_v3  ;;  %v19999_v62 = vpop.permute.xlu1 %7987  ;;  %v24337_v3 = vcombine.low %v19890_v16, %v19880_v32 }
 0x5db   : > { %8009 = vrot.lane.b32.xlu0 %v6765_v49, %s14267_s6  ;;  %24332 = vst [vmem:[#allocation261_spill] sm:$0xff] %v19985_v53  ;;  %24334 = vst [vmem:[#allocation262_spill] sm:$0xff] %v19997_v44  ;;  %v24335_v49 = vcombine.high %v19847_v22, %v19853_v46  ;;  %v20013_v27 = vpop.permute.xlu0 %7897  ;;  %v10096_v57 = vcombine.high %v19972_v26, %v19985_v53  ;;  %v24343_v26 = vld [vmem:[#allocation163_spill] sm:$0xff] }
 0x5dc   : > { %24331 = vst [vmem:[#allocation260_spill] sm:$0xff] %v19981_v25  ;;  %v19991_v52 = vrot.slane %v24333_v36, %v15696_v38  ;;  %v6975_v19 = vrot.slane %v24337_v3, %v15696_v38  ;;  %v6920_v3 = vcombine.high %v24303_v2, %v24302_v11  ;;  %v6968_v36 = vcombine.high %v19890_v16, %v19880_v32  ;;  %v24348_v44 = vld [vmem:[#allocation175_spill] sm:$0xff] }
 0x5dd   : > { %v20005_v13 = vrot.slane %v24335_v49, %v15696_v38  ;;  %v11872_v49 = vcombine.high %v19934_v20, %v20013_v27 }
 0x5de   : > { %12727 = vrot.lane.b32.xlu1 %v10096_v57, %s14268_s7  ;;  %v20035_v25 = vpop.permute.xlu1 %7991  ;;  %v6952_v57 = vcombine.high %v24307_v37, %v24306_v17  ;;  %v7031_v35 = vcombine.low %v6975_v19, %v7007_v54  ;;  %v7032_v12 = vcombine.high %v6975_v19, %v7007_v54 }
 0x5df   : > { %24336 = vst [vmem:[#allocation263_spill] sm:$0xff] %v20005_v13  ;;  %8013 = vrot.lane.b32.xlu0 %v6766_v9, %s14267_s6  ;;  %v7000_v9 = vcombine.high %v19897_v56, %v19884_v51  ;;  %v7902_v24 = vpop.permute.xlu0 %7901  ;;  %v10104_v53 = vcombine.high %v19955_v40, %v20035_v25  ;;  %v6904_v51 = vcombine.high %v24309_v34, %v24308_v42  ;;  %v24349_v13 = vld [vmem:[#allocation94_spill] sm:$0xff] }
 0x5e0   : > { %v11888_v60 = vcombine.high %v19968_v4, %v7902_v24  ;;  %v20054_v37 = vrot.slane %v11872_v49, %v14347_v5  ;;  %v20060_v16 = vrot.slane %v6952_v57, %v14347_v5  ;;  %v6950_v34 = vrot.slane %v6936_v55, %v14347_v5 }
 0x5e1   : > { %v7014_v17 = vrot.slane %v7000_v9, %v15696_v38  ;;  %v20069_v56 = vrot.slane %v10104_v53, %v14347_v5  ;;  %v6982_v49 = vrot.slane %v6968_v36, %v15696_v38  ;;  %v6918_v19 = vrot.slane %v6904_v51, %v14347_v5  ;;  %v24345_v36 = vld [vmem:[#allocation153_spill] sm:$0xff]  ;;  %v24347_v51 = vld [vmem:[#allocation44_spill] sm:$0xff] }
 0x5e2   : > { %24338 = vst [vmem:[#allocation264_spill] sm:$0xff] %v20054_v37  ;;  %v20057_v11 = vrot.slane %v11888_v60, %v14347_v5  ;;  %v7996_v2 = vpop.permute.xlu1 %7995  ;;  %v7015_v57 = vcombine.low %v6950_v34, %v20060_v16  ;;  %v7207_v59 = vcombine.low %v24345_v36, %v24344_v1  ;;  %v7223_v23 = vcombine.low %v24347_v51, %v24346_v33 }
 0x5e3   : > { %8017 = vrot.lane.b32.xlu0 %v7031_v35, %s14267_s6  ;;  %v10120_v32 = vcombine.high %v19999_v62, %v7996_v2  ;;  %v7906_v15 = vpop.permute.xlu0 %7905  ;;  %v6934_v35 = vrot.slane %v6920_v3, %v14347_v5  ;;  %24340 = vst [vmem:[#allocation266_spill] sm:$0xff] %v20069_v56  ;;  %v7033_v55 = vcombine.low %v6982_v49, %v7014_v17 }
 0x5e4   : > { %24339 = vst [vmem:[#allocation265_spill] sm:$0xff] %v20057_v11  ;;  %v7034_v63 = vcombine.high %v6982_v49, %v7014_v17  ;;  %v7023_v9 = vrot.slane %v7015_v57, %v15696_v38  ;;  %v11887_v14 = vcombine.low %v19968_v4, %v7902_v24  ;;  %v20101_v24 = vrot.slane %v7207_v59, %v14347_v5 }
 0x5e5   : > { %v20072_v60 = vrot.slane %v10120_v32, %v14347_v5  ;;  %v6983_v42 = vcombine.low %v6918_v19, %v6934_v35  ;;  %v6984_v53 = vcombine.high %v6918_v19, %v6934_v35  ;;  %v24342_v32 = vld [vmem:[#allocation32_spill] sm:$0xff]  ;;  %v11871_v35 = vcombine.low %v19934_v20, %v20013_v27 }
 0x5e6   : > { %v8000_v54 = vpop.permute.xlu1 %7999  ;;  %v7191_v0 = vcombine.low %v24343_v26, %v24342_v32  ;;  %v10119_v19 = vcombine.low %v19999_v62, %v7996_v2  ;;  %v7016_v29 = vcombine.high %v6950_v34, %v20060_v16  ;;  %v20105_v20 = vrot.slane %v7223_v23, %v14347_v5 }
 0x5e7   : > { %24341 = vst [vmem:[#allocation267_spill] sm:$0xff] %v20072_v60  ;;  %8021 = vrot.lane.b32.xlu0 %v7032_v12, %s14267_s6  ;;  %v7910_v3 = vpop.permute.xlu0 %7909  ;;  %v6991_v22 = vrot.slane %v6983_v42, %v15696_v38  ;;  %v6998_v4 = vrot.slane %v6984_v53, %v15696_v38  ;;  %v10103_v27 = vcombine.low %v19955_v40, %v20035_v25 }
 0x5e8   : > { %v20097_v46 = vrot.slane %v7191_v0, %v14347_v5  ;;  %v20110_v0 = vrot.slane %v11887_v14, %v14347_v5  ;;  %v20116_v59 = vrot.slane %v10119_v19, %v14347_v5  ;;  %v7030_v19 = vrot.slane %v7016_v29, %v15696_v38 }
 0x5ea   : > { %v8004_v12 = vpop.permute.xlu1 %8003  ;;  %24350 = vst [vmem:[#allocation32_spill] sm:$0xff] %v20110_v0 }
 0x5eb   : > { %8025 = vrot.lane.b32.xlu0 %v7033_v55, %s14267_s6  ;;  %v7914_v43 = vpop.permute.xlu0 %7913  ;;  %v7175_v55 = vcombine.low %v24349_v13, %v24348_v44 }
 0x5ec   : > { %v11903_v17 = vcombine.low %v7906_v15, %v7914_v43  ;;  %v11904_v49 = vcombine.high %v7906_v15, %v7914_v43  ;;  %v20113_v15 = vrot.slane %v11871_v35, %v14347_v5 }
 0x5ee   : > { %24351 = vst [vmem:[#allocation163_spill] sm:$0xff] %v20113_v15  ;;  %v20120_v23 = vrot.slane %v11903_v17, %v14347_v5  ;;  %v20123_v40 = vrot.slane %v11904_v49, %v14347_v5  ;;  %v20135_v17 = vrot.slane %v10103_v27, %v14347_v5  ;;  %v11935_v49 = vcombine.low %v20113_v15, %v20110_v0 }
 0x5ef   : > { %8029 = vrot.lane.b32.xlu0 %v7034_v63, %s14267_s6  ;;  %v8008_v57 = vpop.permute.xlu1 %8007  ;;  %v7918_v62 = vpop.permute.xlu0 %7917  ;;  %v7035_v63 = vcombine.low %v6991_v22, %v7023_v9 }
 0x5f0   : > { %v11919_v43 = vcombine.low %v7910_v3, %v7918_v62  ;;  %v11920_v2 = vcombine.high %v7910_v3, %v7918_v62  ;;  %v10135_v16 = vcombine.low %v8000_v54, %v8008_v57  ;;  %v10136_v42 = vcombine.high %v8000_v54, %v8008_v57  ;;  %24352 = vst [vmem:[#allocation11_spill] sm:$0xff] %v20120_v23 }
 0x5f1   : > { %24353 = vst [vmem:[#allocation153_spill] sm:$0xff] %v20123_v40  ;;  %v7036_v54 = vcombine.high %v6991_v22, %v7023_v9  ;;  %v7183_v9 = vrot.slane %v7175_v55, %v14347_v5  ;;  %v10167_v27 = vcombine.low %v20135_v17, %v20116_v59 }
 0x5f2   : > { %v20126_v14 = vrot.slane %v11919_v43, %v14347_v5  ;;  %v20129_v25 = vrot.slane %v11920_v2, %v14347_v5 }
 0x5f3   : > { %8033 = vrot.lane.b32.xlu0 %v7035_v63, %s14267_s6  ;;  %v8012_v34 = vpop.permute.xlu1 %8011  ;;  %v20131_v35 = vpop.permute.xlu0 %7921  ;;  %v20144_v63 = vrot.slane %v10135_v16, %v14347_v5 }
 0x5f4   : > { %24354 = vst [vmem:[#allocation99_spill] sm:$0xff] %v20126_v14  ;;  %24355 = vst [vmem:[#allocation44_spill] sm:$0xff] %v20129_v25  ;;  %v10151_v3 = vcombine.low %v8004_v12, %v8012_v34  ;;  %v10152_v53 = vcombine.high %v8004_v12, %v8012_v34  ;;  %v11967_v57 = vcombine.low %v20120_v23, %v20126_v14 }
 0x5f5   : > { %v11984_v62 = vcombine.high %v20123_v40, %v20129_v25  ;;  %v20147_v12 = vrot.slane %v10136_v42, %v14347_v5  ;;  %v7271_v42 = vcombine.low %v20101_v24, %v20105_v20  ;;  %v7239_v40 = vcombine.low %v7183_v9, %v20097_v46 }
 0x5f6   : > { %v20150_v22 = vrot.slane %v10151_v3, %v14347_v5  ;;  %v20153_v29 = vrot.slane %v10152_v53, %v14347_v5  ;;  %v20162_v2 = vrot.slane %v11967_v57, %v15696_v38  ;;  %v7037_v53 = vcombine.low %v6998_v4, %v7030_v19 }
 0x5f7   : > { %24356 = vst [vmem:[#allocation175_spill] sm:$0xff] %v20147_v12  ;;  %8037 = vrot.lane.b32.xlu0 %v7036_v54, %s14267_s6  ;;  %v20159_v43 = vpop.permute.xlu1 %8015  ;;  %v20165_v16 = vrot.slane %v11984_v62, %v15696_v38  ;;  %v20173_v3 = vpop.permute.xlu0 %7925  ;;  %v20176_v54 = vrot.slane %v11935_v49, %v15696_v38  ;;  %v24361_v57 = vcombine.high %v20054_v37, %v20057_v11 }
 0x5f8   : > { %24357 = vst [vmem:[#allocation94_spill] sm:$0xff] %v20153_v29  ;;  %24358 = vst [vmem:[#allocation268_spill] sm:$0xff] %v20162_v2  ;;  %v10199_v34 = vcombine.low %v20144_v63, %v20150_v22  ;;  %v10216_v55 = vcombine.high %v20147_v12, %v20153_v29  ;;  %v20195_v49 = vrot.slane %v10167_v27, %v15696_v38 }
 0x5f9   : > { %24359 = vst [vmem:[#allocation269_spill] sm:$0xff] %v20165_v16  ;;  %24360 = vst [vmem:[#allocation270_spill] sm:$0xff] %v20176_v54  ;;  %v20182_v62 = vrot.slane %v24361_v57, %v15696_v38  ;;  %v24366_v23 = vcombine.high %v20069_v56, %v20072_v60  ;;  %v7247_v57 = vrot.slane %v7239_v40, %v15696_v38  ;;  %v24405_v60 = vld [vmem:[#allocation103_spill] sm:$0xff] }
 0x5fa   : > { %v20187_v25 = vrot.slane %v10199_v34, %v15696_v38  ;;  %v20190_v15 = vrot.slane %v10216_v55, %v15696_v38  ;;  %24365 = vst [vmem:[#allocation274_spill] sm:$0xff] %v20195_v49  ;;  %v7038_v34 = vcombine.high %v6998_v4, %v7030_v19  ;;  %v7279_v55 = vrot.slane %v7271_v42, %v15696_v38 }
 0x5fb   : > { %24362 = vst [vmem:[#allocation271_spill] sm:$0xff] %v20182_v62  ;;  %8041 = vrot.lane.b32.xlu0 %v7037_v53, %s14267_s6  ;;  %v20192_v0 = vpop.permute.xlu1 %8019  ;;  %v20203_v11 = vpop.permute.xlu0 %7929  ;;  %v20210_v27 = vrot.slane %v24366_v23, %v15696_v38  ;;  %v7224_v23 = vcombine.high %v24347_v51, %v24346_v33  ;;  %v7272_v37 = vcombine.high %v20101_v24, %v20105_v20 }
 0x5fc   : > { %24363 = vst [vmem:[#allocation272_spill] sm:$0xff] %v20187_v25  ;;  %24364 = vst [vmem:[#allocation273_spill] sm:$0xff] %v20190_v15  ;;  %v12008_v19 = vcombine.high %v20131_v35, %v20203_v11  ;;  %v7192_v40 = vcombine.high %v24343_v26, %v24342_v32  ;;  %v7240_v62 = vcombine.high %v7183_v9, %v20097_v46 }
 0x5fd   : > { %24367 = vst [vmem:[#allocation275_spill] sm:$0xff] %v20210_v27  ;;  %v7208_v4 = vcombine.high %v24345_v36, %v24344_v1  ;;  %v7176_v33 = vcombine.high %v24349_v13, %v24348_v44  ;;  %v7238_v32 = vrot.slane %v7224_v23, %v14347_v5  ;;  %v7304_v1 = vcombine.high %v7247_v57, %v7279_v55 }
 0x5fe   : > { %v20237_v51 = vrot.slane %v12008_v19, %v14347_v5  ;;  %v7286_v36 = vrot.slane %v7272_v37, %v15696_v38  ;;  %v7206_v9 = vrot.slane %v7192_v40, %v14347_v5  ;;  %v7254_v23 = vrot.slane %v7240_v62, %v15696_v38 }
 0x5ff   : > { %8045 = vrot.lane.b32.xlu0 %v7038_v34, %s14267_s6  ;;  %v8024_v42 = vpop.permute.xlu1 %8023  ;;  %v7303_v34 = vcombine.low %v7247_v57, %v7279_v55  ;;  %v7222_v13 = vrot.slane %v7208_v4, %v14347_v5  ;;  %v7190_v37 = vrot.slane %v7176_v33, %v14347_v5  ;;  %v12007_v33 = vcombine.low %v20131_v35, %v20203_v11 }
 0x600   : > { %v7934_v16 = vpop.permute.xlu0 %7933  ;;  %v10240_v14 = vcombine.high %v20159_v43, %v8024_v42  ;;  %24368 = vst [vmem:[#allocation276_spill] sm:$0xff] %v20237_v51  ;;  %v7305_v44 = vcombine.low %v7254_v23, %v7286_v36  ;;  %v7306_v2 = vcombine.high %v7254_v23, %v7286_v36 }
 0x601   : > { %v12024_v53 = vcombine.high %v20173_v3, %v7934_v16  ;;  %v7287_v55 = vcombine.low %v7222_v13, %v7238_v32  ;;  %v7255_v4 = vcombine.low %v7190_v37, %v7206_v9  ;;  %v7256_v54 = vcombine.high %v7190_v37, %v7206_v9 }
 0x602   : > { %v20250_v19 = vrot.slane %v10240_v14, %v14347_v5  ;;  %v12023_v62 = vcombine.low %v20173_v3, %v7934_v16  ;;  %v7288_v37 = vcombine.high %v7222_v13, %v7238_v32 }
 0x603   : > { %8049 = vrot.lane.b32.xlu0 %v7303_v34, %s14267_s6  ;;  %v20240_v24 = vrot.slane %v12024_v53, %v14347_v5  ;;  %v8028_v26 = vpop.permute.xlu1 %8027  ;;  %v10239_v34 = vcombine.low %v20159_v43, %v8024_v42  ;;  %v7263_v27 = vrot.slane %v7255_v4, %v15696_v38  ;;  %v20277_v43 = vrot.slane %v12007_v33, %v14347_v5 }
 0x604   : > { %v10256_v46 = vcombine.high %v20192_v0, %v8028_v26  ;;  %v7938_v20 = vpop.permute.xlu0 %7937  ;;  %24370 = vst [vmem:[#allocation278_spill] sm:$0xff] %v20250_v19  ;;  %v10255_v15 = vcombine.low %v20192_v0, %v8028_v26  ;;  %v20271_v16 = vrot.slane %v12023_v62, %v14347_v5  ;;  %v7302_v4 = vrot.slane %v7288_v37, %v15696_v38 }
 0x605   : > { %24369 = vst [vmem:[#allocation277_spill] sm:$0xff] %v20240_v24  ;;  %24373 = vst [vmem:[#allocation281_spill] sm:$0xff] %v20277_v43 }
 0x606   : > { %v20253_v53 = vrot.slane %v10256_v46, %v14347_v5  ;;  %24372 = vst [vmem:[#allocation280_spill] sm:$0xff] %v20271_v16  ;;  %v20274_v0 = vrot.slane %v10255_v15, %v14347_v5 }
 0x607   : > { %8053 = vrot.lane.b32.xlu0 %v7304_v1, %s14267_s6  ;;  %v8032_v57 = vpop.permute.xlu1 %8031  ;;  %v7295_v1 = vrot.slane %v7287_v55, %v15696_v38  ;;  %v7270_v55 = vrot.slane %v7256_v54, %v15696_v38 }
 0x608   : > { %24371 = vst [vmem:[#allocation279_spill] sm:$0xff] %v20253_v53  ;;  %v7942_v40 = vpop.permute.xlu0 %7941 }
 0x609   : > { %v7307_v23 = vcombine.low %v7263_v27, %v7295_v1 }
 0x60b   : > { %8057 = vrot.lane.b32.xlu0 %v7305_v44, %s14267_s6  ;;  %v8036_v14 = vpop.permute.xlu1 %8035 }
 0x60c   : > { %v7946_v46 = vpop.permute.xlu0 %7945 }
 0x60d   : > { %v12039_v44 = vcombine.low %v7938_v20, %v7946_v46  ;;  %v12040_v56 = vcombine.high %v7938_v20, %v7946_v46  ;;  %v12071_v46 = vcombine.low %v20277_v43, %v20271_v16 }
 0x60f   : > { %8061 = vrot.lane.b32.xlu0 %v7306_v2, %s14267_s6  ;;  %v8040_v9 = vpop.permute.xlu1 %8039  ;;  %v20280_v2 = vrot.slane %v10239_v34, %v14347_v5  ;;  %v20284_v54 = vrot.slane %v12039_v44, %v14347_v5  ;;  %v20287_v26 = vrot.slane %v12040_v56, %v14347_v5 }
 0x610   : > { %v7950_v36 = vpop.permute.xlu0 %7949  ;;  %v10271_v3 = vcombine.low %v8032_v57, %v8040_v9  ;;  %v10272_v42 = vcombine.high %v8032_v57, %v8040_v9  ;;  %v7308_v57 = vcombine.high %v7263_v27, %v7295_v1 }
 0x611   : > { %v12055_v11 = vcombine.low %v7942_v40, %v7950_v36  ;;  %v12056_v35 = vcombine.high %v7942_v40, %v7950_v36  ;;  %24374 = vst [vmem:[#allocation282_spill] sm:$0xff] %v20284_v54  ;;  %24375 = vst [vmem:[#allocation283_spill] sm:$0xff] %v20287_v26  ;;  %v10303_v56 = vcombine.low %v20280_v2, %v20274_v0 }
 0x612   : > { %v20307_v44 = vrot.slane %v10271_v3, %v14347_v5  ;;  %v7309_v3 = vcombine.low %v7270_v55, %v7302_v4 }
 0x613   : > { %8065 = vrot.lane.b32.xlu0 %v7307_v23, %s14267_s6  ;;  %v20290_v15 = vrot.slane %v12055_v11, %v14347_v5  ;;  %v20293_v32 = vrot.slane %v12056_v35, %v14347_v5  ;;  %v8044_v20 = vpop.permute.xlu1 %8043 }
 0x614   : > { %v10287_v13 = vcombine.low %v8036_v14, %v8044_v20  ;;  %v10288_v34 = vcombine.high %v8036_v14, %v8044_v20  ;;  %v20295_v40 = vpop.permute.xlu0 %7953  ;;  %v20310_v14 = vrot.slane %v10272_v42, %v14347_v5  ;;  %v20332_v42 = vrot.slane %v12071_v46, %v15696_v38 }
 0x615   : > { %24376 = vst [vmem:[#allocation284_spill] sm:$0xff] %v20290_v15  ;;  %24377 = vst [vmem:[#allocation285_spill] sm:$0xff] %v20293_v32  ;;  %v12103_v62 = vcombine.low %v20284_v54, %v20290_v15  ;;  %v12120_v33 = vcombine.high %v20287_v26, %v20293_v32  ;;  %v24383_v20 = vcombine.high %v20237_v51, %v20240_v24  ;;  %v24403_v15 = vld [vmem:[#allocation204_spill] sm:$0xff] }
 0x616   : > { %24378 = vst [vmem:[#allocation286_spill] sm:$0xff] %v20310_v14  ;;  %v20313_v27 = vrot.slane %v10287_v13, %v14347_v5  ;;  %v20316_v1 = vrot.slane %v10288_v34, %v14347_v5  ;;  %24382 = vst [vmem:[#allocation290_spill] sm:$0xff] %v20332_v42  ;;  %v20342_v34 = vrot.slane %v10303_v56, %v15696_v38 }
 0x617   : > { %8069 = vrot.lane.b32.xlu0 %v7308_v57, %s14267_s6  ;;  %v20322_v37 = vrot.slane %v12103_v62, %v15696_v38  ;;  %v20325_v36 = vrot.slane %v12120_v33, %v15696_v38  ;;  %v20338_v13 = vrot.slane %v24383_v20, %v15696_v38  ;;  %v7310_v24 = vcombine.high %v7270_v55, %v7302_v4 }
 0x618   : > { %24379 = vst [vmem:[#allocation287_spill] sm:$0xff] %v20316_v1  ;;  %v20319_v9 = vpop.permute.xlu1 %8047  ;;  %v10335_v23 = vcombine.low %v20307_v44, %v20313_v27  ;;  %v10352_v11 = vcombine.high %v20310_v14, %v20316_v1  ;;  %24385 = vst [vmem:[#allocation292_spill] sm:$0xff] %v20342_v34 }
 0x619   : > { %24380 = vst [vmem:[#allocation288_spill] sm:$0xff] %v20322_v37  ;;  %24381 = vst [vmem:[#allocation289_spill] sm:$0xff] %v20325_v36  ;;  %v7958_v35 = vpop.permute.xlu0 %7957 }
 0x61a   : > { %24384 = vst [vmem:[#allocation291_spill] sm:$0xff] %v20338_v13  ;;  %v20345_v57 = vrot.slane %v10335_v23, %v15696_v38  ;;  %v20348_v62 = vrot.slane %v10352_v11, %v15696_v38  ;;  %v24388_v23 = vcombine.high %v20250_v19, %v20253_v53  ;;  %v24390_v13 = vld [vmem:[#allocation19_spill] sm:$0xff]  ;;  %v24407_v19 = vld [vmem:[#allocation217_spill] sm:$0xff] }
 0x61b   : > { %8073 = vrot.lane.b32.xlu0 %v7309_v3, %s14267_s6 }
 0x61c   : > { %24386 = vst [vmem:[#allocation293_spill] sm:$0xff] %v20345_v57  ;;  %24387 = vst [vmem:[#allocation294_spill] sm:$0xff] %v20348_v62  ;;  %v8052_v33 = vpop.permute.xlu1 %8051  ;;  %v10368_v56 = vcombine.high %v20342_v34, %v20345_v57  ;;  %v20362_v11 = vrot.slane %v24388_v23, %v15696_v38  ;;  %v24391_v23 = vld [vmem:[#allocation46_spill] sm:$0xff]  ;;  %v24393_v57 = vld [vmem:[#allocation76_spill] sm:$0xff] }
 0x61d   : > { %v7962_v3 = vpop.permute.xlu0 %7961  ;;  %v8600_v26 = vcombine.high %v24391_v23, %v24390_v13  ;;  %v24397_v13 = vld [vmem:[#allocation166_spill] sm:$0xff] }
 0x61e   : > { %24389 = vst [vmem:[#allocation295_spill] sm:$0xff] %v20362_v11  ;;  %12731 = vrot.lane.b32.xlu1 %v10368_v56, %s14268_s7  ;;  %v12144_v55 = vcombine.high %v20295_v40, %v7962_v3  ;;  %v24392_v56 = vld [vmem:[#allocation81_spill] sm:$0xff]  ;;  %v24398_v23 = vld [vmem:[#allocation114_spill] sm:$0xff] }
 0x61f   : > { %8077 = vrot.lane.b32.xlu0 %v7310_v24, %s14267_s6  ;;  %v24394_v24 = vcombine.low %v24392_v56, %v24393_v57  ;;  %v8872_v54 = vcombine.high %v24398_v23, %v24397_v13  ;;  %v24402_v62 = vld [vmem:[#allocation202_spill] sm:$0xff]  ;;  %v12143_v13 = vcombine.low %v20295_v40, %v7962_v3  ;;  %v9688_v40 = vcombine.high %v19193_v21, %v19187_v48 }
 0x620   : > { %v8056_v4 = vpop.permute.xlu1 %8055  ;;  %v20382_v20 = vrot.slane %v12144_v55, %v14347_v5  ;;  %v24399_v55 = vld [vmem:[#allocation73_spill] sm:$0xff]  ;;  %v9144_v11 = vcombine.high %v24403_v15, %v24402_v62  ;;  %v24409_v62 = vld [vmem:[#allocation210_spill] sm:$0xff]  ;;  %v24410_v15 = vld [vmem:[#allocation211_spill] sm:$0xff] }
 0x621   : > { %v7966_v36 = vpop.permute.xlu0 %7965  ;;  %v10376_v46 = vcombine.high %v20319_v9, %v8056_v4  ;;  %v10375_v1 = vcombine.low %v20319_v9, %v8056_v4  ;;  %v24411_v18 = vcombine.low %v24409_v62, %v24410_v15  ;;  %v9960_v9 = vcombine.high %v19770_v58, %v19764_v8  ;;  %v24415_v4 = vld [vmem:[#allocation228_spill] sm:$0xff]  ;;  %v24423_v58 = vld [vmem:[#allocation77_spill] sm:$0xff] }
 0x622   : > { %v12160_v32 = vcombine.high %v7958_v35, %v7966_v36  ;;  %12767 = vrot.lane.b32.xlu1 %v24394_v24, %s14257_s11  ;;  %24395 = vst [vmem:[#allocation81_spill] sm:$0xff] %v20382_v20  ;;  %v24400_v24 = vld [vmem:[#allocation68_spill] sm:$0xff]  ;;  %v12159_v29 = vcombine.low %v7958_v35, %v7966_v36  ;;  %v10304_v36 = vcombine.high %v20280_v2, %v20274_v0  ;;  %v24414_v2 = vld [vmem:[#allocation227_spill] sm:$0xff] }
 0x623   : > { %12705 = vrot.lane.b32.xlu0 %v8600_v26, %s14268_s7  ;;  %v20392_v42 = vrot.slane %v10376_v46, %v14347_v5  ;;  %v24404_v46 = vld [vmem:[#allocation24_spill] sm:$0xff]  ;;  %v20433_v3 = vrot.slane %v12143_v13, %v14347_v5  ;;  %v20436_v0 = vrot.slane %v10375_v1, %v14347_v5 }
 0x624   : > { %v20385_v51 = vrot.slane %v12160_v32, %v14347_v5  ;;  %v8060_v34 = vpop.permute.xlu1 %8059  ;;  %v24401_v32 = vcombine.low %v24399_v55, %v24400_v24  ;;  %v20423_v35 = vrot.slane %v12159_v29, %v14347_v5 }
 0x625   : > { %v10392_v43 = vcombine.high %v8052_v33, %v8060_v34  ;;  %v7970_v16 = vpop.permute.xlu0 %7969  ;;  %v10391_v14 = vcombine.low %v8052_v33, %v8060_v34  ;;  %24413 = vst [vmem:[#allocation68_spill] sm:$0xff] %v20433_v3 }
 0x626   : > { %24396 = vst [vmem:[#allocation76_spill] sm:$0xff] %v20385_v51  ;;  %12771 = vrot.lane.b32.xlu1 %v24401_v32, %s14257_s11  ;;  %24412 = vst [vmem:[#allocation73_spill] sm:$0xff] %v20423_v35 }
 0x627   : > { %v20395_v26 = vrot.slane %v10392_v43, %v14347_v5  ;;  %12709 = vrot.lane.b32.xlu0 %v8872_v54, %s14268_s7  ;;  %v24406_v43 = vcombine.low %v24404_v46, %v24405_v60  ;;  %v24408_v54 = vld [vmem:[#allocation219_spill] sm:$0xff] }
 0x628   : > { %v8064_v37 = vpop.permute.xlu1 %8063  ;;  %v9416_v53 = vcombine.high %v24408_v54, %v24407_v19  ;;  %v10232_v19 = vcombine.high %v20195_v49, %v20187_v25  ;;  %v24426_v54 = vld [vmem:[#allocation74_spill] sm:$0xff] }
 0x629   : > { %v7974_v23 = vpop.permute.xlu0 %7973 }
 0x62a   : > { %12775 = vrot.lane.b32.xlu1 %v24406_v43, %s14257_s11 }
 0x62b   : > { %12713 = vrot.lane.b32.xlu0 %v9144_v11, %s14268_s7 }
 0x62c   : > { %v8068_v12 = vpop.permute.xlu1 %8067 }
 0x62d   : > { %v7978_v32 = vpop.permute.xlu0 %7977 }
 0x62e   : > { %12779 = vrot.lane.b32.xlu1 %v24411_v18, %s14257_s11  ;;  %v12175_v43 = vcombine.low %v7970_v16, %v7978_v32  ;;  %v12176_v11 = vcombine.high %v7970_v16, %v7978_v32  ;;  %v20430_v18 = vrot.slane %v10391_v14, %v14347_v5  ;;  %v24416_v32 = vcombine.low %v24414_v2, %v24415_v4 }
 0x62f   : > { %12717 = vrot.lane.b32.xlu0 %v9416_v53, %s14268_s7 }
 0x630   : > { %v8072_v41 = vpop.permute.xlu1 %8071  ;;  %v20444_v14 = vrot.slane %v12175_v43, %v14347_v5  ;;  %v20447_v8 = vrot.slane %v12176_v11, %v14347_v5  ;;  %v10439_v11 = vcombine.low %v20436_v0, %v20430_v18 }
 0x631   : > { %v7982_v34 = vpop.permute.xlu0 %7981  ;;  %v10407_v53 = vcombine.low %v8064_v37, %v8072_v41  ;;  %v10408_v29 = vcombine.high %v8064_v37, %v8072_v41  ;;  %v10336_v37 = vcombine.high %v20307_v44, %v20313_v27 }
 0x632   : > { %v12191_v33 = vcombine.low %v7974_v23, %v7982_v34  ;;  %v12192_v16 = vcombine.high %v7974_v23, %v7982_v34  ;;  %12783 = vrot.lane.b32.xlu1 %v24416_v32, %s14257_s11  ;;  %24417 = vst [vmem:[#allocation24_spill] sm:$0xff] %v20444_v14  ;;  %24418 = vst [vmem:[#allocation103_spill] sm:$0xff] %v20447_v8  ;;  %v12207_v23 = vcombine.low %v20433_v3, %v20423_v35  ;;  %v24437_v3 = vld [vmem:[#allocation14_spill] sm:$0xff]  ;;  %v24438_v35 = vld [vmem:[#allocation111_spill] sm:$0xff] }
 0x633   : > { %12721 = vrot.lane.b32.xlu0 %v9688_v40, %s14268_s7  ;;  %v20471_v44 = vrot.slane %v10408_v29, %v14347_v5  ;;  %v20514_v25 = vrot.slane %v10439_v11, %v15696_v38 }
 0x634   : > { %v20450_v13 = vrot.slane %v12191_v33, %v14347_v5  ;;  %v20453_v1 = vrot.slane %v12192_v16, %v14347_v5  ;;  %v8076_v41 = vpop.permute.xlu1 %8075  ;;  %v20464_v33 = vrot.slane %v10407_v53, %v14347_v5  ;;  %v24421_v53 = vcombine.low %v19488_v6, %v19491_v39 }
 0x635   : > { %v10423_v34 = vcombine.low %v8068_v12, %v8076_v41  ;;  %v10424_v40 = vcombine.high %v8068_v12, %v8076_v41  ;;  %v20459_v43 = vpop.permute.xlu0 %7985  ;;  %v24422_v41 = vld [vmem:[#allocation78_spill] sm:$0xff] }
 0x636   : > { %24419 = vst [vmem:[#allocation210_spill] sm:$0xff] %v20450_v13  ;;  %24420 = vst [vmem:[#allocation211_spill] sm:$0xff] %v20453_v1  ;;  %v12239_v16 = vcombine.low %v20444_v14, %v20450_v13  ;;  %v12256_v32 = vcombine.high %v20447_v8, %v20453_v1  ;;  %12787 = vrot.lane.b32.xlu1 %v24421_v53, %s14257_s11  ;;  %v8568_v48 = vcombine.high %v24423_v58, %v24422_v41 }
 0x637   : > { %v20474_v27 = vrot.slane %v10423_v34, %v14347_v5  ;;  %v20477_v12 = vrot.slane %v10424_v40, %v14347_v5  ;;  %12725 = vrot.lane.b32.xlu0 %v9960_v9, %s14268_s7  ;;  %v20498_v53 = vrot.slane %v10336_v37, %v15696_v38  ;;  %v24425_v9 = vld [vmem:[#allocation70_spill] sm:$0xff]  ;;  %v24428_v41 = vcombine.low %v19991_v52, %v19994_v47 }
 0x638   : > { %v20487_v21 = vrot.slane %v12239_v16, %v15696_v38  ;;  %v8536_v58 = vcombine.high %v24426_v54, %v24425_v9  ;;  %v20503_v16 = vrot.slane %v12207_v23, %v15696_v38  ;;  %v20511_v8 = vrot.slane %v10304_v36, %v15696_v38  ;;  %24429 = vst [vmem:[#allocation78_spill] sm:$0xff] %v20514_v25  ;;  %v24432_v36 = vld [vmem:[#allocation69_spill] sm:$0xff] }
 0x639   : > { %v10471_v29 = vcombine.low %v20464_v33, %v20474_v27  ;;  %v10488_v34 = vcombine.high %v20471_v44, %v20477_v12  ;;  %v20493_v40 = vpop.permute.xlu0 %7989  ;;  %v20520_v54 = vrot.slane %v8568_v48, %v15696_v38  ;;  %v8808_v14 = vcombine.high %v24438_v35, %v24437_v3  ;;  %v24439_v35 = vld [vmem:[#allocation22_spill] sm:$0xff]  ;;  %v24440_v3 = vld [vmem:[#allocation51_spill] sm:$0xff] }
 0x63a   : > { %24424 = vst [vmem:[#allocation227_spill] sm:$0xff] %v20487_v21  ;;  %24427 = vst [vmem:[#allocation228_spill] sm:$0xff] %v20503_v16  ;;  %12791 = vrot.lane.b32.xlu1 %v24428_v41, %s14257_s11  ;;  %v24433_v41 = vld [vmem:[#allocation36_spill] sm:$0xff] }
 0x63b   : > { %12729 = vrot.lane.b32.xlu0 %v10232_v19, %s14268_s7  ;;  %v20517_v37 = vrot.slane %v10471_v29, %v15696_v38  ;;  %v20523_v23 = vrot.slane %v10488_v34, %v15696_v38  ;;  %v20528_v19 = vrot.slane %v12256_v32, %v15696_v38  ;;  %v8840_v49 = vcombine.high %v24433_v41, %v24432_v36 }
 0x63c   : > { %v10369_v29 = vcombine.low %v20511_v8, %v20498_v53  ;;  %v24434_v34 = vcombine.high %v20392_v42, %v20395_v26  ;;  %v20545_v32 = vrot.slane %v8536_v58, %v15696_v38  ;;  %v24435_v41 = vcombine.high %v20382_v20, %v20385_v51  ;;  %v24441_v20 = vld [vmem:[#allocation88_spill] sm:$0xff]  ;;  %v24442_v51 = vld [vmem:[#allocation123_spill] sm:$0xff] }
 0x63d   : > { %24430 = vst [vmem:[#allocation77_spill] sm:$0xff] %v20517_v37  ;;  %24431 = vst [vmem:[#allocation70_spill] sm:$0xff] %v20528_v19  ;;  %v20532_v11 = vpop.permute.xlu0 %7993  ;;  %v10504_v48 = vcombine.high %v20514_v25, %v20517_v37  ;;  %v20574_v58 = vrot.slane %v8840_v49, %v15696_v38  ;;  %v9080_v13 = vcombine.high %v24442_v51, %v24441_v20  ;;  %v24447_v19 = vld [vmem:[#allocation186_spill] sm:$0xff] }
 0x63e   : > { %v20542_v1 = vrot.slane %v24434_v34, %v15696_v38  ;;  %v20553_v9 = vrot.slane %v24435_v41, %v15696_v38  ;;  %12795 = vrot.lane.b32.xlu1 %v10369_v29, %s14257_s11  ;;  %v12280_v36 = vcombine.high %v20459_v43, %v20532_v11  ;;  %v9112_v29 = vcombine.high %v24440_v3, %v24439_v35  ;;  %v24446_v41 = vld [vmem:[#allocation64_spill] sm:$0xff] }
 0x63f   : > { %12733 = vrot.lane.b32.xlu0 %v10504_v48, %s14268_s7  ;;  %v8601_v48 = vcombine.low %v20545_v32, %v20520_v54  ;;  %v24443_v37 = vcombine.high %v24392_v56, %v24393_v57  ;;  %v20585_v35 = vrot.slane %v8808_v14, %v15696_v38  ;;  %v9384_v51 = vcombine.high %v24447_v19, %v24446_v41  ;;  %v24448_v14 = vld [vmem:[#allocation127_spill] sm:$0xff] }
 0x640   : > { %24436 = vst [vmem:[#allocation74_spill] sm:$0xff] %v20553_v9  ;;  %v20588_v3 = vrot.slane %v12280_v36, %v14347_v5  ;;  %v20598_v57 = vrot.slane %v9112_v29, %v15696_v38  ;;  %v20610_v19 = vrot.slane %v9080_v13, %v15696_v38  ;;  %v9656_v41 = vcombine.high %v19130_v45, %v19136_v31 }
 0x641   : > { %v7998_v25 = vpop.permute.xlu0 %7997  ;;  %v8873_v9 = vcombine.low %v20585_v35, %v20574_v58  ;;  %v9928_v45 = vcombine.high %v19714_v28, %v19720_v50 }
 0x642   : > { %v12296_v34 = vcombine.high %v20493_v40, %v7998_v25  ;;  %12831 = vrot.lane.b32.xlu1 %v24443_v37, %s14269_s9  ;;  %24444 = vst [vmem:[#allocation69_spill] sm:$0xff] %v20588_v3  ;;  %v24449_v37 = vld [vmem:[#allocation87_spill] sm:$0xff]  ;;  %v12295_v31 = vcombine.low %v20493_v40, %v7998_v25  ;;  %v10200_v40 = vcombine.high %v20144_v63, %v20150_v22 }
 0x643   : > { %12769 = vrot.lane.b32.xlu0 %v8601_v48, %s14257_s11  ;;  %v9352_v36 = vcombine.high %v24449_v37, %v24448_v14  ;;  %v9145_v48 = vcombine.low %v20610_v19, %v20598_v57  ;;  %v24451_v14 = vld [vmem:[#allocation155_spill] sm:$0xff]  ;;  %v24452_v37 = vld [vmem:[#allocation184_spill] sm:$0xff]  ;;  %v24455_v63 = vcombine.high %v24414_v2, %v24415_v4  ;;  %v10472_v2 = vcombine.high %v20464_v33, %v20474_v27 }
 0x644   : > { %v20591_v49 = vrot.slane %v12296_v34, %v14347_v5  ;;  %v24450_v34 = vcombine.high %v24399_v55, %v24400_v24  ;;  %v24453_v55 = vcombine.high %v24404_v46, %v24405_v60  ;;  %v9896_v60 = vcombine.high %v19704_v61, %v19683_v30 }
 0x645   : > { %v8002_v20 = vpop.permute.xlu0 %8001  ;;  %v20627_v24 = vrot.slane %v9352_v36, %v15696_v38  ;;  %v12279_v46 = vcombine.low %v20459_v43, %v20532_v11  ;;  %v24454_v36 = vcombine.high %v24409_v62, %v24410_v15  ;;  %v20652_v30 = vrot.slane %v12295_v31, %v14347_v5  ;;  %v24459_v31 = vld [vmem:[#allocation66_spill] sm:$0xff] }
 0x646   : > { %24445 = vst [vmem:[#allocation36_spill] sm:$0xff] %v20591_v49  ;;  %v12360_v56 = vcombine.high %v20588_v3, %v20591_v49  ;;  %12835 = vrot.lane.b32.xlu1 %v24450_v34, %s14269_s9  ;;  %v20617_v3 = vrot.slane %v9384_v51, %v15696_v38  ;;  %v9624_v49 = vcombine.high %v24452_v37, %v24451_v14 }
 0x647   : > { %12773 = vrot.lane.b32.xlu0 %v8873_v9, %s14257_s11  ;;  %v20635_v51 = vrot.slane %v9656_v41, %v15696_v38  ;;  %v20657_v15 = vrot.slane %v9928_v45, %v15696_v38  ;;  %v20670_v22 = vrot.slane %v9896_v60, %v15696_v38  ;;  %v20693_v14 = vrot.slane %v10200_v40, %v15696_v38 }
 0x648   : > { %v9417_v9 = vcombine.low %v20627_v24, %v20617_v3  ;;  %v20647_v28 = vrot.slane %v9624_v49, %v15696_v38  ;;  %v10168_v49 = vcombine.high %v20135_v17, %v20116_v59  ;;  %v10440_v33 = vcombine.high %v20436_v0, %v20430_v18 }
 0x649   : > { %v8006_v29 = vpop.permute.xlu0 %8005  ;;  %v24458_v27 = vcombine.high %v19488_v6, %v19491_v39  ;;  %v20722_v39 = vrot.slane %v10472_v2, %v15696_v38 }
 0x64a   : > { %12839 = vrot.lane.b32.xlu1 %v24453_v55, %s14269_s9  ;;  %v9689_v43 = vcombine.low %v20647_v28, %v20635_v51  ;;  %v20707_v45 = vrot.slane %v10168_v49, %v15696_v38  ;;  %v24468_v49 = vld [vmem:[#allocation63_spill] sm:$0xff] }
 0x64b   : > { %12777 = vrot.lane.b32.xlu0 %v9145_v48, %s14257_s11  ;;  %v9961_v48 = vcombine.low %v20670_v22, %v20657_v15 }
 0x64c   : > { %v10233_v6 = vcombine.low %v20707_v45, %v20693_v14 }
 0x64d   : > { %v8010_v13 = vpop.permute.xlu0 %8009 }
 0x64e   : > { %12843 = vrot.lane.b32.xlu1 %v24454_v36, %s14269_s9  ;;  %v12311_v50 = vcombine.low %v8002_v20, %v8010_v13  ;;  %v12312_v25 = vcombine.high %v8002_v20, %v8010_v13  ;;  %v20662_v20 = vrot.slane %v12279_v46, %v14347_v5  ;;  %v24460_v13 = vld [vmem:[#allocation13_spill] sm:$0xff]  ;;  %v20728_v36 = vrot.slane %v12360_v56, %v15696_v38 }
 0x64f   : > { %12781 = vrot.lane.b32.xlu0 %v9417_v9, %s14257_s11  ;;  %v8447_v9 = vcombine.low %v24460_v13, %v24459_v31 }
 0x650   : > { %v20673_v34 = vrot.slane %v12311_v50, %v14347_v5  ;;  %v20676_v41 = vrot.slane %v12312_v25, %v14347_v5  ;;  %v12343_v4 = vcombine.low %v20662_v20, %v20652_v30  ;;  %24464 = vst [vmem:[#allocation123_spill] sm:$0xff] %v20728_v36  ;;  %v24465_v50 = vld [vmem:[#allocation57_spill] sm:$0xff]  ;;  %v24466_v25 = vld [vmem:[#allocation62_spill] sm:$0xff] }
 0x651   : > { %v8014_v61 = vpop.permute.xlu0 %8013  ;;  %v8415_v40 = vcombine.low %v24466_v25, %v24465_v50  ;;  %v8602_v50 = vcombine.high %v20545_v32, %v20520_v54 }
 0x652   : > { %v12327_v62 = vcombine.low %v8006_v29, %v8014_v61  ;;  %v12328_v11 = vcombine.high %v8006_v29, %v8014_v61  ;;  %12847 = vrot.lane.b32.xlu1 %v24455_v63, %s14269_s9  ;;  %24456 = vst [vmem:[#allocation14_spill] sm:$0xff] %v20676_v41  ;;  %v20725_v0 = vrot.slane %v12343_v4, %v15696_v38  ;;  %v24469_v63 = vld [vmem:[#allocation25_spill] sm:$0xff] }
 0x653   : > { %12785 = vrot.lane.b32.xlu0 %v9689_v43, %s14257_s11  ;;  %v24467_v61 = vcombine.high %v19991_v52, %v19994_v47  ;;  %v20738_v43 = vrot.slane %v10440_v33, %v15696_v38  ;;  %v8719_v2 = vcombine.low %v24469_v63, %v24468_v49  ;;  %v10370_v52 = vcombine.high %v20511_v8, %v20498_v53  ;;  %v24472_v8 = vld [vmem:[#allocation117_spill] sm:$0xff]  ;;  %v24473_v53 = vld [vmem:[#allocation84_spill] sm:$0xff] }
 0x654   : > { %v20679_v59 = vrot.slane %v12327_v62, %v14347_v5  ;;  %v20682_v17 = vrot.slane %v12328_v11, %v14347_v5  ;;  %24463 = vst [vmem:[#allocation88_spill] sm:$0xff] %v20725_v0  ;;  %v8991_v13 = vcombine.low %v24473_v53, %v24472_v8  ;;  %v24475_v49 = vld [vmem:[#allocation192_spill] sm:$0xff]  ;;  %v8874_v53 = vcombine.high %v20585_v35, %v20574_v58  ;;  %v24482_v58 = vld [vmem:[#allocation157_spill] sm:$0xff]  ;;  %v24489_v62 = vld [vmem:[#allocation31_spill] sm:$0xff] }
 0x655   : > { %v20688_v29 = vpop.permute.xlu0 %8017  ;;  %v10505_v47 = vcombine.low %v20738_v43, %v20722_v39  ;;  %v20773_v25 = vrot.slane %v8719_v2, %v15696_v38  ;;  %v24483_v35 = vld [vmem:[#allocation181_spill] sm:$0xff] }
 0x656   : > { %24457 = vst [vmem:[#allocation111_spill] sm:$0xff] %v20682_v17  ;;  %v12375_v37 = vcombine.low %v20673_v34, %v20679_v59  ;;  %v12392_v55 = vcombine.high %v20676_v41, %v20682_v17  ;;  %12851 = vrot.lane.b32.xlu1 %v24458_v27, %s14269_s9  ;;  %v20762_v27 = vrot.slane %v8415_v40, %v15696_v38  ;;  %v24474_v40 = vld [vmem:[#allocation193_spill] sm:$0xff] }
 0x657   : > { %12789 = vrot.lane.b32.xlu0 %v9961_v48, %s14257_s11  ;;  %v20755_v48 = vrot.slane %v8447_v9, %v15696_v38  ;;  %v8959_v63 = vcombine.low %v24475_v49, %v24474_v40 }
 0x658   : > { %v20712_v60 = vrot.slane %v12375_v37, %v15696_v38  ;;  %v20715_v46 = vrot.slane %v12392_v55, %v15696_v38  ;;  %v24470_v37 = vld [vmem:[#allocation91_spill] sm:$0xff]  ;;  %v24471_v55 = vld [vmem:[#allocation96_spill] sm:$0xff] }
 0x659   : > { %v20717_v18 = vpop.permute.xlu0 %8021  ;;  %v8687_v33 = vcombine.low %v24471_v55, %v24470_v37  ;;  %v8467_v9 = vcombine.low %v20762_v27, %v20755_v48  ;;  %v24477_v37 = vld [vmem:[#allocation167_spill] sm:$0xff] }
 0x65a   : > { %24461 = vst [vmem:[#allocation22_spill] sm:$0xff] %v20712_v60  ;;  %24462 = vst [vmem:[#allocation51_spill] sm:$0xff] %v20715_v46  ;;  %12855 = vrot.lane.b32.xlu1 %v24467_v61, %s14269_s9 }
 0x65b   : > { %12793 = vrot.lane.b32.xlu0 %v10233_v6, %s14257_s11 }
 0x65d   : > { %v20748_v4 = vpop.permute.xlu0 %8025 }
 0x65e   : > { %12859 = vrot.lane.b32.xlu1 %v10370_v52, %s14269_s9  ;;  %v12416_v31 = vcombine.high %v20688_v29, %v20748_v4  ;;  %v20781_v52 = vrot.slane %v8687_v33, %v15696_v38  ;;  %v24480_v33 = vld [vmem:[#allocation209_spill] sm:$0xff] }
 0x65f   : > { %12797 = vrot.lane.b32.xlu0 %v10505_v47, %s14257_s11  ;;  %v24476_v47 = vld [vmem:[#allocation27_spill] sm:$0xff] }
 0x660   : > { %v9263_v55 = vcombine.low %v24477_v37, %v24476_v47  ;;  %v20786_v54 = vrot.slane %v12416_v31, %v14347_v5  ;;  %v8739_v8 = vcombine.low %v20781_v52, %v20773_v25  ;;  %v20812_v47 = vpop.permute.xlu1 %12703 }
 0x661   : > { %v8030_v6 = vpop.permute.xlu0 %8029 }
 0x662   : > { %v12432_v61 = vcombine.high %v20717_v18, %v8030_v6  ;;  %12895 = vrot.lane.b32.xlu1 %v8467_v9, %s14254_s8  ;;  %24478 = vst [vmem:[#allocation64_spill] sm:$0xff] %v20786_v54  ;;  %v20796_v9 = vrot.slane %v8991_v13, %v15696_v38  ;;  %v20808_v49 = vrot.slane %v9263_v55, %v15696_v38 }
 0x663   : > { %12833 = vrot.lane.b32.xlu0 %v8602_v50, %s14269_s9  ;;  %v24481_v50 = vld [vmem:[#allocation208_spill] sm:$0xff]  ;;  %v9535_v13 = vcombine.low %v24483_v35, %v24482_v58  ;;  %v9807_v58 = vcombine.low %v19441_v10, %v19445_v7  ;;  %v12431_v35 = vcombine.low %v20717_v18, %v8030_v6  ;;  %v12415_v10 = vcombine.low %v20688_v29, %v20748_v4  ;;  %v24490_v29 = vld [vmem:[#allocation255_spill] sm:$0xff]  ;;  %v24491_v4 = vld [vmem:[#allocation254_spill] sm:$0xff] }
 0x664   : > { %v20789_v32 = vrot.slane %v12432_v61, %v14347_v5  ;;  %v9231_v40 = vcombine.low %v24481_v50, %v24480_v33  ;;  %v20805_v61 = vrot.slane %v8959_v63, %v15696_v38  ;;  %v24484_v50 = vld [vmem:[#allocation222_spill] sm:$0xff]  ;;  %v20842_v46 = vpop.permute.xlu1 %12707 }
 0x665   : > { %v8034_v2 = vpop.permute.xlu0 %8033  ;;  %v20856_v6 = vrot.slane %v9807_v58, %v15696_v38 }
 0x666   : > { %24479 = vst [vmem:[#allocation186_spill] sm:$0xff] %v20789_v32  ;;  %12899 = vrot.lane.b32.xlu1 %v8739_v8, %s14254_s8  ;;  %v9011_v33 = vcombine.low %v20805_v61, %v20796_v9  ;;  %v9146_v8 = vcombine.high %v20610_v19, %v20598_v57  ;;  %v20821_v63 = vrot.slane %v9231_v40, %v15696_v38 }
 0x667   : > { %12837 = vrot.lane.b32.xlu0 %v8874_v53, %s14269_s9  ;;  %v24485_v53 = vld [vmem:[#allocation221_spill] sm:$0xff]  ;;  %v9418_v57 = vcombine.high %v20627_v24, %v20617_v3  ;;  %v20833_v19 = vrot.slane %v9535_v13, %v15696_v38  ;;  %v20849_v24 = vrot.slane %v12431_v35, %v14347_v5  ;;  %v10047_v13 = vcombine.low %v24491_v4, %v24490_v29  ;;  %v24497_v29 = vld [vmem:[#allocation279_spill] sm:$0xff]  ;;  %v24498_v4 = vld [vmem:[#allocation278_spill] sm:$0xff] }
 0x668   : > { %v9503_v11 = vcombine.low %v24485_v53, %v24484_v50  ;;  %v9283_v55 = vcombine.low %v20821_v63, %v20808_v49  ;;  %v24488_v53 = vld [vmem:[#allocation148_spill] sm:$0xff] }
 0x669   : > { %v8038_v37 = vpop.permute.xlu0 %8037  ;;  %v10079_v31 = vcombine.low %v24489_v62, %v24488_v53  ;;  %v9690_v62 = vcombine.high %v20647_v28, %v20635_v51 }
 0x66a   : > { %12903 = vrot.lane.b32.xlu1 %v9011_v33, %s14254_s8  ;;  %v20836_v40 = vrot.slane %v9503_v11, %v15696_v38  ;;  %v24486_v33 = vld [vmem:[#allocation154_spill] sm:$0xff] }
 0x66b   : > { %12841 = vrot.lane.b32.xlu0 %v9146_v8, %s14269_s9  ;;  %v24487_v8 = vld [vmem:[#allocation158_spill] sm:$0xff]  ;;  %v20869_v51 = vrot.slane %v10079_v31, %v15696_v38 }
 0x66c   : > { %v9775_v50 = vcombine.low %v24487_v8, %v24486_v33  ;;  %v9555_v11 = vcombine.low %v20836_v40, %v20833_v19  ;;  %v24494_v33 = vld [vmem:[#allocation287_spill] sm:$0xff]  ;;  %v24495_v8 = vld [vmem:[#allocation286_spill] sm:$0xff] }
 0x66d   : > { %v8042_v56 = vpop.permute.xlu0 %8041  ;;  %v10351_v53 = vcombine.low %v24495_v8, %v24494_v33  ;;  %v24500_v33 = vld [vmem:[#allocation71_spill] sm:$0xff] }
 0x66e   : > { %12907 = vrot.lane.b32.xlu1 %v9283_v55, %s14254_s8  ;;  %v12447_v7 = vcombine.low %v8034_v2, %v8042_v56  ;;  %v12448_v3 = vcombine.high %v8034_v2, %v8042_v56  ;;  %v20861_v56 = vrot.slane %v12415_v10, %v14347_v5  ;;  %v20866_v2 = vrot.slane %v9775_v50, %v15696_v38  ;;  %v20885_v50 = vpop.permute.xlu1 %12711 }
 0x66f   : > { %12845 = vrot.lane.b32.xlu0 %v9418_v57, %s14269_s9  ;;  %24496 = vst [vmem:[#allocation155_spill] sm:$0xff] %v20885_v50 }
 0x670   : > { %v20872_v28 = vrot.slane %v12447_v7, %v14347_v5  ;;  %v20875_v58 = vrot.slane %v12448_v3, %v14347_v5  ;;  %v12479_v31 = vcombine.low %v20861_v56, %v20849_v24  ;;  %v9827_v7 = vcombine.low %v20866_v2, %v20856_v6 }
 0x671   : > { %v8046_v18 = vpop.permute.xlu0 %8045  ;;  %v9962_v3 = vcombine.high %v20670_v22, %v20657_v15 }
 0x672   : > { %v12463_v55 = vcombine.low %v8038_v37, %v8046_v18  ;;  %v12464_v57 = vcombine.high %v8038_v37, %v8046_v18  ;;  %12911 = vrot.lane.b32.xlu1 %v9555_v11, %s14254_s8  ;;  %24492 = vst [vmem:[#allocation127_spill] sm:$0xff] %v20875_v58  ;;  %v20934_v41 = vpop.permute.xlu1 %12715 }
 0x673   : > { %12849 = vrot.lane.b32.xlu0 %v9690_v62, %s14269_s9  ;;  %v20900_v62 = vrot.slane %v10047_v13, %v15696_v38  ;;  %24508 = vst [vmem:[#allocation62_spill] sm:$0xff] %v20934_v41  ;;  %v9012_v41 = vcombine.high %v20805_v61, %v20796_v9  ;;  %v24529_v9 = vld [vmem:[#allocation92_spill] sm:$0xff]  ;;  %v24530_v61 = vld [vmem:[#allocation174_spill] sm:$0xff] }
 0x674   : > { %v20878_v37 = vrot.slane %v12463_v55, %v14347_v5  ;;  %v20881_v35 = vrot.slane %v12464_v57, %v14347_v5  ;;  %v10319_v55 = vcombine.low %v24498_v4, %v24497_v29  ;;  %v24499_v57 = vld [vmem:[#allocation18_spill] sm:$0xff]  ;;  %v10234_v29 = vcombine.high %v20707_v45, %v20693_v14 }
 0x675   : > { %v20889_v10 = vpop.permute.xlu0 %8049  ;;  %v8583_v8 = vcombine.low %v24500_v33, %v24499_v57  ;;  %v10099_v15 = vcombine.low %v20900_v62, %v20869_v51  ;;  %v24504_v4 = vcombine.high %v20786_v54, %v20789_v32  ;;  %v24506_v57 = vld [vmem:[#allocation33_spill] sm:$0xff]  ;;  %v24511_v45 = vld [vmem:[#allocation38_spill] sm:$0xff] }
 0x676   : > { %24493 = vst [vmem:[#allocation87_spill] sm:$0xff] %v20881_v35  ;;  %v12511_v18 = vcombine.low %v20872_v28, %v20878_v37  ;;  %v12528_v11 = vcombine.high %v20875_v58, %v20881_v35  ;;  %12915 = vrot.lane.b32.xlu1 %v9827_v7, %s14254_s8  ;;  %v20921_v7 = vrot.slane %v10351_v53, %v15696_v38  ;;  %v24512_v54 = vld [vmem:[#allocation65_spill] sm:$0xff] }
 0x677   : > { %12853 = vrot.lane.b32.xlu0 %v9962_v3, %s14269_s9  ;;  %v20924_v3 = vrot.slane %v12479_v31, %v15696_v38  ;;  %v20939_v14 = vrot.slane %v10319_v55, %v15696_v38  ;;  %v10506_v55 = vcombine.high %v20738_v43, %v20722_v39  ;;  %v8823_v53 = vcombine.low %v24512_v54, %v24511_v45  ;;  %v24513_v31 = vld [vmem:[#allocation197_spill] sm:$0xff]  ;;  %v20969_v39 = vpop.permute.xlu1 %12719 }
 0x678   : > { %v20911_v22 = vrot.slane %v12511_v18, %v15696_v38  ;;  %v20914_v36 = vrot.slane %v12528_v11, %v15696_v38  ;;  %v20930_v18 = vrot.slane %v24504_v4, %v15696_v38  ;;  %v24507_v11 = vld [vmem:[#allocation61_spill] sm:$0xff]  ;;  %24515 = vst [vmem:[#allocation63_spill] sm:$0xff] %v20969_v39 }
 0x679   : > { %v20916_v13 = vpop.permute.xlu0 %8053  ;;  %24503 = vst [vmem:[#allocation13_spill] sm:$0xff] %v20924_v3  ;;  %v8551_v33 = vcombine.low %v24507_v11, %v24506_v57  ;;  %v24509_v4 = vld [vmem:[#allocation41_spill] sm:$0xff]  ;;  %v24510_v57 = vld [vmem:[#allocation178_spill] sm:$0xff] }
 0x67a   : > { %24501 = vst [vmem:[#allocation184_spill] sm:$0xff] %v20911_v22  ;;  %24502 = vst [vmem:[#allocation66_spill] sm:$0xff] %v20914_v36  ;;  %12919 = vrot.lane.b32.xlu1 %v10099_v15, %s14254_s8  ;;  %v8855_v11 = vcombine.low %v24510_v57, %v24509_v4  ;;  %v10371_v15 = vcombine.low %v20939_v14, %v20921_v7  ;;  %v24514_v36 = vld [vmem:[#allocation168_spill] sm:$0xff] }
 0x67b   : > { %24505 = vst [vmem:[#allocation57_spill] sm:$0xff] %v20930_v18  ;;  %12857 = vrot.lane.b32.xlu0 %v10234_v29, %s14269_s9  ;;  %v20956_v29 = vrot.slane %v8583_v8, %v15696_v38  ;;  %v20963_v4 = vrot.slane %v8551_v33, %v15696_v38  ;;  %v9127_v18 = vcombine.low %v24514_v36, %v24513_v31  ;;  %v24520_v31 = vld [vmem:[#allocation170_spill] sm:$0xff]  ;;  %v21005_v39 = vpop.permute.xlu1 %12723 }
 0x67c   : > { %v8468_v8 = vcombine.high %v20762_v27, %v20755_v48  ;;  %v20976_v45 = vrot.slane %v8855_v11, %v15696_v38  ;;  %v20984_v36 = vrot.slane %v8823_v53, %v15696_v38  ;;  %v24521_v11 = vld [vmem:[#allocation135_spill] sm:$0xff]  ;;  %24524 = vst [vmem:[#allocation96_spill] sm:$0xff] %v21005_v39 }
 0x67d   : > { %v20949_v17 = vpop.permute.xlu0 %8057  ;;  %v8603_v54 = vcombine.low %v20963_v4, %v20956_v29  ;;  %v9399_v58 = vcombine.low %v24521_v11, %v24520_v31  ;;  %v24526_v31 = vld [vmem:[#allocation160_spill] sm:$0xff] }
 0x67e   : > { %12923 = vrot.lane.b32.xlu1 %v10371_v15, %s14254_s8  ;;  %v12552_v57 = vcombine.high %v20889_v10, %v20949_v17  ;;  %v24516_v15 = vld [vmem:[#allocation120_spill] sm:$0xff] }
 0x67f   : > { %12861 = vrot.lane.b32.xlu0 %v10506_v55, %s14269_s9  ;;  %v24517_v55 = vld [vmem:[#allocation47_spill] sm:$0xff] }
 0x680   : > { %v9095_v32 = vcombine.low %v24517_v55, %v24516_v15  ;;  %v20987_v48 = vrot.slane %v12552_v57, %v14347_v5  ;;  %v8740_v15 = vcombine.high %v20781_v52, %v20773_v25  ;;  %v24522_v57 = vld [vmem:[#allocation122_spill] sm:$0xff]  ;;  %v24523_v55 = vld [vmem:[#allocation196_spill] sm:$0xff]  ;;  %v24525_v52 = vld [vmem:[#allocation53_spill] sm:$0xff] }
 0x681   : > { %v8062_v43 = vpop.permute.xlu0 %8061  ;;  %v9671_v11 = vcombine.low %v24526_v31, %v24525_v52  ;;  %v9943_v52 = vcombine.low %v24530_v61, %v24529_v9  ;;  %v21032_v31 = vpop.permute.xlu1 %12727  ;;  %v9556_v9 = vcombine.high %v20836_v40, %v20833_v19  ;;  %v24535_v61 = vld [vmem:[#allocation175_spill] sm:$0xff]  ;;  %v9828_v19 = vcombine.high %v20866_v2, %v20856_v6 }
 0x682   : > { %v12568_v33 = vcombine.high %v20916_v13, %v8062_v43  ;;  %12959 = vrot.lane.b32.xlu1 %v8468_v8, %s14270_s10  ;;  %24518 = vst [vmem:[#allocation25_spill] sm:$0xff] %v20987_v48  ;;  %v8875_v8 = vcombine.low %v20984_v36, %v20976_v45  ;;  %v21010_v25 = vrot.slane %v9095_v32, %v15696_v38  ;;  %24531 = vst [vmem:[#allocation117_spill] sm:$0xff] %v21032_v31  ;;  %v24537_v40 = vld [vmem:[#allocation267_spill] sm:$0xff] }
 0x683   : > { %12897 = vrot.lane.b32.xlu0 %v8603_v54, %s14254_s8  ;;  %v20999_v54 = vrot.slane %v9127_v18, %v15696_v38 }
 0x684   : > { %v20990_v27 = vrot.slane %v12568_v33, %v14347_v5  ;;  %v9367_v33 = vcombine.low %v24523_v55, %v24522_v57  ;;  %v21019_v57 = vrot.slane %v9399_v58, %v15696_v38  ;;  %v24527_v55 = vld [vmem:[#allocation232_spill] sm:$0xff]  ;;  %v12567_v58 = vcombine.low %v20916_v13, %v8062_v43 }
 0x685   : > { %v8066_v35 = vpop.permute.xlu0 %8065  ;;  %v9147_v53 = vcombine.low %v21010_v25, %v20999_v54 }
 0x686   : > { %24519 = vst [vmem:[#allocation91_spill] sm:$0xff] %v20990_v27  ;;  %12963 = vrot.lane.b32.xlu1 %v8740_v15, %s14270_s10  ;;  %v24528_v15 = vld [vmem:[#allocation231_spill] sm:$0xff]  ;;  %v21026_v32 = vrot.slane %v9367_v33, %v15696_v38  ;;  %v24533_v33 = vld [vmem:[#allocation242_spill] sm:$0xff] }
 0x687   : > { %12901 = vrot.lane.b32.xlu0 %v8875_v8, %s14254_s8  ;;  %v9639_v39 = vcombine.low %v24528_v15, %v24527_v55  ;;  %v9284_v8 = vcombine.high %v20821_v63, %v20808_v49  ;;  %v12551_v49 = vcombine.low %v20889_v10, %v20949_v17 }
 0x688   : > { %v9419_v55 = vcombine.low %v21026_v32, %v21019_v57 }
 0x689   : > { %v8070_v18 = vpop.permute.xlu0 %8069  ;;  %v21047_v63 = vrot.slane %v9639_v39, %v15696_v38  ;;  %v21061_v39 = vrot.slane %v9943_v52, %v15696_v38 }
 0x68a   : > { %12967 = vrot.lane.b32.xlu1 %v9012_v41, %s14270_s10  ;;  %v21038_v41 = vrot.slane %v9671_v11, %v15696_v38  ;;  %v24534_v11 = vld [vmem:[#allocation94_spill] sm:$0xff] }
 0x68b   : > { %12905 = vrot.lane.b32.xlu0 %v9147_v53, %s14254_s8  ;;  %v24532_v53 = vld [vmem:[#allocation243_spill] sm:$0xff]  ;;  %v10215_v31 = vcombine.low %v24535_v61, %v24534_v11 }
 0x68c   : > { %v9911_v15 = vcombine.low %v24533_v33, %v24532_v53  ;;  %v21054_v53 = vrot.slane %v12567_v58, %v14347_v5  ;;  %v9691_v10 = vcombine.low %v21047_v63, %v21038_v41  ;;  %v21068_v58 = vrot.slane %v12551_v49, %v14347_v5 }
 0x68d   : > { %v8074_v50 = vpop.permute.xlu0 %8073  ;;  %v10487_v49 = vcombine.low %v20471_v44, %v20477_v12  ;;  %v10455_v44 = vcombine.low %v20392_v42, %v20395_v26 }
 0x68e   : > { %12971 = vrot.lane.b32.xlu1 %v9284_v8, %s14270_s10  ;;  %v12583_v13 = vcombine.low %v8066_v35, %v8074_v50  ;;  %v12584_v43 = vcombine.high %v8066_v35, %v8074_v50  ;;  %v24538_v50 = vld [vmem:[#allocation266_spill] sm:$0xff]  ;;  %v21073_v11 = vrot.slane %v9911_v15, %v15696_v38 }
 0x68f   : > { %12909 = vrot.lane.b32.xlu0 %v9419_v55, %s14254_s8  ;;  %v10183_v55 = vcombine.low %v24538_v50, %v24537_v40  ;;  %v10100_v40 = vcombine.high %v20900_v62, %v20869_v51  ;;  %v10495_v26 = vrot.slane %v10487_v49, %v15696_v38  ;;  %v24546_v50 = vcombine.high %v20987_v48, %v20990_v27  ;;  %v24550_v49 = vld [vmem:[#allocation85_spill] sm:$0xff]  ;;  %v24551_v62 = vld [vmem:[#allocation79_spill] sm:$0xff]  ;;  %v24560_v48 = vld [vmem:[#allocation194_spill] sm:$0xff] }
 0x690   : > { %v21056_v33 = vpop.permute.xlu1 %12731  ;;  %v21076_v52 = vrot.slane %v12583_v13, %v14347_v5  ;;  %v9963_v13 = vcombine.low %v21073_v11, %v21061_v39  ;;  %v24552_v51 = vcombine.low %v24550_v49, %v24551_v62 }
 0x691   : > { %24536 = vst [vmem:[#allocation84_spill] sm:$0xff] %v21056_v33  ;;  %v8078_v17 = vpop.permute.xlu0 %8077  ;;  %v10191_v12 = vrot.slane %v10183_v55, %v15696_v38  ;;  %v21127_v55 = vrot.slane %v24546_v50, %v15696_v38  ;;  %v8604_v50 = vcombine.high %v20963_v4, %v20956_v29 }
 0x692   : > { %v12599_v8 = vcombine.low %v8070_v18, %v8078_v17  ;;  %v12600_v35 = vcombine.high %v8070_v18, %v8078_v17  ;;  %12975 = vrot.lane.b32.xlu1 %v9556_v9, %s14270_s10  ;;  %v21079_v18 = vrot.slane %v12584_v43, %v14347_v5  ;;  %v12615_v9 = vcombine.low %v21068_v58, %v21054_v53 }
 0x693   : > { %12913 = vrot.lane.b32.xlu0 %v9691_v10, %s14254_s8  ;;  %v10223_v43 = vrot.slane %v10215_v31, %v15696_v38  ;;  %24547 = vst [vmem:[#allocation181_spill] sm:$0xff] %v21127_v55 }
 0x694   : > { %24539 = vst [vmem:[#allocation193_spill] sm:$0xff] %v21079_v18  ;;  %v21082_v6 = vrot.slane %v12599_v8, %v14347_v5  ;;  %v21085_v2 = vrot.slane %v12600_v35, %v14347_v5  ;;  %v21091_v15 = vpop.permute.xlu1 %12767 }
 0x695   : > { %v21093_v61 = vpop.permute.xlu0 %12705  ;;  %v10235_v42 = vcombine.low %v10191_v12, %v10223_v43 }
 0x696   : > { %24540 = vst [vmem:[#allocation192_spill] sm:$0xff] %v21085_v2  ;;  %24541 = vst [vmem:[#allocation27_spill] sm:$0xff] %v21093_v61  ;;  %v12647_v17 = vcombine.low %v21076_v52, %v21082_v6  ;;  %v12664_v5 = vcombine.high %v21079_v18, %v21085_v2  ;;  %12979 = vrot.lane.b32.xlu1 %v9828_v19, %s14270_s10  ;;  %v21121_v19 = vrot.slane %v12615_v9, %v15696_v38  ;;  %v24565_v18 = vld [vmem:[#allocation212_spill] sm:$0xff] }
 0x697   : > { %12917 = vrot.lane.b32.xlu0 %v9963_v13, %s14254_s8  ;;  %v10463_v13 = vrot.slane %v10455_v44, %v15696_v38 }
 0x698   : > { %v21108_v10 = vrot.slane %v12647_v17, %v15696_v38  ;;  %v21111_v31 = vrot.slane %v12664_v5, %v15696_v38  ;;  %v21113_v8 = vpop.permute.xlu1 %12771  ;;  %24545 = vst [vmem:[#allocation157_spill] sm:$0xff] %v21121_v19  ;;  %v10372_v5 = vcombine.high %v20939_v14, %v20921_v7 }
 0x699   : > { %v21115_v35 = vpop.permute.xlu0 %12709 }
 0x69a   : > { %24542 = vst [vmem:[#allocation167_spill] sm:$0xff] %v21108_v10  ;;  %24543 = vst [vmem:[#allocation209_spill] sm:$0xff] %v21111_v31  ;;  %12983 = vrot.lane.b32.xlu1 %v10100_v40, %s14270_s10  ;;  %v10507_v40 = vcombine.low %v10463_v13, %v10495_v26  ;;  %v24555_v31 = vld [vmem:[#allocation105_spill] sm:$0xff] }
 0x69b   : > { %24544 = vst [vmem:[#allocation208_spill] sm:$0xff] %v21115_v35  ;;  %12921 = vrot.lane.b32.xlu0 %v10235_v42, %s14254_s8  ;;  %v10508_v35 = vcombine.high %v10463_v13, %v10495_v26  ;;  %v24587_v26 = vld [vmem:[#allocation93_spill] sm:$0xff] }
 0x69c   : > { %v21138_v9 = vpop.permute.xlu1 %12775 }
 0x69d   : > { %v21140_v17 = vpop.permute.xlu0 %12713 }
 0x69e   : > { %24548 = vst [vmem:[#allocation222_spill] sm:$0xff] %v21140_v17  ;;  %12987 = vrot.lane.b32.xlu1 %v10372_v5, %s14270_s10  ;;  %v8876_v5 = vcombine.high %v20984_v36, %v20976_v45 }
 0x69f   : > { %12925 = vrot.lane.b32.xlu0 %v10507_v40, %s14254_s8  ;;  %v24554_v40 = vld [vmem:[#allocation29_spill] sm:$0xff] }
 0x6a0   : > { %v21146_v44 = vpop.permute.xlu1 %12779  ;;  %v24556_v55 = vcombine.low %v24554_v40, %v24555_v31 }
 0x6a1   : > { %v21148_v42 = vpop.permute.xlu0 %12717 }
 0x6a2   : > { %24549 = vst [vmem:[#allocation221_spill] sm:$0xff] %v21148_v42  ;;  %13023 = vrot.lane.b32.xlu1 %v24552_v51, %s14251_s5  ;;  %v9148_v51 = vcombine.high %v21010_v25, %v20999_v54  ;;  %v24578_v42 = vld [vmem:[#allocation262_spill] sm:$0xff] }
 0x6a3   : > { %12961 = vrot.lane.b32.xlu0 %v8604_v50, %s14270_s10  ;;  %v24559_v50 = vld [vmem:[#allocation195_spill] sm:$0xff] }
 0x6a4   : > { %v21157_v7 = vpop.permute.xlu1 %12783  ;;  %v24561_v27 = vcombine.low %v24559_v50, %v24560_v48 }
 0x6a5   : > { %v21159_v14 = vpop.permute.xlu0 %12721 }
 0x6a6   : > { %24553 = vst [vmem:[#allocation154_spill] sm:$0xff] %v21159_v14  ;;  %13027 = vrot.lane.b32.xlu1 %v24556_v55, %s14251_s5  ;;  %v9420_v55 = vcombine.high %v21026_v32, %v21019_v57 }
 0x6a7   : > { %12965 = vrot.lane.b32.xlu0 %v8876_v5, %s14270_s10  ;;  %v24564_v5 = vld [vmem:[#allocation213_spill] sm:$0xff] }
 0x6a8   : > { %v21168_v29 = vpop.permute.xlu1 %12787  ;;  %v24566_v2 = vcombine.low %v24564_v5, %v24565_v18 }
 0x6a9   : > { %24557 = vst [vmem:[#allocation158_spill] sm:$0xff] %v21168_v29  ;;  %v21170_v4 = vpop.permute.xlu0 %12725 }
 0x6aa   : > { %24558 = vst [vmem:[#allocation148_spill] sm:$0xff] %v21170_v4  ;;  %13031 = vrot.lane.b32.xlu1 %v24561_v27, %s14251_s5  ;;  %v9692_v27 = vcombine.high %v21047_v63, %v21038_v41 }
 0x6ab   : > { %12969 = vrot.lane.b32.xlu0 %v9148_v51, %s14270_s10  ;;  %v24569_v51 = vld [vmem:[#allocation230_spill] sm:$0xff] }
 0x6ac   : > { %v21179_v45 = vpop.permute.xlu1 %12791 }
 0x6ad   : > { %24562 = vst [vmem:[#allocation31_spill] sm:$0xff] %v21179_v45  ;;  %v21181_v36 = vpop.permute.xlu0 %12729 }
 0x6ae   : > { %24563 = vst [vmem:[#allocation255_spill] sm:$0xff] %v21181_v36  ;;  %13035 = vrot.lane.b32.xlu1 %v24566_v2, %s14251_s5  ;;  %v24570_v36 = vld [vmem:[#allocation229_spill] sm:$0xff]  ;;  %v9964_v2 = vcombine.high %v21073_v11, %v21061_v39 }
 0x6af   : > { %12973 = vrot.lane.b32.xlu0 %v9420_v55, %s14270_s10  ;;  %v24571_v4 = vcombine.low %v24569_v51, %v24570_v36  ;;  %v24573_v55 = vld [vmem:[#allocation241_spill] sm:$0xff] }
 0x6b0   : > { %v21190_v54 = vpop.permute.xlu1 %12795 }
 0x6b1   : > { %24567 = vst [vmem:[#allocation254_spill] sm:$0xff] %v21190_v54  ;;  %v21192_v25 = vpop.permute.xlu0 %12733 }
 0x6b2   : > { %24568 = vst [vmem:[#allocation287_spill] sm:$0xff] %v21192_v25  ;;  %13039 = vrot.lane.b32.xlu1 %v24571_v4, %s14251_s5  ;;  %v24574_v25 = vld [vmem:[#allocation240_spill] sm:$0xff]  ;;  %v10236_v4 = vcombine.high %v10191_v12, %v10223_v43 }
 0x6b3   : > { %12977 = vrot.lane.b32.xlu0 %v9692_v27, %s14270_s10  ;;  %v24575_v14 = vcombine.low %v24573_v55, %v24574_v25  ;;  %v24577_v27 = vld [vmem:[#allocation263_spill] sm:$0xff] }
 0x6b4   : > { %v21201_v57 = vpop.permute.xlu1 %12831  ;;  %v24579_v17 = vcombine.low %v24577_v27, %v24578_v42 }
 0x6b5   : > { %v21203_v32 = vpop.permute.xlu0 %12769 }
 0x6b6   : > { %24572 = vst [vmem:[#allocation286_spill] sm:$0xff] %v21203_v32  ;;  %13043 = vrot.lane.b32.xlu1 %v24575_v14, %s14251_s5  ;;  %v24581_v14 = vld [vmem:[#allocation295_spill] sm:$0xff] }
 0x6b7   : > { %12981 = vrot.lane.b32.xlu0 %v9964_v2, %s14270_s10  ;;  %v24582_v2 = vld [vmem:[#allocation294_spill] sm:$0xff] }
 0x6b8   : > { %v21212_v41 = vpop.permute.xlu1 %12835  ;;  %v24583_v32 = vcombine.low %v24581_v14, %v24582_v2 }
 0x6b9   : > { %v21214_v63 = vpop.permute.xlu0 %12773 }
 0x6ba   : > { %24576 = vst [vmem:[#allocation279_spill] sm:$0xff] %v21214_v63  ;;  %13047 = vrot.lane.b32.xlu1 %v24579_v17, %s14251_s5  ;;  %v24585_v17 = vcombine.high %v24550_v49, %v24551_v62  ;;  %v24593_v63 = vld [vmem:[#allocation16_spill] sm:$0xff] }
 0x6bb   : > { %12985 = vrot.lane.b32.xlu0 %v10236_v4, %s14270_s10  ;;  %v24586_v4 = vld [vmem:[#allocation21_spill] sm:$0xff] }
 0x6bc   : > { %v21221_v39 = vpop.permute.xlu1 %12839  ;;  %v24588_v13 = vcombine.low %v24586_v4, %v24587_v26 }
 0x6bd   : > { %v21223_v11 = vpop.permute.xlu0 %12777 }
 0x6be   : > { %24580 = vst [vmem:[#allocation278_spill] sm:$0xff] %v21223_v11  ;;  %13051 = vrot.lane.b32.xlu1 %v24583_v32, %s14251_s5 }
 0x6bf   : > { %12989 = vrot.lane.b32.xlu0 %v10508_v35, %s14270_s10  ;;  %v24591_v35 = vcombine.high %v24554_v40, %v24555_v31 }
 0x6c0   : > { %v21230_v43 = vpop.permute.xlu1 %12843 }
 0x6c1   : > { %v21232_v12 = vpop.permute.xlu0 %12781 }
 0x6c2   : > { %24584 = vst [vmem:[#allocation18_spill] sm:$0xff] %v21232_v12  ;;  %13087 = vrot.lane.b32.xlu1 %v24585_v17, %s14271_s17  ;;  %v24592_v12 = vld [vmem:[#allocation40_spill] sm:$0xff]  ;;  %v24597_v17 = vcombine.high %v24559_v50, %v24560_v48 }
 0x6c3   : > { %13025 = vrot.lane.b32.xlu0 %v24588_v13, %s14251_s5  ;;  %v24594_v61 = vcombine.low %v24592_v12, %v24593_v63  ;;  %v24598_v13 = vld [vmem:[#allocation205_spill] sm:$0xff] }
 0x6c4   : > { %v21242_v11 = vpop.permute.xlu1 %12847 }
 0x6c5   : > { %24589 = vst [vmem:[#allocation71_spill] sm:$0xff] %v21242_v11  ;;  %v21244_v32 = vpop.permute.xlu0 %12785 }
 0x6c6   : > { %24590 = vst [vmem:[#allocation33_spill] sm:$0xff] %v21244_v32  ;;  %13091 = vrot.lane.b32.xlu1 %v24591_v35, %s14271_s17  ;;  %v24599_v32 = vld [vmem:[#allocation203_spill] sm:$0xff]  ;;  %v24604_v35 = vld [vmem:[#allocation220_spill] sm:$0xff] }
 0x6c7   : > { %13029 = vrot.lane.b32.xlu0 %v24594_v61, %s14251_s5  ;;  %v24600_v54 = vcombine.low %v24598_v13, %v24599_v32  ;;  %v24603_v61 = vcombine.high %v24564_v5, %v24565_v18 }
 0x6c8   : > { %v21254_v62 = vpop.permute.xlu1 %12851 }
 0x6c9   : > { %24595 = vst [vmem:[#allocation61_spill] sm:$0xff] %v21254_v62  ;;  %v21256_v49 = vpop.permute.xlu0 %12789 }
 0x6ca   : > { %24596 = vst [vmem:[#allocation41_spill] sm:$0xff] %v21256_v49  ;;  %13095 = vrot.lane.b32.xlu1 %v24597_v17, %s14271_s17  ;;  %v24605_v49 = vld [vmem:[#allocation218_spill] sm:$0xff]  ;;  %v24610_v17 = vld [vmem:[#allocation235_spill] sm:$0xff] }
 0x6cb   : > { %13033 = vrot.lane.b32.xlu0 %v24600_v54, %s14251_s5  ;;  %v24606_v33 = vcombine.low %v24604_v35, %v24605_v49  ;;  %v24609_v54 = vcombine.high %v24569_v51, %v24570_v36 }
 0x6cc   : > { %v21266_v31 = vpop.permute.xlu1 %12855 }
 0x6cd   : > { %24601 = vst [vmem:[#allocation178_spill] sm:$0xff] %v21266_v31  ;;  %v21268_v40 = vpop.permute.xlu0 %12793 }
 0x6ce   : > { %24602 = vst [vmem:[#allocation38_spill] sm:$0xff] %v21268_v40  ;;  %13099 = vrot.lane.b32.xlu1 %v24603_v61, %s14271_s17  ;;  %v24611_v40 = vld [vmem:[#allocation233_spill] sm:$0xff]  ;;  %v24615_v61 = vld [vmem:[#allocation251_spill] sm:$0xff] }
 0x6cf   : > { %13037 = vrot.lane.b32.xlu0 %v24606_v33, %s14251_s5  ;;  %v24612_v31 = vcombine.low %v24610_v17, %v24611_v40  ;;  %v24614_v33 = vcombine.high %v24573_v55, %v24574_v25 }
 0x6d0   : > { %v21278_v48 = vpop.permute.xlu1 %12859 }
 0x6d1   : > { %24607 = vst [vmem:[#allocation65_spill] sm:$0xff] %v21278_v48  ;;  %v21280_v50 = vpop.permute.xlu0 %12797 }
 0x6d2   : > { %24608 = vst [vmem:[#allocation197_spill] sm:$0xff] %v21280_v50  ;;  %13103 = vrot.lane.b32.xlu1 %v24609_v54, %s14271_s17  ;;  %v24616_v50 = vld [vmem:[#allocation249_spill] sm:$0xff]  ;;  %v24620_v54 = vld [vmem:[#allocation275_spill] sm:$0xff] }
 0x6d3   : > { %13041 = vrot.lane.b32.xlu0 %v24612_v31, %s14251_s5  ;;  %v24617_v48 = vcombine.low %v24615_v61, %v24616_v50  ;;  %v24619_v31 = vcombine.high %v24577_v27, %v24578_v42 }
 0x6d4   : > { %v21290_v18 = vpop.permute.xlu1 %12895 }
 0x6d5   : > { %v21292_v5 = vpop.permute.xlu0 %12833 }
 0x6d6   : > { %24613 = vst [vmem:[#allocation168_spill] sm:$0xff] %v21292_v5  ;;  %13107 = vrot.lane.b32.xlu1 %v24614_v33, %s14271_s17  ;;  %v24621_v5 = vld [vmem:[#allocation273_spill] sm:$0xff]  ;;  %v24625_v33 = vcombine.low %v20542_v1, %v20523_v23 }
 0x6d7   : > { %13045 = vrot.lane.b32.xlu0 %v24617_v48, %s14251_s5  ;;  %v24622_v45 = vcombine.low %v24620_v54, %v24621_v5  ;;  %v24624_v48 = vcombine.high %v24581_v14, %v24582_v2 }
 0x6d8   : > { %v21302_v36 = vpop.permute.xlu1 %12899 }
 0x6d9   : > { %v21304_v51 = vpop.permute.xlu0 %12837 }
 0x6da   : > { %24618 = vst [vmem:[#allocation120_spill] sm:$0xff] %v21304_v51  ;;  %13111 = vrot.lane.b32.xlu1 %v24619_v31, %s14271_s17  ;;  %v24627_v31 = vld [vmem:[#allocation134_spill] sm:$0xff] }
 0x6db   : > { %13049 = vrot.lane.b32.xlu0 %v24622_v45, %s14251_s5  ;;  %v24628_v45 = vld [vmem:[#allocation113_spill] sm:$0xff] }
 0x6dc   : > { %v21314_v25 = vpop.permute.xlu1 %12903  ;;  %v10640_v51 = vcombine.high %v24628_v45, %v24627_v31  ;;  %v24634_v31 = vcombine.high %v24592_v12, %v24593_v63  ;;  %v24642_v63 = vld [vmem:[#allocation146_spill] sm:$0xff]  ;;  %v24643_v12 = vld [vmem:[#allocation188_spill] sm:$0xff] }
 0x6dd   : > { %v21316_v55 = vpop.permute.xlu0 %12841 }
 0x6de   : > { %24623 = vst [vmem:[#allocation47_spill] sm:$0xff] %v21316_v55  ;;  %13115 = vrot.lane.b32.xlu1 %v24624_v48, %s14271_s17  ;;  %v24629_v55 = vcombine.high %v24586_v4, %v24587_v26  ;;  %v24632_v48 = vld [vmem:[#allocation198_spill] sm:$0xff]  ;;  %v24638_v26 = vld [vmem:[#allocation215_spill] sm:$0xff] }
 0x6df   : > { %13053 = vrot.lane.b32.xlu0 %v24625_v33, %s14251_s5  ;;  %v24633_v33 = vld [vmem:[#allocation200_spill] sm:$0xff]  ;;  %v24637_v4 = vld [vmem:[#allocation30_spill] sm:$0xff] }
 0x6e0   : > { %v21326_v42 = vpop.permute.xlu1 %12907  ;;  %v10912_v62 = vcombine.high %v24633_v33, %v24632_v48  ;;  %v24639_v48 = vcombine.high %v24598_v13, %v24599_v32  ;;  %v24647_v32 = vld [vmem:[#allocation244_spill] sm:$0xff]  ;;  %v24648_v13 = vld [vmem:[#allocation246_spill] sm:$0xff] }
 0x6e1   : > { %v21328_v27 = vpop.permute.xlu0 %12845 }
 0x6e2   : > { %24626 = vst [vmem:[#allocation170_spill] sm:$0xff] %v21328_v27  ;;  %13151 = vrot.lane.b32.xlu1 %v10640_v51, %s14268_s7 }
 0x6e3   : > { %13089 = vrot.lane.b32.xlu0 %v24629_v55, %s14271_s17  ;;  %v11184_v55 = vcombine.high %v24638_v26, %v24637_v4  ;;  %v24644_v4 = vcombine.high %v24604_v35, %v24605_v49  ;;  %v24651_v49 = vld [vmem:[#allocation268_spill] sm:$0xff]  ;;  %v24652_v35 = vld [vmem:[#allocation270_spill] sm:$0xff] }
 0x6e4   : > { %v21337_v14 = vpop.permute.xlu1 %12911 }
 0x6e5   : > { %24630 = vst [vmem:[#allocation135_spill] sm:$0xff] %v21337_v14  ;;  %v21339_v2 = vpop.permute.xlu0 %12849 }
 0x6e6   : > { %24631 = vst [vmem:[#allocation122_spill] sm:$0xff] %v21339_v2  ;;  %13155 = vrot.lane.b32.xlu1 %v10912_v62, %s14268_s7 }
 0x6e7   : > { %13093 = vrot.lane.b32.xlu0 %v24634_v31, %s14271_s17  ;;  %v11456_v31 = vcombine.high %v24643_v12, %v24642_v63  ;;  %v24649_v63 = vcombine.high %v24610_v17, %v24611_v40  ;;  %v12272_v17 = vcombine.high %v20503_v16, %v20487_v21  ;;  %v12544_v21 = vcombine.high %v20924_v3, %v20911_v22 }
 0x6e8   : > { %v21348_v51 = vpop.permute.xlu1 %12915 }
 0x6e9   : > { %24635 = vst [vmem:[#allocation196_spill] sm:$0xff] %v21348_v51  ;;  %v21350_v45 = vpop.permute.xlu0 %12853 }
 0x6ea   : > { %24636 = vst [vmem:[#allocation53_spill] sm:$0xff] %v21350_v45  ;;  %13159 = vrot.lane.b32.xlu1 %v11184_v55, %s14268_s7  ;;  %v24658_v45 = vld [vmem:[#allocation164_spill] sm:$0xff] }
 0x6eb   : > { %13097 = vrot.lane.b32.xlu0 %v24639_v48, %s14271_s17  ;;  %v11728_v48 = vcombine.high %v24648_v13, %v24647_v32  ;;  %v24653_v32 = vcombine.high %v24615_v61, %v24616_v50  ;;  %v24655_v13 = vld [vmem:[#allocation108_spill] sm:$0xff]  ;;  %v24659_v50 = vcombine.high %v24620_v54, %v24621_v5  ;;  %v24660_v61 = vld [vmem:[#allocation82_spill] sm:$0xff]  ;;  %v24665_v5 = vcombine.high %v20542_v1, %v20523_v23  ;;  %v24671_v1 = vld [vmem:[#allocation59_spill] sm:$0xff] }
 0x6ec   : > { %v21359_v62 = vpop.permute.xlu1 %12919  ;;  %v24672_v23 = vld [vmem:[#allocation133_spill] sm:$0xff] }
 0x6ed   : > { %24640 = vst [vmem:[#allocation160_spill] sm:$0xff] %v21359_v62  ;;  %v21361_v33 = vpop.permute.xlu0 %12857 }
 0x6ee   : > { %24641 = vst [vmem:[#allocation232_spill] sm:$0xff] %v21361_v33  ;;  %13163 = vrot.lane.b32.xlu1 %v11456_v31, %s14268_s7 }
 0x6ef   : > { %13101 = vrot.lane.b32.xlu0 %v24644_v4, %s14271_s17  ;;  %v12000_v4 = vcombine.high %v24652_v35, %v24651_v49 }
 0x6f0   : > { %v21370_v55 = vpop.permute.xlu1 %12923 }
 0x6f1   : > { %24645 = vst [vmem:[#allocation231_spill] sm:$0xff] %v21370_v55  ;;  %v21372_v26 = vpop.permute.xlu0 %12861 }
 0x6f2   : > { %24646 = vst [vmem:[#allocation92_spill] sm:$0xff] %v21372_v26  ;;  %13167 = vrot.lane.b32.xlu1 %v11728_v48, %s14268_s7  ;;  %v24654_v48 = vld [vmem:[#allocation110_spill] sm:$0xff] }
 0x6f3   : > { %13105 = vrot.lane.b32.xlu0 %v24649_v63, %s14271_s17  ;;  %v10608_v26 = vcombine.high %v24655_v13, %v24654_v48  ;;  %v24657_v63 = vld [vmem:[#allocation129_spill] sm:$0xff] }
 0x6f4   : > { %v21381_v31 = vpop.permute.xlu1 %12959  ;;  %v10576_v49 = vcombine.high %v24658_v45, %v24657_v63  ;;  %v24663_v45 = vld [vmem:[#allocation118_spill] sm:$0xff] }
 0x6f5   : > { %v21383_v12 = vpop.permute.xlu0 %12897  ;;  %v21416_v16 = vrot.slane %v10608_v26, %v15696_v38 }
 0x6f6   : > { %24650 = vst [vmem:[#allocation174_spill] sm:$0xff] %v21383_v12  ;;  %13171 = vrot.lane.b32.xlu1 %v12000_v4, %s14268_s7  ;;  %v21426_v54 = vrot.slane %v10576_v49, %v15696_v38  ;;  %v11120_v49 = vcombine.high %v24672_v23, %v24671_v1  ;;  %v24680_v23 = vld [vmem:[#allocation75_spill] sm:$0xff] }
 0x6f7   : > { %13109 = vrot.lane.b32.xlu0 %v24653_v32, %s14271_s17  ;;  %v24661_v32 = vld [vmem:[#allocation189_spill] sm:$0xff] }
 0x6f8   : > { %v21394_v33 = vpop.permute.xlu1 %12963  ;;  %v10880_v13 = vcombine.high %v24661_v32, %v24660_v61  ;;  %v24667_v61 = vld [vmem:[#allocation182_spill] sm:$0xff] }
 0x6f9   : > { %v21396_v40 = vpop.permute.xlu0 %12901 }
 0x6fa   : > { %24656 = vst [vmem:[#allocation243_spill] sm:$0xff] %v21396_v40  ;;  %13175 = vrot.lane.b32.xlu1 %v12272_v17, %s14268_s7  ;;  %v24664_v17 = vld [vmem:[#allocation180_spill] sm:$0xff]  ;;  %v21439_v3 = vrot.slane %v10880_v13, %v15696_v38 }
 0x6fb   : > { %13113 = vrot.lane.b32.xlu0 %v24659_v50, %s14271_s17  ;;  %v10848_v63 = vcombine.high %v24664_v17, %v24663_v45  ;;  %v24666_v50 = vld [vmem:[#allocation58_spill] sm:$0xff]  ;;  %v10641_v45 = vcombine.low %v21426_v54, %v21416_v16  ;;  %v24669_v17 = vld [vmem:[#allocation43_spill] sm:$0xff] }
 0x6fc   : > { %v21409_v4 = vpop.permute.xlu1 %12967  ;;  %v11152_v32 = vcombine.high %v24667_v61, %v24666_v50  ;;  %v24673_v50 = vld [vmem:[#allocation143_spill] sm:$0xff]  ;;  %v24674_v61 = vld [vmem:[#allocation149_spill] sm:$0xff] }
 0x6fd   : > { %v21411_v48 = vpop.permute.xlu0 %12905  ;;  %v11424_v2 = vcombine.high %v24674_v61, %v24673_v50  ;;  %v21466_v50 = vrot.slane %v11120_v49, %v15696_v38  ;;  %v24681_v61 = vld [vmem:[#allocation97_spill] sm:$0xff] }
 0x6fe   : > { %24662 = vst [vmem:[#allocation242_spill] sm:$0xff] %v21411_v48  ;;  %13179 = vrot.lane.b32.xlu1 %v12544_v21, %s14268_s7  ;;  %v24670_v21 = vld [vmem:[#allocation107_spill] sm:$0xff] }
 0x6ff   : > { %13117 = vrot.lane.b32.xlu0 %v24665_v5, %s14271_s17  ;;  %v10776_v22 = vcombine.high %v24670_v21, %v24669_v17  ;;  %v21446_v5 = vrot.slane %v10848_v63, %v15696_v38  ;;  %v24677_v17 = vld [vmem:[#allocation119_spill] sm:$0xff]  ;;  %v24678_v21 = vld [vmem:[#allocation10_spill] sm:$0xff] }
 0x700   : > { %v21430_v35 = vpop.permute.xlu1 %12971  ;;  %v11048_v1 = vcombine.high %v24678_v21, %v24677_v17  ;;  %v24685_v17 = vld [vmem:[#allocation8_spill] sm:$0xff] }
 0x701   : > { %v21432_v26 = vpop.permute.xlu0 %12909  ;;  %v10913_v13 = vcombine.low %v21446_v5, %v21439_v3  ;;  %v24686_v21 = vld [vmem:[#allocation224_spill] sm:$0xff] }
 0x702   : > { %24668 = vst [vmem:[#allocation94_spill] sm:$0xff] %v21432_v26  ;;  %13215 = vrot.lane.b32.xlu1 %v10641_v45, %s14257_s11  ;;  %v21459_v45 = vrot.slane %v11152_v32, %v15696_v38 }
 0x703   : > { %13153 = vrot.lane.b32.xlu0 %v10776_v22, %s14268_s7  ;;  %v24679_v22 = vld [vmem:[#allocation152_spill] sm:$0xff] }
 0x704   : > { %v21450_v26 = vpop.permute.xlu1 %12975  ;;  %v11392_v63 = vcombine.high %v24680_v23, %v24679_v22  ;;  %v11185_v32 = vcombine.low %v21466_v50, %v21459_v45  ;;  %v11320_v22 = vcombine.high %v24686_v21, %v24685_v17  ;;  %v24688_v23 = vld [vmem:[#allocation162_spill] sm:$0xff]  ;;  %v24694_v21 = vld [vmem:[#allocation237_spill] sm:$0xff] }
 0x705   : > { %24675 = vst [vmem:[#allocation175_spill] sm:$0xff] %v21450_v26  ;;  %v21452_v27 = vpop.permute.xlu0 %12913  ;;  %v24693_v17 = vld [vmem:[#allocation190_spill] sm:$0xff] }
 0x706   : > { %24676 = vst [vmem:[#allocation267_spill] sm:$0xff] %v21452_v27  ;;  %13219 = vrot.lane.b32.xlu1 %v10913_v13, %s14257_s11  ;;  %v24682_v27 = vld [vmem:[#allocation42_spill] sm:$0xff]  ;;  %v21479_v13 = vrot.slane %v11424_v2, %v15696_v38 }
 0x707   : > { %13157 = vrot.lane.b32.xlu0 %v11048_v1, %s14268_s7  ;;  %v11696_v48 = vcombine.high %v24682_v27, %v24681_v61  ;;  %v24687_v1 = vld [vmem:[#allocation35_spill] sm:$0xff]  ;;  %v21486_v27 = vrot.slane %v11392_v63, %v15696_v38 }
 0x708   : > { %v21470_v40 = vpop.permute.xlu1 %12979  ;;  %v11664_v49 = vcombine.high %v24688_v23, %v24687_v1  ;;  %v24689_v61 = vld [vmem:[#allocation99_spill] sm:$0xff]  ;;  %v11592_v1 = vcombine.high %v24694_v21, %v24693_v17  ;;  %v24701_v17 = vld [vmem:[#allocation256_spill] sm:$0xff] }
 0x709   : > { %24683 = vst [vmem:[#allocation266_spill] sm:$0xff] %v21470_v40  ;;  %v21472_v12 = vpop.permute.xlu0 %12917  ;;  %v11457_v2 = vcombine.low %v21486_v27, %v21479_v13  ;;  %v24696_v23 = vld [vmem:[#allocation163_spill] sm:$0xff] }
 0x70a   : > { %24684 = vst [vmem:[#allocation85_spill] sm:$0xff] %v21472_v12  ;;  %13223 = vrot.lane.b32.xlu1 %v11185_v32, %s14257_s11  ;;  %v24690_v12 = vld [vmem:[#allocation11_spill] sm:$0xff]  ;;  %v21499_v32 = vrot.slane %v11696_v48, %v15696_v38 }
 0x70b   : > { %13161 = vrot.lane.b32.xlu0 %v11320_v22, %s14268_s7  ;;  %v11968_v55 = vcombine.high %v24690_v12, %v24689_v61  ;;  %v24695_v22 = vld [vmem:[#allocation32_spill] sm:$0xff]  ;;  %v21506_v12 = vrot.slane %v11664_v49, %v15696_v38  ;;  %v24697_v61 = vld [vmem:[#allocation210_spill] sm:$0xff]  ;;  %v24702_v21 = vld [vmem:[#allocation259_spill] sm:$0xff] }
 0x70c   : > { %v21490_v62 = vpop.permute.xlu1 %12983  ;;  %v11936_v63 = vcombine.high %v24696_v23, %v24695_v22  ;;  %v11864_v22 = vcombine.high %v24702_v21, %v24701_v17  ;;  %v24704_v23 = vld [vmem:[#allocation68_spill] sm:$0xff]  ;;  %v24707_v21 = vld [vmem:[#allocation290_spill] sm:$0xff] }
 0x70d   : > { %24691 = vst [vmem:[#allocation79_spill] sm:$0xff] %v21490_v62  ;;  %v21492_v40 = vpop.permute.xlu0 %12921  ;;  %v11729_v48 = vcombine.low %v21506_v12, %v21499_v32  ;;  %v24706_v17 = vld [vmem:[#allocation288_spill] sm:$0xff] }
 0x70e   : > { %24692 = vst [vmem:[#allocation29_spill] sm:$0xff] %v21492_v40  ;;  %13227 = vrot.lane.b32.xlu1 %v11457_v2, %s14257_s11  ;;  %v24698_v40 = vld [vmem:[#allocation24_spill] sm:$0xff]  ;;  %v21519_v2 = vrot.slane %v11968_v55, %v15696_v38 }
 0x70f   : > { %13165 = vrot.lane.b32.xlu0 %v11592_v1, %s14268_s7  ;;  %v12240_v62 = vcombine.high %v24698_v40, %v24697_v61  ;;  %v24703_v1 = vld [vmem:[#allocation73_spill] sm:$0xff]  ;;  %v21526_v40 = vrot.slane %v11936_v63, %v15696_v38  ;;  %v12512_v61 = vcombine.high %v20872_v28, %v20878_v37  ;;  %v12480_v63 = vcombine.high %v20861_v56, %v20849_v24  ;;  %v24708_v37 = vld [vmem:[#allocation20_spill] sm:$0xff] }
 0x710   : > { %v21510_v51 = vpop.permute.xlu1 %12987  ;;  %v12208_v49 = vcombine.high %v24704_v23, %v24703_v1  ;;  %v12136_v1 = vcombine.high %v24707_v21, %v24706_v17  ;;  %v12408_v24 = vcombine.high %v20725_v0, %v20712_v60  ;;  %v24714_v17 = vld [vmem:[#allocation126_spill] sm:$0xff]  ;;  %v24719_v60 = vld [vmem:[#allocation9_spill] sm:$0xff] }
 0x711   : > { %24699 = vst [vmem:[#allocation105_spill] sm:$0xff] %v21510_v51  ;;  %v21512_v29 = vpop.permute.xlu0 %12925  ;;  %v12001_v55 = vcombine.low %v21526_v40, %v21519_v2  ;;  %v21559_v56 = vrot.slane %v12512_v61, %v15696_v38 }
 0x712   : > { %24700 = vst [vmem:[#allocation195_spill] sm:$0xff] %v21512_v29  ;;  %13231 = vrot.lane.b32.xlu1 %v11729_v48, %s14257_s11  ;;  %v21539_v48 = vrot.slane %v12240_v62, %v15696_v38  ;;  %v21546_v28 = vrot.slane %v12208_v49, %v15696_v38 }
 0x713   : > { %13169 = vrot.lane.b32.xlu0 %v11864_v22, %s14268_s7  ;;  %v24709_v22 = vld [vmem:[#allocation100_spill] sm:$0xff] }
 0x714   : > { %v21530_v29 = vpop.permute.xlu1 %13023  ;;  %v10744_v23 = vcombine.high %v24709_v22, %v24708_v37  ;;  %v12273_v62 = vcombine.low %v21546_v28, %v21539_v48  ;;  %v21566_v37 = vrot.slane %v12480_v63, %v15696_v38  ;;  %v24713_v22 = vld [vmem:[#allocation45_spill] sm:$0xff] }
 0x715   : > { %v21532_v51 = vpop.permute.xlu0 %12961  ;;  %v11016_v21 = vcombine.high %v24714_v17, %v24713_v22  ;;  %v24718_v22 = vld [vmem:[#allocation169_spill] sm:$0xff] }
 0x716   : > { %24705 = vst [vmem:[#allocation194_spill] sm:$0xff] %v21532_v51  ;;  %13235 = vrot.lane.b32.xlu1 %v12001_v55, %s14257_s11  ;;  %v24711_v55 = vld [vmem:[#allocation116_spill] sm:$0xff]  ;;  %v12545_v61 = vcombine.low %v21566_v37, %v21559_v56  ;;  %v11288_v0 = vcombine.high %v24719_v60, %v24718_v22  ;;  %v24723_v22 = vld [vmem:[#allocation183_spill] sm:$0xff] }
 0x717   : > { %13173 = vrot.lane.b32.xlu0 %v12136_v1, %s14268_s7  ;;  %v24712_v1 = vld [vmem:[#allocation112_spill] sm:$0xff] }
 0x718   : > { %v21550_v51 = vpop.permute.xlu1 %13027  ;;  %v10712_v49 = vcombine.high %v24712_v1, %v24711_v55  ;;  %v12680_v55 = vcombine.high %v21121_v19, %v21108_v10  ;;  %v24717_v1 = vld [vmem:[#allocation121_spill] sm:$0xff]  ;;  %v24724_v10 = vld [vmem:[#allocation171_spill] sm:$0xff] }
 0x719   : > { %v21552_v26 = vpop.permute.xlu0 %12965  ;;  %v11560_v19 = vcombine.high %v24724_v10, %v24723_v22  ;;  %v24728_v22 = vld [vmem:[#allocation173_spill] sm:$0xff] }
 0x71a   : > { %24710 = vst [vmem:[#allocation213_spill] sm:$0xff] %v21552_v26  ;;  %13239 = vrot.lane.b32.xlu1 %v12273_v62, %s14257_s11  ;;  %v21579_v62 = vrot.slane %v10744_v23, %v15696_v38  ;;  %v21586_v17 = vrot.slane %v10712_v49, %v15696_v38  ;;  %v10642_v23 = vcombine.high %v21426_v54, %v21416_v16 }
 0x71b   : > { %13177 = vrot.lane.b32.xlu0 %v12408_v24, %s14268_s7  ;;  %v24716_v24 = vld [vmem:[#allocation125_spill] sm:$0xff] }
 0x71c   : > { %v21570_v26 = vpop.permute.xlu1 %13031  ;;  %v10984_v63 = vcombine.high %v24717_v1, %v24716_v24  ;;  %v10777_v24 = vcombine.low %v21586_v17, %v21579_v62  ;;  %v24722_v1 = vld [vmem:[#allocation67_spill] sm:$0xff] }
 0x71d   : > { %v21572_v14 = vpop.permute.xlu0 %12969 }
 0x71e   : > { %24715 = vst [vmem:[#allocation212_spill] sm:$0xff] %v21572_v14  ;;  %13243 = vrot.lane.b32.xlu1 %v12545_v61, %s14257_s11  ;;  %v21599_v61 = vrot.slane %v11016_v21, %v15696_v38  ;;  %v21606_v60 = vrot.slane %v10984_v63, %v15696_v38  ;;  %v10914_v21 = vcombine.high %v21446_v5, %v21439_v3 }
 0x71f   : > { %13181 = vrot.lane.b32.xlu0 %v12680_v55, %s14268_s7  ;;  %v24721_v55 = vld [vmem:[#allocation141_spill] sm:$0xff] }
 0x720   : > { %v21590_v14 = vpop.permute.xlu1 %13035  ;;  %v11256_v49 = vcombine.high %v24722_v1, %v24721_v55  ;;  %v11049_v55 = vcombine.low %v21606_v60, %v21599_v61  ;;  %v24727_v1 = vld [vmem:[#allocation187_spill] sm:$0xff] }
 0x721   : > { %v21592_v11 = vpop.permute.xlu0 %12973 }
 0x722   : > { %24720 = vst [vmem:[#allocation230_spill] sm:$0xff] %v21592_v11  ;;  %13279 = vrot.lane.b32.xlu1 %v10642_v23, %s14269_s9  ;;  %v21619_v23 = vrot.slane %v11288_v0, %v15696_v38  ;;  %v21626_v10 = vrot.slane %v11256_v49, %v15696_v38  ;;  %v11186_v0 = vcombine.high %v21466_v50, %v21459_v45  ;;  %v24733_v49 = vld [vmem:[#allocation161_spill] sm:$0xff] }
 0x723   : > { %13217 = vrot.lane.b32.xlu0 %v10777_v24, %s14257_s11  ;;  %v24726_v24 = vld [vmem:[#allocation60_spill] sm:$0xff] }
 0x724   : > { %v21610_v16 = vpop.permute.xlu1 %13039  ;;  %v11528_v63 = vcombine.high %v24727_v1, %v24726_v24  ;;  %v11321_v24 = vcombine.low %v21626_v10, %v21619_v23 }
 0x725   : > { %v21612_v54 = vpop.permute.xlu0 %12977 }
 0x726   : > { %24725 = vst [vmem:[#allocation229_spill] sm:$0xff] %v21612_v54  ;;  %13283 = vrot.lane.b32.xlu1 %v10914_v21, %s14269_s9  ;;  %v24729_v54 = vld [vmem:[#allocation12_spill] sm:$0xff]  ;;  %v21639_v21 = vrot.slane %v11560_v19, %v15696_v38  ;;  %v11458_v19 = vcombine.high %v21486_v27, %v21479_v13  ;;  %v24739_v13 = vld [vmem:[#allocation17_spill] sm:$0xff]  ;;  %v24740_v27 = vld [vmem:[#allocation15_spill] sm:$0xff] }
 0x727   : > { %13221 = vrot.lane.b32.xlu0 %v11049_v55, %s14257_s11  ;;  %v11832_v11 = vcombine.high %v24729_v54, %v24728_v22  ;;  %v24732_v55 = vld [vmem:[#allocation39_spill] sm:$0xff]  ;;  %v21646_v54 = vrot.slane %v11528_v63, %v15696_v38  ;;  %v24734_v22 = vld [vmem:[#allocation284_spill] sm:$0xff] }
 0x728   : > { %v21630_v3 = vpop.permute.xlu1 %13043  ;;  %v11800_v1 = vcombine.high %v24733_v49, %v24732_v55  ;;  %v24738_v49 = vld [vmem:[#allocation281_spill] sm:$0xff] }
 0x729   : > { %24730 = vst [vmem:[#allocation241_spill] sm:$0xff] %v21630_v3  ;;  %v21632_v5 = vpop.permute.xlu0 %12981  ;;  %v11593_v55 = vcombine.low %v21646_v54, %v21639_v21 }
 0x72a   : > { %24731 = vst [vmem:[#allocation240_spill] sm:$0xff] %v21632_v5  ;;  %13287 = vrot.lane.b32.xlu1 %v11186_v0, %s14269_s9  ;;  %v24735_v5 = vld [vmem:[#allocation282_spill] sm:$0xff]  ;;  %v21659_v0 = vrot.slane %v11832_v11, %v15696_v38 }
 0x72b   : > { %13225 = vrot.lane.b32.xlu0 %v11321_v24, %s14257_s11  ;;  %v12104_v3 = vcombine.high %v24735_v5, %v24734_v22  ;;  %v24737_v24 = vld [vmem:[#allocation280_spill] sm:$0xff]  ;;  %v21667_v5 = vrot.slane %v11800_v1, %v15696_v38  ;;  %v24741_v22 = vcombine.low %v24739_v13, %v24740_v27 }
 0x72c   : > { %v21650_v45 = vpop.permute.xlu1 %13047  ;;  %v12072_v63 = vcombine.high %v24738_v49, %v24737_v24 }
 0x72d   : > { %v21652_v50 = vpop.permute.xlu0 %12985  ;;  %v13583_v11 = vsel %vm2004_vm15, %v24741_v22, %v20812_v47  ;;  %v21677_v24 = vrot.slane %v12104_v3, %v15696_v38  ;;  %v11865_v47 = vcombine.low %v21667_v5, %v21659_v0  ;;  %v24743_v3 = vld [vmem:[#allocation98_spill] sm:$0xff] }
 0x72e   : > { %24736 = vst [vmem:[#allocation263_spill] sm:$0xff] %v21652_v50  ;;  %13291 = vrot.lane.b32.xlu1 %v11458_v19, %s14269_s9  ;;  %v11730_v50 = vcombine.high %v21506_v12, %v21499_v32  ;;  %v12376_v19 = vcombine.high %v20673_v34, %v20679_v59  ;;  %v21694_v12 = vrot.slane %v12072_v63, %v15696_v38 }
 0x72f   : > { %13229 = vrot.lane.b32.xlu0 %v11593_v55, %s14257_s11  ;;  %v13600_v55 = vsel %vm632_vm10, %v13583_v11, %v21091_v15  ;;  %v12344_v34 = vcombine.high %v20662_v20, %v20652_v30  ;;  %v24742_v15 = vld [vmem:[#allocation102_spill] sm:$0xff]  ;;  %v12002_v30 = vcombine.high %v21526_v40, %v21519_v2 }
 0x730   : > { %v21683_v1 = vpop.permute.xlu1 %13051  ;;  %v13617_v32 = vsel %vm13616_vm0, %v13600_v55, %v21201_v57  ;;  %v24744_v13 = vcombine.low %v24742_v15, %v24743_v3  ;;  %v12137_v20 = vcombine.low %v21694_v12, %v21677_v24 }
 0x731   : > { %v21685_v49 = vpop.permute.xlu0 %12989  ;;  %v13634_v59 = vsel %vm499_vm7, %v13617_v32, %v21290_v18  ;;  %v12648_v18 = vcombine.high %v21076_v52, %v21082_v6  ;;  %v12616_v52 = vcombine.high %v21068_v58, %v21054_v53  ;;  %v24748_v53 = vld [vmem:[#allocation132_spill] sm:$0xff]  ;;  %v24749_v58 = vld [vmem:[#allocation37_spill] sm:$0xff]  ;;  %v12274_v32 = vcombine.high %v21546_v28, %v21539_v48 }
 0x732   : > { %13295 = vrot.lane.b32.xlu1 %v11730_v50, %s14269_s9  ;;  %v13585_v57 = vsel %vm2004_vm15, %v24744_v13, %v20842_v46  ;;  %v13651_v63 = vsel %vm13650_vm5, %v13634_v59, %v21381_v31  ;;  %v21722_v31 = vrot.slane %v12376_v19, %v15696_v38  ;;  %v24747_v19 = vld [vmem:[#allocation155_spill] sm:$0xff]  ;;  %v24750_v55 = vcombine.low %v24748_v53, %v24749_v58 }
 0x733   : > { %13233 = vrot.lane.b32.xlu0 %v11865_v47, %s14257_s11  ;;  %v13602_v50 = vsel %vm632_vm10, %v13585_v57, %v21113_v8  ;;  %v13668_v27 = vsel %vm365_vm4, %v13651_v63, %v21530_v29  ;;  %v21737_v8 = vrot.slane %v12344_v34, %v15696_v38  ;;  %v24745_v29 = vld [vmem:[#allocation106_spill] sm:$0xff]  ;;  %v21759_v57 = vrot.slane %v12648_v18, %v15696_v38  ;;  %v24751_v63 = vld [vmem:[#allocation176_spill] sm:$0xff] }
 0x734   : > { %v13088_v22 = vpop.permute.xlu1 %13087  ;;  %v13619_v2 = vsel %vm13616_vm0, %v13602_v50, %v21212_v41  ;;  %v24746_v41 = vld [vmem:[#allocation34_spill] sm:$0xff]  ;;  %v21772_v28 = vrot.slane %v12616_v52, %v15696_v38  ;;  %v12546_v53 = vcombine.high %v21566_v37, %v21559_v56  ;;  %v24762_v37 = vld [vmem:[#allocation104_spill] sm:$0xff] }
 0x735   : > { %v21719_v46 = vpop.permute.xlu0 %13025  ;;  %v13685_v40 = vsel %vm13684_vm6, %v13668_v27, %v13088_v22  ;;  %v13636_v6 = vsel %vm499_vm7, %v13619_v2, %v21302_v36  ;;  %v10623_v11 = vcombine.low %v24746_v41, %v24745_v29  ;;  %v13587_v36 = vsel %vm2004_vm15, %v24750_v55, %v24747_v19  ;;  %v24754_v18 = vld [vmem:[#allocation138_spill] sm:$0xff]  ;;  %v24756_v22 = vld [vmem:[#allocation101_spill] sm:$0xff] }
 0x736   : > { %13813 = vst [vmem:[%s21731_s24] sm:$0xff] %v13685_v40  ;;  %13299 = vrot.lane.b32.xlu1 %v12002_v30, %s14269_s9  ;;  %v13653_v47 = vsel %vm13650_vm5, %v13636_v6, %v21394_v33  ;;  %v13604_v59 = vsel %vm632_vm10, %v13587_v36, %v21138_v9  ;;  %v12409_v13 = vcombine.low %v21737_v8, %v21722_v31  ;;  %v24752_v33 = vld [vmem:[#allocation26_spill] sm:$0xff]  ;;  %v24760_v36 = vld [vmem:[#allocation115_spill] sm:$0xff] }
 0x737   : > { %13237 = vrot.lane.b32.xlu0 %v12137_v20, %s14257_s11  ;;  %v13670_v34 = vsel %vm365_vm4, %v13653_v47, %v21550_v51  ;;  %v10591_v30 = vcombine.low %v24752_v33, %v24751_v63  ;;  %v13621_v48 = vsel %vm13616_vm0, %v13604_v59, %v21221_v39  ;;  %v24753_v20 = vld [vmem:[#allocation6_spill] sm:$0xff]  ;;  %v24757_v39 = vld [vmem:[#allocation48_spill] sm:$0xff]  ;;  %v21784_v6 = vrot.slane %v10623_v11, %v15696_v38  ;;  %v24764_v59 = vld [vmem:[#allocation223_spill] sm:$0xff] }
 0x738   : > { %v13092_v15 = vpop.permute.xlu1 %13091  ;;  %v13638_v51 = vsel %vm499_vm7, %v13621_v48, %v21314_v25  ;;  %v10895_v50 = vcombine.low %v24754_v18, %v24753_v20  ;;  %v24755_v27 = vld [vmem:[#allocation62_spill] sm:$0xff]  ;;  %v24758_v2 = vcombine.low %v24756_v22, %v24757_v39  ;;  %v12681_v58 = vcombine.low %v21772_v28, %v21759_v57  ;;  %v24767_v18 = vld [vmem:[#allocation124_spill] sm:$0xff]  ;;  %v24769_v22 = vld [vmem:[#allocation71_spill] sm:$0xff] }
 0x739   : > { %v21754_v3 = vpop.permute.xlu0 %13029  ;;  %v13687_v9 = vsel %vm13684_vm6, %v13670_v34, %v13092_v15  ;;  %v13655_v25 = vsel %vm13650_vm5, %v13638_v51, %v21409_v4  ;;  %v21800_v55 = vrot.slane %v10591_v30, %v15696_v38  ;;  %v24761_v56 = vld [vmem:[#allocation142_spill] sm:$0xff]  ;;  %v10778_v51 = vcombine.high %v21586_v17, %v21579_v62 }
 0x73a   : > { %13817 = vst [vmem:[%s21731_s24 + $0x20] sm:$0xff] %v13687_v9  ;;  %13303 = vrot.lane.b32.xlu1 %v12274_v32, %s14269_s9  ;;  %v13589_v40 = vsel %vm2004_vm15, %v24758_v2, %v24755_v27  ;;  %v13672_v29 = vsel %vm365_vm4, %v13655_v25, %v21570_v26  ;;  %v24763_v32 = vld [vmem:[#allocation63_spill] sm:$0xff]  ;;  %v24765_v34 = vld [vmem:[#allocation226_spill] sm:$0xff]  ;;  %v21829_v20 = vrot.slane %v10895_v50, %v15696_v38  ;;  %v24773_v25 = vld [vmem:[#allocation96_spill] sm:$0xff] }
 0x73b   : > { %13241 = vrot.lane.b32.xlu0 %v12409_v13, %s14257_s11  ;;  %v13606_v52 = vsel %vm632_vm10, %v13589_v40, %v21146_v44  ;;  %v24759_v44 = vld [vmem:[#allocation50_spill] sm:$0xff]  ;;  %v24766_v15 = vcombine.low %v24764_v59, %v24765_v34  ;;  %v24770_v2 = vld [vmem:[#allocation135_spill] sm:$0xff]  ;;  %v24779_v59 = vld [vmem:[#allocation137_spill] sm:$0xff] }
 0x73c   : > { %v13096_v41 = vpop.permute.xlu1 %13095  ;;  %v13623_v4 = vsel %vm13616_vm0, %v13606_v52, %v21230_v43  ;;  %v10863_v26 = vcombine.low %v24760_v36, %v24759_v44  ;;  %v11167_v43 = vcombine.low %v24762_v37, %v24761_v56  ;;  %v24771_v17 = vld [vmem:[#allocation130_spill] sm:$0xff]  ;;  %v24772_v50 = vld [vmem:[#allocation151_spill] sm:$0xff]  ;;  %v24774_v52 = vld [vmem:[#allocation236_spill] sm:$0xff] }
 0x73d   : > { %v21790_v19 = vpop.permute.xlu0 %13033  ;;  %v13689_v11 = vsel %vm13684_vm6, %v13672_v29, %v13096_v41  ;;  %v13640_v47 = vsel %vm499_vm7, %v13623_v4, %v21326_v42  ;;  %v13591_v13 = vsel %vm2004_vm15, %v24766_v15, %v24763_v32  ;;  %v10643_v42 = vcombine.low %v21800_v55, %v21784_v6  ;;  %v24775_v29 = vld [vmem:[#allocation239_spill] sm:$0xff]  ;;  %v24778_v44 = vld [vmem:[#allocation158_spill] sm:$0xff]  ;;  %v24780_v34 = vld [vmem:[#allocation145_spill] sm:$0xff] }
 0x73e   : > { %13821 = vst [vmem:[%s21731_s24 + $0x40] sm:$0xff] %v13689_v11  ;;  %13307 = vrot.lane.b32.xlu1 %v12546_v53, %s14269_s9  ;;  %v13657_v63 = vsel %vm13650_vm5, %v13640_v47, %v21430_v35  ;;  %v13608_v33 = vsel %vm632_vm10, %v13591_v13, %v21157_v7  ;;  %v24768_v35 = vld [vmem:[#allocation128_spill] sm:$0xff]  ;;  %v21842_v62 = vrot.slane %v10863_v26, %v15696_v38 }
 0x73f   : > { %13245 = vrot.lane.b32.xlu0 %v12681_v58, %s14257_s11  ;;  %v13674_v30 = vsel %vm365_vm4, %v13657_v63, %v21590_v14  ;;  %v11135_v27 = vcombine.low %v24768_v35, %v24767_v18  ;;  %v13625_v39 = vsel %vm13616_vm0, %v13608_v33, %v24769_v22  ;;  %v11439_v40 = vcombine.low %v24772_v50, %v24771_v17  ;;  %v24777_v58 = vld [vmem:[#allocation175_spill] sm:$0xff]  ;;  %v24787_v18 = vld [vmem:[#allocation266_spill] sm:$0xff]  ;;  %v24791_v50 = vld [vmem:[#allocation241_spill] sm:$0xff] }
 0x740   : > { %v13100_v48 = vpop.permute.xlu1 %13099  ;;  %v13642_v14 = vsel %vm499_vm7, %v13625_v39, %v24770_v2  ;;  %v24776_v41 = vcombine.low %v24774_v52, %v24775_v29  ;;  %v21854_v11 = vrot.slane %v11167_v43, %v15696_v38  ;;  %v10915_v37 = vcombine.low %v21842_v62, %v21829_v20  ;;  %v24781_v43 = vld [vmem:[#allocation61_spill] sm:$0xff] }
 0x741   : > { %v21824_v9 = vpop.permute.xlu0 %13037  ;;  %v13691_v7 = vsel %vm13684_vm6, %v13674_v30, %v13100_v48  ;;  %v13659_v4 = vsel %vm13650_vm5, %v13642_v14, %v24777_v58  ;;  %v11050_v32 = vcombine.high %v21606_v60, %v21599_v61  ;;  %v11407_v15 = vcombine.low %v24780_v34, %v24779_v59  ;;  %v24783_v61 = vld [vmem:[#allocation117_spill] sm:$0xff]  ;;  %v24784_v60 = vld [vmem:[#allocation258_spill] sm:$0xff]  ;;  %v24790_v14 = vld [vmem:[#allocation31_spill] sm:$0xff] }
 0x742   : > { %13825 = vst [vmem:[%s21731_s24 + $0x60] sm:$0xff] %v13691_v7  ;;  %13343 = vrot.lane.b32.xlu1 %v10643_v42, %s14254_s8  ;;  %v13593_v53 = vsel %vm2004_vm15, %v24776_v41, %v24773_v25  ;;  %v13676_v26 = vsel %vm365_vm4, %v13659_v4, %v21610_v16  ;;  %v21872_v42 = vrot.slane %v11135_v27, %v15696_v38  ;;  %v24782_v16 = vld [vmem:[#allocation196_spill] sm:$0xff]  ;;  %v24785_v30 = vld [vmem:[#allocation261_spill] sm:$0xff]  ;;  %v24789_v7 = vld [vmem:[#allocation150_spill] sm:$0xff] }
 0x743   : > { %13281 = vrot.lane.b32.xlu0 %v10778_v51, %s14269_s9  ;;  %v13610_v36 = vsel %vm632_vm10, %v13593_v53, %v24778_v44  ;;  %v24786_v48 = vcombine.low %v24784_v60, %v24785_v30  ;;  %v21889_v22 = vrot.slane %v11439_v40, %v15696_v38  ;;  %v24788_v39 = vld [vmem:[#allocation49_spill] sm:$0xff]  ;;  %v11322_v41 = vcombine.high %v21626_v10, %v21619_v23  ;;  %v24792_v53 = vld [vmem:[#allocation178_spill] sm:$0xff]  ;;  %v24793_v44 = vld [vmem:[#allocation147_spill] sm:$0xff] }
 0x744   : > { %v13104_v47 = vpop.permute.xlu1 %13103  ;;  %v13627_v13 = vsel %vm13616_vm0, %v13610_v36, %v24781_v43  ;;  %v11187_v27 = vcombine.low %v21872_v42, %v21854_v11  ;;  %v11711_v2 = vcombine.low %v24789_v7, %v24788_v39  ;;  %v21905_v4 = vrot.slane %v11407_v15, %v15696_v38  ;;  %v24794_v36 = vld [vmem:[#allocation72_spill] sm:$0xff]  ;;  %v24797_v10 = vld [vmem:[#allocation153_spill] sm:$0xff] }
 0x745   : > { %v21860_v56 = vpop.permute.xlu0 %13041  ;;  %v13693_v63 = vsel %vm13684_vm6, %v13676_v26, %v13104_v47  ;;  %v13644_v33 = vsel %vm499_vm7, %v13627_v13, %v24782_v16  ;;  %v13595_v51 = vsel %vm2004_vm15, %v24786_v48, %v24783_v61  ;;  %v11679_v26 = vcombine.low %v24794_v36, %v24793_v44  ;;  %v24795_v47 = vld [vmem:[#allocation160_spill] sm:$0xff]  ;;  %v24800_v43 = vld [vmem:[#allocation293_spill] sm:$0xff]  ;;  %v24803_v61 = vld [vmem:[#allocation254_spill] sm:$0xff] }
 0x746   : > { %13829 = vst [vmem:[%s21731_s24 + $0x80] sm:$0xff] %v13693_v63  ;;  %13347 = vrot.lane.b32.xlu1 %v10915_v37, %s14254_s8  ;;  %v13661_v35 = vsel %vm13650_vm5, %v13644_v33, %v24787_v18  ;;  %v13612_v17 = vsel %vm632_vm10, %v13595_v51, %v24790_v14  ;;  %v24796_v23 = vld [vmem:[#allocation44_spill] sm:$0xff]  ;;  %v24802_v63 = vld [vmem:[#allocation79_spill] sm:$0xff]  ;;  %v11459_v33 = vcombine.low %v21905_v4, %v21889_v22  ;;  %v24806_v14 = vld [vmem:[#allocation65_spill] sm:$0xff] }
 0x747   : > { %13285 = vrot.lane.b32.xlu0 %v11050_v32, %s14269_s9  ;;  %v13678_v25 = vsel %vm365_vm4, %v13661_v35, %v24791_v50  ;;  %v13629_v58 = vsel %vm13616_vm0, %v13612_v17, %v24792_v53  ;;  %v11983_v32 = vcombine.low %v24797_v10, %v24796_v23  ;;  %v24798_v59 = vld [vmem:[#allocation84_spill] sm:$0xff]  ;;  %v11594_v18 = vcombine.high %v21646_v54, %v21639_v21  ;;  %v24808_v54 = vld [vmem:[#allocation211_spill] sm:$0xff]  ;;  %v24811_v53 = vld [vmem:[#allocation46_spill] sm:$0xff] }
 0x748   : > { %v13108_v52 = vpop.permute.xlu1 %13107  ;;  %v13646_v37 = vsel %vm499_vm7, %v13629_v58, %v24795_v47  ;;  %v24799_v34 = vld [vmem:[#allocation292_spill] sm:$0xff]  ;;  %v21934_v35 = vrot.slane %v11711_v2, %v15696_v38  ;;  %v21947_v21 = vrot.slane %v11679_v26, %v15696_v38  ;;  %v24809_v2 = vld [vmem:[#allocation103_spill] sm:$0xff]  ;;  %v24814_v36 = vld [vmem:[#allocation105_spill] sm:$0xff] }
 0x749   : > { %v21897_v29 = vpop.permute.xlu0 %13045  ;;  %v13695_v40 = vsel %vm13684_vm6, %v13678_v25, %v13108_v52  ;;  %v24801_v15 = vcombine.low %v24799_v34, %v24800_v43  ;;  %v13663_v16 = vsel %vm13650_vm5, %v13646_v37, %v24802_v63  ;;  %v24805_v39 = vld [vmem:[#allocation264_spill] sm:$0xff]  ;;  %v24807_v25 = vld [vmem:[#allocation231_spill] sm:$0xff]  ;;  %v12255_v52 = vcombine.low %v24809_v2, %v24808_v54  ;;  %v24815_v23 = vld [vmem:[#allocation286_spill] sm:$0xff] }
 0x74a   : > { %13833 = vst [vmem:[%s21731_s24 + $0xa0] sm:$0xff] %v13695_v40  ;;  %13351 = vrot.lane.b32.xlu1 %v11187_v27, %s14254_s8  ;;  %v13680_v30 = vsel %vm365_vm4, %v13663_v16, %v21650_v45  ;;  %v24804_v27 = vld [vmem:[#allocation265_spill] sm:$0xff]  ;;  %v24812_v58 = vld [vmem:[#allocation19_spill] sm:$0xff]  ;;  %v21959_v37 = vrot.slane %v11983_v32, %v15696_v38  ;;  %v11731_v43 = vcombine.low %v21947_v21, %v21934_v35  ;;  %v24818_v32 = vld [vmem:[#allocation168_spill] sm:$0xff] }
 0x74b   : > { %13289 = vrot.lane.b32.xlu0 %v11322_v41, %s14269_s9  ;;  %v13597_v13 = vsel %vm2004_vm15, %v24801_v15, %v24798_v59  ;;  %v11951_v7 = vcombine.low %v24805_v39, %v24804_v27  ;;  %v24810_v41 = vld [vmem:[#allocation27_spill] sm:$0xff]  ;;  %v24813_v40 = vcombine.low %v24811_v53, %v24812_v58  ;;  %v11866_v15 = vcombine.high %v21667_v5, %v21659_v0  ;;  %v24817_v63 = vld [vmem:[#allocation81_spill] sm:$0xff]  ;;  %v24820_v0 = vld [vmem:[#allocation208_spill] sm:$0xff] }
 0x74c   : > { %v13614_v60 = vsel %vm632_vm10, %v13597_v13, %v24803_v61  ;;  %v13112_v48 = vpop.permute.xlu1 %13111  ;;  %v24816_v13 = vld [vmem:[#allocation76_spill] sm:$0xff]  ;;  %v24821_v5 = vld [vmem:[#allocation114_spill] sm:$0xff]  ;;  %v24827_v54 = vld [vmem:[#allocation279_spill] sm:$0xff] }
 0x74d   : > { %v21929_v51 = vpop.permute.xlu0 %13049  ;;  %v13631_v17 = vsel %vm13616_vm0, %v13614_v60, %v24806_v14  ;;  %v13697_v50 = vsel %vm13684_vm6, %v13680_v30, %v13112_v48  ;;  %v13584_v44 = vsel %vm2004_vm15, %v24813_v40, %v24810_v41  ;;  %v12223_v16 = vcombine.low %v24817_v63, %v24816_v13  ;;  %v24822_v48 = vld [vmem:[#allocation166_spill] sm:$0xff]  ;;  %v24835_v13 = vld [vmem:[#allocation204_spill] sm:$0xff] }
 0x74e   : > { %v13648_v45 = vsel %vm499_vm7, %v13631_v17, %v24807_v25  ;;  %13837 = vst [vmem:[%s21731_s24 + $0xc0] sm:$0xff] %v13697_v50  ;;  %13355 = vrot.lane.b32.xlu1 %v11459_v33, %s14254_s8  ;;  %v13601_v26 = vsel %vm632_vm10, %v13584_v44, %v24815_v23  ;;  %v21977_v60 = vrot.slane %v11951_v7, %v15696_v38  ;;  %v24824_v39 = vld [vmem:[#allocation194_spill] sm:$0xff]  ;;  %v24825_v50 = vld [vmem:[#allocation87_spill] sm:$0xff]  ;;  %v24828_v44 = vld [vmem:[#allocation120_spill] sm:$0xff] }
 0x74f   : > { %13293 = vrot.lane.b32.xlu0 %v11594_v18, %s14269_s9  ;;  %v13665_v47 = vsel %vm13650_vm5, %v13648_v45, %v24814_v36  ;;  %v13618_v33 = vsel %vm13616_vm0, %v13601_v26, %v24818_v32  ;;  %v24823_v18 = vcombine.low %v24821_v5, %v24822_v48  ;;  %v21994_v17 = vrot.slane %v12255_v52, %v15696_v38  ;;  %v24826_v25 = vld [vmem:[#allocation127_spill] sm:$0xff]  ;;  %v24829_v23 = vld [vmem:[#allocation186_spill] sm:$0xff]  ;;  %v24830_v26 = vld [vmem:[#allocation64_spill] sm:$0xff] }
 0x750   : > { %v13682_v10 = vsel %vm365_vm4, %v13665_v47, %v21683_v1  ;;  %v13116_v59 = vpop.permute.xlu1 %13115  ;;  %v24819_v1 = vld [vmem:[#allocation174_spill] sm:$0xff]  ;;  %v12003_v7 = vcombine.low %v21977_v60, %v21959_v37  ;;  %v12527_v45 = vcombine.low %v24826_v25, %v24825_v50  ;;  %v12138_v40 = vcombine.high %v21694_v12, %v21677_v24  ;;  %v24832_v24 = vld [vmem:[#allocation177_spill] sm:$0xff]  ;;  %v24842_v25 = vld [vmem:[#allocation47_spill] sm:$0xff] }
 0x751   : > { %v21965_v34 = vpop.permute.xlu0 %13053  ;;  %v13699_v61 = vsel %vm13684_vm6, %v13682_v10, %v13116_v59  ;;  %v13635_v30 = vsel %vm499_vm7, %v13618_v33, %v24819_v1  ;;  %v13586_v27 = vsel %vm2004_vm15, %v24823_v18, %v24820_v0  ;;  %v22010_v47 = vrot.slane %v12223_v16, %v15696_v38  ;;  %v24831_v59 = vld [vmem:[#allocation243_spill] sm:$0xff]  ;;  %v24833_v12 = vld [vmem:[#allocation165_spill] sm:$0xff]  ;;  %v24836_v63 = vld [vmem:[#allocation202_spill] sm:$0xff] }
 0x752   : > { %13841 = vst [vmem:[%s21731_s24 + $0xe0] sm:$0xff] %v13699_v61  ;;  %13359 = vrot.lane.b32.xlu1 %v11731_v43, %s14254_s8  ;;  %v13652_v14 = vsel %vm13650_vm5, %v13635_v30, %v24824_v39  ;;  %v13603_v2 = vsel %vm632_vm10, %v13586_v27, %v24827_v54  ;;  %v12495_v10 = vcombine.low %v24830_v26, %v24829_v23  ;;  %v24838_v33 = vld [vmem:[#allocation213_spill] sm:$0xff]  ;;  %v24839_v30 = vld [vmem:[#allocation278_spill] sm:$0xff]  ;;  %v24850_v26 = vld [vmem:[#allocation212_spill] sm:$0xff] }
 0x753   : > { %13297 = vrot.lane.b32.xlu0 %v11866_v15, %s14269_s9  ;;  %v13669_v41 = vsel %vm365_vm4, %v13652_v14, %v21719_v46  ;;  %v13620_v36 = vsel %vm13616_vm0, %v13603_v2, %v24828_v44  ;;  %v10759_v43 = vcombine.low %v24833_v12, %v24832_v24  ;;  %v24834_v15 = vld [vmem:[#allocation222_spill] sm:$0xff]  ;;  %v24837_v16 = vcombine.low %v24835_v13, %v24836_v63  ;;  %v24840_v14 = vld [vmem:[#allocation191_spill] sm:$0xff] }
 0x754   : > { %v22002_v53 = vpop.permute.xlu1 %13151  ;;  %v13637_v46 = vsel %vm499_vm7, %v13620_v36, %v24831_v59  ;;  %v12275_v1 = vcombine.low %v22010_v47, %v21994_v17  ;;  %v12410_v27 = vcombine.high %v21737_v8, %v21722_v31  ;;  %v22039_v39 = vrot.slane %v12527_v45, %v15696_v38  ;;  %v24844_v8 = vld [vmem:[#allocation28_spill] sm:$0xff]  ;;  %v24847_v44 = vld [vmem:[#allocation219_spill] sm:$0xff]  ;;  %v24848_v36 = vld [vmem:[#allocation217_spill] sm:$0xff] }
 0x755   : > { %v13090_v58 = vpop.permute.xlu0 %13089  ;;  %v13588_v32 = vsel %vm2004_vm15, %v24837_v16, %v24834_v15  ;;  %v13654_v61 = vsel %vm13650_vm5, %v13637_v46, %v24838_v33  ;;  %v22052_v31 = vrot.slane %v12495_v10, %v15696_v38  ;;  %v24845_v45 = vld [vmem:[#allocation56_spill] sm:$0xff]  ;;  %v22064_v46 = vrot.slane %v10759_v43, %v15696_v38  ;;  %v24851_v24 = vld [vmem:[#allocation18_spill] sm:$0xff] }
 0x756   : > { %v13686_v52 = vsel %vm13684_vm6, %v13669_v41, %v13090_v58  ;;  %13363 = vrot.lane.b32.xlu1 %v12003_v7, %s14254_s8  ;;  %v13605_v0 = vsel %vm632_vm10, %v13588_v32, %v24839_v30  ;;  %v13671_v5 = vsel %vm365_vm4, %v13654_v61, %v21754_v3  ;;  %v24841_v7 = vld [vmem:[#allocation95_spill] sm:$0xff]  ;;  %v24843_v41 = vld [vmem:[#allocation242_spill] sm:$0xff]  ;;  %v11031_v58 = vcombine.low %v24845_v45, %v24844_v8  ;;  %v24863_v8 = vld [vmem:[#allocation33_spill] sm:$0xff] }
 0x757   : > { %13815 = vst [vmem:[%s21731_s24 + $0x10] sm:$0xff] %v13686_v52  ;;  %13301 = vrot.lane.b32.xlu0 %v12138_v40, %s14269_s9  ;;  %v10727_v50 = vcombine.low %v24841_v7, %v24840_v14  ;;  %v13622_v54 = vsel %vm13616_vm0, %v13605_v0, %v24842_v25  ;;  %v24846_v40 = vld [vmem:[#allocation221_spill] sm:$0xff]  ;;  %v24849_v52 = vcombine.low %v24847_v44, %v24848_v36  ;;  %v24852_v32 = vld [vmem:[#allocation170_spill] sm:$0xff] }
 0x758   : > { %v22034_v48 = vpop.permute.xlu1 %13155  ;;  %v13639_v3 = vsel %vm499_vm7, %v13622_v54, %v24843_v41  ;;  %v12547_v63 = vcombine.low %v22052_v31, %v22039_v39  ;;  %v12682_v16 = vcombine.high %v21772_v28, %v21759_v57  ;;  %v24854_v30 = vld [vmem:[#allocation206_spill] sm:$0xff]  ;;  %v10644_v25 = vcombine.high %v21800_v55, %v21784_v6  ;;  %v24862_v41 = vld [vmem:[#allocation185_spill] sm:$0xff] }
 0x759   : > { %v13094_v18 = vpop.permute.xlu0 %13093  ;;  %v13590_v23 = vsel %vm2004_vm15, %v24849_v52, %v24846_v40  ;;  %v13656_v59 = vsel %vm13650_vm5, %v13639_v3, %v24850_v26  ;;  %v22080_v61 = vrot.slane %v10727_v50, %v15696_v38  ;;  %v24855_v0 = vld [vmem:[#allocation94_spill] sm:$0xff]  ;;  %v22109_v52 = vrot.slane %v11031_v58, %v15696_v38  ;;  %v24865_v26 = vld [vmem:[#allocation131_spill] sm:$0xff] }
 0x75a   : > { %v13688_v2 = vsel %vm13684_vm6, %v13671_v5, %v13094_v18  ;;  %13367 = vrot.lane.b32.xlu1 %v12275_v1, %s14254_s8  ;;  %v13607_v10 = vsel %vm632_vm10, %v13590_v23, %v24851_v24  ;;  %v13673_v12 = vsel %vm365_vm4, %v13656_v59, %v21790_v19  ;;  %v24853_v1 = vld [vmem:[#allocation207_spill] sm:$0xff]  ;;  %v24856_v57 = vld [vmem:[#allocation154_spill] sm:$0xff]  ;;  %v24858_v18 = vld [vmem:[#allocation89_spill] sm:$0xff] }
 0x75b   : > { %13819 = vst [vmem:[%s21731_s24 + $0x30] sm:$0xff] %v13688_v2  ;;  %13305 = vrot.lane.b32.xlu0 %v12410_v27, %s14269_s9  ;;  %v13624_v33 = vsel %vm13616_vm0, %v13607_v10, %v24852_v32  ;;  %v10999_v19 = vcombine.low %v24854_v30, %v24853_v1  ;;  %v24857_v28 = vld [vmem:[#allocation234_spill] sm:$0xff]  ;;  %v10779_v54 = vcombine.low %v22080_v61, %v22064_v46  ;;  %v24861_v2 = vld [vmem:[#allocation83_spill] sm:$0xff]  ;;  %v24874_v30 = vld [vmem:[#allocation229_spill] sm:$0xff] }
 0x75c   : > { %v22070_v15 = vpop.permute.xlu1 %13159  ;;  %v13641_v5 = vsel %vm499_vm7, %v13624_v33, %v24855_v0  ;;  %v24859_v27 = vcombine.low %v24857_v28, %v24858_v18  ;;  %v24860_v7 = vld [vmem:[#allocation230_spill] sm:$0xff]  ;;  %v11303_v3 = vcombine.low %v24862_v41, %v24861_v2  ;;  %v24866_v59 = vld [vmem:[#allocation139_spill] sm:$0xff]  ;;  %v24872_v33 = vld [vmem:[#allocation248_spill] sm:$0xff] }
 0x75d   : > { %v13098_v13 = vpop.permute.xlu0 %13097  ;;  %v13658_v50 = vsel %vm13650_vm5, %v13641_v5, %v24860_v7  ;;  %v24864_v23 = vld [vmem:[#allocation122_spill] sm:$0xff]  ;;  %v11271_v24 = vcombine.low %v24866_v59, %v24865_v26  ;;  %v24867_v10 = vld [vmem:[#allocation267_spill] sm:$0xff]  ;;  %v10916_v5 = vcombine.high %v21842_v62, %v21829_v20  ;;  %v24878_v2 = vld [vmem:[#allocation53_spill] sm:$0xff]  ;;  %v11188_v26 = vcombine.high %v21872_v42, %v21854_v11 }
 0x75e   : > { %v13690_v43 = vsel %vm13684_vm6, %v13673_v12, %v13098_v13  ;;  %13371 = vrot.lane.b32.xlu1 %v12547_v63, %s14254_s8  ;;  %v13592_v14 = vsel %vm2004_vm15, %v24859_v27, %v24856_v57  ;;  %v13675_v40 = vsel %vm365_vm4, %v13658_v50, %v21824_v9  ;;  %v22122_v9 = vrot.slane %v10999_v19, %v15696_v38  ;;  %v24868_v58 = vld [vmem:[#allocation159_spill] sm:$0xff]  ;;  %v24869_v13 = vld [vmem:[#allocation86_spill] sm:$0xff]  ;;  %v24875_v57 = vld [vmem:[#allocation41_spill] sm:$0xff] }
 0x75f   : > { %13823 = vst [vmem:[%s21731_s24 + $0x50] sm:$0xff] %v13690_v43  ;;  %13309 = vrot.lane.b32.xlu0 %v12682_v16, %s14269_s9  ;;  %v13609_v45 = vsel %vm632_vm10, %v13592_v14, %v24863_v8  ;;  %v11575_v63 = vcombine.low %v24869_v13, %v24868_v58  ;;  %v24870_v16 = vld [vmem:[#allocation148_spill] sm:$0xff]  ;;  %v24871_v32 = vld [vmem:[#allocation250_spill] sm:$0xff]  ;;  %v22144_v7 = vrot.slane %v11303_v3, %v15696_v38  ;;  %v24879_v41 = vld [vmem:[#allocation85_spill] sm:$0xff] }
 0x760   : > { %v22106_v44 = vpop.permute.xlu1 %13163  ;;  %v13626_v6 = vsel %vm13616_vm0, %v13609_v45, %v24864_v23  ;;  %v24873_v43 = vcombine.low %v24871_v32, %v24872_v33  ;;  %v11051_v14 = vcombine.low %v22122_v9, %v22109_v52  ;;  %v24876_v50 = vld [vmem:[#allocation80_spill] sm:$0xff]  ;;  %v22157_v8 = vrot.slane %v11271_v24, %v15696_v38  ;;  %v24880_v3 = vld [vmem:[#allocation255_spill] sm:$0xff]  ;;  %v24881_v45 = vld [vmem:[#allocation274_spill] sm:$0xff] }
 0x761   : > { %v13102_v36 = vpop.permute.xlu0 %13101  ;;  %v13643_v12 = vsel %vm499_vm7, %v13626_v6, %v24867_v10  ;;  %v24884_v6 = vld [vmem:[#allocation240_spill] sm:$0xff]  ;;  %v22169_v59 = vrot.slane %v11575_v63, %v15696_v38  ;;  %v24885_v10 = vld [vmem:[#allocation90_spill] sm:$0xff] }
 0x762   : > { %v13692_v55 = vsel %vm13684_vm6, %v13675_v40, %v13102_v36  ;;  %13407 = vrot.lane.b32.xlu1 %v10644_v25, %s14270_s10  ;;  %v13594_v1 = vsel %vm2004_vm15, %v24873_v43, %v24870_v16  ;;  %v13660_v0 = vsel %vm13650_vm5, %v13643_v12, %v24874_v30  ;;  %v24877_v25 = vld [vmem:[#allocation156_spill] sm:$0xff]  ;;  %v24886_v12 = vld [vmem:[#allocation54_spill] sm:$0xff]  ;;  %v11323_v43 = vcombine.low %v22157_v8, %v22144_v7  ;;  %v24889_v30 = vld [vmem:[#allocation253_spill] sm:$0xff] }
 0x763   : > { %13827 = vst [vmem:[%s21731_s24 + $0x70] sm:$0xff] %v13692_v55  ;;  %13345 = vrot.lane.b32.xlu0 %v10779_v54, %s14254_s8  ;;  %v13611_v28 = vsel %vm632_vm10, %v13594_v1, %v24875_v57  ;;  %v13677_v19 = vsel %vm365_vm4, %v13660_v0, %v21860_v56  ;;  %v11543_v54 = vcombine.low %v24877_v25, %v24876_v50  ;;  %v24882_v40 = vld [vmem:[#allocation272_spill] sm:$0xff]  ;;  %v24887_v58 = vld [vmem:[#allocation38_spill] sm:$0xff]  ;;  %v24891_v57 = vld [vmem:[#allocation29_spill] sm:$0xff] }
 0x764   : > { %v22139_v18 = vpop.permute.xlu1 %13167  ;;  %v13628_v20 = vsel %vm13616_vm0, %v13611_v28, %v24878_v2  ;;  %v24883_v36 = vcombine.low %v24881_v45, %v24882_v40  ;;  %v11847_v24 = vcombine.low %v24886_v12, %v24885_v10  ;;  %v24888_v1 = vld [vmem:[#allocation232_spill] sm:$0xff]  ;;  %v24892_v28 = vld [vmem:[#allocation287_spill] sm:$0xff]  ;;  %v11460_v2 = vcombine.high %v21905_v4, %v21889_v22 }
 0x765   : > { %v13106_v27 = vpop.permute.xlu0 %13105  ;;  %v13645_v56 = vsel %vm499_vm7, %v13628_v20, %v24879_v41  ;;  %v22185_v63 = vrot.slane %v11543_v54, %v15696_v38  ;;  %v24890_v0 = vld [vmem:[#allocation252_spill] sm:$0xff]  ;;  %v24896_v25 = vld [vmem:[#allocation263_spill] sm:$0xff] }
 0x766   : > { %v13694_v62 = vsel %vm13684_vm6, %v13677_v19, %v13106_v27  ;;  %13411 = vrot.lane.b32.xlu1 %v10916_v5, %s14270_s10  ;;  %v13596_v23 = vsel %vm2004_vm15, %v24883_v36, %v24880_v3  ;;  %v13662_v55 = vsel %vm13650_vm5, %v13645_v56, %v24884_v6  ;;  %v11815_v5 = vcombine.low %v24890_v0, %v24889_v30  ;;  %v24893_v19 = vld [vmem:[#allocation78_spill] sm:$0xff]  ;;  %v24894_v27 = vld [vmem:[#allocation77_spill] sm:$0xff]  ;;  %v24898_v41 = vld [vmem:[#allocation283_spill] sm:$0xff] }
 0x767   : > { %13831 = vst [vmem:[%s21731_s24 + $0x90] sm:$0xff] %v13694_v62  ;;  %13349 = vrot.lane.b32.xlu0 %v11051_v14, %s14254_s8  ;;  %v13613_v13 = vsel %vm632_vm10, %v13596_v23, %v24887_v58  ;;  %v13679_v16 = vsel %vm365_vm4, %v13662_v55, %v21897_v29  ;;  %v24895_v14 = vcombine.low %v24893_v19, %v24894_v27  ;;  %v24897_v62 = vld [vmem:[#allocation285_spill] sm:$0xff]  ;;  %v24900_v55 = vld [vmem:[#allocation92_spill] sm:$0xff]  ;;  %v24903_v58 = vld [vmem:[#allocation195_spill] sm:$0xff] }
 0x768   : > { %v22177_v32 = vpop.permute.xlu1 %13171  ;;  %v13630_v11 = vsel %vm13616_vm0, %v13613_v13, %v24888_v1  ;;  %v11595_v20 = vcombine.low %v22185_v63, %v22169_v59  ;;  %v12119_v56 = vcombine.low %v24898_v41, %v24897_v62  ;;  %v24899_v3 = vld [vmem:[#allocation197_spill] sm:$0xff]  ;;  %v22214_v6 = vrot.slane %v11847_v24, %v15696_v38  ;;  %v24902_v10 = vld [vmem:[#allocation276_spill] sm:$0xff] }
 0x769   : > { %v13110_v33 = vpop.permute.xlu0 %13109  ;;  %v13647_v29 = vsel %vm499_vm7, %v13630_v11, %v24891_v57  ;;  %v13598_v50 = vsel %vm2004_vm15, %v24895_v14, %v24892_v28  ;;  %v24906_v57 = vld [vmem:[#allocation13_spill] sm:$0xff]  ;;  %v12004_v14 = vcombine.high %v21977_v60, %v21959_v37  ;;  %v24916_v37 = vld [vmem:[#allocation91_spill] sm:$0xff] }
 0x76a   : > { %v13696_v42 = vsel %vm13684_vm6, %v13679_v16, %v13110_v33  ;;  %13415 = vrot.lane.b32.xlu1 %v11188_v26, %s14270_s10  ;;  %v13664_v54 = vsel %vm13650_vm5, %v13647_v29, %v24896_v25  ;;  %v13615_v45 = vsel %vm632_vm10, %v13598_v50, %v24899_v3  ;;  %v24901_v26 = vld [vmem:[#allocation277_spill] sm:$0xff]  ;;  %v11732_v16 = vcombine.high %v21947_v21, %v21934_v35  ;;  %v24904_v33 = vld [vmem:[#allocation111_spill] sm:$0xff]  ;;  %v24907_v29 = vld [vmem:[#allocation184_spill] sm:$0xff] }
 0x76b   : > { %13835 = vst [vmem:[%s21731_s24 + $0xb0] sm:$0xff] %v13696_v42  ;;  %13353 = vrot.lane.b32.xlu0 %v11323_v43, %s14254_s8  ;;  %v13681_v40 = vsel %vm365_vm4, %v13664_v54, %v21929_v51  ;;  %v13632_v22 = vsel %vm13616_vm0, %v13615_v45, %v24900_v55  ;;  %v12087_v12 = vcombine.low %v24902_v10, %v24901_v26  ;;  %v24905_v43 = vld [vmem:[#allocation14_spill] sm:$0xff]  ;;  %v24909_v21 = vld [vmem:[#allocation36_spill] sm:$0xff]  ;;  %v24910_v19 = vld [vmem:[#allocation69_spill] sm:$0xff] }
 0x76c   : > { %v22211_v36 = vpop.permute.xlu1 %13175  ;;  %v13649_v13 = vsel %vm499_vm7, %v13632_v22, %v24903_v58  ;;  %v22227_v51 = vrot.slane %v11815_v5, %v15696_v38  ;;  %v12391_v1 = vcombine.low %v24905_v43, %v24904_v33  ;;  %v22240_v5 = vrot.slane %v12119_v56, %v15696_v38  ;;  %v24911_v50 = vld [vmem:[#allocation192_spill] sm:$0xff]  ;;  %v24912_v25 = vld [vmem:[#allocation193_spill] sm:$0xff] }
 0x76d   : > { %v13114_v23 = vpop.permute.xlu0 %13113  ;;  %v13666_v24 = vsel %vm13650_vm5, %v13649_v13, %v21685_v49  ;;  %v24908_v49 = vcombine.low %v24906_v57, %v24907_v29  ;;  %v12359_v27 = vcombine.low %v24910_v19, %v24909_v21  ;;  %v12663_v54 = vcombine.low %v24912_v25, %v24911_v50  ;;  %v24917_v60 = vld [vmem:[#allocation25_spill] sm:$0xff]  ;;  %v24918_v22 = vld [vmem:[#allocation200_spill] sm:$0xff]  ;;  %v24925_v29 = vld [vmem:[#allocation146_spill] sm:$0xff] }
 0x76e   : > { %v13698_v4 = vsel %vm13684_vm6, %v13681_v40, %v13114_v23  ;;  %13419 = vrot.lane.b32.xlu1 %v11460_v2, %s14270_s10  ;;  %v13683_v11 = vsel %vm365_vm4, %v13666_v24, %v21965_v34  ;;  %v11867_v0 = vcombine.low %v22227_v51, %v22214_v6  ;;  %v22255_v34 = vrot.slane %v12087_v12, %v15696_v38  ;;  %v24913_v2 = vld [vmem:[#allocation113_spill] sm:$0xff]  ;;  %v24930_v50 = vld [vmem:[#allocation246_spill] sm:$0xff]  ;;  %v24931_v25 = vld [vmem:[#allocation244_spill] sm:$0xff] }
 0x76f   : > { %13839 = vst [vmem:[%s21731_s24 + $0xd0] sm:$0xff] %v13698_v4  ;;  %13357 = vrot.lane.b32.xlu0 %v11595_v20, %s14254_s8  ;;  %v24914_v20 = vld [vmem:[#allocation134_spill] sm:$0xff]  ;;  %v22269_v40 = vrot.slane %v12391_v1, %v15696_v38  ;;  %v12631_v55 = vcombine.low %v24917_v60, %v24916_v37  ;;  %v12276_v13 = vcombine.high %v22010_v47, %v21994_v17  ;;  %v24927_v19 = vld [vmem:[#allocation109_spill] sm:$0xff]  ;;  %v24937_v37 = vld [vmem:[#allocation268_spill] sm:$0xff] }
 0x770   : > { %v13180_v42 = vpop.permute.xlu1 %13179  ;;  %v24915_v62 = vcombine.low %v24913_v2, %v24914_v20  ;;  %v12139_v45 = vcombine.low %v22255_v34, %v22240_v5  ;;  %v24919_v4 = vld [vmem:[#allocation198_spill] sm:$0xff] }
 0x771   : > { %v13118_v30 = vpop.permute.xlu0 %13117  ;;  %v22246_v28 = vsel %vm2004_vm15, %v24908_v49, %v13180_v42  ;;  %v24920_v26 = vcombine.low %v24918_v22, %v24919_v4  ;;  %v22297_v43 = vrot.slane %v12631_v55, %v15696_v38  ;;  %v24922_v1 = vld [vmem:[#allocation30_spill] sm:$0xff]  ;;  %v24939_v4 = vld [vmem:[#allocation216_spill] sm:$0xff] }
 0x772   : > { %v13700_v35 = vsel %vm13684_vm6, %v13683_v11, %v13118_v30  ;;  %13423 = vrot.lane.b32.xlu1 %v11732_v16, %s14270_s10  ;;  %v13701_v41 = vsel %vm2004_vm15, %v24915_v62, %v22002_v53  ;;  %v22279_v53 = vrot.slane %v12359_v27, %v15696_v38  ;;  %v22291_v16 = vrot.slane %v12663_v54, %v15696_v38  ;;  %v24924_v38 = vld [vmem:[#allocation188_spill] sm:$0xff]  ;;  %v24928_v27 = vld [vmem:[#allocation7_spill] sm:$0xff]  ;;  %v24933_v62 = vld [vmem:[#allocation201_spill] sm:$0xff] }
 0x773   : > { %13843 = vst [vmem:[%s21731_s24 + $0xf0] sm:$0xff] %v13700_v35  ;;  %13361 = vrot.lane.b32.xlu0 %v11867_v0, %s14254_s8  ;;  %v13703_v10 = vsel %vm2004_vm15, %v24920_v26, %v22034_v48  ;;  %v24921_v48 = vld [vmem:[#allocation215_spill] sm:$0xff]  ;;  %v12548_v30 = vcombine.high %v22052_v31, %v22039_v39  ;;  %v24926_v49 = vcombine.low %v24924_v38, %v24925_v29  ;;  %v24940_v26 = vld [vmem:[#allocation214_spill] sm:$0xff]  ;;  %v24948_v29 = vld [vmem:[#allocation157_spill] sm:$0xff] }
 0x774   : > { %v13216_v56 = vpop.permute.xlu1 %13215  ;;  %v12411_v24 = vcombine.low %v22279_v53, %v22269_v40  ;;  %v24923_v11 = vcombine.low %v24921_v48, %v24922_v1  ;;  %v12683_v0 = vcombine.low %v22297_v43, %v22291_v16  ;;  %v10780_v39 = vcombine.high %v22080_v61, %v22064_v46 }
 0x775   : > { %v13154_v3 = vpop.permute.xlu0 %13153  ;;  %v22272_v23 = vsel %vm632_vm10, %v13701_v41, %v13216_v56  ;;  %v24932_v54 = vcombine.low %v24930_v50, %v24931_v25  ;;  %v11052_v46 = vcombine.high %v22122_v9, %v22109_v52  ;;  %v24934_v41 = vld [vmem:[#allocation199_spill] sm:$0xff]  ;;  %v11324_v52 = vcombine.high %v22157_v8, %v22144_v7 }
 0x776   : > { %13427 = vrot.lane.b32.xlu1 %v12004_v14, %s14270_s10  ;;  %v13705_v17 = vsel %vm2004_vm15, %v24923_v11, %v22070_v15  ;;  %v13707_v15 = vsel %vm2004_vm15, %v24926_v49, %v22106_v44  ;;  %v24929_v14 = vcombine.low %v24927_v19, %v24928_v27  ;;  %v24935_v56 = vcombine.low %v24933_v62, %v24934_v41  ;;  %v24945_v11 = vld [vmem:[#allocation172_spill] sm:$0xff]  ;;  %v24949_v49 = vld [vmem:[#allocation167_spill] sm:$0xff] }
 0x777   : > { %13365 = vrot.lane.b32.xlu0 %v12139_v45, %s14254_s8  ;;  %v13709_v44 = vsel %vm2004_vm15, %v24932_v54, %v22139_v18  ;;  %v24936_v45 = vld [vmem:[#allocation270_spill] sm:$0xff]  ;;  %v11596_v7 = vcombine.high %v22185_v63, %v22169_v59  ;;  %v11868_v38 = vcombine.high %v22227_v51, %v22214_v6  ;;  %v24950_v59 = vcombine.low %v24948_v29, %v24949_v49  ;;  %v24955_v50 = vld [vmem:[#allocation43_spill] sm:$0xff]  ;;  %v24972_v29 = vld [vmem:[#allocation237_spill] sm:$0xff] }
 0x778   : > { %v13220_v12 = vpop.permute.xlu1 %13219  ;;  %v24938_v60 = vcombine.low %v24936_v45, %v24937_v37  ;;  %v24960_v37 = vld [vmem:[#allocation10_spill] sm:$0xff] }
 0x779   : > { %v13158_v58 = vpop.permute.xlu0 %13157  ;;  %v13719_v33 = vsel %vm632_vm10, %v13703_v10, %v13220_v12  ;;  %v24941_v10 = vcombine.low %v24939_v4, %v24940_v26  ;;  %v24942_v12 = vld [vmem:[#allocation228_spill] sm:$0xff]  ;;  %v24973_v49 = vld [vmem:[#allocation190_spill] sm:$0xff] }
 0x77a   : > { %13431 = vrot.lane.b32.xlu1 %v12276_v13, %s14270_s10  ;;  %v13711_v18 = vsel %vm2004_vm15, %v24938_v60, %v22177_v32  ;;  %v24943_v13 = vld [vmem:[#allocation227_spill] sm:$0xff] }
 0x77b   : > { %13369 = vrot.lane.b32.xlu0 %v12411_v24, %s14254_s8  ;;  %v24944_v24 = vcombine.low %v24942_v12, %v24943_v13  ;;  %v24961_v60 = vld [vmem:[#allocation119_spill] sm:$0xff]  ;;  %v24964_v12 = vld [vmem:[#allocation70_spill] sm:$0xff] }
 0x77c   : > { %v13224_v47 = vpop.permute.xlu1 %13223 }
 0x77d   : > { %v13162_v42 = vpop.permute.xlu0 %13161  ;;  %v13721_v57 = vsel %vm632_vm10, %v13705_v17, %v13224_v47  ;;  %v13713_v32 = vsel %vm2004_vm15, %v24944_v24, %v22211_v36  ;;  %v24946_v17 = vld [vmem:[#allocation23_spill] sm:$0xff]  ;;  %v24966_v24 = vld [vmem:[#allocation224_spill] sm:$0xff] }
 0x77e   : > { %13435 = vrot.lane.b32.xlu1 %v12548_v30, %s14270_s10  ;;  %v24947_v47 = vcombine.low %v24945_v11, %v24946_v17 }
 0x77f   : > { %13373 = vrot.lane.b32.xlu0 %v12683_v0, %s14254_s8  ;;  %s13859_s8 = sshll.u32 %s21731_s24, 4  ;;  %s22703_s8 = int_to_ptr.vmem [resolvable:$true] %s13859_s8 }
 0x780   : > { %v13228_v35 = vpop.permute.xlu1 %13227  ;;  %s14185_s27 = scalar_lea.vmem %s22703_s8, 4096  ;;  %p14192_p0 = scmp.lt.s32.totalorder %s22703_s8, %s14190_s29 }
 0x781   : > { %v13166_v21 = vpop.permute.xlu0 %13165  ;;  %v13723_v31 = vsel %vm632_vm10, %v13707_v15, %v13228_v35  ;;  %v24951_v15 = vld [vmem:[#allocation247_spill] sm:$0xff]  ;;  %v24952_v35 = vld [vmem:[#allocation245_spill] sm:$0xff]  ;;  %p14186_p11 = scmp.ne.s32.totalorder %s22703_s8, %s14185_s27  ;;  %p14193_p1 = scmp.lt.s32.totalorder %s14191_s30, %s14185_s27 }
 0x782   : > { %13471 = vrot.lane.b32.xlu1 %v24929_v14, %s14251_s5  ;;  %v24954_v14 = vld [vmem:[#allocation107_spill] sm:$0xff] }
 0x783   : > { %13409 = vrot.lane.b32.xlu0 %v10780_v39, %s14270_s10  ;;  %v24953_v39 = vcombine.low %v24951_v15, %v24952_v35  ;;  %v24956_v25 = vcombine.low %v24954_v14, %v24955_v50  ;;  %v24976_v50 = vld [vmem:[#allocation55_spill] sm:$0xff]  ;;  %p14187_p12 = pnand %p14186_p11, %p14332_p5  ;;  %p14194_p2 = por %p14193_p1, %p14192_p0 }
 0x784   : > { %v13232_v2 = vpop.permute.xlu1 %13231 }
 0x785   : > { %v13170_v20 = vpop.permute.xlu0 %13169  ;;  %v13725_v61 = vsel %vm632_vm10, %v13709_v44, %v13232_v2  ;;  %v13702_v6 = vsel %vm2004_vm15, %v24956_v25, %v13154_v3  ;;  %v24962_v3 = vcombine.low %v24960_v37, %v24961_v60  ;;  %v24977_v25 = vld [vmem:[#allocation52_spill] sm:$0xff]  ;;  %p14188_p13 = pneg %p14187_p12 }
 0x786   : > { %13475 = vrot.lane.b32.xlu1 %v24935_v56, %s14251_s5  ;;  %v24958_v56 = vld [vmem:[#allocation269_spill] sm:$0xff] }
 0x787   : > { %13413 = vrot.lane.b32.xlu0 %v11052_v46, %s14270_s10  ;;  %v24957_v46 = vld [vmem:[#allocation271_spill] sm:$0xff]  ;;  %p14195_p3 = pnand %p14194_p2, %p14188_p13 }
 0x788   : > { %v13236_v55 = vpop.permute.xlu1 %13235  ;;  %v24959_v45 = vcombine.low %v24957_v46, %v24958_v56 }
 0x789   : > { %v13174_v22 = vpop.permute.xlu0 %13173  ;;  %v13727_v9 = vsel %vm632_vm10, %v13711_v18, %v13236_v55  ;;  %v13704_v18 = vsel %vm2004_vm15, %v24962_v3, %v13158_v58  ;;  %v24984_v3 = vld [vmem:[#allocation179_spill] sm:$0xff] }
 0x78a   : > { %13479 = vrot.lane.b32.xlu1 %v24941_v10, %s14251_s5  ;;  %v24963_v10 = vld [vmem:[#allocation74_spill] sm:$0xff] }
 0x78b   : > { %13417 = vrot.lane.b32.xlu0 %v11324_v52, %s14270_s10  ;;  %v24965_v13 = vcombine.low %v24963_v10, %v24964_v12 }
 0x78c   : > { %v13240_v48 = vpop.permute.xlu1 %13239 }
 0x78d   : > { %v13178_v1 = vpop.permute.xlu0 %13177  ;;  %v13729_v8 = vsel %vm632_vm10, %v13713_v32, %v13240_v48  ;;  %v24967_v32 = vld [vmem:[#allocation8_spill] sm:$0xff] }
 0x78e   : > { %13483 = vrot.lane.b32.xlu1 %v24947_v47, %s14251_s5  ;;  %v24968_v48 = vcombine.low %v24966_v24, %v24967_v32 }
 0x78f   : > { %13421 = vrot.lane.b32.xlu0 %v11596_v7, %s14270_s10 }
 0x790   : > { %v13244_v30 = vpop.permute.xlu1 %13243  ;;  %v13706_v58 = vsel %vm2004_vm15, %v24968_v48, %v13162_v42  ;;  %v24991_v48 = vld [vmem:[#allocation140_spill] sm:$0xff] }
 0x791   : > { %v13182_v0 = vpop.permute.xlu0 %13181  ;;  %v13731_v36 = vsel %vm632_vm10, %v22246_v28, %v13244_v30  ;;  %v12140_v28 = vcombine.high %v22255_v34, %v22240_v5  ;;  %v12412_v5 = vcombine.high %v22279_v53, %v22269_v40  ;;  %v12684_v40 = vcombine.high %v22297_v43, %v22291_v16  ;;  %v24969_v30 = vld [vmem:[#allocation57_spill] sm:$0xff] }
 0x792   : > { %v13716_v63 = vsel %vm2004_vm15, %v24950_v59, %v13182_v0  ;;  %13487 = vrot.lane.b32.xlu1 %v24953_v39, %s14251_s5  ;;  %v24970_v0 = vld [vmem:[#allocation66_spill] sm:$0xff]  ;;  %v24974_v59 = vcombine.low %v24972_v29, %v24973_v49 }
 0x793   : > { %13425 = vrot.lane.b32.xlu0 %v11868_v38, %s14270_s10  ;;  %v24971_v38 = vcombine.low %v24969_v30, %v24970_v0 }
 0x794   : > { %v13280_v51 = vpop.permute.xlu1 %13279  ;;  %v13708_v42 = vsel %vm2004_vm15, %v24974_v59, %v13166_v21  ;;  %v24998_v59 = vld [vmem:[#allocation144_spill] sm:$0xff] }
 0x795   : > { %v13218_v54 = vpop.permute.xlu0 %13217  ;;  %v13733_v44 = vsel %vm13616_vm0, %v22272_v23, %v13280_v51  ;;  %v24979_v51 = vld [vmem:[#allocation259_spill] sm:$0xff] }
 0x796   : > { %v13718_v2 = vsel %vm632_vm10, %v13702_v6, %v13218_v54  ;;  %13491 = vrot.lane.b32.xlu1 %v24959_v45, %s14251_s5  ;;  %v24978_v6 = vcombine.low %v24976_v50, %v24977_v25  ;;  %v24980_v54 = vld [vmem:[#allocation256_spill] sm:$0xff] }
 0x797   : > { %13429 = vrot.lane.b32.xlu0 %v12140_v28, %s14270_s10  ;;  %v24981_v28 = vcombine.low %v24979_v51, %v24980_v54 }
 0x798   : > { %v13284_v55 = vpop.permute.xlu1 %13283 }
 0x799   : > { %v13222_v52 = vpop.permute.xlu0 %13221  ;;  %v13735_v34 = vsel %vm13616_vm0, %v13719_v33, %v13284_v55  ;;  %v13710_v21 = vsel %vm2004_vm15, %v24981_v28, %v13170_v20  ;;  %v24986_v55 = vld [vmem:[#allocation290_spill] sm:$0xff] }
 0x79a   : > { %v13720_v23 = vsel %vm632_vm10, %v13704_v18, %v13222_v52  ;;  %13495 = vrot.lane.b32.xlu1 %v24965_v13, %s14251_s5  ;;  %v24987_v52 = vld [vmem:[#allocation288_spill] sm:$0xff] }
 0x79b   : > { %13433 = vrot.lane.b32.xlu0 %v12412_v5, %s14270_s10  ;;  %v24988_v5 = vcombine.low %v24986_v55, %v24987_v52 }
 0x79c   : > { %v13288_v7 = vpop.permute.xlu1 %13287 }
 0x79d   : > { %v13226_v47 = vpop.permute.xlu0 %13225  ;;  %v13737_v53 = vsel %vm13616_vm0, %v13721_v57, %v13288_v7  ;;  %v24975_v57 = vcombine.high %v24927_v19, %v24928_v27  ;;  %v24982_v19 = vcombine.high %v24933_v62, %v24934_v41  ;;  %v24983_v27 = vld [vmem:[#allocation136_spill] sm:$0xff]  ;;  %v13712_v20 = vsel %vm2004_vm15, %v24988_v5, %v13174_v22  ;;  %v24990_v41 = vld [vmem:[#allocation225_spill] sm:$0xff] }
 0x79e   : > { %v13722_v33 = vsel %vm632_vm10, %v13706_v58, %v13226_v47  ;;  %13499 = vrot.lane.b32.xlu1 %v24971_v38, %s14251_s5  ;;  %v24985_v18 = vcombine.low %v24983_v27, %v24984_v3  ;;  %v24989_v62 = vcombine.high %v24939_v4, %v24940_v26  ;;  %v24992_v58 = vcombine.low %v24990_v41, %v24991_v48  ;;  %v24993_v7 = vld [vmem:[#allocation88_spill] sm:$0xff]  ;;  %v24994_v47 = vld [vmem:[#allocation22_spill] sm:$0xff] }
 0x79f   : > { %13437 = vrot.lane.b32.xlu0 %v12684_v40, %s14270_s10  ;;  %v24995_v40 = vcombine.low %v24993_v7, %v24994_v47  ;;  %v24996_v4 = vcombine.high %v24945_v11, %v24946_v17  ;;  %v24997_v26 = vld [vmem:[#allocation238_spill] sm:$0xff]  ;;  %v25002_v11 = vld [vmem:[#allocation257_spill] sm:$0xff]  ;;  %v25017_v47 = vcombine.high %v24983_v27, %v24984_v3 }
 0x7a0   : > { %v13292_v39 = vpop.permute.xlu1 %13291  ;;  %v25019_v3 = vcombine.high %v24997_v26, %v24998_v59 }
 0x7a1   : > { %v13230_v14 = vpop.permute.xlu0 %13229  ;;  %v13739_v16 = vsel %vm13616_vm0, %v13723_v31, %v13292_v39  ;;  %v13714_v22 = vsel %vm2004_vm15, %v24995_v40, %v13178_v1 }
 0x7a2   : > { %v13724_v43 = vsel %vm632_vm10, %v13708_v42, %v13230_v14  ;;  %13535 = vrot.lane.b32.xlu1 %v24975_v57, %s14271_s17  ;;  %v24999_v42 = vcombine.low %v24997_v26, %v24998_v59 }
 0x7a3   : > { %13473 = vrot.lane.b32.xlu0 %v24978_v6, %s14251_s5  ;;  %v25001_v6 = vld [vmem:[#allocation260_spill] sm:$0xff] }
 0x7a4   : > { %v13296_v45 = vpop.permute.xlu1 %13295  ;;  %v25003_v17 = vcombine.low %v25001_v6, %v25002_v11 }
 0x7a5   : > { %v13234_v37 = vpop.permute.xlu0 %13233  ;;  %v13741_v31 = vsel %vm13616_vm0, %v13725_v61, %v13296_v45 }
 0x7a6   : > { %v13726_v60 = vsel %vm632_vm10, %v13710_v21, %v13234_v37  ;;  %13539 = vrot.lane.b32.xlu1 %v24982_v19, %s14271_s17 }
 0x7a7   : > { %13477 = vrot.lane.b32.xlu0 %v24985_v18, %s14251_s5 }
 0x7a8   : > { %v13300_v13 = vpop.permute.xlu1 %13299 }
 0x7a9   : > { %v13238_v24 = vpop.permute.xlu0 %13237  ;;  %v13743_v61 = vsel %vm13616_vm0, %v13727_v9, %v13300_v13 }
 0x7aa   : > { %v13728_v32 = vsel %vm632_vm10, %v13712_v20, %v13238_v24  ;;  %13543 = vrot.lane.b32.xlu1 %v24989_v62, %s14271_s17 }
 0x7ab   : > { %13481 = vrot.lane.b32.xlu0 %v24992_v58, %s14251_s5 }
 0x7ac   : > { %v13304_v38 = vpop.permute.xlu1 %13303 }
 0x7ad   : > { %v13242_v29 = vpop.permute.xlu0 %13241  ;;  %v13745_v9 = vsel %vm13616_vm0, %v13729_v8, %v13304_v38  ;;  %v25000_v8 = vcombine.high %v24951_v15, %v24952_v35  ;;  %v25006_v15 = vld [vmem:[#allocation289_spill] sm:$0xff] }
 0x7ae   : > { %v13730_v49 = vsel %vm632_vm10, %v13714_v22, %v13242_v29  ;;  %13547 = vrot.lane.b32.xlu1 %v24996_v4, %s14271_s17 }
 0x7af   : > { %13485 = vrot.lane.b32.xlu0 %v24999_v42, %s14251_s5 }
 0x7b0   : > { %v13308_v39 = vpop.permute.xlu1 %13307 }
 0x7b1   : > { %v13246_v14 = vpop.permute.xlu0 %13245  ;;  %v13747_v1 = vsel %vm13616_vm0, %v13731_v36, %v13308_v39  ;;  %v25004_v36 = vcombine.high %v24957_v46, %v24958_v56  ;;  %v25009_v46 = vld [vmem:[#allocation123_spill] sm:$0xff] }
 0x7b2   : > { %v13732_v57 = vsel %vm632_vm10, %v13716_v63, %v13246_v14  ;;  %13551 = vrot.lane.b32.xlu1 %v25000_v8, %s14271_s17  ;;  %v25005_v63 = vld [vmem:[#allocation291_spill] sm:$0xff] }
 0x7b3   : > { %13489 = vrot.lane.b32.xlu0 %v25003_v17, %s14251_s5  ;;  %v25007_v35 = vcombine.low %v25005_v63, %v25006_v15  ;;  %v25010_v56 = vld [vmem:[#allocation51_spill] sm:$0xff]  ;;  %v25021_v4 = vcombine.high %v25005_v63, %v25006_v15 }
 0x7b4   : > { %v13344_v51 = vpop.permute.xlu1 %13343  ;;  %v25011_v18 = vcombine.low %v25009_v46, %v25010_v56  ;;  %v25022_v39 = vcombine.high %v25009_v46, %v25010_v56 }
 0x7b5   : > { %v13282_v54 = vpop.permute.xlu0 %13281  ;;  %v22483_v28 = vsel %vm499_vm7, %v13733_v44, %v13344_v51 }
 0x7b6   : > { %v13734_v21 = vsel %vm13616_vm0, %v13718_v2, %v13282_v54  ;;  %13555 = vrot.lane.b32.xlu1 %v25004_v36, %s14271_s17  ;;  %v25008_v2 = vcombine.high %v24963_v10, %v24964_v12  ;;  %v25013_v10 = vld [vmem:[#allocation181_spill] sm:$0xff] }
 0x7b7   : > { %13493 = vrot.lane.b32.xlu0 %v25007_v35, %s14251_s5  ;;  %v25014_v12 = vld [vmem:[#allocation209_spill] sm:$0xff] }
 0x7b8   : > { %v13348_v45 = vpop.permute.xlu1 %13347  ;;  %v25015_v20 = vcombine.low %v25013_v10, %v25014_v12  ;;  %v25023_v8 = vcombine.high %v25013_v10, %v25014_v12 }
 0x7b9   : > { %v13286_v37 = vpop.permute.xlu0 %13285  ;;  %v22495_v19 = vsel %vm499_vm7, %v13735_v34, %v13348_v45 }
 0x7ba   : > { %v13736_v44 = vsel %vm13616_vm0, %v13720_v23, %v13286_v37  ;;  %13559 = vrot.lane.b32.xlu1 %v25008_v2, %s14271_s17  ;;  %v25012_v23 = vcombine.high %v24969_v30, %v24970_v0 }
 0x7bb   : > { %13497 = vrot.lane.b32.xlu0 %v25011_v18, %s14251_s5 }
 0x7bc   : > { %v13352_v55 = vpop.permute.xlu1 %13351 }
 0x7bd   : > { %v13290_v52 = vpop.permute.xlu0 %13289  ;;  %v22507_v5 = vsel %vm499_vm7, %v13737_v53, %v13352_v55 }
 0x7be   : > { %v13738_v34 = vsel %vm13616_vm0, %v13722_v33, %v13290_v52  ;;  %13563 = vrot.lane.b32.xlu1 %v25012_v23, %s14271_s17  ;;  %v25016_v33 = vcombine.high %v24976_v50, %v24977_v25  ;;  %v25018_v25 = vcombine.high %v24990_v41, %v24991_v48  ;;  %v25020_v48 = vcombine.high %v25001_v6, %v25002_v11 }
 0x7bf   : > { %13501 = vrot.lane.b32.xlu0 %v25015_v20, %s14251_s5  ;;  %s14019_s5 = sshll.u32 %s14315_s16, 12  ;;  %s22709_s16 = scalar_lea.sflag [#allocation4], %s161_s19 }
 0x7c0   : > { %v13356_v13 = vpop.permute.xlu1 %13355  ;;  %s22700_s26 = scalar_lea.hbm %s22753_s3, %s14019_s5 }
 0x7c1   : > { %v13294_v24 = vpop.permute.xlu0 %13293  ;;  %v22519_v62 = vsel %vm499_vm7, %v13739_v16, %v13356_v13 }
 0x7c2   : > { %v13740_v53 = vsel %vm13616_vm0, %v13724_v43, %v13294_v24 }
 0x7c3   : > { %13537 = vrot.lane.b32.xlu0 %v25016_v33, %s14271_s17 }
 0x7c4   : > { %v13360_v58 = vpop.permute.xlu1 %13359 }
 0x7c5   : > { %v13298_v30 = vpop.permute.xlu0 %13297  ;;  %v22527_v0 = vsel %vm499_vm7, %v13741_v31, %v13360_v58 }
 0x7c6   : > { %v13742_v7 = vsel %vm13616_vm0, %v13726_v60, %v13298_v30 }
 0x7c7   : > { %13541 = vrot.lane.b32.xlu0 %v25017_v47, %s14271_s17 }
 0x7c8   : > { %v13364_v16 = vpop.permute.xlu1 %13363 }
 0x7c9   : > { %v13302_v40 = vpop.permute.xlu0 %13301  ;;  %v22535_v43 = vsel %vm499_vm7, %v13743_v61, %v13364_v16 }
 0x7ca   : > { %v13744_v50 = vsel %vm13616_vm0, %v13728_v32, %v13302_v40 }
 0x7cb   : > { %13545 = vrot.lane.b32.xlu0 %v25018_v25, %s14271_s17 }
 0x7cc   : > { %v13368_v31 = vpop.permute.xlu1 %13367 }
 0x7cd   : > { %v13306_v22 = vpop.permute.xlu0 %13305  ;;  %v22543_v60 = vsel %vm499_vm7, %v13745_v9, %v13368_v31 }
 0x7ce   : > { %v13746_v27 = vsel %vm13616_vm0, %v13730_v49, %v13306_v22 }
 0x7cf   : > { %13549 = vrot.lane.b32.xlu0 %v25019_v3, %s14271_s17 }
 0x7d0   : > { %v13372_v61 = vpop.permute.xlu1 %13371 }
 0x7d1   : > { %v13310_v38 = vpop.permute.xlu0 %13309  ;;  %v22551_v32 = vsel %vm499_vm7, %v13747_v1, %v13372_v61 }
 0x7d2   : > { %v13748_v41 = vsel %vm13616_vm0, %v13732_v57, %v13310_v38 }
 0x7d3   : > { %13553 = vrot.lane.b32.xlu0 %v25020_v48, %s14271_s17 }
 0x7d4   : > { %v13408_v29 = vpop.permute.xlu1 %13407 }
 0x7d5   : > { %v13346_v9 = vpop.permute.xlu0 %13345  ;;  %v13765_v47 = vsel %vm13650_vm5, %v22483_v28, %v13408_v29 }
 0x7d6   : > { %v22559_v49 = vsel %vm499_vm7, %v13734_v21, %v13346_v9 }
 0x7d7   : > { %13557 = vrot.lane.b32.xlu0 %v25021_v4, %s14271_s17 }
 0x7d8   : > { %v13412_v26 = vpop.permute.xlu1 %13411 }
 0x7d9   : > { %v13350_v59 = vpop.permute.xlu0 %13349  ;;  %v13767_v31 = vsel %vm13650_vm5, %v22495_v19, %v13412_v26 }
 0x7da   : > { %v22566_v42 = vsel %vm499_vm7, %v13736_v44, %v13350_v59 }
 0x7db   : > { %13561 = vrot.lane.b32.xlu0 %v25022_v39, %s14271_s17 }
 0x7dc   : > { %v13416_v14 = vpop.permute.xlu1 %13415 }
 0x7dd   : > { %v13354_v1 = vpop.permute.xlu0 %13353  ;;  %v13769_v28 = vsel %vm13650_vm5, %v22507_v5, %v13416_v14 }
 0x7de   : > { %v22573_v57 = vsel %vm499_vm7, %v13738_v34, %v13354_v1 }
 0x7df   : > { %13565 = vrot.lane.b32.xlu0 %v25023_v8, %s14271_s17 }
 0x7e0   : > { %v13420_v6 = vpop.permute.xlu1 %13419 }
 0x7e1   : > { %v13358_v11 = vpop.permute.xlu0 %13357  ;;  %v13771_v19 = vsel %vm13650_vm5, %v22519_v62, %v13420_v6 }
 0x7e2   : > { %v22580_v17 = vsel %vm499_vm7, %v13740_v53, %v13358_v11 }
 0x7e4   : > { %v13424_v51 = vpop.permute.xlu1 %13423 }
 0x7e5   : > { %v13362_v54 = vpop.permute.xlu0 %13361  ;;  %v13773_v5 = vsel %vm13650_vm5, %v22527_v0, %v13424_v51 }
 0x7e6   : > { %v22583_v21 = vsel %vm499_vm7, %v13742_v7, %v13362_v54 }
 0x7e8   : > { %v13428_v36 = vpop.permute.xlu1 %13427 }
 0x7e9   : > { %v13366_v63 = vpop.permute.xlu0 %13365  ;;  %v13775_v62 = vsel %vm13650_vm5, %v22535_v43, %v13428_v36 }
 0x7ea   : > { %v22586_v15 = vsel %vm499_vm7, %v13744_v50, %v13366_v63 }
 0x7ec   : > { %v13432_v35 = vpop.permute.xlu1 %13431 }
 0x7ed   : > { %v13370_v45 = vpop.permute.xlu0 %13369  ;;  %v13777_v0 = vsel %vm13650_vm5, %v22543_v60, %v13432_v35 }
 0x7ee   : > { %v22589_v37 = vsel %vm499_vm7, %v13746_v27, %v13370_v45 }
 0x7f0   : > { %v13436_v44 = vpop.permute.xlu1 %13435 }
 0x7f1   : > { %v13374_v2 = vpop.permute.xlu0 %13373  ;;  %v13779_v43 = vsel %vm13650_vm5, %v22551_v32, %v13436_v44 }
 0x7f2   : > { %v22592_v46 = vsel %vm499_vm7, %v13748_v41, %v13374_v2 }
 0x7f4   : > { %v13472_v56 = vpop.permute.xlu1 %13471 }
 0x7f5   : > { %v22594_v18 = vpop.permute.xlu0 %13409  ;;  %v13781_v16 = vsel %vm365_vm4, %v13765_v47, %v13472_v56 }
 0x7f6   : > { %v13766_v60 = vsel %vm13650_vm5, %v22559_v49, %v22594_v18 }
 0x7f8   : > { %v13476_v55 = vpop.permute.xlu1 %13475 }
 0x7f9   : > { %v22596_v52 = vpop.permute.xlu0 %13413  ;;  %v13783_v22 = vsel %vm365_vm4, %v13767_v31, %v13476_v55 }
 0x7fa   : > { %v13768_v32 = vsel %vm13650_vm5, %v22566_v42, %v22596_v52 }
 0x7fc   : > { %v13480_v34 = vpop.permute.xlu1 %13479 }
 0x7fd   : > { %v22598_v23 = vpop.permute.xlu0 %13417  ;;  %v13785_v38 = vsel %vm365_vm4, %v13769_v28, %v13480_v34 }
 0x7fe   : > { %v13770_v49 = vsel %vm13650_vm5, %v22573_v57, %v22598_v23 }
 0x800   : > { %v13484_v10 = vpop.permute.xlu1 %13483 }
 0x801   : > { %v22600_v12 = vpop.permute.xlu0 %13421  ;;  %v13787_v9 = vsel %vm365_vm4, %v13771_v19, %v13484_v10 }
 0x802   : > { %v13772_v42 = vsel %vm13650_vm5, %v22580_v17, %v22600_v12 }
 0x804   : > { %v13488_v20 = vpop.permute.xlu1 %13487 }
 0x805   : > { %v22602_v13 = vpop.permute.xlu0 %13425  ;;  %v13789_v39 = vsel %vm365_vm4, %v13773_v5, %v13488_v20 }
 0x806   : > { %v13774_v57 = vsel %vm13650_vm5, %v22583_v21, %v22602_v13 }
 0x808   : > { %v13492_v24 = vpop.permute.xlu1 %13491 }
 0x809   : > { %v22604_v53 = vpop.permute.xlu0 %13429  ;;  %v13791_v6 = vsel %vm365_vm4, %v13775_v62, %v13492_v24 }
 0x80a   : > { %v13776_v17 = vsel %vm13650_vm5, %v22586_v15, %v22604_v53 }
 0x80c   : > { %v13496_v33 = vpop.permute.xlu1 %13495 }
 0x80d   : > { %v22606_v58 = vpop.permute.xlu0 %13433  ;;  %v13793_v51 = vsel %vm365_vm4, %v13777_v0, %v13496_v33 }
 0x80e   : > { %v13778_v21 = vsel %vm13650_vm5, %v22589_v37, %v22606_v58 }
 0x810   : > { %v13500_v30 = vpop.permute.xlu1 %13499 }
 0x811   : > { %v22608_v7 = vpop.permute.xlu0 %13437  ;;  %v13795_v36 = vsel %vm365_vm4, %v13779_v43, %v13500_v30 }
 0x812   : > { %v13780_v15 = vsel %vm13650_vm5, %v22592_v46, %v22608_v7 }
 0x814   : > { %v13536_v40 = vpop.permute.xlu1 %13535 }
 0x815   : > { %v13474_v50 = vpop.permute.xlu0 %13473  ;;  %v13797_v25 = vsel %vm13684_vm6, %v13781_v16, %v13536_v40 }
 0x816   : > { %13814 = vst [vmem:[%s21731_s24 + $0x8] sm:$0xff] %v13797_v25  ;;  %v13782_v35 = vsel %vm365_vm4, %v13766_v60, %v13474_v50 }
 0x818   : > { %v13540_v27 = vpop.permute.xlu1 %13539 }
 0x819   : > { %v13478_v3 = vpop.permute.xlu0 %13477  ;;  %v13799_v61 = vsel %vm13684_vm6, %v13783_v22, %v13540_v27 }
 0x81a   : > { %13818 = vst [vmem:[%s21731_s24 + $0x28] sm:$0xff] %v13799_v61  ;;  %v13784_v44 = vsel %vm365_vm4, %v13768_v32, %v13478_v3 }
 0x81c   : > { %v13544_v41 = vpop.permute.xlu1 %13543 }
 0x81d   : > { %v13482_v48 = vpop.permute.xlu0 %13481  ;;  %v13801_v29 = vsel %vm13684_vm6, %v13785_v38, %v13544_v41 }
 0x81e   : > { %13822 = vst [vmem:[%s21731_s24 + $0x48] sm:$0xff] %v13801_v29  ;;  %v13786_v18 = vsel %vm365_vm4, %v13770_v49, %v13482_v48 }
 0x820   : > { %v13548_v4 = vpop.permute.xlu1 %13547 }
 0x821   : > { %v13486_v26 = vpop.permute.xlu0 %13485  ;;  %v13803_v59 = vsel %vm13684_vm6, %v13787_v9, %v13548_v4 }
 0x822   : > { %13826 = vst [vmem:[%s21731_s24 + $0x68] sm:$0xff] %v13803_v59  ;;  %v13788_v52 = vsel %vm365_vm4, %v13772_v42, %v13486_v26 }
 0x824   : > { %v13552_v14 = vpop.permute.xlu1 %13551 }
 0x825   : > { %v13490_v1 = vpop.permute.xlu0 %13489  ;;  %v13805_v8 = vsel %vm13684_vm6, %v13789_v39, %v13552_v14 }
 0x826   : > { %13830 = vst [vmem:[%s21731_s24 + $0x88] sm:$0xff] %v13805_v8  ;;  %v13790_v23 = vsel %vm365_vm4, %v13774_v57, %v13490_v1 }
 0x828   : > { %v13556_v11 = vpop.permute.xlu1 %13555 }
 0x829   : > { %v13494_v54 = vpop.permute.xlu0 %13493  ;;  %v13807_v63 = vsel %vm13684_vm6, %v13791_v6, %v13556_v11 }
 0x82a   : > { %13834 = vst [vmem:[%s21731_s24 + $0xa8] sm:$0xff] %v13807_v63  ;;  %v13792_v12 = vsel %vm365_vm4, %v13776_v17, %v13494_v54 }
 0x82c   : > { %v13560_v45 = vpop.permute.xlu1 %13559 }
 0x82d   : > { %v13498_v2 = vpop.permute.xlu0 %13497  ;;  %v13809_v56 = vsel %vm13684_vm6, %v13793_v51, %v13560_v45 }
 0x82e   : > { %13838 = vst [vmem:[%s21731_s24 + $0xc8] sm:$0xff] %v13809_v56  ;;  %v13794_v13 = vsel %vm365_vm4, %v13778_v21, %v13498_v2 }
 0x830   : > { %v13564_v55 = vpop.permute.xlu1 %13563 }
 0x831   : > { %v13502_v34 = vpop.permute.xlu0 %13501  ;;  %v13811_v10 = vsel %vm13684_vm6, %v13795_v36, %v13564_v55 }
 0x832   : > { %13842 = vst [vmem:[%s21731_s24 + $0xe8] sm:$0xff] %v13811_v10  ;;  %v13796_v37 = vsel %vm365_vm4, %v13780_v15, %v13502_v34 }
 0x835   : > { %v13538_v20 = vpop.permute.xlu0 %13537 }
 0x836   : > { %v13798_v24 = vsel %vm13684_vm6, %v13782_v35, %v13538_v20 }
 0x837   : > { %13816 = vst [vmem:[%s21731_s24 + $0x18] sm:$0xff] %v13798_v24 }
 0x839   : > { %v13542_v33 = vpop.permute.xlu0 %13541 }
 0x83a   : > { %v13800_v30 = vsel %vm13684_vm6, %v13784_v44, %v13542_v33 }
 0x83b   : > { %13820 = vst [vmem:[%s21731_s24 + $0x38] sm:$0xff] %v13800_v30 }
 0x83d   : > { %v13546_v47 = vpop.permute.xlu0 %13545 }
 0x83e   : > { %v13802_v16 = vsel %vm13684_vm6, %v13786_v18, %v13546_v47 }
 0x83f   : > { %13824 = vst [vmem:[%s21731_s24 + $0x58] sm:$0xff] %v13802_v16 }
 0x841   : > { %v13550_v40 = vpop.permute.xlu0 %13549 }
 0x842   : > { %v13804_v50 = vsel %vm13684_vm6, %v13788_v52, %v13550_v40 }
 0x843   : > { %13828 = vst [vmem:[%s21731_s24 + $0x78] sm:$0xff] %v13804_v50 }
 0x845   : > { %v13554_v25 = vpop.permute.xlu0 %13553 }
 0x846   : > { %v13806_v31 = vsel %vm13684_vm6, %v13790_v23, %v13554_v25 }
 0x847   : > { %13832 = vst [vmem:[%s21731_s24 + $0x98] sm:$0xff] %v13806_v31 }
 0x849   : > { %v13558_v22 = vpop.permute.xlu0 %13557 }
 0x84a   : > { %v13808_v27 = vsel %vm13684_vm6, %v13792_v12, %v13558_v22 }
 0x84b   : > { %13836 = vst [vmem:[%s21731_s24 + $0xb8] sm:$0xff] %v13808_v27 }
 0x84d   : > { %v13562_v3 = vpop.permute.xlu0 %13561 }
 0x84e   : > { %v13810_v61 = vsel %vm13684_vm6, %v13794_v13, %v13562_v3 }
 0x84f   : > { %13840 = vst [vmem:[%s21731_s24 + $0xd8] sm:$0xff] %v13810_v61 }
 0x851   : > { %v13566_v53 = vpop.permute.xlu0 %13565 }
 0x852   : > { %v13812_v58 = vsel %vm13684_vm6, %v13796_v37, %v13566_v53 }
 0x853   : > { %13844 = vst [vmem:[%s21731_s24 + $0xf8] sm:$0xff] %v13812_v58 }
 0x854   : > { %14198 = shalt.err (!%p14195_p3)
}
 0x855   : > { %s14199_s4 = scalar_lea.hbm %s22700_s26, 4096  ;;  %s14203_s10 = scalar_lea.hbm %s22753_s3, 8192 }
 0x856   : > { %p14200_p4 = scmp.ne.s32.totalorder %s22700_s26, %s14199_s4  ;;  %p14204_p9 = scmp.lt.s32.totalorder %s22700_s26, %s22753_s3 }
 0x857   : > { %p14205_p10 = scmp.lt.s32.totalorder %s14203_s10, %s14199_s4 }
 0x858   : > { %p14201_p7 = pnand %p14200_p4, %p14332_p5 }
 0x859   : > { %p14206_p11 = por %p14205_p10, %p14204_p9 }
 0x85a   : > { %p14202_p8 = pneg %p14201_p7 }
 0x85c   : > { %p14207_p12 = pnand %p14206_p11, %p14202_p8 }
 0x85e   : > { %14210 = shalt.err (!%p14207_p12)
}
 0x85f   : > { %s14273_s20 = smov 256  }
 0x860   : > { %14021 = dma.vmem_to_hbm [thread:$0]  (%p14332_p5), %s22703_s8, 4096, %s22700_s26, %s22709_s16, %s14273_s20, %s14273_s20, %s14268_s7  }
 0x861 PF: > { %p14027_p13 = scmp.ge.s32.totalorder %s14245_s15, 2  ;;  %s13874_s24 = sand.u32 1, %s14233_s12  }
 0x862   : > { %s13875_s5 = scalar_lea.sflag [#allocation4], %s13874_s24 }
 0x863   : > { %p14024_p0 = pnand %p14027_p13, %p14336_p6 }
 0x865   : > { %p14025_p1 = pneg %p14024_p0 }
 0x867   : > { %14228 = dma.done.wait (%p14025_p1), %s13875_s5, 4096  }
 0x868   : > { %14230 = vsyncadd (%p14025_p1), %s13875_s5, 4294963200  ;;  %p13_p2 = scmp.ge.s32.totalorder %s14319_s18, 4   ;;  %s25024_s12 = smov %s14237_s13 }
 0x869   : > { %s25025_s13 = smov %s14241_s14  ;;  %s25026_s14 = smov %s14330_s21 }
 0x86a   : > { %s25027_s15 = smov %s14319_s18  ;;  %15 = sbr.rel (!%p13_p2) target bundleno = 3 (0x3), region = 67 }
 0x86f   :  { %13880 = vsyncpa [#allocation4], 1 }
 0x870   :  { %13882 = vsyncpa [#allocation4 + $0x1], 1 }

</bundles_post_ra>
